<compile_context>
chip_gen: v7x
topology: tpu7x:2x2x1
jax: 0.10.0
libtpu: 0.0.40
codegen_flags: <defaults>
</compile_context>

<pallas_src>
import jax
import jax.numpy as jnp
import numpy as np
from jax import lax
from jax.experimental import pallas as pl
from jax.experimental.pallas import tpu as pltpu


# ----------------------------------------------------------------------------
# Pallas kernel: fused Euler integration of the NeuralODE for one string block
# ----------------------------------------------------------------------------
def fused_string_kernel(ts_ref, za_ref, w_ref, zN_ref):
    # ts_ref : (T,)           f32 SMEM — integration time grid (method = 'euler')
    # za_ref : (2S, N+2)      f32 VMEM — rows [0:S] x, [S:2S] y of S strings;
    #                                    lane cols [0:N] = images, col N = t, col N+1 = 1
    # w_ref  : (3, N+2, N+2)  f32 VMEM — packed NeuralSpring layers (t / biases folded)
    # zN_ref : (2S, N+2)      f32 VMEM — final state, same layout
    two_s, NP = za_ref.shape
    S = two_s // 2
    N = NP - 2
    num_steps = ts_ref.shape[0] - 1

    # Weights loaded ONCE; live across the whole time loop.
    w1 = w_ref[0]
    w2 = w_ref[1]
    w3 = w_ref[2]

    # Loop-invariant masks, hoisted (JAX does not CSE broadcast_in_dim).
    col_h = lax.broadcasted_iota(jnp.int32, (S, NP), 1)
    interior = (col_h >= 1) & (col_h <= N - 2)          # endpoint images are clamped
    col_f = lax.broadcasted_iota(jnp.int32, (2 * S, NP), 1)
    t_col = col_f == N                                   # the folded "t" lane

    def rhs(za):
        # NeuralSpring: Linear -> ReLU x3, with t and biases folded into the
        # contraction via the [t | 1] lanes of the state; pass-through columns in
        # w1/w2 carry the "1" lane through the ReLUs, and w3's last two columns are
        # zero so spring is exactly 0 on the [t | 1] lanes.
        h1 = jnp.maximum(jnp.dot(za, w1, preferred_element_type=jnp.float32), 0.0)
        h2 = jnp.maximum(jnp.dot(h1, w2, preferred_element_type=jnp.float32), 0.0)
        spring = jnp.maximum(jnp.dot(h2, w3, preferred_element_type=jnp.float32), 0.0)

        zx, zy = za[:S], za[S:]
        # analytic grad of V(x, y) = (x^2 - 1)^2 + y^2, zeroed outside interior images
        gx = jnp.where(interior, 4.0 * zx * (zx * zx - 1.0), 0.0)
        gy = jnp.where(interior, 2.0 * zy, 0.0)
        # central-difference tangent z[i+1] - z[i-1]; wrap / extra columns hold
        # garbage but grad == 0 there kills dot*tau, so tau itself needs no mask.
        dx = pltpu.roll(zx, shift=NP - 1, axis=1) - pltpu.roll(zx, shift=1, axis=1)
        dy = pltpu.roll(zy, shift=NP - 1, axis=1) - pltpu.roll(zy, shift=1, axis=1)
        inv = lax.rsqrt(jnp.maximum(dx * dx + dy * dy, 1e-30))  # EUP slot, no 0/0
        tx = dx * inv
        ty = dy * inv
        dot = gx * tx + gy * ty                 # per-string pairwise (x,y) reduction
        # f = -(grad - dot*tau) - spring, negation folded:
        fx = (dot * tx - gx) - spring[:S]
        fy = (dot * ty - gy) - spring[S:]
        return jnp.concatenate([fx, fy], axis=0)  # (2S, NP); cols N, N+1 are exactly 0

    def step(i, za):
        t_next = ts_ref[i + 1]
        dt = t_next - ts_ref[i]
        za = za + dt * rhs(za)                   # [t | 1] lanes get zero update
        # refresh the folded t lane for the next evaluation
        return jnp.where(t_col, t_next, za)

    zN_ref[...] = lax.fori_loop(0, num_steps, step, za_ref[...],
                                unroll=(True if num_steps <= 16 else 8))


# ----------------------------------------------------------------------------
# Wrapper: batch of strings -> blocked kernel layout -> pallas_call
# ----------------------------------------------------------------------------
def make_forward(n_images, strings_per_block=128):
    N = n_images
    NP = N + 2
    S = strings_per_block

    def forward(z0_batch, ts, w_packed):
        z0_batch = jnp.asarray(z0_batch, jnp.float32)
        if z0_batch.ndim == 2:                   # single string: the module's own forward
            z0_batch = z0_batch[None]
        B = z0_batch.shape[0]
        G = pl.cdiv(B, S)                        # number of string blocks = grid size
        zb = jnp.pad(z0_batch, ((0, G * S - B), (0, 0), (0, 0)))
        # (G*S, N, 2) -> (G, 2S, N): within a block, x-coord rows then y-coord rows
        zb = zb.transpose(0, 2, 1).reshape(G, S, 2, N).transpose(0, 2, 1, 3)
        zb = zb.reshape(G, 2 * S, N)
        ts = jnp.asarray(ts, jnp.float32)
        # append the folded [t | 1] lanes (t initialized to ts[0])
        za0 = jnp.concatenate(
            [zb,
             jnp.full((G, 2 * S, 1), ts[0], jnp.float32),
             jnp.ones((G, 2 * S, 1), jnp.float32)], axis=2)          # (G, 2S, NP)

        call = pl.pallas_call(
            fused_string_kernel,
            out_shape=jax.ShapeDtypeStruct((G, 2 * S, NP), jnp.float32),
            grid=(G,),
            in_specs=[
                pl.BlockSpec(memory_space=pltpu.MemorySpace.SMEM),      # ts (whole)
                pl.BlockSpec((None, 2 * S, NP), lambda g: (g, 0, 0)),   # state block
                pl.BlockSpec((3, NP, NP), lambda g: (0, 0, 0)),         # weights (once)
            ],
            out_specs=pl.BlockSpec((None, 2 * S, NP), lambda g: (g, 0, 0)),
            compiler_params=pltpu.CompilerParams(
                dimension_semantics=("parallel",)),   # v7x: blocks split across 2 TCs
        )
        out = call(ts, za0, w_packed)                                 # (G, 2S, NP)
        zN = out[:, :, :N].reshape(G, 2, S, N).transpose(0, 2, 3, 1)
        return zN.reshape(G * S, N, 2)[:B]

    return forward


# ----------------------------------------------------------------------------
# Parameter construction (mirrors torch nn.Linear init) and weight packing
# ----------------------------------------------------------------------------
def init_params(key, n):
    """NeuralSpring MLP: Linear(n+1, n+1), Linear(n+1, n), Linear(n, n)."""
    def linear(k, fan_in, fan_out):
        kw, kb = jax.random.split(k)
        bound = 1.0 / np.sqrt(fan_in)
        w = jax.random.uniform(kw, (fan_out, fan_in), jnp.float32, -bound, bound)
        b = jax.random.uniform(kb, (fan_out,), jnp.float32, -bound, bound)
        return w, b

    k1, k2, k3 = jax.random.split(key, 3)
    A1, c1 = linear(k1, n + 1, n + 1)
    A2, c2 = linear(k2, n + 1, n)
    A3, c3 = linear(k3, n, n)
    return A1, c1, A2, c2, A3, c3


def pack_weights(params, n):
    """Pack the 3 Linear layers into one (3, n+2, n+2) buffer with the t row and the
    bias rows folded into the contraction, plus pass-through columns that carry the
    state's '1' lane through the ReLUs (relu(1)=1, relu(0)=0)."""
    A1, c1, A2, c2, A3, c3 = (np.asarray(p, np.float32) for p in params)
    NP = n + 2

    w1 = np.zeros((NP, NP), np.float32)
    w1[0:n, 0:n + 1] = A1[:, 1:].T          # acts on z (torch input order is [t, z])
    w1[n, 0:n + 1] = A1[:, 0]               # acts on the folded t lane
    w1[n + 1, 0:n + 1] = c1                 # bias, multiplied by the folded 1 lane
    w1[n + 1, n + 1] = 1.0                  # pass the 1 lane through to h1

    w2 = np.zeros((NP, NP), np.float32)
    w2[0:n + 1, 0:n] = A2.T
    w2[n + 1, 0:n] = c2
    w2[n + 1, n] = 1.0                      # pass the 1 lane through to h2

    w3 = np.zeros((NP, NP), np.float32)
    w3[0:n, 0:n] = A3.T
    w3[n, 0:n] = c3                         # cols n, n+1 stay zero -> spring == 0 there

    return jnp.asarray(np.stack([w1, w2, w3], axis=0))


# ----------------------------------------------------------------------------
# Pure-JAX reference (literal mirror of the PyTorch math, (N, 2) layout)
# ----------------------------------------------------------------------------
def rhs_reference(t, z, params):
    A1, c1, A2, c2, A3, c3 = params
    T = t * jnp.ones((1, z.shape[1]), jnp.float32)
    x = jnp.concatenate([T, z], axis=0)               # torch.cat((T, z), dim=0): (N+1, 2)
    xt = x.T                                          # (2, N+1)
    h1 = jax.nn.relu(xt @ A1.T + c1)
    h2 = jax.nn.relu(h1 @ A2.T + c2)
    h3 = jax.nn.relu(h2 @ A3.T + c3)
    spring = h3.T                                     # (N, 2)
    # DV: perpendicular component of grad V, V = (x^2 - 1)^2 + y^2
    grad = jnp.stack([4.0 * z[:, 0] * (z[:, 0] ** 2 - 1.0), 2.0 * z[:, 1]], axis=1)
    grad = grad.at[0].set(0.0).at[-1].set(0.0)
    tan = z[2:] - z[:-2]
    norm = jnp.sqrt(jnp.sum(tan * tan, axis=1, keepdims=True))
    tau = jnp.concatenate([jnp.zeros((1, 2)), tan / norm, jnp.zeros((1, 2))], axis=0)
    dot = jnp.sum(grad * tau, axis=1, keepdims=True)
    return -(grad - dot * tau) - spring


def forward_reference(z0, ts, params):
    def step(z, t_pair):
        t, t_next = t_pair
        return z + (t_next - t) * rhs_reference(t, z, params), None

    z, _ = lax.scan(step, jnp.asarray(z0, jnp.float32), (ts[:-1], ts[1:]))
    return z


# ----------------------------------------------------------------------------
if __name__ == "__main__":
    N_IMAGES = 8                     # self.N in the module
    S_PER_BLOCK = 128                # strings per grid block (MXU M = 2*S = 256)
    N_BLOCKS = 2                     # grid size (v7x: one block per TensorCore)
    N_STRINGS = S_PER_BLOCK * N_BLOCKS

    initial = (-1.0, 0.5)            # stands in for read('initial.traj')
    final = (1.0, -0.5)              # stands in for read('final.traj')
    # TODO(synk): read('*.traj') / ASE Atoms have no Pallas equivalent; endpoints are
    #             synthetic 2-D points as implied by the (N, 2) string state.

    key = jax.random.PRNGKey(0)
    kp, ke = jax.random.split(key)
    params = init_params(kp, N_IMAGES)
    w_packed = pack_weights(params, N_IMAGES)

    # Batch of strings: the module's linspace z0 between (slightly perturbed) endpoints.
    ends = jnp.array([initial, final], jnp.float32)[None]               # (1, 2, 2)
    ends = ends + 0.1 * jax.random.normal(ke, (N_STRINGS, 2, 2), jnp.float32)
    start = ends[:, 0, :][:, None, :]                                   # (B, 1, 2)
    stop = ends[:, 1, :][:, None, :]                                    # (B, 1, 2)
    frac = jnp.linspace(0.0, 1.0, N_IMAGES, dtype=jnp.float32)[None, :, None]
    z0_batch = ((1.0 - frac) * start + frac * stop).astype(jnp.float32)  # (B, N, 2)

    ts = jnp.linspace(0.0, 1.0, 5).astype(jnp.float32)   # self.t; method = 'euler'

    fwd = jax.jit(make_forward(N_IMAGES, S_PER_BLOCK))
    zN = jax.block_until_ready(fwd(z0_batch, ts, w_packed))   # ContinuousString.forward

    zN_ref = jax.block_until_ready(
        jax.jit(jax.vmap(forward_reference, in_axes=(0, None, None)))(
            z0_batch, ts, params))
    # Tolerance covers MXU-f32 pass differences between the in-kernel dots (with t and
    # biases folded into the contraction) and the XLA reference dots + separate bias add.
    np.testing.assert_allclose(np.asarray(zN), np.asarray(zN_ref), rtol=1e-2, atol=5e-3)

    print("KERNEL_OK")
</pallas_src>

<mosaic_0001>
module attributes {stable_mosaic.version = 11 : i64} {
  func.func @fused_string_kernel(%arg0: i32, %arg1: memref<5xf32, #tpu.memory_space<smem>>, %arg2: memref<1x256x10xf32, #tpu.memory_space<vmem>>, %arg3: memref<3x10x10xf32, #tpu.memory_space<vmem>>, %arg4: memref<1x256x10xf32, #tpu.memory_space<vmem>>) attributes {dimension_semantics = [#tpu.dimension_semantics<parallel>], iteration_bounds = array<i64: 2>, scalar_prefetch = 0 : i64, scratch_operands = 0 : i64, tpu.core_type = #tpu.core_type<tc>, window_params = [{transform_indices = @transform_0, window_bounds = array<i64: 5>}, {transform_indices = @transform_1, window_bounds = array<i64: 1, 256, 10>}, {pipeline_mode = #tpu.pipeline_mode<synchronous>, transform_indices = @transform_2, window_bounds = array<i64: 3, 10, 10>}, {transform_indices = @transform_3, window_bounds = array<i64: 1, 256, 10>}]} {
    %c0 = arith.constant 0 : index
    %c0_0 = arith.constant 0 : index
    %c0_1 = arith.constant 0 : index
    %0 = vector.load %arg3[%c0, %c0_0, %c0_1] : memref<3x10x10xf32, #tpu.memory_space<vmem>>, vector<1x10x10xf32>
    %1 = vector.shape_cast %0 : vector<1x10x10xf32> to vector<10x10xf32>
    %c1 = arith.constant 1 : index
    %c0_2 = arith.constant 0 : index
    %c0_3 = arith.constant 0 : index
    %2 = vector.load %arg3[%c1, %c0_2, %c0_3] : memref<3x10x10xf32, #tpu.memory_space<vmem>>, vector<1x10x10xf32>
    %3 = vector.shape_cast %2 : vector<1x10x10xf32> to vector<10x10xf32>
    %c2 = arith.constant 2 : index
    %c0_4 = arith.constant 0 : index
    %c0_5 = arith.constant 0 : index
    %4 = vector.load %arg3[%c2, %c0_4, %c0_5] : memref<3x10x10xf32, #tpu.memory_space<vmem>>, vector<1x10x10xf32>
    %5 = vector.shape_cast %4 : vector<1x10x10xf32> to vector<10x10xf32>
    %6 = tpu.iota {dimensions = array<i32: 1>} : vector<128x10xi32>
    %c1_i32 = arith.constant 1 : i32
    %7 = vector.broadcast %c1_i32 : i32 to vector<128x10xi32>
    %8 = arith.cmpi sge, %6, %7 : vector<128x10xi32>
    %c6_i32 = arith.constant 6 : i32
    %9 = vector.broadcast %c6_i32 : i32 to vector<128x10xi32>
    %10 = arith.cmpi sle, %6, %9 : vector<128x10xi32>
    %11 = arith.andi %8, %10 : vector<128x10xi1>
    %12 = tpu.iota {dimensions = array<i32: 1>} : vector<256x10xi32>
    %c8_i32 = arith.constant 8 : i32
    %13 = vector.broadcast %c8_i32 : i32 to vector<256x10xi32>
    %14 = arith.cmpi eq, %12, %13 : vector<256x10xi32>
    %c0_6 = arith.constant 0 : index
    %c0_7 = arith.constant 0 : index
    %c0_8 = arith.constant 0 : index
    %15 = vector.load %arg2[%c0_6, %c0_7, %c0_8] : memref<1x256x10xf32, #tpu.memory_space<vmem>>, vector<1x256x10xf32>
    %16 = vector.shape_cast %15 : vector<1x256x10xf32> to vector<256x10xf32>
    %c0_i32 = arith.constant 0 : i32
    %c1_i32_9 = arith.constant 1 : i32
    %17 = arith.addi %c0_i32, %c1_i32_9 : i32
    %18 = arith.index_cast %17 : i32 to index
    %19 = memref.load %arg1[%18] : memref<5xf32, #tpu.memory_space<smem>>
    %20 = arith.index_cast %c0_i32 : i32 to index
    %21 = memref.load %arg1[%20] : memref<5xf32, #tpu.memory_space<smem>>
    %22 = arith.subf %19, %21 : f32
    %cst = arith.constant dense<0.000000e+00> : vector<256x10xf32>
    %23 = tpu.matmul %16, %1, %cst {dimension_numbers = #tpu.dot_dimension_numbers<[1], [0], [0], [1], [0, 0, 1, 1], [], []>} : vector<256x10xf32>, vector<10x10xf32>, vector<256x10xf32> -> vector<256x10xf32>
    %cst_10 = arith.constant 0.000000e+00 : f32
    %24 = vector.broadcast %cst_10 : f32 to vector<256x10xf32>
    %25 = arith.maximumf %23, %24 : vector<256x10xf32>
    %cst_11 = arith.constant dense<0.000000e+00> : vector<256x10xf32>
    %26 = tpu.matmul %25, %3, %cst_11 {dimension_numbers = #tpu.dot_dimension_numbers<[1], [0], [0], [1], [0, 0, 1, 1], [], []>} : vector<256x10xf32>, vector<10x10xf32>, vector<256x10xf32> -> vector<256x10xf32>
    %cst_12 = arith.constant 0.000000e+00 : f32
    %27 = vector.broadcast %cst_12 : f32 to vector<256x10xf32>
    %28 = arith.maximumf %26, %27 : vector<256x10xf32>
    %cst_13 = arith.constant dense<0.000000e+00> : vector<256x10xf32>
    %29 = tpu.matmul %28, %5, %cst_13 {dimension_numbers = #tpu.dot_dimension_numbers<[1], [0], [0], [1], [0, 0, 1, 1], [], []>} : vector<256x10xf32>, vector<10x10xf32>, vector<256x10xf32> -> vector<256x10xf32>
    %cst_14 = arith.constant 0.000000e+00 : f32
    %30 = vector.broadcast %cst_14 : f32 to vector<256x10xf32>
    %31 = arith.maximumf %29, %30 : vector<256x10xf32>
    %32 = vector.extract_strided_slice %16 {offsets = [0, 0], sizes = [128, 10], strides = [1, 1]} : vector<256x10xf32> to vector<128x10xf32>
    %33 = vector.extract_strided_slice %16 {offsets = [128, 0], sizes = [128, 10], strides = [1, 1]} : vector<256x10xf32> to vector<128x10xf32>
    %cst_15 = arith.constant 4.000000e+00 : f32
    %34 = vector.broadcast %cst_15 : f32 to vector<128x10xf32>
    %35 = arith.mulf %34, %32 : vector<128x10xf32>
    %36 = arith.mulf %32, %32 : vector<128x10xf32>
    %cst_16 = arith.constant 1.000000e+00 : f32
    %37 = vector.broadcast %cst_16 : f32 to vector<128x10xf32>
    %38 = arith.subf %36, %37 : vector<128x10xf32>
    %39 = arith.mulf %35, %38 : vector<128x10xf32>
    %cst_17 = arith.constant 0.000000e+00 : f32
    %40 = vector.broadcast %cst_17 : f32 to vector<128x10xf32>
    %41 = arith.select %11, %39, %40 : vector<128x10xi1>, vector<128x10xf32>
    %cst_18 = arith.constant 2.000000e+00 : f32
    %42 = vector.broadcast %cst_18 : f32 to vector<128x10xf32>
    %43 = arith.mulf %42, %33 : vector<128x10xf32>
    %cst_19 = arith.constant 0.000000e+00 : f32
    %44 = vector.broadcast %cst_19 : f32 to vector<128x10xf32>
    %45 = arith.select %11, %43, %44 : vector<128x10xi1>, vector<128x10xf32>
    %c9_i32 = arith.constant 9 : i32
    %46 = tpu.dynamic_rotate %32 by %c9_i32 dim 1 : vector<128x10xf32>, i32 -> vector<128x10xf32>
    %c1_i32_20 = arith.constant 1 : i32
    %47 = tpu.dynamic_rotate %32 by %c1_i32_20 dim 1 : vector<128x10xf32>, i32 -> vector<128x10xf32>
    %48 = arith.subf %46, %47 : vector<128x10xf32>
    %c9_i32_21 = arith.constant 9 : i32
    %49 = tpu.dynamic_rotate %33 by %c9_i32_21 dim 1 : vector<128x10xf32>, i32 -> vector<128x10xf32>
    %c1_i32_22 = arith.constant 1 : i32
    %50 = tpu.dynamic_rotate %33 by %c1_i32_22 dim 1 : vector<128x10xf32>, i32 -> vector<128x10xf32>
    %51 = arith.subf %49, %50 : vector<128x10xf32>
    %52 = arith.mulf %48, %48 : vector<128x10xf32>
    %53 = arith.mulf %51, %51 : vector<128x10xf32>
    %54 = arith.addf %52, %53 : vector<128x10xf32>
    %cst_23 = arith.constant 1.000000e-30 : f32
    %55 = vector.broadcast %cst_23 : f32 to vector<128x10xf32>
    %56 = arith.maximumf %54, %55 : vector<128x10xf32>
    %57 = math.rsqrt %56 : vector<128x10xf32>
    %58 = arith.mulf %48, %57 : vector<128x10xf32>
    %59 = arith.mulf %51, %57 : vector<128x10xf32>
    %60 = arith.mulf %41, %58 : vector<128x10xf32>
    %61 = arith.mulf %45, %59 : vector<128x10xf32>
    %62 = arith.addf %60, %61 : vector<128x10xf32>
    %63 = arith.mulf %62, %58 : vector<128x10xf32>
    %64 = arith.subf %63, %41 : vector<128x10xf32>
    %65 = vector.extract_strided_slice %31 {offsets = [0, 0], sizes = [128, 10], strides = [1, 1]} : vector<256x10xf32> to vector<128x10xf32>
    %66 = arith.subf %64, %65 : vector<128x10xf32>
    %67 = arith.mulf %62, %59 : vector<128x10xf32>
    %68 = arith.subf %67, %45 : vector<128x10xf32>
    %69 = vector.extract_strided_slice %31 {offsets = [128, 0], sizes = [128, 10], strides = [1, 1]} : vector<256x10xf32> to vector<128x10xf32>
    %70 = arith.subf %68, %69 : vector<128x10xf32>
    %71 = tpu.concatenate %66, %70 in 0 : vector<128x10xf32>, vector<128x10xf32> -> vector<256x10xf32>
    %72 = vector.broadcast %22 : f32 to vector<256x10xf32>
    %73 = arith.mulf %72, %71 : vector<256x10xf32>
    %74 = arith.addf %16, %73 : vector<256x10xf32>
    %75 = vector.broadcast %19 : f32 to vector<256x10xf32>
    %76 = arith.select %14, %75, %74 : vector<256x10xi1>, vector<256x10xf32>
    %c1_i32_24 = arith.constant 1 : i32
    %c1_i32_25 = arith.constant 1 : i32
    %77 = arith.addi %c1_i32_24, %c1_i32_25 : i32
    %78 = arith.index_cast %77 : i32 to index
    %79 = memref.load %arg1[%78] : memref<5xf32, #tpu.memory_space<smem>>
    %80 = arith.index_cast %c1_i32_24 : i32 to index
    %81 = memref.load %arg1[%80] : memref<5xf32, #tpu.memory_space<smem>>
    %82 = arith.subf %79, %81 : f32
    %cst_26 = arith.constant dense<0.000000e+00> : vector<256x10xf32>
    %83 = tpu.matmul %76, %1, %cst_26 {dimension_numbers = #tpu.dot_dimension_numbers<[1], [0], [0], [1], [0, 0, 1, 1], [], []>} : vector<256x10xf32>, vector<10x10xf32>, vector<256x10xf32> -> vector<256x10xf32>
    %cst_27 = arith.constant 0.000000e+00 : f32
    %84 = vector.broadcast %cst_27 : f32 to vector<256x10xf32>
    %85 = arith.maximumf %83, %84 : vector<256x10xf32>
    %cst_28 = arith.constant dense<0.000000e+00> : vector<256x10xf32>
    %86 = tpu.matmul %85, %3, %cst_28 {dimension_numbers = #tpu.dot_dimension_numbers<[1], [0], [0], [1], [0, 0, 1, 1], [], []>} : vector<256x10xf32>, vector<10x10xf32>, vector<256x10xf32> -> vector<256x10xf32>
    %cst_29 = arith.constant 0.000000e+00 : f32
    %87 = vector.broadcast %cst_29 : f32 to vector<256x10xf32>
    %88 = arith.maximumf %86, %87 : vector<256x10xf32>
    %cst_30 = arith.constant dense<0.000000e+00> : vector<256x10xf32>
    %89 = tpu.matmul %88, %5, %cst_30 {dimension_numbers = #tpu.dot_dimension_numbers<[1], [0], [0], [1], [0, 0, 1, 1], [], []>} : vector<256x10xf32>, vector<10x10xf32>, vector<256x10xf32> -> vector<256x10xf32>
    %cst_31 = arith.constant 0.000000e+00 : f32
    %90 = vector.broadcast %cst_31 : f32 to vector<256x10xf32>
    %91 = arith.maximumf %89, %90 : vector<256x10xf32>
    %92 = vector.extract_strided_slice %76 {offsets = [0, 0], sizes = [128, 10], strides = [1, 1]} : vector<256x10xf32> to vector<128x10xf32>
    %93 = vector.extract_strided_slice %76 {offsets = [128, 0], sizes = [128, 10], strides = [1, 1]} : vector<256x10xf32> to vector<128x10xf32>
    %cst_32 = arith.constant 4.000000e+00 : f32
    %94 = vector.broadcast %cst_32 : f32 to vector<128x10xf32>
    %95 = arith.mulf %94, %92 : vector<128x10xf32>
    %96 = arith.mulf %92, %92 : vector<128x10xf32>
    %cst_33 = arith.constant 1.000000e+00 : f32
    %97 = vector.broadcast %cst_33 : f32 to vector<128x10xf32>
    %98 = arith.subf %96, %97 : vector<128x10xf32>
    %99 = arith.mulf %95, %98 : vector<128x10xf32>
    %cst_34 = arith.constant 0.000000e+00 : f32
    %100 = vector.broadcast %cst_34 : f32 to vector<128x10xf32>
    %101 = arith.select %11, %99, %100 : vector<128x10xi1>, vector<128x10xf32>
    %cst_35 = arith.constant 2.000000e+00 : f32
    %102 = vector.broadcast %cst_35 : f32 to vector<128x10xf32>
    %103 = arith.mulf %102, %93 : vector<128x10xf32>
    %cst_36 = arith.constant 0.000000e+00 : f32
    %104 = vector.broadcast %cst_36 : f32 to vector<128x10xf32>
    %105 = arith.select %11, %103, %104 : vector<128x10xi1>, vector<128x10xf32>
    %c9_i32_37 = arith.constant 9 : i32
    %106 = tpu.dynamic_rotate %92 by %c9_i32_37 dim 1 : vector<128x10xf32>, i32 -> vector<128x10xf32>
    %c1_i32_38 = arith.constant 1 : i32
    %107 = tpu.dynamic_rotate %92 by %c1_i32_38 dim 1 : vector<128x10xf32>, i32 -> vector<128x10xf32>
    %108 = arith.subf %106, %107 : vector<128x10xf32>
    %c9_i32_39 = arith.constant 9 : i32
    %109 = tpu.dynamic_rotate %93 by %c9_i32_39 dim 1 : vector<128x10xf32>, i32 -> vector<128x10xf32>
    %c1_i32_40 = arith.constant 1 : i32
    %110 = tpu.dynamic_rotate %93 by %c1_i32_40 dim 1 : vector<128x10xf32>, i32 -> vector<128x10xf32>
    %111 = arith.subf %109, %110 : vector<128x10xf32>
    %112 = arith.mulf %108, %108 : vector<128x10xf32>
    %113 = arith.mulf %111, %111 : vector<128x10xf32>
    %114 = arith.addf %112, %113 : vector<128x10xf32>
    %cst_41 = arith.constant 1.000000e-30 : f32
    %115 = vector.broadcast %cst_41 : f32 to vector<128x10xf32>
    %116 = arith.maximumf %114, %115 : vector<128x10xf32>
    %117 = math.rsqrt %116 : vector<128x10xf32>
    %118 = arith.mulf %108, %117 : vector<128x10xf32>
    %119 = arith.mulf %111, %117 : vector<128x10xf32>
    %120 = arith.mulf %101, %118 : vector<128x10xf32>
    %121 = arith.mulf %105, %119 : vector<128x10xf32>
    %122 = arith.addf %120, %121 : vector<128x10xf32>
    %123 = arith.mulf %122, %118 : vector<128x10xf32>
    %124 = arith.subf %123, %101 : vector<128x10xf32>
    %125 = vector.extract_strided_slice %91 {offsets = [0, 0], sizes = [128, 10], strides = [1, 1]} : vector<256x10xf32> to vector<128x10xf32>
    %126 = arith.subf %124, %125 : vector<128x10xf32>
    %127 = arith.mulf %122, %119 : vector<128x10xf32>
    %128 = arith.subf %127, %105 : vector<128x10xf32>
    %129 = vector.extract_strided_slice %91 {offsets = [128, 0], sizes = [128, 10], strides = [1, 1]} : vector<256x10xf32> to vector<128x10xf32>
    %130 = arith.subf %128, %129 : vector<128x10xf32>
    %131 = tpu.concatenate %126, %130 in 0 : vector<128x10xf32>, vector<128x10xf32> -> vector<256x10xf32>
    %132 = vector.broadcast %82 : f32 to vector<256x10xf32>
    %133 = arith.mulf %132, %131 : vector<256x10xf32>
    %134 = arith.addf %76, %133 : vector<256x10xf32>
    %135 = vector.broadcast %79 : f32 to vector<256x10xf32>
    %136 = arith.select %14, %135, %134 : vector<256x10xi1>, vector<256x10xf32>
    %c2_i32 = arith.constant 2 : i32
    %c1_i32_42 = arith.constant 1 : i32
    %137 = arith.addi %c2_i32, %c1_i32_42 : i32
    %138 = arith.index_cast %137 : i32 to index
    %139 = memref.load %arg1[%138] : memref<5xf32, #tpu.memory_space<smem>>
    %140 = arith.index_cast %c2_i32 : i32 to index
    %141 = memref.load %arg1[%140] : memref<5xf32, #tpu.memory_space<smem>>
    %142 = arith.subf %139, %141 : f32
    %cst_43 = arith.constant dense<0.000000e+00> : vector<256x10xf32>
    %143 = tpu.matmul %136, %1, %cst_43 {dimension_numbers = #tpu.dot_dimension_numbers<[1], [0], [0], [1], [0, 0, 1, 1], [], []>} : vector<256x10xf32>, vector<10x10xf32>, vector<256x10xf32> -> vector<256x10xf32>
    %cst_44 = arith.constant 0.000000e+00 : f32
    %144 = vector.broadcast %cst_44 : f32 to vector<256x10xf32>
    %145 = arith.maximumf %143, %144 : vector<256x10xf32>
    %cst_45 = arith.constant dense<0.000000e+00> : vector<256x10xf32>
    %146 = tpu.matmul %145, %3, %cst_45 {dimension_numbers = #tpu.dot_dimension_numbers<[1], [0], [0], [1], [0, 0, 1, 1], [], []>} : vector<256x10xf32>, vector<10x10xf32>, vector<256x10xf32> -> vector<256x10xf32>
    %cst_46 = arith.constant 0.000000e+00 : f32
    %147 = vector.broadcast %cst_46 : f32 to vector<256x10xf32>
    %148 = arith.maximumf %146, %147 : vector<256x10xf32>
    %cst_47 = arith.constant dense<0.000000e+00> : vector<256x10xf32>
    %149 = tpu.matmul %148, %5, %cst_47 {dimension_numbers = #tpu.dot_dimension_numbers<[1], [0], [0], [1], [0, 0, 1, 1], [], []>} : vector<256x10xf32>, vector<10x10xf32>, vector<256x10xf32> -> vector<256x10xf32>
    %cst_48 = arith.constant 0.000000e+00 : f32
    %150 = vector.broadcast %cst_48 : f32 to vector<256x10xf32>
    %151 = arith.maximumf %149, %150 : vector<256x10xf32>
    %152 = vector.extract_strided_slice %136 {offsets = [0, 0], sizes = [128, 10], strides = [1, 1]} : vector<256x10xf32> to vector<128x10xf32>
    %153 = vector.extract_strided_slice %136 {offsets = [128, 0], sizes = [128, 10], strides = [1, 1]} : vector<256x10xf32> to vector<128x10xf32>
    %cst_49 = arith.constant 4.000000e+00 : f32
    %154 = vector.broadcast %cst_49 : f32 to vector<128x10xf32>
    %155 = arith.mulf %154, %152 : vector<128x10xf32>
    %156 = arith.mulf %152, %152 : vector<128x10xf32>
    %cst_50 = arith.constant 1.000000e+00 : f32
    %157 = vector.broadcast %cst_50 : f32 to vector<128x10xf32>
    %158 = arith.subf %156, %157 : vector<128x10xf32>
    %159 = arith.mulf %155, %158 : vector<128x10xf32>
    %cst_51 = arith.constant 0.000000e+00 : f32
    %160 = vector.broadcast %cst_51 : f32 to vector<128x10xf32>
    %161 = arith.select %11, %159, %160 : vector<128x10xi1>, vector<128x10xf32>
    %cst_52 = arith.constant 2.000000e+00 : f32
    %162 = vector.broadcast %cst_52 : f32 to vector<128x10xf32>
    %163 = arith.mulf %162, %153 : vector<128x10xf32>
    %cst_53 = arith.constant 0.000000e+00 : f32
    %164 = vector.broadcast %cst_53 : f32 to vector<128x10xf32>
    %165 = arith.select %11, %163, %164 : vector<128x10xi1>, vector<128x10xf32>
    %c9_i32_54 = arith.constant 9 : i32
    %166 = tpu.dynamic_rotate %152 by %c9_i32_54 dim 1 : vector<128x10xf32>, i32 -> vector<128x10xf32>
    %c1_i32_55 = arith.constant 1 : i32
    %167 = tpu.dynamic_rotate %152 by %c1_i32_55 dim 1 : vector<128x10xf32>, i32 -> vector<128x10xf32>
    %168 = arith.subf %166, %167 : vector<128x10xf32>
    %c9_i32_56 = arith.constant 9 : i32
    %169 = tpu.dynamic_rotate %153 by %c9_i32_56 dim 1 : vector<128x10xf32>, i32 -> vector<128x10xf32>
    %c1_i32_57 = arith.constant 1 : i32
    %170 = tpu.dynamic_rotate %153 by %c1_i32_57 dim 1 : vector<128x10xf32>, i32 -> vector<128x10xf32>
    %171 = arith.subf %169, %170 : vector<128x10xf32>
    %172 = arith.mulf %168, %168 : vector<128x10xf32>
    %173 = arith.mulf %171, %171 : vector<128x10xf32>
    %174 = arith.addf %172, %173 : vector<128x10xf32>
    %cst_58 = arith.constant 1.000000e-30 : f32
    %175 = vector.broadcast %cst_58 : f32 to vector<128x10xf32>
    %176 = arith.maximumf %174, %175 : vector<128x10xf32>
    %177 = math.rsqrt %176 : vector<128x10xf32>
    %178 = arith.mulf %168, %177 : vector<128x10xf32>
    %179 = arith.mulf %171, %177 : vector<128x10xf32>
    %180 = arith.mulf %161, %178 : vector<128x10xf32>
    %181 = arith.mulf %165, %179 : vector<128x10xf32>
    %182 = arith.addf %180, %181 : vector<128x10xf32>
    %183 = arith.mulf %182, %178 : vector<128x10xf32>
    %184 = arith.subf %183, %161 : vector<128x10xf32>
    %185 = vector.extract_strided_slice %151 {offsets = [0, 0], sizes = [128, 10], strides = [1, 1]} : vector<256x10xf32> to vector<128x10xf32>
    %186 = arith.subf %184, %185 : vector<128x10xf32>
    %187 = arith.mulf %182, %179 : vector<128x10xf32>
    %188 = arith.subf %187, %165 : vector<128x10xf32>
    %189 = vector.extract_strided_slice %151 {offsets = [128, 0], sizes = [128, 10], strides = [1, 1]} : vector<256x10xf32> to vector<128x10xf32>
    %190 = arith.subf %188, %189 : vector<128x10xf32>
    %191 = tpu.concatenate %186, %190 in 0 : vector<128x10xf32>, vector<128x10xf32> -> vector<256x10xf32>
    %192 = vector.broadcast %142 : f32 to vector<256x10xf32>
    %193 = arith.mulf %192, %191 : vector<256x10xf32>
    %194 = arith.addf %136, %193 : vector<256x10xf32>
    %195 = vector.broadcast %139 : f32 to vector<256x10xf32>
    %196 = arith.select %14, %195, %194 : vector<256x10xi1>, vector<256x10xf32>
    %c3_i32 = arith.constant 3 : i32
    %c1_i32_59 = arith.constant 1 : i32
    %197 = arith.addi %c3_i32, %c1_i32_59 : i32
    %198 = arith.index_cast %197 : i32 to index
    %199 = memref.load %arg1[%198] : memref<5xf32, #tpu.memory_space<smem>>
    %200 = arith.index_cast %c3_i32 : i32 to index
    %201 = memref.load %arg1[%200] : memref<5xf32, #tpu.memory_space<smem>>
    %202 = arith.subf %199, %201 : f32
    %cst_60 = arith.constant dense<0.000000e+00> : vector<256x10xf32>
    %203 = tpu.matmul %196, %1, %cst_60 {dimension_numbers = #tpu.dot_dimension_numbers<[1], [0], [0], [1], [0, 0, 1, 1], [], []>} : vector<256x10xf32>, vector<10x10xf32>, vector<256x10xf32> -> vector<256x10xf32>
    %cst_61 = arith.constant 0.000000e+00 : f32
    %204 = vector.broadcast %cst_61 : f32 to vector<256x10xf32>
    %205 = arith.maximumf %203, %204 : vector<256x10xf32>
    %cst_62 = arith.constant dense<0.000000e+00> : vector<256x10xf32>
    %206 = tpu.matmul %205, %3, %cst_62 {dimension_numbers = #tpu.dot_dimension_numbers<[1], [0], [0], [1], [0, 0, 1, 1], [], []>} : vector<256x10xf32>, vector<10x10xf32>, vector<256x10xf32> -> vector<256x10xf32>
    %cst_63 = arith.constant 0.000000e+00 : f32
    %207 = vector.broadcast %cst_63 : f32 to vector<256x10xf32>
    %208 = arith.maximumf %206, %207 : vector<256x10xf32>
    %cst_64 = arith.constant dense<0.000000e+00> : vector<256x10xf32>
    %209 = tpu.matmul %208, %5, %cst_64 {dimension_numbers = #tpu.dot_dimension_numbers<[1], [0], [0], [1], [0, 0, 1, 1], [], []>} : vector<256x10xf32>, vector<10x10xf32>, vector<256x10xf32> -> vector<256x10xf32>
    %cst_65 = arith.constant 0.000000e+00 : f32
    %210 = vector.broadcast %cst_65 : f32 to vector<256x10xf32>
    %211 = arith.maximumf %209, %210 : vector<256x10xf32>
    %212 = vector.extract_strided_slice %196 {offsets = [0, 0], sizes = [128, 10], strides = [1, 1]} : vector<256x10xf32> to vector<128x10xf32>
    %213 = vector.extract_strided_slice %196 {offsets = [128, 0], sizes = [128, 10], strides = [1, 1]} : vector<256x10xf32> to vector<128x10xf32>
    %cst_66 = arith.constant 4.000000e+00 : f32
    %214 = vector.broadcast %cst_66 : f32 to vector<128x10xf32>
    %215 = arith.mulf %214, %212 : vector<128x10xf32>
    %216 = arith.mulf %212, %212 : vector<128x10xf32>
    %cst_67 = arith.constant 1.000000e+00 : f32
    %217 = vector.broadcast %cst_67 : f32 to vector<128x10xf32>
    %218 = arith.subf %216, %217 : vector<128x10xf32>
    %219 = arith.mulf %215, %218 : vector<128x10xf32>
    %cst_68 = arith.constant 0.000000e+00 : f32
    %220 = vector.broadcast %cst_68 : f32 to vector<128x10xf32>
    %221 = arith.select %11, %219, %220 : vector<128x10xi1>, vector<128x10xf32>
    %cst_69 = arith.constant 2.000000e+00 : f32
    %222 = vector.broadcast %cst_69 : f32 to vector<128x10xf32>
    %223 = arith.mulf %222, %213 : vector<128x10xf32>
    %cst_70 = arith.constant 0.000000e+00 : f32
    %224 = vector.broadcast %cst_70 : f32 to vector<128x10xf32>
    %225 = arith.select %11, %223, %224 : vector<128x10xi1>, vector<128x10xf32>
    %c9_i32_71 = arith.constant 9 : i32
    %226 = tpu.dynamic_rotate %212 by %c9_i32_71 dim 1 : vector<128x10xf32>, i32 -> vector<128x10xf32>
    %c1_i32_72 = arith.constant 1 : i32
    %227 = tpu.dynamic_rotate %212 by %c1_i32_72 dim 1 : vector<128x10xf32>, i32 -> vector<128x10xf32>
    %228 = arith.subf %226, %227 : vector<128x10xf32>
    %c9_i32_73 = arith.constant 9 : i32
    %229 = tpu.dynamic_rotate %213 by %c9_i32_73 dim 1 : vector<128x10xf32>, i32 -> vector<128x10xf32>
    %c1_i32_74 = arith.constant 1 : i32
    %230 = tpu.dynamic_rotate %213 by %c1_i32_74 dim 1 : vector<128x10xf32>, i32 -> vector<128x10xf32>
    %231 = arith.subf %229, %230 : vector<128x10xf32>
    %232 = arith.mulf %228, %228 : vector<128x10xf32>
    %233 = arith.mulf %231, %231 : vector<128x10xf32>
    %234 = arith.addf %232, %233 : vector<128x10xf32>
    %cst_75 = arith.constant 1.000000e-30 : f32
    %235 = vector.broadcast %cst_75 : f32 to vector<128x10xf32>
    %236 = arith.maximumf %234, %235 : vector<128x10xf32>
    %237 = math.rsqrt %236 : vector<128x10xf32>
    %238 = arith.mulf %228, %237 : vector<128x10xf32>
    %239 = arith.mulf %231, %237 : vector<128x10xf32>
    %240 = arith.mulf %221, %238 : vector<128x10xf32>
    %241 = arith.mulf %225, %239 : vector<128x10xf32>
    %242 = arith.addf %240, %241 : vector<128x10xf32>
    %243 = arith.mulf %242, %238 : vector<128x10xf32>
    %244 = arith.subf %243, %221 : vector<128x10xf32>
    %245 = vector.extract_strided_slice %211 {offsets = [0, 0], sizes = [128, 10], strides = [1, 1]} : vector<256x10xf32> to vector<128x10xf32>
    %246 = arith.subf %244, %245 : vector<128x10xf32>
    %247 = arith.mulf %242, %239 : vector<128x10xf32>
    %248 = arith.subf %247, %225 : vector<128x10xf32>
    %249 = vector.extract_strided_slice %211 {offsets = [128, 0], sizes = [128, 10], strides = [1, 1]} : vector<256x10xf32> to vector<128x10xf32>
    %250 = arith.subf %248, %249 : vector<128x10xf32>
    %251 = tpu.concatenate %246, %250 in 0 : vector<128x10xf32>, vector<128x10xf32> -> vector<256x10xf32>
    %252 = vector.broadcast %202 : f32 to vector<256x10xf32>
    %253 = arith.mulf %252, %251 : vector<256x10xf32>
    %254 = arith.addf %196, %253 : vector<256x10xf32>
    %255 = vector.broadcast %199 : f32 to vector<256x10xf32>
    %256 = arith.select %14, %255, %254 : vector<256x10xi1>, vector<256x10xf32>
    %c4_i32 = arith.constant 4 : i32
    %c0_76 = arith.constant 0 : index
    %c0_77 = arith.constant 0 : index
    %c0_78 = arith.constant 0 : index
    %257 = vector.load %arg4[%c0_76, %c0_77, %c0_78] : memref<1x256x10xf32, #tpu.memory_space<vmem>>, vector<1x256x10xf32>
    %258 = vector.shape_cast %257 : vector<1x256x10xf32> to vector<256x10xf32>
    %259 = vector.shape_cast %256 : vector<256x10xf32> to vector<1x256x10xf32>
    tpu.vector_store %arg4[%c0_76, %c0_77, %c0_78], %259 {strides = array<i32>} : memref<1x256x10xf32, #tpu.memory_space<vmem>>, vector<1x256x10xf32>,
    return
  }
  func.func @transform_0(%arg0: i32) -> i32 {
    %c0_i32 = arith.constant 0 : i32
    %c0_i32_0 = arith.constant 0 : i32
    return %c0_i32 : i32
  }
  func.func @transform_1(%arg0: i32) -> (i32, i32, i32) {
    %c0_i32 = arith.constant 0 : i32
    %c0_i32_0 = arith.constant 0 : i32
    %c0_i32_1 = arith.constant 0 : i32
    return %arg0, %c0_i32, %c0_i32_0 : i32, i32, i32
  }
  func.func @transform_2(%arg0: i32) -> (i32, i32, i32) {
    %c0_i32 = arith.constant 0 : i32
    %c0_i32_0 = arith.constant 0 : i32
    %c0_i32_1 = arith.constant 0 : i32
    %c0_i32_2 = arith.constant 0 : i32
    return %c0_i32, %c0_i32_0, %c0_i32_1 : i32, i32, i32
  }
  func.func @transform_3(%arg0: i32) -> (i32, i32, i32) {
    %c0_i32 = arith.constant 0 : i32
    %c0_i32_0 = arith.constant 0 : i32
    %c0_i32_1 = arith.constant 0 : i32
    return %arg0, %c0_i32, %c0_i32_0 : i32, i32, i32
  }
}

</mosaic_0001>

<bundles_post_ra>
// kernel: forward.1
= control target key start
LH: loop header
LB: loop body
LE: loop exit
PB: predicated region body
PF: predicated region fallthrough
CT: control target
= control target key end

     0   :  { %8 = vsyncpa [#allocation3], 0  ;;  %s10193_s12 = smov 0   ;;  %s16004_s0 = inlined_call_operand.vmem [shape: f32[5], index: 0, kind: input, shape index: {}]   ;;  %s16005_s1 = inlined_call_operand.vmem [shape: f32[2,256,10], index: 1, kind: input, shape index: {}]   ;;  %s16006_s2 = inlined_call_operand.vmem [shape: f32[3,10,10], index: 2, kind: input, shape index: {}]   ;;  %s16007_s3 = inlined_call_operand.vmem [shape: f32[2,256,10], index: 3, kind: output, shape index: {}]  }
   0x1 LB: > { %s10199_s13 = sadd.s32 4294967295, %s10166_s12   ;;  %p8373_p0 = scmp.ge.s32.totalorder %s10166_s12, 1  ;;  %s10166_s12 = sphi %s10193_s12, %s14_s12  }
   0x2   : > { %p113_p1 = scmp.lt.s32.totalorder %s10166_s12, 3  ;;  %s126_s16 = sshll.u32 %s16004_s0, 4  ;;  %s127_s16 = int_to_ptr.vmem [resolvable:$true] %s126_s16 }
   0x3   : > { %p9966_p3 = scmp.eq.s32.totalorder %s10199_s13, 0  ;;  %s10141_s18 = scalar_lea.vmem %s127_s16, 16 }
   0x4   : > { %p10206_p2 = pnand %p8373_p0, %p113_p1  ;;  %p10142_p6 = scmp.ne.s32.totalorder %s127_s16, %s10141_s18 }
   0x5   : > { %p10149_p10 = scmp.lt.s32.totalorder %s127_s16, %s127_s16  ;;  %p10150_p11 = scmp.lt.s32.totalorder %s10141_s18, %s10141_s18 }
   0x6   : > { %p9962_p4 = pneg %p10206_p2 }
   0x7   : > { %p10151_p12 = por %p10150_p11, %p10149_p10 }
   0x8   : > { %p9963_p5 = pnand %p9966_p3, %p9962_p4 }
   0xa   : > { %p10143_p7 = pneg %p9963_p5 }
   0xc   : > { %p10144_p8 = pnand %p10143_p7, %p10142_p6 }
   0xe   : > { %p10145_p9 = pneg %p10144_p8 }
  0x10   : > { %p10152_p13 = pnand %p10151_p12, %p10145_p9 }
  0x12   : > { %10155 = shalt.err (!%p10152_p13)
}
  0x13   : > { %s10168_s19 = smov [#allocation2]   ;;  %150 = sbr.rel (%p10206_p2) target bundleno = 2721 (0xaa1), region = 32 }
  0x14   : > { %9965 = dma.vmem_to_smem (!%p9963_p5), %s127_s16, 16, %s10168_s19, [#allocation3]  }
  0x1a   : > { %10161 = dma.done.wait (%p9966_p3), [#allocation3], 16  }
  0x1b   : > { %10163 = vsyncadd (%p9966_p3), [#allocation3], 4294967280 }
  0x1c   : > { %156 = sfence }
  0x1d   : > { %v185_v0 = vld [vmem:[%s16006_s2] sm:$0xff]  ;;  %v186_v1 = vld [vmem:[%s16006_s2 + $0x8] sm:$0x3]  ;;  %vm331_vm0 = vcmask 1041408   ;;  %p175_p0 = scmp.lt.s32.totalorder %s10199_s13, 1  ;;  %vm10169_vm1 = vmmov 1  }
  0x1e   : > { %v10228_v2 = vpack.c.bf16 %v186_v1, %v185_v0  ;;  %vm10230_vm2 = vmpackc.low %vm331_vm0, %vm10169_vm1  ;;  %v16366_v3 = vmov 0  ;;  %vm234_vm3 = vcmask 80896   ;;  %s10170_s28 = smov 10   ;;  %v8382_v36 = vld [vmem:[%s16006_s2 + $0x10] sm:$0xff]  ;;  %v8383_v37 = vld [vmem:[%s16006_s2 + $0x18] sm:$0x3] }
  0x1f   : > { %v16367_v3 = vsel %vm10230_vm2, 4294967295, %v16366_v3  ;;  %s16933_s13 = smov (!%p175_p0, %s10199_s13), 1  ;;  %v10481_v38 = vpack.c.bf16 %v8383_v37, %v8382_v36  ;;  %vm1416_vm4 = vcmask 1047632   ;;  %s10171_s6 = smov 120  }
  0x20   : > { %16365 = vst [vmem:[#allocation5_spill] sm:$0xff] %v10228_v2  ;;  %16368 = vst [vmem:[#allocation6_spill] sm:$0xff] %v16367_v3  ;;  %9888 = vmatprep.subr.msk.bf16.mxu0 %vm10230_vm2, %v10228_v2  ;;  %s8852_s24 = sshll.u32 %s16933_s13, 8  ;;  %s10172_s11 = smov 127  }
  0x21   : > { %9891 = vmatpush3.bf16.msk.msra.mxu0 %vm10230_vm2, %v10228_v2  ;;  %s10249_s27 = scalar_lea.vmem %s16005_s1, %s8852_s24  ;;  %16369 = vst [vmem:[#allocation7_spill] sm:$0xff] %v10481_v38  ;;  %9894 = vmatprep.subr.msk.bf16.mxu1 %vm10230_vm2, %v10481_v38  ;;  %s11343_s14 = sld [smem:[#allocation2 + $0x1]] }
  0x22   : > { %v10252_v4 = vld [vmem:[%s10249_s27] sm:$0xff]  ;;  %v10255_v5 = vld [vmem:[%s10249_s27 + $0x8] sm:$0xff]  ;;  %v10262_v6 = vld [vmem:[%s10249_s27 + $0x10] sm:$0xff]  ;;  %9897 = vmatpush3.bf16.msk.msra.mxu1 %vm10230_vm2, %v10481_v38  ;;  %s11345_s15 = sld [smem:[#allocation2]]  ;;  %s12720_s17 = sld [smem:[#allocation2 + $0x2]] }
  0x23   : > { %1417 = vrot.lane.b32.xlu0 %v10252_v4, %s10170_s28  ;;  %9266 = vmatprep.mubr.msk.f32.mxu0 %vm234_vm3, %v10252_v4  ;;  %v10269_v7 = vld [vmem:[%s10249_s27 + $0x80] sm:$0xff]  ;;  %v10274_v8 = vld [vmem:[%s10249_s27 + $0x18] sm:$0xff]  ;;  %v10277_v9 = vld [vmem:[%s10249_s27 + $0x88] sm:$0xff]  ;;  %s14078_s19 = sld [smem:[#allocation2 + $0x3]]  ;;  %s15493_s21 = sld [smem:[#allocation2 + $0x4]] }
  0x24   : > { %9267 = vmatmul.mubr.msk.f32.vlgmr.msra.gmra.mrb[0].mxu0 %vm234_vm3, %v10255_v5  ;;  %1420 = vrot.lane.b32.xlu1 %v10255_v5, %s10170_s28  ;;  %v10280_v10 = vld [vmem:[%s10249_s27 + $0x20] sm:$0xff]  ;;  %v10291_v11 = vld [vmem:[%s10249_s27 + $0x28] sm:$0xff]  ;;  %v10294_v12 = vld [vmem:[%s10249_s27 + $0x90] sm:$0xff]  ;;  %s15666_s26 = scalar_lea.vmem %s16007_s3, %s8852_s24 }
  0x25   : > { %9269 = vmatprep.mubr.msk.f32.mxu0 %vm234_vm3, %v10262_v6  ;;  %v10297_v13 = vld [vmem:[%s10249_s27 + $0x30] sm:$0xff]  ;;  %v10308_v14 = vld [vmem:[%s10249_s27 + $0x38] sm:$0xff]  ;;  %v10314_v16 = vld [vmem:[%s10249_s27 + $0x40] sm:$0xff]  ;;  %9906 = vmatprep.subr.msk.bf16.mxu1 %vm10230_vm2, %v10228_v2 }
  0x26   : > { %v10311_v15 = vld [vmem:[%s10249_s27 + $0x98] sm:$0xff]  ;;  %v10325_v17 = vld [vmem:[%s10249_s27 + $0x48] sm:$0xff]  ;;  %v10328_v18 = vld [vmem:[%s10249_s27 + $0xa0] sm:$0xff] }
  0x27   : > { %1593 = vrot.lane.b32.xlu0 %v10269_v7, %s10170_s28  ;;  %v10331_v19 = vld [vmem:[%s10249_s27 + $0x50] sm:$0xff]  ;;  %v10342_v20 = vld [vmem:[%s10249_s27 + $0x58] sm:$0xff]  ;;  %v10345_v21 = vld [vmem:[%s10249_s27 + $0xa8] sm:$0xff] }
  0x28   : > { %9270 = vmatmul.mubr.msk.f32.gmra.mrb[2].mxu0 %vm234_vm3, %v10274_v8  ;;  %1596 = vrot.lane.b32.xlu1 %v10277_v9, %s10170_s28  ;;  %v10348_v22 = vld [vmem:[%s10249_s27 + $0x60] sm:$0xff]  ;;  %v10359_v23 = vld [vmem:[%s10249_s27 + $0x68] sm:$0xff]  ;;  %v10362_v24 = vld [vmem:[%s10249_s27 + $0xb0] sm:$0xff]  ;;  %s233_s16 = ssub.f32 %s11343_s14, %s11345_s15 }
  0x29   : > { %9272 = vmatprep.mubr.msk.f32.mxu0 %vm234_vm3, %v10280_v10  ;;  %v10365_v25 = vld [vmem:[%s10249_s27 + $0x70] sm:$0xff]  ;;  %v10376_v26 = vld [vmem:[%s10249_s27 + $0x78] sm:$0xff]  ;;  %v10390_v28 = vld [vmem:[%s10249_s27 + $0xc0] sm:$0xff]  ;;  %s2252_s18 = ssub.f32 %s12720_s17, %s11343_s14 }
  0x2a   : > { %v10379_v27 = vld [vmem:[%s10249_s27 + $0xb8] sm:$0xff]  ;;  %v10401_v29 = vld [vmem:[%s10249_s27 + $0xc8] sm:$0xff]  ;;  %v10412_v30 = vld [vmem:[%s10249_s27 + $0xd0] sm:$0xff]  ;;  %s4259_s20 = ssub.f32 %s14078_s19, %s12720_s17 }
  0x2b   : > { %1423 = vrot.lane.b32.xlu0 %v10262_v6, %s10170_s28  ;;  %v10423_v31 = vld [vmem:[%s10249_s27 + $0xd8] sm:$0xff]  ;;  %v10434_v32 = vld [vmem:[%s10249_s27 + $0xe0] sm:$0xff]  ;;  %v10445_v33 = vld [vmem:[%s10249_s27 + $0xe8] sm:$0xff]  ;;  %s6266_s22 = ssub.f32 %s15493_s21, %s14078_s19 }
  0x2c   : > { %9273 = vmatmul.mubr.msk.f32.gmra.mrb[4].mxu0 %vm234_vm3, %v10291_v11  ;;  %1599 = vrot.lane.b32.xlu1 %v10294_v12, %s10170_s28  ;;  %v10456_v34 = vld [vmem:[%s10249_s27 + $0xf0] sm:$0xff]  ;;  %v10467_v35 = vld [vmem:[%s10249_s27 + $0xf8] sm:$0xff] }
  0x2d   : > { %9275 = vmatprep.mubr.msk.f32.mxu0 %vm234_vm3, %v10297_v13 }
  0x2f   : > { %1426 = vrot.lane.b32.xlu0 %v10274_v8, %s10170_s28 }
  0x30   : > { %9276 = vmatmul.mubr.msk.f32.gmra.mrb[6].mxu0 %vm234_vm3, %v10308_v14  ;;  %1602 = vrot.lane.b32.xlu1 %v10311_v15, %s10170_s28 }
  0x31   : > { %9278 = vmatprep.mubr.msk.f32.mxu0 %vm234_vm3, %v10314_v16 }
  0x33   : > { %1429 = vrot.lane.b32.xlu0 %v10280_v10, %s10170_s28 }
  0x34   : > { %9279 = vmatmul.mubr.msk.f32.gmra.mrb[8].mxu0 %vm234_vm3, %v10325_v17  ;;  %1605 = vrot.lane.b32.xlu1 %v10328_v18, %s10170_s28 }
  0x35   : > { %9281 = vmatprep.mubr.msk.f32.mxu0 %vm234_vm3, %v10331_v19 }
  0x37   : > { %1432 = vrot.lane.b32.xlu0 %v10291_v11, %s10170_s28 }
  0x38   : > { %9282 = vmatmul.mubr.msk.f32.gmra.mrb[10].mxu0 %vm234_vm3, %v10342_v20  ;;  %1608 = vrot.lane.b32.xlu1 %v10345_v21, %s10170_s28 }
  0x39   : > { %9284 = vmatprep.mubr.msk.f32.mxu0 %vm234_vm3, %v10348_v22 }
  0x3b   : > { %1435 = vrot.lane.b32.xlu0 %v10297_v13, %s10170_s28 }
  0x3c   : > { %9285 = vmatmul.mubr.msk.f32.gmra.mrb[12].mxu0 %vm234_vm3, %v10359_v23  ;;  %1611 = vrot.lane.b32.xlu1 %v10362_v24, %s10170_s28 }
  0x3d   : > { %9287 = vmatprep.mubr.msk.f32.mxu0 %vm234_vm3, %v10365_v25 }
  0x3f   : > { %1438 = vrot.lane.b32.xlu0 %v10308_v14, %s10170_s28 }
  0x40   : > { %9288 = vmatmul.mubr.msk.f32.gmra.mrb[14].mxu0 %vm234_vm3, %v10376_v26  ;;  %1614 = vrot.lane.b32.xlu1 %v10379_v27, %s10170_s28 }
  0x41   : > { %9290 = vmatprep.mubr.msk.f32.mxu0 %vm234_vm3, %v10269_v7 }
  0x43   : > { %1441 = vrot.lane.b32.xlu0 %v10314_v16, %s10170_s28 }
  0x44   : > { %9291 = vmatmul.mubr.msk.f32.gmra.mrb[16].mxu0 %vm234_vm3, %v10277_v9  ;;  %1617 = vrot.lane.b32.xlu1 %v10390_v28, %s10170_s28 }
  0x45   : > { %9293 = vmatprep.mubr.msk.f32.mxu0 %vm234_vm3, %v10294_v12 }
  0x47   : > { %1444 = vrot.lane.b32.xlu0 %v10325_v17, %s10170_s28 }
  0x48   : > { %9294 = vmatmul.mubr.msk.f32.gmra.mrb[18].mxu0 %vm234_vm3, %v10311_v15  ;;  %1620 = vrot.lane.b32.xlu1 %v10401_v29, %s10170_s28 }
  0x49   : > { %9296 = vmatprep.mubr.msk.f32.mxu0 %vm234_vm3, %v10328_v18 }
  0x4b   : > { %1447 = vrot.lane.b32.xlu0 %v10331_v19, %s10170_s28 }
  0x4c   : > { %9297 = vmatmul.mubr.msk.f32.gmra.mrb[20].mxu0 %vm234_vm3, %v10345_v21  ;;  %1623 = vrot.lane.b32.xlu1 %v10412_v30, %s10170_s28 }
  0x4d   : > { %9299 = vmatprep.mubr.msk.f32.mxu0 %vm234_vm3, %v10362_v24 }
  0x4f   : > { %1450 = vrot.lane.b32.xlu0 %v10342_v20, %s10170_s28 }
  0x50   : > { %9300 = vmatmul.mubr.msk.f32.gmra.mrb[22].mxu0 %vm234_vm3, %v10379_v27  ;;  %1626 = vrot.lane.b32.xlu1 %v10423_v31, %s10170_s28 }
  0x51   : > { %9302 = vmatprep.mubr.msk.f32.mxu0 %vm234_vm3, %v10390_v28 }
  0x53   : > { %1453 = vrot.lane.b32.xlu0 %v10348_v22, %s10170_s28 }
  0x54   : > { %9303 = vmatmul.mubr.msk.f32.gmra.mrb[24].mxu0 %vm234_vm3, %v10401_v29  ;;  %1629 = vrot.lane.b32.xlu1 %v10434_v32, %s10170_s28 }
  0x55   : > { %9305 = vmatprep.mubr.msk.f32.mxu0 %vm234_vm3, %v10412_v30 }
  0x57   : > { %1456 = vrot.lane.b32.xlu0 %v10359_v23, %s10170_s28 }
  0x58   : > { %9306 = vmatmul.mubr.msk.f32.gmra.mrb[26].mxu0 %vm234_vm3, %v10423_v31  ;;  %1632 = vrot.lane.b32.xlu1 %v10445_v33, %s10170_s28 }
  0x59   : > { %9308 = vmatprep.mubr.msk.f32.mxu0 %vm234_vm3, %v10434_v32 }
  0x5b   : > { %1459 = vrot.lane.b32.xlu0 %v10365_v25, %s10170_s28 }
  0x5c   : > { %9309 = vmatmul.mubr.msk.f32.gmra.mrb[28].mxu0 %vm234_vm3, %v10445_v33  ;;  %1635 = vrot.lane.b32.xlu1 %v10456_v34, %s10170_s28 }
  0x5d   : > { %9311 = vmatprep.mubr.msk.f32.mxu0 %vm234_vm3, %v10456_v34 }
  0x5f   : > { %1462 = vrot.lane.b32.xlu0 %v10376_v26, %s10170_s28 }
  0x60   : > { %9312 = vmatmul.mubr.msk.f32.gmra.mrb[30].mxu0 %vm234_vm3, %v10467_v35  ;;  %1638 = vrot.lane.b32.xlu1 %v10467_v35, %s10170_s28 }
  0x95   : > { %v1418_v39 = vpop.permute.xlu0 %1417 }
  0x96   : > { %v1421_v40 = vpop.permute.xlu1 %1420  ;;  %v1419_v41 = vsel %vm1416_vm4, %v1418_v39, %v10252_v4 }
  0x97   : > { %1465 = vrot.lane.b32.xlu0 %v1419_v41, %s10170_s28  ;;  %v1422_v42 = vsel %vm1416_vm4, %v1421_v40, %v10255_v5 }
  0x99   : > { %v1594_v43 = vpop.permute.xlu0 %1593 }
  0x9a   : > { %v1595_v44 = vsel %vm1416_vm4, %v1594_v43, %v10269_v7  ;;  %v1597_v45 = vpop.permute.xlu1 %1596 }
  0x9b   : > { %1641 = vrot.lane.b32.xlu1 %v1595_v44, %s10170_s28  ;;  %1467 = vrot.lane.b32.xlu0 %v1422_v42, %s10170_s28  ;;  %v1598_v46 = vsel %vm1416_vm4, %v1597_v45, %v10277_v9 }
  0x9d   : > { %v1424_v47 = vpop.permute.xlu0 %1423 }
  0x9e   : > { %v1600_v48 = vpop.permute.xlu1 %1599  ;;  %v1425_v49 = vsel %vm1416_vm4, %v1424_v47, %v10262_v6 }
  0x9f   : > { %1643 = vrot.lane.b32.xlu1 %v1598_v46, %s10170_s28  ;;  %1469 = vrot.lane.b32.xlu0 %v1425_v49, %s10170_s28  ;;  %v1601_v50 = vsel %vm1416_vm4, %v1600_v48, %v10294_v12 }
  0xa1   : > { %v1427_v51 = vpop.permute.xlu0 %1426 }
  0xa2   : > { %v1603_v52 = vpop.permute.xlu1 %1602  ;;  %v1428_v53 = vsel %vm1416_vm4, %v1427_v51, %v10274_v8 }
  0xa3   : > { %1645 = vrot.lane.b32.xlu1 %v1601_v50, %s10170_s28  ;;  %1471 = vrot.lane.b32.xlu0 %v1428_v53, %s10170_s28  ;;  %v1604_v54 = vsel %vm1416_vm4, %v1603_v52, %v10311_v15 }
  0xa5   : > { %v1430_v55 = vpop.permute.xlu0 %1429 }
  0xa6   : > { %v1606_v56 = vpop.permute.xlu1 %1605  ;;  %v1431_v57 = vsel %vm1416_vm4, %v1430_v55, %v10280_v10 }
  0xa7   : > { %1647 = vrot.lane.b32.xlu1 %v1604_v54, %s10170_s28  ;;  %1473 = vrot.lane.b32.xlu0 %v1431_v57, %s10170_s28  ;;  %v1607_v58 = vsel %vm1416_vm4, %v1606_v56, %v10328_v18 }
  0xa9   : > { %v1433_v59 = vpop.permute.xlu0 %1432 }
  0xaa   : > { %v1609_v60 = vpop.permute.xlu1 %1608  ;;  %v1434_v61 = vsel %vm1416_vm4, %v1433_v59, %v10291_v11 }
  0xab   : > { %1649 = vrot.lane.b32.xlu1 %v1607_v58, %s10170_s28  ;;  %1475 = vrot.lane.b32.xlu0 %v1434_v61, %s10170_s28  ;;  %v1610_v62 = vsel %vm1416_vm4, %v1609_v60, %v10345_v21 }
  0xad   : > { %v1436_v63 = vpop.permute.xlu0 %1435 }
  0xae   : > { %v1612_v0 = vpop.permute.xlu1 %1611  ;;  %v1437_v1 = vsel %vm1416_vm4, %v1436_v63, %v10297_v13 }
  0xaf   : > { %1651 = vrot.lane.b32.xlu1 %v1610_v62, %s10170_s28  ;;  %1477 = vrot.lane.b32.xlu0 %v1437_v1, %s10170_s28  ;;  %v1613_v36 = vsel %vm1416_vm4, %v1612_v0, %v10362_v24 }
  0xb1   : > { %v1439_v37 = vpop.permute.xlu0 %1438 }
  0xb2   : > { %v1615_v39 = vpop.permute.xlu1 %1614  ;;  %v1440_v40 = vsel %vm1416_vm4, %v1439_v37, %v10308_v14 }
  0xb3   : > { %1653 = vrot.lane.b32.xlu1 %v1613_v36, %s10170_s28  ;;  %1479 = vrot.lane.b32.xlu0 %v1440_v40, %s10170_s28  ;;  %v1616_v41 = vsel %vm1416_vm4, %v1615_v39, %v10379_v27 }
  0xb5   : > { %v1442_v42 = vpop.permute.xlu0 %1441 }
  0xb6   : > { %v1618_v43 = vpop.permute.xlu1 %1617  ;;  %v1443_v44 = vsel %vm1416_vm4, %v1442_v42, %v10314_v16 }
  0xb7   : > { %1655 = vrot.lane.b32.xlu1 %v1616_v41, %s10170_s28  ;;  %1481 = vrot.lane.b32.xlu0 %v1443_v44, %s10170_s28  ;;  %v1619_v45 = vsel %vm1416_vm4, %v1618_v43, %v10390_v28 }
  0xb9   : > { %v1445_v46 = vpop.permute.xlu0 %1444 }
  0xba   : > { %v1621_v47 = vpop.permute.xlu1 %1620  ;;  %v1446_v48 = vsel %vm1416_vm4, %v1445_v46, %v10325_v17 }
  0xbb   : > { %1657 = vrot.lane.b32.xlu1 %v1619_v45, %s10170_s28  ;;  %1483 = vrot.lane.b32.xlu0 %v1446_v48, %s10170_s28  ;;  %v1622_v49 = vsel %vm1416_vm4, %v1621_v47, %v10401_v29 }
  0xbd   : > { %v1448_v50 = vpop.permute.xlu0 %1447 }
  0xbe   : > { %v1624_v51 = vpop.permute.xlu1 %1623  ;;  %v1449_v52 = vsel %vm1416_vm4, %v1448_v50, %v10331_v19 }
  0xbf   : > { %1659 = vrot.lane.b32.xlu1 %v1622_v49, %s10170_s28  ;;  %1485 = vrot.lane.b32.xlu0 %v1449_v52, %s10170_s28  ;;  %v1625_v53 = vsel %vm1416_vm4, %v1624_v51, %v10412_v30 }
  0xc1   : > { %v1451_v54 = vpop.permute.xlu0 %1450 }
  0xc2   : > { %v1627_v55 = vpop.permute.xlu1 %1626  ;;  %v1452_v56 = vsel %vm1416_vm4, %v1451_v54, %v10342_v20 }
  0xc3   : > { %1661 = vrot.lane.b32.xlu1 %v1625_v53, %s10170_s28  ;;  %1487 = vrot.lane.b32.xlu0 %v1452_v56, %s10170_s28  ;;  %v1628_v57 = vsel %vm1416_vm4, %v1627_v55, %v10423_v31 }
  0xc5   : > { %v1454_v58 = vpop.permute.xlu0 %1453 }
  0xc6   : > { %v1630_v59 = vpop.permute.xlu1 %1629  ;;  %v1455_v60 = vsel %vm1416_vm4, %v1454_v58, %v10348_v22 }
  0xc7   : > { %1663 = vrot.lane.b32.xlu1 %v1628_v57, %s10170_s28  ;;  %1489 = vrot.lane.b32.xlu0 %v1455_v60, %s10170_s28  ;;  %v1631_v61 = vsel %vm1416_vm4, %v1630_v59, %v10434_v32 }
  0xc9   : > { %v1457_v62 = vpop.permute.xlu0 %1456 }
  0xca   : > { %v1633_v63 = vpop.permute.xlu1 %1632  ;;  %v1458_v0 = vsel %vm1416_vm4, %v1457_v62, %v10359_v23 }
  0xcb   : > { %1665 = vrot.lane.b32.xlu1 %v1631_v61, %s10170_s28  ;;  %1491 = vrot.lane.b32.xlu0 %v1458_v0, %s10170_s28  ;;  %v1634_v1 = vsel %vm1416_vm4, %v1633_v63, %v10445_v33 }
  0xcd   : > { %v1460_v36 = vpop.permute.xlu0 %1459 }
  0xce   : > { %v1636_v37 = vpop.permute.xlu1 %1635  ;;  %v1461_v39 = vsel %vm1416_vm4, %v1460_v36, %v10365_v25 }
  0xcf   : > { %1667 = vrot.lane.b32.xlu1 %v1634_v1, %s10170_s28  ;;  %1493 = vrot.lane.b32.xlu0 %v1461_v39, %s10170_s28  ;;  %v1637_v40 = vsel %vm1416_vm4, %v1636_v37, %v10456_v34 }
  0xd1   : > { %v1463_v41 = vpop.permute.xlu0 %1462 }
  0xd2   : > { %v1639_v42 = vpop.permute.xlu1 %1638  ;;  %v1464_v43 = vsel %vm1416_vm4, %v1463_v41, %v10376_v26 }
  0xd3   : > { %1669 = vrot.lane.b32.xlu1 %v1637_v40, %s10170_s28  ;;  %1495 = vrot.lane.b32.xlu0 %v1464_v43, %s10170_s28  ;;  %v1640_v44 = vsel %vm1416_vm4, %v1639_v42, %v10467_v35 }
  0xd7   : > { %1671 = vrot.lane.b32.xlu1 %v1640_v44, %s10170_s28 }
  0xf7   : > { %v9268_v45 = vpop.f32.mrb[0].mxu0 }
  0xf8   : > { %v401_v46 = vpop.f32.mrb[1].mxu0  ;;  %v561_v48 = vmax.f32 %v9268_v45, 0.0 }
  0xf9   : > { %v560_v47 = vmax.f32 %v401_v46, 0.0 }
  0xfb   : > { %v9271_v49 = vpop.f32.mrb[2].mxu0  ;;  %9318 = vmatprep.mubr.msk.f32.mxu1 %vm234_vm3, %v560_v47 }
  0xfc   : > { %v411_v50 = vpop.f32.mrb[3].mxu0  ;;  %9319 = vmatmul.mubr.msk.f32.vlgmr.msra.gmra.mrb[0].mxu1 %vm234_vm3, %v561_v48  ;;  %v563_v52 = vmax.f32 %v9271_v49, 0.0 }
  0xfd   : > { %v562_v51 = vmax.f32 %v411_v50, 0.0  ;;  %9909 = vmatpush3.bf16.msk.msra.mxu1 %vm10230_vm2, %v10228_v2 }
  0xff   : > { %v9274_v53 = vpop.f32.mrb[4].mxu0  ;;  %9321 = vmatprep.mubr.msk.f32.mxu1 %vm234_vm3, %v562_v51 }
 0x100   : > { %v421_v54 = vpop.f32.mrb[5].mxu0  ;;  %9322 = vmatmul.mubr.msk.f32.gmra.mrb[2].mxu1 %vm234_vm3, %v563_v52  ;;  %v565_v56 = vmax.f32 %v9274_v53, 0.0 }
 0x101   : > { %v564_v55 = vmax.f32 %v421_v54, 0.0 }
 0x103   : > { %v9277_v57 = vpop.f32.mrb[6].mxu0  ;;  %9324 = vmatprep.mubr.msk.f32.mxu1 %vm234_vm3, %v564_v55 }
 0x104   : > { %v431_v58 = vpop.f32.mrb[7].mxu0  ;;  %9325 = vmatmul.mubr.msk.f32.gmra.mrb[4].mxu1 %vm234_vm3, %v565_v56  ;;  %v567_v60 = vmax.f32 %v9277_v57, 0.0 }
 0x105   : > { %v566_v59 = vmax.f32 %v431_v58, 0.0 }
 0x107   : > { %v9280_v61 = vpop.f32.mrb[8].mxu0  ;;  %9327 = vmatprep.mubr.msk.f32.mxu1 %vm234_vm3, %v566_v59 }
 0x108   : > { %v441_v62 = vpop.f32.mrb[9].mxu0  ;;  %9328 = vmatmul.mubr.msk.f32.gmra.mrb[6].mxu1 %vm234_vm3, %v567_v60  ;;  %v569_v1 = vmax.f32 %v9280_v61, 0.0 }
 0x109   : > { %v568_v63 = vmax.f32 %v441_v62, 0.0  ;;  %v1466_v0 = vpop.permute.xlu0 %1465 }
 0x10a   : > { %v10601_v36 = vsel %vm1416_vm4, %v1466_v0, %v10252_v4 }
 0x10b   : > { %v9283_v37 = vpop.f32.mrb[10].mxu0  ;;  %9330 = vmatprep.mubr.msk.f32.mxu1 %vm234_vm3, %v568_v63  ;;  %1529 = vrot.lane.b32.xlu0 %v10601_v36, %s10171_s6 }
 0x10c   : > { %v451_v39 = vpop.f32.mrb[11].mxu0  ;;  %9331 = vmatmul.mubr.msk.f32.gmra.mrb[8].mxu1 %vm234_vm3, %v569_v1  ;;  %v571_v43 = vmax.f32 %v9283_v37, 0.0 }
 0x10d   : > { %v570_v40 = vmax.f32 %v451_v39, 0.0  ;;  %v1642_v41 = vpop.permute.xlu1 %1641  ;;  %v1468_v42 = vpop.permute.xlu0 %1467 }
 0x10e   : > { %v10609_v44 = vsel %vm1416_vm4, %v1642_v41, %v10269_v7  ;;  %v10613_v4 = vsel %vm1416_vm4, %v1468_v42, %v10255_v5 }
 0x10f   : > { %1705 = vrot.lane.b32.xlu1 %v10609_v44, %s10171_s6  ;;  %v9286_v45 = vpop.f32.mrb[12].mxu0  ;;  %9333 = vmatprep.mubr.msk.f32.mxu1 %vm234_vm3, %v570_v40 }
 0x110   : > { %v461_v46 = vpop.f32.mrb[13].mxu0  ;;  %9334 = vmatmul.mubr.msk.f32.gmra.mrb[10].mxu1 %vm234_vm3, %v571_v43  ;;  %1531 = vrot.lane.b32.xlu0 %v10613_v4, %s10171_s6  ;;  %v573_v49 = vmax.f32 %v9286_v45, 0.0 }
 0x111   : > { %v572_v47 = vmax.f32 %v461_v46, 0.0  ;;  %v1644_v48 = vpop.permute.xlu1 %1643  ;;  %v1470_v7 = vpop.permute.xlu0 %1469 }
 0x112   : > { %v10623_v5 = vsel %vm1416_vm4, %v1644_v48, %v10277_v9  ;;  %v10627_v50 = vsel %vm1416_vm4, %v1470_v7, %v10262_v6 }
 0x113   : > { %1707 = vrot.lane.b32.xlu1 %v10623_v5, %s10171_s6  ;;  %v9289_v51 = vpop.f32.mrb[14].mxu0  ;;  %9336 = vmatprep.mubr.msk.f32.mxu1 %vm234_vm3, %v572_v47 }
 0x114   : > { %v471_v52 = vpop.f32.mrb[15].mxu0  ;;  %9337 = vmatmul.mubr.msk.f32.gmra.mrb[12].mxu1 %vm234_vm3, %v573_v49  ;;  %1533 = vrot.lane.b32.xlu0 %v10627_v50, %s10171_s6  ;;  %v575_v55 = vmax.f32 %v9289_v51, 0.0 }
 0x115   : > { %v574_v53 = vmax.f32 %v471_v52, 0.0  ;;  %v1646_v54 = vpop.permute.xlu1 %1645  ;;  %v1472_v9 = vpop.permute.xlu0 %1471  ;;  %v8385_v52 = vld [vmem:[%s16006_s2 + $0x28] sm:$0x3] }
 0x116   : > { %v10637_v6 = vsel %vm1416_vm4, %v1646_v54, %v10294_v12  ;;  %v10641_v56 = vsel %vm1416_vm4, %v1472_v9, %v10274_v8 }
 0x117   : > { %1709 = vrot.lane.b32.xlu1 %v10637_v6, %s10171_s6  ;;  %v9292_v57 = vpop.f32.mrb[16].mxu0  ;;  %9339 = vmatprep.mubr.msk.f32.mxu1 %vm234_vm3, %v574_v53 }
 0x118   : > { %v481_v58 = vpop.f32.mrb[17].mxu0  ;;  %9340 = vmatmul.mubr.msk.f32.gmra.mrb[14].mxu1 %vm234_vm3, %v575_v55  ;;  %1535 = vrot.lane.b32.xlu0 %v10641_v56, %s10171_s6  ;;  %v577_v61 = vmax.f32 %v9292_v57, 0.0 }
 0x119   : > { %v576_v59 = vmax.f32 %v481_v58, 0.0  ;;  %v1648_v60 = vpop.permute.xlu1 %1647  ;;  %v1474_v12 = vpop.permute.xlu0 %1473 }
 0x11a   : > { %v10651_v8 = vsel %vm1416_vm4, %v1648_v60, %v10311_v15  ;;  %v10655_v62 = vsel %vm1416_vm4, %v1474_v12, %v10280_v10 }
 0x11b   : > { %1711 = vrot.lane.b32.xlu1 %v10651_v8, %s10171_s6  ;;  %v9295_v63 = vpop.f32.mrb[18].mxu0  ;;  %9342 = vmatprep.mubr.msk.f32.mxu1 %vm234_vm3, %v576_v59 }
 0x11c   : > { %v491_v0 = vpop.f32.mrb[19].mxu0  ;;  %9343 = vmatmul.mubr.msk.f32.gmra.mrb[16].mxu1 %vm234_vm3, %v577_v61  ;;  %1537 = vrot.lane.b32.xlu0 %v10655_v62, %s10171_s6  ;;  %v579_v39 = vmax.f32 %v9295_v63, 0.0 }
 0x11d   : > { %v578_v1 = vmax.f32 %v491_v0, 0.0  ;;  %v1650_v37 = vpop.permute.xlu1 %1649  ;;  %v1476_v15 = vpop.permute.xlu0 %1475 }
 0x11e   : > { %v10665_v10 = vsel %vm1416_vm4, %v1650_v37, %v10328_v18  ;;  %v10669_v40 = vsel %vm1416_vm4, %v1476_v15, %v10291_v11 }
 0x11f   : > { %1713 = vrot.lane.b32.xlu1 %v10665_v10, %s10171_s6  ;;  %v9298_v41 = vpop.f32.mrb[20].mxu0  ;;  %9345 = vmatprep.mubr.msk.f32.mxu1 %vm234_vm3, %v578_v1 }
 0x120   : > { %v501_v42 = vpop.f32.mrb[21].mxu0  ;;  %9346 = vmatmul.mubr.msk.f32.gmra.mrb[18].mxu1 %vm234_vm3, %v579_v39  ;;  %1539 = vrot.lane.b32.xlu0 %v10669_v40, %s10171_s6  ;;  %v581_v46 = vmax.f32 %v9298_v41, 0.0 }
 0x121   : > { %v580_v43 = vmax.f32 %v501_v42, 0.0  ;;  %v1652_v45 = vpop.permute.xlu1 %1651  ;;  %v1478_v18 = vpop.permute.xlu0 %1477 }
 0x122   : > { %v10679_v11 = vsel %vm1416_vm4, %v1652_v45, %v10345_v21  ;;  %v10683_v47 = vsel %vm1416_vm4, %v1478_v18, %v10297_v13  ;;  %v8384_v13 = vld [vmem:[%s16006_s2 + $0x20] sm:$0xff] }
 0x123   : > { %1715 = vrot.lane.b32.xlu1 %v10679_v11, %s10171_s6  ;;  %v9301_v48 = vpop.f32.mrb[22].mxu0  ;;  %9348 = vmatprep.mubr.msk.f32.mxu1 %vm234_vm3, %v580_v43  ;;  %v10705_v55 = vpack.c.bf16 %v8385_v52, %v8384_v13 }
 0x124   : > { %v511_v7 = vpop.f32.mrb[23].mxu0  ;;  %9349 = vmatmul.mubr.msk.f32.gmra.mrb[20].mxu1 %vm234_vm3, %v581_v46  ;;  %1541 = vrot.lane.b32.xlu0 %v10683_v47, %s10171_s6  ;;  %v583_v53 = vmax.f32 %v9301_v48, 0.0 }
 0x125   : > { %v582_v49 = vmax.f32 %v511_v7, 0.0  ;;  %v1654_v51 = vpop.permute.xlu1 %1653  ;;  %v1480_v21 = vpop.permute.xlu0 %1479  ;;  %16370 = vst [vmem:[#allocation8_spill] sm:$0xff] %v10705_v55  ;;  %9900 = vmatprep.subr.msk.bf16.mxu0 %vm10230_vm2, %v10705_v55  ;;  %9918 = vmatprep.subr.msk.bf16.mxu1 %vm10230_vm2, %v10705_v55 }
 0x126   : > { %v10699_v54 = vsel %vm1416_vm4, %v1654_v51, %v10362_v24  ;;  %v10703_v9 = vsel %vm1416_vm4, %v1480_v21, %v10308_v14  ;;  %9903 = vmatpush3.bf16.msk.msra.mxu0 %vm10230_vm2, %v10705_v55 }
 0x127   : > { %1717 = vrot.lane.b32.xlu1 %v10699_v54, %s10171_s6  ;;  %v9304_v57 = vpop.f32.mrb[24].mxu0  ;;  %9351 = vmatprep.mubr.msk.f32.mxu1 %vm234_vm3, %v582_v49 }
 0x128   : > { %v521_v58 = vpop.f32.mrb[25].mxu0  ;;  %9352 = vmatmul.mubr.msk.f32.gmra.mrb[22].mxu1 %vm234_vm3, %v583_v53  ;;  %1543 = vrot.lane.b32.xlu0 %v10703_v9, %s10171_s6  ;;  %v585_v14 = vmax.f32 %v9304_v57, 0.0 }
 0x129   : > { %v584_v24 = vmax.f32 %v521_v58, 0.0  ;;  %v1656_v59 = vpop.permute.xlu1 %1655  ;;  %v1482_v60 = vpop.permute.xlu0 %1481  ;;  %9912 = vmatprep.subr.msk.bf16.mxu0 %vm10230_vm2, %v10481_v38 }
 0x12a   : > { %v10721_v12 = vsel %vm1416_vm4, %v1656_v59, %v10379_v27  ;;  %v10725_v61 = vsel %vm1416_vm4, %v1482_v60, %v10314_v16 }
 0x12b   : > { %1719 = vrot.lane.b32.xlu1 %v10721_v12, %s10171_s6  ;;  %v9307_v63 = vpop.f32.mrb[26].mxu0  ;;  %9354 = vmatprep.mubr.msk.f32.mxu1 %vm234_vm3, %v584_v24 }
 0x12c   : > { %v531_v0 = vpop.f32.mrb[27].mxu0  ;;  %9355 = vmatmul.mubr.msk.f32.gmra.mrb[24].mxu1 %vm234_vm3, %v585_v14  ;;  %1545 = vrot.lane.b32.xlu0 %v10725_v61, %s10171_s6  ;;  %v587_v37 = vmax.f32 %v9307_v63, 0.0 }
 0x12d   : > { %v586_v27 = vmax.f32 %v531_v0, 0.0  ;;  %v1658_v1 = vpop.permute.xlu1 %1657  ;;  %v1484_v16 = vpop.permute.xlu0 %1483 }
 0x12e   : > { %v10741_v15 = vsel %vm1416_vm4, %v1658_v1, %v10390_v28  ;;  %v10745_v39 = vsel %vm1416_vm4, %v1484_v16, %v10325_v17 }
 0x12f   : > { %1721 = vrot.lane.b32.xlu1 %v10741_v15, %s10171_s6  ;;  %v9310_v41 = vpop.f32.mrb[28].mxu0  ;;  %9357 = vmatprep.mubr.msk.f32.mxu1 %vm234_vm3, %v586_v27 }
 0x130   : > { %v541_v42 = vpop.f32.mrb[29].mxu0  ;;  %9358 = vmatmul.mubr.msk.f32.gmra.mrb[26].mxu1 %vm234_vm3, %v587_v37  ;;  %1547 = vrot.lane.b32.xlu0 %v10745_v39, %s10171_s6  ;;  %v589_v18 = vmax.f32 %v9310_v41, 0.0 }
 0x131   : > { %v588_v43 = vmax.f32 %v541_v42, 0.0  ;;  %v1660_v45 = vpop.permute.xlu1 %1659  ;;  %v1486_v28 = vpop.permute.xlu0 %1485 }
 0x132   : > { %v10755_v17 = vsel %vm1416_vm4, %v1660_v45, %v10401_v29  ;;  %v10759_v46 = vsel %vm1416_vm4, %v1486_v28, %v10331_v19 }
 0x133   : > { %1723 = vrot.lane.b32.xlu1 %v10755_v17, %s10171_s6  ;;  %v9313_v48 = vpop.f32.mrb[30].mxu0  ;;  %9360 = vmatprep.mubr.msk.f32.mxu1 %vm234_vm3, %v588_v43 }
 0x134   : > { %v551_v7 = vpop.f32.mrb[31].mxu0  ;;  %9361 = vmatmul.mubr.msk.f32.gmra.mrb[28].mxu1 %vm234_vm3, %v589_v18  ;;  %1549 = vrot.lane.b32.xlu0 %v10759_v46, %s10171_s6  ;;  %v591_v21 = vmax.f32 %v9313_v48, 0.0 }
 0x135   : > { %v590_v49 = vmax.f32 %v551_v7, 0.0  ;;  %v1662_v51 = vpop.permute.xlu1 %1661  ;;  %v1488_v29 = vpop.permute.xlu0 %1487 }
 0x136   : > { %v10769_v19 = vsel %vm1416_vm4, %v1662_v51, %v10412_v30  ;;  %v10773_v13 = vsel %vm1416_vm4, %v1488_v29, %v10342_v20 }
 0x137   : > { %1725 = vrot.lane.b32.xlu1 %v10769_v19, %s10171_s6  ;;  %9363 = vmatprep.mubr.msk.f32.mxu1 %vm234_vm3, %v590_v49 }
 0x138   : > { %9364 = vmatmul.mubr.msk.f32.gmra.mrb[30].mxu1 %vm234_vm3, %v591_v21  ;;  %1551 = vrot.lane.b32.xlu0 %v10773_v13, %s10171_s6 }
 0x139   : > { %v1664_v52 = vpop.permute.xlu1 %1663  ;;  %v1490_v53 = vpop.permute.xlu0 %1489 }
 0x13a   : > { %v10783_v30 = vsel %vm1416_vm4, %v1664_v52, %v10423_v31  ;;  %v10787_v20 = vsel %vm1416_vm4, %v1490_v53, %v10348_v22 }
 0x13b   : > { %1727 = vrot.lane.b32.xlu1 %v10783_v30, %s10171_s6 }
 0x13c   : > { %1553 = vrot.lane.b32.xlu0 %v10787_v20, %s10171_s6 }
 0x13d   : > { %v1666_v57 = vpop.permute.xlu1 %1665  ;;  %v1492_v58 = vpop.permute.xlu0 %1491 }
 0x13e   : > { %v10795_v24 = vsel %vm1416_vm4, %v1666_v57, %v10434_v32  ;;  %v10799_v31 = vsel %vm1416_vm4, %v1492_v58, %v10359_v23 }
 0x13f   : > { %1729 = vrot.lane.b32.xlu1 %v10795_v24, %s10171_s6 }
 0x140   : > { %1555 = vrot.lane.b32.xlu0 %v10799_v31, %s10171_s6 }
 0x141   : > { %v1668_v22 = vpop.permute.xlu1 %1667  ;;  %v1494_v59 = vpop.permute.xlu0 %1493 }
 0x142   : > { %v10807_v60 = vsel %vm1416_vm4, %v1668_v22, %v10445_v33  ;;  %v10811_v32 = vsel %vm1416_vm4, %v1494_v59, %v10365_v25 }
 0x143   : > { %1731 = vrot.lane.b32.xlu1 %v10807_v60, %s10171_s6 }
 0x144   : > { %1557 = vrot.lane.b32.xlu0 %v10811_v32, %s10171_s6 }
 0x145   : > { %v1670_v23 = vpop.permute.xlu1 %1669  ;;  %v1496_v14 = vpop.permute.xlu0 %1495 }
 0x146   : > { %v10819_v63 = vsel %vm1416_vm4, %v1670_v23, %v10456_v34  ;;  %v10823_v33 = vsel %vm1416_vm4, %v1496_v14, %v10376_v26 }
 0x147   : > { %1733 = vrot.lane.b32.xlu1 %v10819_v63, %s10171_s6 }
 0x148   : > { %1559 = vrot.lane.b32.xlu0 %v10823_v33, %s10171_s6 }
 0x149   : > { %v1672_v25 = vpop.permute.xlu1 %1671 }
 0x14a   : > { %v10831_v0 = vsel %vm1416_vm4, %v1672_v25, %v10467_v35 }
 0x14b   : > { %1735 = vrot.lane.b32.xlu1 %v10831_v0, %s10171_s6 }
 0x17d   : > { %v1530_v34 = vpop.permute.xlu0 %1529 }
 0x17e   : > { %v1577_v27 = vsub.f32 %v10601_v36, %v1530_v34 }
 0x180   : > { %v1769_v16 = vmul.f32 %v1577_v27, %v1577_v27 }
 0x181   : > { %v1706_v1 = vpop.permute.xlu1 %1705 }
 0x182   : > { %v1753_v26 = vsub.f32 %v10609_v44, %v1706_v1  ;;  %v1532_v37 = vpop.permute.xlu0 %1531 }
 0x183   : > { %v1578_v41 = vsub.f32 %v10613_v4, %v1532_v37 }
 0x184   : > { %v1785_v42 = vmul.f32 %v1753_v26, %v1753_v26 }
 0x185   : > { %v1708_v43 = vpop.permute.xlu1 %1707  ;;  %v1770_v35 = vmul.f32 %v1578_v41, %v1578_v41 }
 0x186   : > { %v1801_v45 = vadd.f32 %v1785_v42, %v1769_v16  ;;  %v1754_v28 = vsub.f32 %v10623_v5, %v1708_v43  ;;  %v1534_v18 = vpop.permute.xlu0 %1533 }
 0x187   : > { %v1579_v48 = vsub.f32 %v10627_v50, %v1534_v18 }
 0x188   : > { %v1817_v7 = vmax.f32 %v1801_v45, 1e-30  ;;  %v1786_v49 = vmul.f32 %v1754_v28, %v1754_v28 }
 0x189   : > { %v1710_v51 = vpop.permute.xlu1 %1709  ;;  %v1771_v29 = vmul.f32 %v1579_v48, %v1579_v48 }
 0x18a   : > { %9981 = vrsqrt.f32 %v1817_v7  ;;  %v1802_v36 = vadd.f32 %v1786_v49, %v1770_v35  ;;  %v1755_v44 = vsub.f32 %v10637_v6, %v1710_v51  ;;  %v1536_v21 = vpop.permute.xlu0 %1535 }
 0x18b   : > { %v10842_v4 = vsub.f32 %v10641_v56, %v1536_v21 }
 0x18c   : > { %v1818_v52 = vmax.f32 %v1802_v36, 1e-30  ;;  %v1787_v53 = vmul.f32 %v1755_v44, %v1755_v44 }
 0x18d   : > { %v1712_v57 = vpop.permute.xlu1 %1711  ;;  %v1772_v50 = vmul.f32 %v10842_v4, %v10842_v4 }
 0x18e   : > { %9983 = vrsqrt.f32 %v1818_v52  ;;  %v1803_v5 = vadd.f32 %v1787_v53, %v1771_v29  ;;  %v1756_v58 = vsub.f32 %v10651_v8, %v1712_v57  ;;  %v1538_v22 = vpop.permute.xlu0 %1537 }
 0x18f   : > { %v10848_v59 = vsub.f32 %v10655_v62, %v1538_v22 }
 0x190   : > { %v1819_v6 = vmax.f32 %v1803_v5, 1e-30  ;;  %v1788_v23 = vmul.f32 %v1756_v58, %v1756_v58 }
 0x191   : > { %v1714_v14 = vpop.permute.xlu1 %1713  ;;  %v1773_v34 = vmul.f32 %v10848_v59, %v10848_v59 }
 0x192   : > { %9985 = vrsqrt.f32 %v1819_v6  ;;  %v1804_v56 = vadd.f32 %v1788_v23, %v1772_v50  ;;  %v10851_v25 = vsub.f32 %v10665_v10, %v1714_v14  ;;  %v1540_v1 = vpop.permute.xlu0 %1539 }
 0x193   : > { %v10856_v8 = vsub.f32 %v10669_v40, %v1540_v1 }
 0x194   : > { %v9982_v16 = vpop.eup %9981  ;;  %v1820_v37 = vmax.f32 %v1804_v56, 1e-30  ;;  %v1789_v62 = vmul.f32 %v10851_v25, %v10851_v25 }
 0x195   : > { %v1849_v42 = vmul.f32 %v9982_v16, %v1577_v27  ;;  %v1716_v43 = vpop.permute.xlu1 %1715  ;;  %v1865_v45 = vmul.f32 %v9982_v16, %v1753_v26  ;;  %v1774_v18 = vmul.f32 %v10856_v8, %v10856_v8 }
 0x196   : > { %9987 = vrsqrt.f32 %v1820_v37  ;;  %v1805_v35 = vadd.f32 %v1789_v62, %v1773_v34  ;;  %v10861_v10 = vsub.f32 %v10679_v11, %v1716_v43  ;;  %v1542_v7 = vpop.permute.xlu0 %1541 }
 0x197   : > { %1977 = vrot.lane.b32.xlu1 %v1865_v45, %s10172_s11  ;;  %1897 = vrot.lane.b32.xlu0 %v1849_v42, %s10172_s11  ;;  %v10868_v40 = vsub.f32 %v10683_v47, %v1542_v7 }
 0x198   : > { %v9984_v27 = vpop.eup %9983  ;;  %v1821_v49 = vmax.f32 %v1805_v35, 1e-30  ;;  %v1790_v26 = vmul.f32 %v10861_v10, %v10861_v10 }
 0x199   : > { %v1850_v51 = vmul.f32 %v9984_v27, %v1578_v41  ;;  %v1718_v11 = vpop.permute.xlu1 %1717  ;;  %v1866_v36 = vmul.f32 %v9984_v27, %v1754_v28  ;;  %v1775_v52 = vmul.f32 %v10868_v40, %v10868_v40 }
 0x19a   : > { %9989 = vrsqrt.f32 %v1821_v49  ;;  %v1806_v29 = vadd.f32 %v1790_v26, %v1774_v18  ;;  %v10873_v21 = vsub.f32 %v10699_v54, %v1718_v11  ;;  %v1544_v53 = vpop.permute.xlu0 %1543 }
 0x19b   : > { %1979 = vrot.lane.b32.xlu1 %v1866_v36, %s10172_s11  ;;  %1899 = vrot.lane.b32.xlu0 %v1850_v51, %s10172_s11  ;;  %v10880_v47 = vsub.f32 %v10703_v9, %v1544_v53 }
 0x19c   : > { %v9986_v57 = vpop.eup %9985  ;;  %v1822_v41 = vmax.f32 %v1806_v29, 1e-30  ;;  %v1791_v28 = vmul.f32 %v10873_v21, %v10873_v21 }
 0x19d   : > { %v1851_v5 = vmul.f32 %v9986_v57, %v1579_v48  ;;  %v1720_v50 = vpop.permute.xlu1 %1719  ;;  %v1867_v54 = vmul.f32 %v9986_v57, %v1755_v44  ;;  %v1776_v23 = vmul.f32 %v10880_v47, %v10880_v47 }
 0x19e   : > { %9991 = vrsqrt.f32 %v1822_v41  ;;  %v1807_v22 = vadd.f32 %v1791_v28, %v1775_v52  ;;  %v10885_v6 = vsub.f32 %v10721_v12, %v1720_v50  ;;  %v1546_v14 = vpop.permute.xlu0 %1545 }
 0x19f   : > { %1981 = vrot.lane.b32.xlu1 %v1867_v54, %s10172_s11  ;;  %1901 = vrot.lane.b32.xlu0 %v1851_v5, %s10172_s11  ;;  %v10892_v9 = vsub.f32 %v10725_v61, %v1546_v14 }
 0x1a0   : > { %v9988_v56 = vpop.eup %9987  ;;  %v1823_v48 = vmax.f32 %v1807_v22, 1e-30  ;;  %v1792_v44 = vmul.f32 %v10885_v6, %v10885_v6 }
 0x1a1   : > { %v1852_v34 = vmul.f32 %v9988_v56, %v10842_v4  ;;  %v1722_v12 = vpop.permute.xlu1 %1721  ;;  %v1868_v1 = vmul.f32 %v9988_v56, %v1756_v58  ;;  %v1777_v62 = vmul.f32 %v10892_v9, %v10892_v9 }
 0x1a2   : > { %9993 = vrsqrt.f32 %v1823_v48  ;;  %v1808_v16 = vadd.f32 %v1792_v44, %v1776_v23  ;;  %v10898_v37 = vsub.f32 %v10741_v15, %v1722_v12  ;;  %v1548_v42 = vpop.permute.xlu0 %1547 }
 0x1a3   : > { %1983 = vrot.lane.b32.xlu1 %v1868_v1, %s10172_s11  ;;  %1903 = vrot.lane.b32.xlu0 %v1852_v34, %s10172_s11  ;;  %v10905_v61 = vsub.f32 %v10745_v39, %v1548_v42 }
 0x1a4   : > { %v9990_v43 = vpop.eup %9989  ;;  %v1824_v4 = vmax.f32 %v1808_v16, 1e-30  ;;  %v1793_v58 = vmul.f32 %v10898_v37, %v10898_v37 }
 0x1a5   : > { %v1853_v45 = vmul.f32 %v9990_v43, %v10848_v59  ;;  %v1724_v15 = vpop.permute.xlu1 %1723  ;;  %v1869_v35 = vmul.f32 %v9990_v43, %v10851_v25  ;;  %v1778_v27 = vmul.f32 %v10905_v61, %v10905_v61 }
 0x1a6   : > { %9995 = vrsqrt.f32 %v1824_v4  ;;  %v1809_v18 = vadd.f32 %v1793_v58, %v1777_v62  ;;  %v10912_v7 = vsub.f32 %v10755_v17, %v1724_v15  ;;  %v1550_v39 = vpop.permute.xlu0 %1549 }
 0x1a7   : > { %1985 = vrot.lane.b32.xlu1 %v1869_v35, %s10172_s11  ;;  %1905 = vrot.lane.b32.xlu0 %v1853_v45, %s10172_s11  ;;  %v10919_v49 = vsub.f32 %v10759_v46, %v1550_v39 }
 0x1a8   : > { %v9992_v59 = vpop.eup %9991  ;;  %v1825_v26 = vmax.f32 %v1809_v18, 1e-30  ;;  %v1794_v25 = vmul.f32 %v10912_v7, %v10912_v7 }
 0x1a9   : > { %v1854_v51 = vmul.f32 %v9992_v59, %v10856_v8  ;;  %v1726_v17 = vpop.permute.xlu1 %1725  ;;  %v1870_v11 = vmul.f32 %v9992_v59, %v10861_v10  ;;  %v1779_v52 = vmul.f32 %v10919_v49, %v10919_v49 }
 0x1aa   : > { %9997 = vrsqrt.f32 %v1825_v26  ;;  %v1810_v36 = vadd.f32 %v1794_v25, %v1778_v27  ;;  %v10926_v29 = vsub.f32 %v10769_v19, %v1726_v17  ;;  %v1552_v46 = vpop.permute.xlu0 %1551 }
 0x1ab   : > { %1987 = vrot.lane.b32.xlu1 %v1870_v11, %s10172_s11  ;;  %1907 = vrot.lane.b32.xlu0 %v1854_v51, %s10172_s11  ;;  %v10933_v53 = vsub.f32 %v10773_v13, %v1552_v46 }
 0x1ac   : > { %v9994_v8 = vpop.eup %9993  ;;  %v1826_v57 = vmax.f32 %v1810_v36, 1e-30  ;;  %v1795_v10 = vmul.f32 %v10926_v29, %v10926_v29 }
 0x1ad   : > { %v1855_v41 = vmul.f32 %v9994_v8, %v10868_v40  ;;  %v1728_v19 = vpop.permute.xlu1 %1727  ;;  %v1871_v28 = vmul.f32 %v9994_v8, %v10873_v21  ;;  %v1780_v54 = vmul.f32 %v10933_v53, %v10933_v53 }
 0x1ae   : > { %9999 = vrsqrt.f32 %v1826_v57  ;;  %v1811_v5 = vadd.f32 %v1795_v10, %v1779_v52  ;;  %v10940_v50 = vsub.f32 %v10783_v30, %v1728_v19  ;;  %v1554_v13 = vpop.permute.xlu0 %1553 }
 0x1af   : > { %1989 = vrot.lane.b32.xlu1 %v1871_v28, %s10172_s11  ;;  %1909 = vrot.lane.b32.xlu0 %v1855_v41, %s10172_s11  ;;  %v10947_v22 = vsub.f32 %v10787_v20, %v1554_v13 }
 0x1b0   : > { %v9996_v40 = vpop.eup %9995  ;;  %v1827_v23 = vmax.f32 %v1811_v5, 1e-30  ;;  %v1796_v21 = vmul.f32 %v10940_v50, %v10940_v50 }
 0x1b1   : > { %v1856_v14 = vmul.f32 %v9996_v40, %v10880_v47  ;;  %v1730_v30 = vpop.permute.xlu1 %1729  ;;  %v1872_v56 = vmul.f32 %v9996_v40, %v10885_v6  ;;  %v1781_v34 = vmul.f32 %v10947_v22, %v10947_v22 }
 0x1b2   : > { %10001 = vrsqrt.f32 %v1827_v23  ;;  %v1812_v48 = vadd.f32 %v1796_v21, %v1780_v54  ;;  %v1765_v44 = vsub.f32 %v10795_v24, %v1730_v30  ;;  %v1556_v12 = vpop.permute.xlu0 %1555 }
 0x1b3   : > { %1991 = vrot.lane.b32.xlu1 %v1872_v56, %s10172_s11  ;;  %1911 = vrot.lane.b32.xlu0 %v1856_v14, %s10172_s11  ;;  %v1590_v20 = vsub.f32 %v10799_v31, %v1556_v12 }
 0x1b4   : > { %v9998_v1 = vpop.eup %9997  ;;  %v1828_v16 = vmax.f32 %v1812_v48, 1e-30  ;;  %v1797_v47 = vmul.f32 %v1765_v44, %v1765_v44 }
 0x1b5   : > { %v1857_v62 = vmul.f32 %v9998_v1, %v10892_v9  ;;  %v1732_v6 = vpop.permute.xlu1 %1731  ;;  %v1873_v42 = vmul.f32 %v9998_v1, %v10898_v37  ;;  %v1782_v4 = vmul.f32 %v1590_v20, %v1590_v20 }
 0x1b6   : > { %10003 = vrsqrt.f32 %v1828_v16  ;;  %v1813_v24 = vadd.f32 %v1797_v47, %v1781_v34  ;;  %v1766_v43 = vsub.f32 %v10807_v60, %v1732_v6  ;;  %v1558_v58 = vpop.permute.xlu0 %1557 }
 0x1b7   : > { %1993 = vrot.lane.b32.xlu1 %v1873_v42, %s10172_s11  ;;  %1913 = vrot.lane.b32.xlu0 %v1857_v62, %s10172_s11  ;;  %v1591_v31 = vsub.f32 %v10811_v32, %v1558_v58 }
 0x1b8   : > { %v10000_v45 = vpop.eup %9999  ;;  %v1829_v15 = vmax.f32 %v1813_v24, 1e-30  ;;  %v1798_v35 = vmul.f32 %v1766_v43, %v1766_v43 }
 0x1b9   : > { %v1858_v9 = vmul.f32 %v10000_v45, %v10905_v61  ;;  %v1734_v18 = vpop.permute.xlu1 %1733  ;;  %v1874_v37 = vmul.f32 %v10000_v45, %v10912_v7  ;;  %v1783_v39 = vmul.f32 %v1591_v31, %v1591_v31 }
 0x1ba   : > { %10005 = vrsqrt.f32 %v1829_v15  ;;  %v1814_v27 = vadd.f32 %v1798_v35, %v1782_v4  ;;  %v1767_v60 = vsub.f32 %v10819_v63, %v1734_v18  ;;  %v1560_v59 = vpop.permute.xlu0 %1559 }
 0x1bb   : > { %1995 = vrot.lane.b32.xlu1 %v1874_v37, %s10172_s11  ;;  %1915 = vrot.lane.b32.xlu0 %v1858_v9, %s10172_s11  ;;  %v1592_v32 = vsub.f32 %v10823_v33, %v1560_v59 }
 0x1bc   : > { %v10002_v26 = vpop.eup %10001  ;;  %v1830_v25 = vmax.f32 %v1814_v27, 1e-30  ;;  %v1799_v51 = vmul.f32 %v1767_v60, %v1767_v60 }
 0x1bd   : > { %v1859_v61 = vmul.f32 %v10002_v26, %v10919_v49  ;;  %v1736_v17 = vpop.permute.xlu1 %1735  ;;  %v1875_v7 = vmul.f32 %v10002_v26, %v10926_v29  ;;  %v1784_v36 = vmul.f32 %v1592_v32, %v1592_v32 }
 0x1be   : > { %10007 = vrsqrt.f32 %v1830_v25  ;;  %v1815_v11 = vadd.f32 %v1799_v51, %v1783_v39  ;;  %v1768_v63 = vsub.f32 %v10831_v0, %v1736_v17 }
 0x1bf   : > { %1997 = vrot.lane.b32.xlu1 %v1875_v7, %s10172_s11  ;;  %1917 = vrot.lane.b32.xlu0 %v1859_v61, %s10172_s11 }
 0x1c0   : > { %v10004_v52 = vpop.eup %10003  ;;  %v1831_v46 = vmax.f32 %v1815_v11, 1e-30  ;;  %v1800_v33 = vmul.f32 %v1768_v63, %v1768_v63 }
 0x1c1   : > { %v1860_v8 = vmul.f32 %v10004_v52, %v10933_v53  ;;  %v1876_v57 = vmul.f32 %v10004_v52, %v10940_v50 }
 0x1c2   : > { %10009 = vrsqrt.f32 %v1831_v46  ;;  %v1816_v49 = vadd.f32 %v1800_v33, %v1784_v36 }
 0x1c3   : > { %1999 = vrot.lane.b32.xlu1 %v1876_v57, %s10172_s11  ;;  %1919 = vrot.lane.b32.xlu0 %v1860_v8, %s10172_s11 }
 0x1c4   : > { %v10006_v29 = vpop.eup %10005  ;;  %v1832_v0 = vmax.f32 %v1816_v49, 1e-30 }
 0x1c5   : > { %v1861_v10 = vmul.f32 %v10006_v29, %v10947_v22  ;;  %v1877_v41 = vmul.f32 %v10006_v29, %v1765_v44 }
 0x1c6   : > { %10011 = vrsqrt.f32 %v1832_v0 }
 0x1c7   : > { %2001 = vrot.lane.b32.xlu1 %v1877_v41, %s10172_s11  ;;  %1921 = vrot.lane.b32.xlu0 %v1861_v10, %s10172_s11 }
 0x1c8   : > { %v10008_v19 = vpop.eup %10007 }
 0x1c9   : > { %v1862_v53 = vmul.f32 %v10008_v19, %v1590_v20  ;;  %v1878_v28 = vmul.f32 %v10008_v19, %v1766_v43 }
 0x1cb   : > { %2003 = vrot.lane.b32.xlu1 %v1878_v28, %s10172_s11  ;;  %1923 = vrot.lane.b32.xlu0 %v1862_v53, %s10172_s11 }
 0x1cc   : > { %v10010_v5 = vpop.eup %10009 }
 0x1cd   : > { %v1863_v50 = vmul.f32 %v10010_v5, %v1591_v31  ;;  %v1879_v54 = vmul.f32 %v10010_v5, %v1767_v60 }
 0x1cf   : > { %2005 = vrot.lane.b32.xlu1 %v1879_v54, %s10172_s11  ;;  %1925 = vrot.lane.b32.xlu0 %v1863_v50, %s10172_s11  ;;  %v9320_v13 = vpop.f32.mrb[0].mxu1 }
 0x1d0   : > { %v10012_v22 = vpop.eup %10011  ;;  %v757_v40 = vpop.f32.mrb[1].mxu1  ;;  %v917_v30 = vmax.f32 %v9320_v13, 0.0 }
 0x1d1   : > { %v1864_v23 = vmul.f32 %v10012_v22, %v1592_v32  ;;  %v916_v21 = vmax.f32 %v757_v40, 0.0  ;;  %v1880_v14 = vmul.f32 %v10012_v22, %v1768_v63 }
 0x1d3   : > { %2007 = vrot.lane.b32.xlu1 %v1880_v14, %s10172_s11  ;;  %1927 = vrot.lane.b32.xlu0 %v1864_v23, %s10172_s11  ;;  %v9323_v56 = vpop.f32.mrb[2].mxu1 }
 0x1d4   : > { %9370 = vmatprep.mubr.msk.f32.mxu0 %vm234_vm3, %v916_v21  ;;  %v767_v48 = vpop.f32.mrb[3].mxu1  ;;  %v919_v34 = vmax.f32 %v9323_v56, 0.0 }
 0x1d5   : > { %v918_v44 = vmax.f32 %v767_v48, 0.0  ;;  %9371 = vmatmul.mubr.msk.f32.vlgmr.msra.gmra.mrb[32].mxu0 %vm234_vm3, %v917_v30 }
 0x1d6   : > { %9915 = vmatpush3.bf16.msk.msra.mxu0 %vm10230_vm2, %v10481_v38 }
 0x1d7   : > { %v9326_v12 = vpop.f32.mrb[4].mxu1  ;;  %9373 = vmatprep.mubr.msk.f32.mxu0 %vm234_vm3, %v918_v44  ;;  %9924 = vmatprep.subr.msk.bf16.mxu0 %vm10230_vm2, %v10228_v2  ;;  %v11190_v2 = vld [vmem:[%s10249_s27 + $0xb0] sm:$0xff] }
 0x1d8   : > { %v777_v20 = vpop.f32.mrb[5].mxu1  ;;  %v921_v16 = vmax.f32 %v9326_v12, 0.0  ;;  %16402 = vst [vmem:[#allocation38_spill] sm:$0xff] %v11190_v2 }
 0x1d9   : > { %v920_v1 = vmax.f32 %v777_v20, 0.0  ;;  %9374 = vmatmul.mubr.msk.f32.gmra.mrb[34].mxu0 %vm234_vm3, %v919_v34 }
 0x1db   : > { %v9329_v47 = vpop.f32.mrb[6].mxu1  ;;  %9376 = vmatprep.mubr.msk.f32.mxu0 %vm234_vm3, %v920_v1 }
 0x1dc   : > { %v787_v62 = vpop.f32.mrb[7].mxu1  ;;  %v923_v42 = vmax.f32 %v9329_v47, 0.0 }
 0x1dd   : > { %v922_v6 = vmax.f32 %v787_v62, 0.0  ;;  %9377 = vmatmul.mubr.msk.f32.gmra.mrb[36].mxu0 %vm234_vm3, %v921_v16 }
 0x1df   : > { %v9332_v24 = vpop.f32.mrb[8].mxu1  ;;  %9379 = vmatprep.mubr.msk.f32.mxu0 %vm234_vm3, %v922_v6 }
 0x1e0   : > { %v797_v43 = vpop.f32.mrb[9].mxu1  ;;  %v925_v58 = vmax.f32 %v9332_v24, 0.0  ;;  %v193_v24 = vlaneseq }
 0x1e1   : > { %v924_v4 = vmax.f32 %v797_v43, 0.0  ;;  %9380 = vmatmul.mubr.msk.f32.gmra.mrb[38].mxu0 %vm234_vm3, %v923_v42  ;;  %v11052_v43 = vld [vmem:[%s10249_s27] sm:$0xff] }
 0x1e2   : > { %16377 = vst [vmem:[#allocation15_spill] sm:$0xff] %v11052_v43 }
 0x1e3   : > { %v9335_v31 = vpop.f32.mrb[10].mxu1  ;;  %9382 = vmatprep.mubr.msk.f32.mxu0 %vm234_vm3, %v924_v4  ;;  %v1320_v4 = vmul.f32 %v11052_v43, %v11052_v43 }
 0x1e4   : > { %v807_v45 = vpop.f32.mrb[11].mxu1  ;;  %v927_v35 = vmax.f32 %v9335_v31, 0.0  ;;  %v11059_v31 = vld [vmem:[%s10249_s27 + $0x8] sm:$0xff] }
 0x1e5   : > { %v926_v15 = vmax.f32 %v807_v45, 0.0  ;;  %9383 = vmatmul.mubr.msk.f32.gmra.mrb[40].mxu0 %vm234_vm3, %v925_v58  ;;  %v11056_v58 = vand.u32 127, %v193_v24  ;;  %16379 = vst [vmem:[#allocation17_spill] sm:$0xff] %v11059_v31  ;;  %v1321_v45 = vmul.f32 %v11059_v31, %v11059_v31 }
 0x1e7   : > { %v9338_v9 = vpop.f32.mrb[12].mxu1  ;;  %9385 = vmatprep.mubr.msk.f32.mxu0 %vm234_vm3, %v926_v15  ;;  %16378 = vst [vmem:[#allocation16_spill] sm:$0xff] %v11056_v58  ;;  %vm195_vm5 = vcmp.ge.s32.totalorder %v11056_v58, 1  ;;  %vm196_vm6 = vcmp.le.s32.totalorder %v11056_v58, 6 }
 0x1e8   : > { %v817_v18 = vpop.f32.mrb[13].mxu1  ;;  %v929_v27 = vmax.f32 %v9338_v9, 0.0  ;;  %vm11089_vm7 = vmand %vm195_vm5, %vm196_vm6 }
 0x1e9   : > { %v928_v37 = vmax.f32 %v817_v18, 0.0  ;;  %9386 = vmatmul.mubr.msk.f32.gmra.mrb[42].mxu0 %vm234_vm3, %v927_v35  ;;  %v11066_v35 = vld [vmem:[%s10249_s27 + $0x10] sm:$0xff] }
 0x1ea   : > { %16380 = vst [vmem:[#allocation18_spill] sm:$0xff] %v11066_v35  ;;  %v1322_v9 = vmul.f32 %v11066_v35, %v11066_v35 }
 0x1eb   : > { %v9341_v60 = vpop.f32.mrb[14].mxu1  ;;  %9388 = vmatprep.mubr.msk.f32.mxu0 %vm234_vm3, %v928_v37  ;;  %v1304_v37 = vmul.f32 4.0, %v11052_v43  ;;  %v11309_v43 = vld [vmem:[%s10249_s27 + $0xe0] sm:$0xff] }
 0x1ec   : > { %v827_v39 = vpop.f32.mrb[15].mxu1  ;;  %v931_v32 = vmax.f32 %v9341_v60, 0.0  ;;  %v11074_v60 = vld [vmem:[%s10249_s27 + $0x18] sm:$0xff]  ;;  %16422 = vst [vmem:[#allocation58_spill] sm:$0xff] %v11309_v43 }
 0x1ed   : > { %v930_v59 = vmax.f32 %v827_v39, 0.0  ;;  %9389 = vmatmul.mubr.msk.f32.gmra.mrb[44].mxu0 %vm234_vm3, %v929_v27  ;;  %v8486_v27 = vadd.f32 -1.0, %v1320_v4  ;;  %16381 = vst [vmem:[#allocation19_spill] sm:$0xff] %v11074_v60  ;;  %v1323_v39 = vmul.f32 %v11074_v60, %v11074_v60  ;;  %v11141_v4 = vld [vmem:[%s10249_s27 + $0x38] sm:$0xff] }
 0x1ee   : > { %16394 = vst [vmem:[#allocation30_spill] sm:$0xff] %v11141_v4 }
 0x1ef   : > { %v9344_v26 = vpop.f32.mrb[16].mxu1  ;;  %9391 = vmatprep.mubr.msk.f32.mxu0 %vm234_vm3, %v930_v59  ;;  %v1305_v59 = vmul.f32 4.0, %v11059_v31 }
 0x1f0   : > { %v837_v25 = vpop.f32.mrb[17].mxu1  ;;  %v933_v61 = vmax.f32 %v9344_v26, 0.0  ;;  %v1306_v26 = vmul.f32 4.0, %v11066_v35 }
 0x1f1   : > { %v932_v51 = vmax.f32 %v837_v25, 0.0  ;;  %9392 = vmatmul.mubr.msk.f32.gmra.mrb[46].mxu0 %vm234_vm3, %v931_v32  ;;  %v8487_v32 = vadd.f32 -1.0, %v1321_v45  ;;  %v8488_v25 = vadd.f32 -1.0, %v1322_v9  ;;  %v1327_v45 = vmul.f32 %v11141_v4, %v11141_v4 }
 0x1f3   : > { %v9347_v17 = vpop.f32.mrb[18].mxu1  ;;  %9394 = vmatprep.mubr.msk.f32.mxu0 %vm234_vm3, %v932_v51  ;;  %v11083_v51 = vld [vmem:[%s10249_s27 + $0x80] sm:$0xff] }
 0x1f4   : > { %v847_v7 = vpop.f32.mrb[19].mxu1  ;;  %v935_v63 = vmax.f32 %v9347_v17, 0.0  ;;  %16382 = vst [vmem:[#allocation20_spill] sm:$0xff] %v11083_v51  ;;  %v1352_v17 = vmul.f32 %v8486_v27, %v1304_v37 }
 0x1f5   : > { %v934_v11 = vmax.f32 %v847_v7, 0.0  ;;  %9395 = vmatmul.mubr.msk.f32.gmra.mrb[48].mxu0 %vm234_vm3, %v933_v61  ;;  %v1384_v61 = vmul.f32 2.0, %v11083_v51  ;;  %v1307_v7 = vmul.f32 4.0, %v11074_v60 }
 0x1f7   : > { %v9350_v36 = vpop.f32.mrb[20].mxu1  ;;  %9397 = vmatprep.mubr.msk.f32.mxu0 %vm234_vm3, %v934_v11  ;;  %v8489_v11 = vadd.f32 -1.0, %v1323_v39  ;;  %v11156_v39 = vld [vmem:[%s10249_s27 + $0x40] sm:$0xff] }
 0x1f8   : > { %v857_v52 = vpop.f32.mrb[21].mxu1  ;;  %v937_v33 = vmax.f32 %v9350_v36, 0.0  ;;  %v16383_v36 = vmov 0  ;;  %16396 = vst [vmem:[#allocation32_spill] sm:$0xff] %v11156_v39  ;;  %v1312_v51 = vmul.f32 4.0, %v11156_v39 }
 0x1f9   : > { %v936_v46 = vmax.f32 %v857_v52, 0.0  ;;  %9398 = vmatmul.mubr.msk.f32.gmra.mrb[50].mxu0 %vm234_vm3, %v935_v63  ;;  %v16384_v36 = vsel %vm11089_vm7, 4294967295, %v16383_v36  ;;  %v11094_v52 = vld [vmem:[%s10249_s27 + $0x88] sm:$0xff] }
 0x1fa   : > { %16385 = vst [vmem:[#allocation21_spill] sm:$0xff] %v16384_v36  ;;  %16386 = vst [vmem:[#allocation22_spill] sm:$0xff] %v11094_v52 }
 0x1fb   : > { %v9353_v8 = vpop.f32.mrb[22].mxu1  ;;  %9400 = vmatprep.mubr.msk.f32.mxu0 %vm234_vm3, %v936_v46  ;;  %v1385_v46 = vmul.f32 2.0, %v11094_v52 }
 0x1fc   : > { %v867_v57 = vpop.f32.mrb[23].mxu1  ;;  %v939_v29 = vmax.f32 %v9353_v8, 0.0 }
 0x1fd   : > { %v938_v49 = vmax.f32 %v867_v57, 0.0  ;;  %9401 = vmatmul.mubr.msk.f32.gmra.mrb[52].mxu0 %vm234_vm3, %v937_v33  ;;  %v11098_v33 = vld [vmem:[%s10249_s27 + $0x20] sm:$0xff] }
 0x1fe   : > { %16387 = vst [vmem:[#allocation23_spill] sm:$0xff] %v11098_v33  ;;  %v1324_v8 = vmul.f32 %v11098_v33, %v11098_v33 }
 0x1ff   : > { %v9356_v0 = vpop.f32.mrb[24].mxu1  ;;  %9403 = vmatprep.mubr.msk.f32.mxu0 %vm234_vm3, %v938_v49  ;;  %v1353_v49 = vmul.f32 %v8487_v32, %v1305_v59  ;;  %v1328_v59 = vmul.f32 %v11156_v39, %v11156_v39 }
 0x200   : > { %v877_v10 = vpop.f32.mrb[25].mxu1  ;;  %v941_v19 = vmax.f32 %v9356_v0, 0.0 }
 0x201   : > { %v940_v41 = vmax.f32 %v877_v10, 0.0  ;;  %9404 = vmatmul.mubr.msk.f32.gmra.mrb[54].mxu0 %vm234_vm3, %v939_v29  ;;  %v11105_v29 = vld [vmem:[%s10249_s27 + $0x28] sm:$0xff]  ;;  %v11110_v10 = vld [vmem:[%s10249_s27 + $0x90] sm:$0xff] }
 0x202   : > { %16388 = vst [vmem:[#allocation24_spill] sm:$0xff] %v11105_v29  ;;  %v1325_v0 = vmul.f32 %v11105_v29, %v11105_v29  ;;  %16389 = vst [vmem:[#allocation25_spill] sm:$0xff] %v11110_v10 }
 0x203   : > { %v9359_v53 = vpop.f32.mrb[26].mxu1  ;;  %9406 = vmatprep.mubr.msk.f32.mxu0 %vm234_vm3, %v940_v41  ;;  %v1386_v41 = vmul.f32 2.0, %v11110_v10  ;;  %v1390_v10 = vmul.f32 2.0, %v11190_v2  ;;  %v11204_v2 = vld [vmem:[%s10249_s27 + $0x58] sm:$0xff] }
 0x204   : > { %v887_v28 = vpop.f32.mrb[27].mxu1  ;;  %v943_v50 = vmax.f32 %v9359_v53, 0.0  ;;  %v11115_v53 = vsel %vm11089_vm7, %v1384_v61, 0.0  ;;  %v8491_v24 = vadd.f32 -1.0, %v1325_v0  ;;  %v11185_v0 = vld [vmem:[%s10249_s27 + $0xa8] sm:$0xff]  ;;  %16404 = vst [vmem:[#allocation40_spill] sm:$0xff] %v11204_v2 }
 0x205   : > { %v942_v5 = vmax.f32 %v887_v28, 0.0  ;;  %9407 = vmatmul.mubr.msk.f32.gmra.mrb[56].mxu0 %vm234_vm3, %v941_v19  ;;  %v1354_v19 = vmul.f32 %v8488_v25, %v1306_v26  ;;  %16390 = vst [vmem:[#allocation26_spill] sm:$0xff] %v11115_v53  ;;  %v11119_v28 = vsel %vm11089_vm7, %v1352_v17, 0.0  ;;  %v11149_v37 = vsel %vm11089_vm7, %v1386_v41, 0.0  ;;  %v11163_v26 = vld [vmem:[%s10249_s27 + $0x48] sm:$0xff]  ;;  %16401 = vst [vmem:[#allocation37_spill] sm:$0xff] %v11185_v0 }
 0x206   : > { %16395 = vst [vmem:[#allocation31_spill] sm:$0xff] %v11149_v37  ;;  %16397 = vst [vmem:[#allocation33_spill] sm:$0xff] %v11163_v26  ;;  %v1329_v25 = vmul.f32 %v11163_v26, %v11163_v26  ;;  %v1389_v41 = vmul.f32 2.0, %v11185_v0 }
 0x207   : > { %v9362_v54 = vpop.f32.mrb[28].mxu1  ;;  %9409 = vmatprep.mubr.msk.f32.mxu0 %vm234_vm3, %v942_v5  ;;  %v11122_v5 = vld [vmem:[%s10249_s27 + $0x98] sm:$0xff]  ;;  %v11153_v27 = vsel %vm11089_vm7, %v1354_v19, 0.0 }
 0x208   : > { %v897_v13 = vpop.f32.mrb[29].mxu1  ;;  %v945_v40 = vmax.f32 %v9362_v54, 0.0  ;;  %16391 = vst [vmem:[#allocation27_spill] sm:$0xff] %v11122_v5  ;;  %v1355_v54 = vmul.f32 %v8489_v11, %v1307_v7  ;;  %v11176_v7 = vld [vmem:[%s10249_s27 + $0xa0] sm:$0xff]  ;;  %v8495_v0 = vadd.f32 -1.0, %v1329_v25  ;;  %v11214_v25 = vsel %vm11089_vm7, %v1389_v41, 0.0 }
 0x209   : > { %v944_v22 = vmax.f32 %v897_v13, 0.0  ;;  %9410 = vmatmul.mubr.msk.f32.gmra.mrb[58].mxu0 %vm234_vm3, %v943_v50  ;;  %v11027_v56 = vpop.permute.xlu1 %1977  ;;  %v11029_v48 = vpop.permute.xlu0 %1897  ;;  %v1387_v50 = vmul.f32 2.0, %v11122_v5  ;;  %v11127_v13 = vsel %vm11089_vm7, %v1385_v46, 0.0  ;;  %16399 = vst [vmem:[#allocation35_spill] sm:$0xff] %v11176_v7  ;;  %v1388_v11 = vmul.f32 2.0, %v11176_v7  ;;  %v11180_v46 = vld [vmem:[%s10249_s27 + $0x50] sm:$0xff] }
 0x20a   : > { %16371 = vst [vmem:[#allocation9_spill] sm:$0xff] %v11027_v56  ;;  %16392 = vst [vmem:[#allocation28_spill] sm:$0xff] %v11127_v13  ;;  %v11173_v17 = vsel %vm11089_vm7, %v1355_v54, 0.0  ;;  %v1311_v7 = vmul.f32 4.0, %v11141_v4  ;;  %v8493_v5 = vadd.f32 -1.0, %v1327_v45  ;;  %v1331_v45 = vmul.f32 %v11204_v2, %v11204_v2 }
 0x20b   : > { %v9365_v23 = vpop.f32.mrb[30].mxu1  ;;  %9412 = vmatprep.mubr.msk.f32.mxu0 %vm234_vm3, %v944_v22  ;;  %v1308_v22 = vmul.f32 4.0, %v11098_v33  ;;  %v11169_v61 = vsel %vm11089_vm7, %v1387_v50, 0.0  ;;  %16400 = vst [vmem:[#allocation36_spill] sm:$0xff] %v11180_v46  ;;  %v11198_v52 = vsel %vm11089_vm7, %v1388_v11, 0.0  ;;  %16405 = vst [vmem:[#allocation41_spill] sm:$0xff] %v11214_v25 }
 0x20c   : > { %v907_v21 = vpop.f32.mrb[31].mxu1  ;;  %v947_v30 = vmax.f32 %v9365_v23, 0.0  ;;  %v11131_v23 = vld [vmem:[%s10249_s27 + $0x30] sm:$0xff]  ;;  %16398 = vst [vmem:[#allocation34_spill] sm:$0xff] %v11169_v61  ;;  %16403 = vst [vmem:[#allocation39_spill] sm:$0xff] %v11198_v52 }
 0x20d   : > { %v946_v14 = vmax.f32 %v907_v21, 0.0  ;;  %9413 = vmatmul.mubr.msk.f32.gmra.mrb[60].mxu0 %vm234_vm3, %v945_v40  ;;  %v11031_v44 = vpop.permute.xlu1 %1979  ;;  %v11033_v34 = vpop.permute.xlu0 %1899  ;;  %v8490_v40 = vadd.f32 -1.0, %v1324_v8  ;;  %16393 = vst [vmem:[#allocation29_spill] sm:$0xff] %v11131_v23  ;;  %v1326_v21 = vmul.f32 %v11131_v23, %v11131_v23  ;;  %v1330_v8 = vmul.f32 %v11180_v46, %v11180_v46 }
 0x20e   : > { %16372 = vst [vmem:[#allocation10_spill] sm:$0xff] %v11031_v44  ;;  %v1310_v19 = vmul.f32 4.0, %v11131_v23  ;;  %v11232_v23 = vld [vmem:[%s10249_s27 + $0xb8] sm:$0xff] }
 0x20f   : > { %9415 = vmatprep.mubr.msk.f32.mxu0 %vm234_vm3, %v946_v14  ;;  %v11137_v14 = vsel %vm11089_vm7, %v1353_v49, 0.0  ;;  %v1356_v49 = vmul.f32 %v8490_v40, %v1308_v22  ;;  %v8492_v50 = vadd.f32 -1.0, %v1326_v21  ;;  %v8494_v22 = vadd.f32 -1.0, %v1328_v59  ;;  %16408 = vst [vmem:[#allocation44_spill] sm:$0xff] %v11232_v23 }
 0x210   : > { %v1313_v40 = vmul.f32 4.0, %v11163_v26  ;;  %v1391_v41 = vmul.f32 2.0, %v11232_v23  ;;  %v1315_v23 = vmul.f32 4.0, %v11204_v2 }
 0x211   : > { %9416 = vmatmul.mubr.msk.f32.gmra.mrb[62].mxu0 %vm234_vm3, %v947_v30  ;;  %v11035_v12 = vpop.permute.xlu1 %1981  ;;  %v11037_v20 = vpop.permute.xlu0 %1901  ;;  %v1309_v30 = vmul.f32 4.0, %v11105_v29  ;;  %v11210_v59 = vsel %vm11089_vm7, %v1356_v49, 0.0  ;;  %v1358_v11 = vmul.f32 %v8492_v50, %v1310_v19  ;;  %v11229_v49 = vsel %vm11089_vm7, %v1390_v10, 0.0  ;;  %v11236_v50 = vld [vmem:[%s10249_s27 + $0xc0] sm:$0xff]  ;;  %v11240_v29 = vld [vmem:[%s10249_s27 + $0xc8] sm:$0xff]  ;;  %v11244_v10 = vld [vmem:[%s10249_s27 + $0xd0] sm:$0xff] }
 0x212   : > { %16373 = vst [vmem:[#allocation11_spill] sm:$0xff] %v11035_v12  ;;  %16407 = vst [vmem:[#allocation43_spill] sm:$0xff] %v11229_v49  ;;  %v1359_v19 = vmul.f32 %v8493_v5, %v1311_v7  ;;  %v1392_v4 = vmul.f32 2.0, %v11236_v50  ;;  %v1360_v33 = vmul.f32 %v8494_v22, %v1312_v51  ;;  %v1361_v38 = vmul.f32 %v8495_v0, %v1313_v40 }
 0x213   : > { %v1357_v54 = vmul.f32 %v8491_v24, %v1309_v30  ;;  %v1314_v30 = vmul.f32 4.0, %v11180_v46  ;;  %v8496_v24 = vadd.f32 -1.0, %v1330_v8  ;;  %v11219_v46 = vld [vmem:[%s10249_s27 + $0x60] sm:$0xff]  ;;  %16409 = vst [vmem:[#allocation45_spill] sm:$0xff] %v11236_v50  ;;  %16410 = vst [vmem:[#allocation46_spill] sm:$0xff] %v11240_v29  ;;  %v1394_v3 = vmul.f32 2.0, %v11244_v10 }
 0x214   : > { %16406 = vst [vmem:[#allocation42_spill] sm:$0xff] %v11219_v46  ;;  %v1332_v8 = vmul.f32 %v11219_v46, %v11219_v46  ;;  %16411 = vst [vmem:[#allocation47_spill] sm:$0xff] %v11244_v10  ;;  %v8497_v5 = vadd.f32 -1.0, %v1331_v45  ;;  %v11250_v7 = vsel %vm11089_vm7, %v1358_v11, 0.0  ;;  %v1316_v51 = vmul.f32 4.0, %v11219_v46  ;;  %v11254_v50 = vld [vmem:[%s10249_s27 + $0x68] sm:$0xff] }
 0x215   : > { %v11039_v1 = vpop.permute.xlu1 %1983  ;;  %v11041_v16 = vpop.permute.xlu0 %1903  ;;  %v11225_v26 = vsel %vm11089_vm7, %v1357_v54, 0.0  ;;  %v1393_v54 = vmul.f32 2.0, %v11240_v29  ;;  %v1362_v55 = vmul.f32 %v8496_v24, %v1314_v30  ;;  %16412 = vst [vmem:[#allocation48_spill] sm:$0xff] %v11254_v50  ;;  %v1333_v0 = vmul.f32 %v11254_v50, %v11254_v50  ;;  %v11269_v45 = vld [vmem:[%s10249_s27 + $0x70] sm:$0xff] }
 0x216   : > { %16374 = vst [vmem:[#allocation12_spill] sm:$0xff] %v11039_v1  ;;  %v8498_v22 = vadd.f32 -1.0, %v1332_v8  ;;  %v11260_v40 = vsel %vm11089_vm7, %v1391_v41, 0.0  ;;  %v11264_v30 = vsel %vm11089_vm7, %v1359_v19, 0.0  ;;  %16414 = vst [vmem:[#allocation50_spill] sm:$0xff] %v11269_v45  ;;  %v1334_v11 = vmul.f32 %v11269_v45, %v11269_v45  ;;  %v11274_v8 = vld [vmem:[%s10249_s27 + $0x78] sm:$0xff] }
 0x217   : > { %16415 = vst [vmem:[#allocation51_spill] sm:$0xff] %v11274_v8  ;;  %v1335_v10 = vmul.f32 %v11274_v8, %v11274_v8  ;;  %v11280_v41 = vsel %vm11089_vm7, %v1392_v4, 0.0  ;;  %v11284_v19 = vsel %vm11089_vm7, %v1360_v33, 0.0  ;;  %v11288_v29 = vsel %vm11089_vm7, %v1393_v54, 0.0  ;;  %v11305_v33 = vld [vmem:[%s10249_s27 + $0xd8] sm:$0xff] }
 0x218   : > { %16416 = vst [vmem:[#allocation52_spill] sm:$0xff] %v11280_v41  ;;  %16417 = vst [vmem:[#allocation53_spill] sm:$0xff] %v11288_v29  ;;  %v11292_v46 = vsel %vm11089_vm7, %v1361_v38, 0.0  ;;  %v11298_v35 = vsel %vm11089_vm7, %v1394_v3, 0.0  ;;  %v11302_v4 = vsel %vm11089_vm7, %v1362_v55, 0.0  ;;  %v1395_v60 = vmul.f32 2.0, %v11305_v33 }
 0x219   : > { %v11043_v47 = vpop.permute.xlu1 %1985  ;;  %v11045_v62 = vpop.permute.xlu0 %1905  ;;  %16419 = vst [vmem:[#allocation55_spill] sm:$0xff] %v11298_v35  ;;  %16420 = vst [vmem:[#allocation56_spill] sm:$0xff] %v11302_v4  ;;  %v1363_v54 = vmul.f32 %v8497_v5, %v1315_v23  ;;  %v1396_v38 = vmul.f32 2.0, %v11309_v43  ;;  %v1364_v31 = vmul.f32 %v8498_v22, %v1316_v51  ;;  %v1318_v3 = vmul.f32 4.0, %v11269_v45 }
 0x21a   : > { %16375 = vst [vmem:[#allocation13_spill] sm:$0xff] %v11043_v47  ;;  %16421 = vst [vmem:[#allocation57_spill] sm:$0xff] %v11305_v33  ;;  %v8500_v35 = vadd.f32 -1.0, %v1334_v11  ;;  %v1319_v58 = vmul.f32 4.0, %v11274_v8  ;;  %v8501_v55 = vadd.f32 -1.0, %v1335_v10  ;;  %v2025_v4 = vmul.f32 %v11027_v56, %v11115_v53  ;;  %v11368_v53 = vld [vmem:[%s10249_s27 + $0xf0] sm:$0xff] }
 0x21b   : > { %v1945_v23 = vmul.f32 %v11029_v48, %v11119_v28  ;;  %v2026_v5 = vmul.f32 %v11031_v44, %v11127_v13  ;;  %v1946_v51 = vmul.f32 %v11033_v34, %v11137_v14  ;;  %v2027_v22 = vmul.f32 %v11035_v12, %v11149_v37  ;;  %16428 = vst [vmem:[#allocation64_spill] sm:$0xff] %v11368_v53  ;;  %v11378_v56 = vld [vmem:[%s10249_s27 + $0xf8] sm:$0xff] }
 0x21c   : > { %v2028_v10 = vmul.f32 %v11039_v1, %v11169_v61  ;;  %v1948_v11 = vmul.f32 %v11041_v16, %v11173_v17  ;;  %v2029_v33 = vmul.f32 %v11043_v47, %v11198_v52  ;;  %v1949_v45 = vmul.f32 %v11045_v62, %v11210_v59  ;;  %16429 = vst [vmem:[#allocation65_spill] sm:$0xff] %v11378_v56 }
 0x21d   : > { %v11047_v6 = vpop.permute.xlu1 %1987  ;;  %v11049_v42 = vpop.permute.xlu0 %1907  ;;  %v11349_v61 = vsel %vm11089_vm7, %v1395_v60, 0.0  ;;  %v11353_v52 = vsel %vm11089_vm7, %v1363_v54, 0.0  ;;  %v11361_v47 = vsel %vm11089_vm7, %v1364_v31, 0.0  ;;  %v1398_v60 = vmul.f32 2.0, %v11368_v53 }
 0x21e   : > { %16376 = vst [vmem:[#allocation14_spill] sm:$0xff] %v11047_v6  ;;  %v2030_v37 = vmul.f32 %v11047_v6, %v11214_v25  ;;  %v1950_v8 = vmul.f32 %v11049_v42, %v11225_v26  ;;  %16424 = vst [vmem:[#allocation60_spill] sm:$0xff] %v11349_v61  ;;  %v11357_v25 = vsel %vm11089_vm7, %v1396_v38, 0.0  ;;  %v11364_v6 = vld [vmem:[%s10249_s27 + $0xe8] sm:$0xff]  ;;  %v11371_v54 = vadd.f32 %v2025_v4, %v1945_v23 }
 0x21f   : > { %16425 = vst [vmem:[#allocation61_spill] sm:$0xff] %v11357_v25  ;;  %16426 = vst [vmem:[#allocation62_spill] sm:$0xff] %v11361_v47  ;;  %v1397_v1 = vmul.f32 2.0, %v11364_v6  ;;  %v11373_v44 = vadd.f32 %v2026_v5, %v1946_v51  ;;  %v1399_v31 = vmul.f32 2.0, %v11378_v56  ;;  %v11381_v47 = vadd.f32 %v2028_v10, %v1948_v11 }
 0x220   : > { %16427 = vst [vmem:[#allocation63_spill] sm:$0xff] %v11364_v6  ;;  %v11383_v25 = vadd.f32 %v2029_v33, %v1949_v45 }
 0x221   : > { %v11063_v15 = vpop.permute.xlu1 %1989  ;;  %v11070_v18 = vpop.permute.xlu0 %1909  ;;  %v2058_v51 = vmul.f32 %v11373_v44, %v11033_v34  ;;  %v11433_v34 = vsel %vm11089_vm7, %v1399_v31, 0.0  ;;  %v16432_v31 = vld [vmem:[#allocation16_spill] sm:$0xff] }
 0x222   : > { %v1951_v4 = vmul.f32 %v11070_v18, %v11250_v7  ;;  %vm198_vm8 = vcmp.eq.s32.totalorder %v16432_v31, 8 }
 0x225   : > { %v11087_v63 = vpop.permute.xlu1 %1991  ;;  %v11102_v57 = vpop.permute.xlu0 %1911 }
 0x226   : > { %v1952_v23 = vmul.f32 %v11102_v57, %v11264_v30 }
 0x229   : > { %v11145_v9 = vpop.permute.xlu1 %1993  ;;  %v11160_v32 = vpop.permute.xlu0 %1913 }
 0x22d   : > { %v11200_v21 = vpop.permute.xlu1 %1995  ;;  %v11216_v39 = vpop.permute.xlu0 %1915 }
 0x231   : > { %v11266_v24 = vpop.permute.xlu1 %1997  ;;  %v11294_v2 = vpop.permute.xlu0 %1917 }
 0x232   : > { %16413 = vst [vmem:[#allocation49_spill] sm:$0xff] %v11266_v24  ;;  %16418 = vst [vmem:[#allocation54_spill] sm:$0xff] %v11294_v2  ;;  %v1317_v2 = vmul.f32 4.0, %v11254_v50  ;;  %v8499_v24 = vadd.f32 -1.0, %v1333_v0  ;;  %v1947_v0 = vmul.f32 %v11037_v20, %v11153_v27  ;;  %v1366_v50 = vmul.f32 %v8500_v35, %v1318_v3 }
 0x233   : > { %v2031_v35 = vmul.f32 %v11063_v15, %v11229_v49  ;;  %v2032_v3 = vmul.f32 %v11087_v63, %v11260_v40 }
 0x234   : > { %v1365_v13 = vmul.f32 %v8499_v24, %v1317_v2  ;;  %v11375_v38 = vadd.f32 %v2027_v22, %v1947_v0  ;;  %v11385_v2 = vadd.f32 %v2030_v37, %v1950_v8  ;;  %v1367_v24 = vmul.f32 %v8501_v55, %v1319_v58 }
 0x235   : > { %v11331_v43 = vpop.permute.xlu1 %1999  ;;  %v11341_v12 = vpop.permute.xlu0 %1919  ;;  %v2033_v37 = vmul.f32 %v11145_v9, %v11280_v41  ;;  %v1953_v58 = vmul.f32 %v11160_v32, %v11284_v19  ;;  %v11405_v8 = vsel %vm11089_vm7, %v1397_v1, 0.0  ;;  %v2057_v55 = vmul.f32 %v11371_v54, %v11029_v48 }
 0x236   : > { %16423 = vst [vmem:[#allocation59_spill] sm:$0xff] %v11331_v43  ;;  %16430 = vst [vmem:[#allocation66_spill] sm:$0xff] %v11405_v8  ;;  %v11409_v33 = vsel %vm11089_vm7, %v1365_v13, 0.0  ;;  %v2059_v22 = vmul.f32 %v11375_v38, %v11037_v20  ;;  %v11419_v0 = vsel %vm11089_vm7, %v1398_v60, 0.0  ;;  %v2060_v1 = vmul.f32 %v11381_v47, %v11041_v16 }
 0x237   : > { %16431 = vst [vmem:[#allocation67_spill] sm:$0xff] %v11419_v0  ;;  %v11425_v13 = vmul.f32 %v11383_v25, %v11045_v62  ;;  %v11429_v48 = vsel %vm11089_vm7, %v1366_v50, 0.0  ;;  %v11439_v20 = vmul.f32 %v11385_v2, %v11049_v42  ;;  %v11441_v10 = vadd.f32 %v2031_v35, %v1951_v4 }
 0x238   : > { %v11443_v16 = vadd.f32 %v2032_v3, %v1952_v23  ;;  %v11447_v62 = vsel %vm11089_vm7, %v1367_v24, 0.0  ;;  %v11449_v11 = vadd.f32 %v2033_v37, %v1953_v58  ;;  %v2034_v50 = vmul.f32 %v11200_v21, %v11288_v29 }
 0x239   : > { %v11395_v5 = vpop.permute.xlu1 %2001  ;;  %v11401_v45 = vpop.permute.xlu0 %1921  ;;  %v1954_v60 = vmul.f32 %v11216_v39, %v11292_v46  ;;  %v2074_v4 = vsub.f32 %v2058_v51, %v11137_v14  ;;  %v2073_v24 = vsub.f32 %v2057_v55, %v11119_v28  ;;  %v2075_v23 = vsub.f32 %v2059_v22, %v11153_v27 }
 0x23a   : > { %v11463_v58 = vstv %s233_s16  ;;  %v2076_v56 = vsub.f32 %v2060_v1, %v11173_v17  ;;  %v2077_v6 = vsub.f32 %v11425_v13, %v11210_v59  ;;  %v11474_v14 = vmul.f32 %v11443_v16, %v11102_v57  ;;  %v16434_v1 = vld [vmem:[#allocation49_spill] sm:$0xff]  ;;  %v16436_v57 = vld [vmem:[#allocation54_spill] sm:$0xff] }
 0x23b   : > { %v2078_v27 = vsub.f32 %v11439_v20, %v11225_v26  ;;  %v11480_v55 = vmul.f32 %v11449_v11, %v11160_v32  ;;  %v11482_v17 = vadd.f32 %v2034_v50, %v1954_v60  ;;  %v11485_v51 = vstv %s11343_s14 }
 0x23c   : > { %v2036_v32 = vmul.f32 %v11331_v43, %v11349_v61  ;;  %v1956_v20 = vmul.f32 %v11341_v12, %v11353_v52  ;;  %v2080_v41 = vsub.f32 %v11474_v14, %v11264_v30  ;;  %v16438_v43 = vld [vmem:[#allocation15_spill] sm:$0xff] }
 0x23d   : > { %v11456_v53 = vpop.permute.xlu1 %2003  ;;  %v11461_v37 = vpop.permute.xlu0 %1923 }
 0x23e   : > { %v11521_v14 = vadd.f32 %v2036_v32, %v1956_v20 }
 0x241   : > { %v11497_v60 = vpop.permute.xlu1 %2005  ;;  %v11508_v61 = vpop.permute.xlu0 %1925 }
 0x2a8   : > { %v9372_v42 = vpop.f32.mrb[32].mxu0 }
 0x2a9   : > { %v1273_v35 = vmax.f32 %v9372_v42, 0.0  ;;  %v1113_v3 = vpop.f32.mrb[33].mxu0  ;;  %v11470_v42 = vmul.f32 %v11441_v10, %v11070_v18  ;;  %v16433_v18 = vld [vmem:[#allocation55_spill] sm:$0xff] }
 0x2aa   : > { %v1272_v36 = vmax.f32 %v1113_v3, 0.0  ;;  %v2035_v13 = vmul.f32 %v16434_v1, %v16433_v18  ;;  %v16435_v3 = vld [vmem:[#allocation56_spill] sm:$0xff] }
 0x2ab   : > { %v2090_v28 = vsub.f32 %v2074_v4, %v1273_v35  ;;  %v1955_v29 = vmul.f32 %v16436_v57, %v16435_v3 }
 0x2ac   : > { %v2089_v59 = vsub.f32 %v2073_v24, %v1272_v36  ;;  %v9375_v22 = vpop.f32.mrb[34].mxu0  ;;  %v16437_v24 = vld [vmem:[#allocation17_spill] sm:$0xff] }
 0x2ad   : > { %v2155_v35 = vmul.f32 %v11463_v58, %v2090_v28  ;;  %v1275_v4 = vmax.f32 %v9375_v22, 0.0  ;;  %v1123_v26 = vpop.f32.mrb[35].mxu0  ;;  %v2079_v28 = vsub.f32 %v11470_v42, %v11250_v7  ;;  %v11506_v22 = vmul.f32 %v11482_v17, %v11216_v39 }
 0x2ae   : > { %v2154_v50 = vmul.f32 %v11463_v58, %v2089_v59  ;;  %v1274_v36 = vmax.f32 %v1123_v26, 0.0 }
 0x2af   : > { %v2187_v18 = vadd.f32 %v16437_v24, %v2155_v35  ;;  %v2092_v1 = vsub.f32 %v2076_v56, %v1275_v4  ;;  %v11513_v56 = vadd.f32 %v2035_v13, %v1955_v29  ;;  %v16441_v13 = vld [vmem:[#allocation61_spill] sm:$0xff]  ;;  %v16442_v4 = vld [vmem:[#allocation62_spill] sm:$0xff]  ;;  %v2082_v35 = vsub.f32 %v11506_v22, %v11292_v46  ;;  %v16448_v46 = vld [vmem:[#allocation7_spill] sm:$0xff] }
 0x2b0   : > { %v2186_v59 = vadd.f32 %v16438_v43, %v2154_v50  ;;  %v2091_v26 = vsub.f32 %v2075_v23, %v1274_v36  ;;  %v9378_v49 = vpop.f32.mrb[36].mxu0  ;;  %v2038_v50 = vmul.f32 %v11456_v53, %v11405_v8  ;;  %v1958_v36 = vmul.f32 %v11461_v37, %v11409_v33  ;;  %v16444_v24 = vld [vmem:[#allocation18_spill] sm:$0xff]  ;;  %v16445_v8 = vld [vmem:[#allocation8_spill] sm:$0xff] }
 0x2b1   : > { %v11518_v30 = vsel %vm198_vm8, %v11485_v51, %v2187_v18  ;;  %v2157_v7 = vmul.f32 %v11463_v58, %v2092_v1  ;;  %v1277_v39 = vmax.f32 %v9378_v49, 0.0  ;;  %v1133_v42 = vpop.f32.mrb[37].mxu0  ;;  %v2037_v18 = vmul.f32 %v11395_v5, %v16441_v13  ;;  %v16443_v1 = vld [vmem:[#allocation19_spill] sm:$0xff] }
 0x2b2   : > { %16439 = vst [vmem:[#allocation56_spill] sm:$0xff] %v11518_v30  ;;  %v11526_v43 = vsel %vm198_vm8, %v11485_v51, %v2186_v59  ;;  %v2156_v23 = vmul.f32 %v11463_v58, %v2091_v26  ;;  %v1276_v29 = vmax.f32 %v1133_v42, 0.0  ;;  %3427 = vrot.lane.b32.xlu0 %v11518_v30, %s10170_s28  ;;  %v1957_v49 = vmul.f32 %v11401_v45, %v16442_v4  ;;  %v16451_v13 = vld [vmem:[#allocation23_spill] sm:$0xff] }
 0x2b3   : > { %16440 = vst [vmem:[#allocation54_spill] sm:$0xff] %v11526_v43  ;;  %v2189_v32 = vadd.f32 %v16443_v1, %v2157_v7  ;;  %v2094_v20 = vsub.f32 %v2078_v27, %v1277_v39  ;;  %9422 = vmatprep.mubr.msk.f32.mxu1 %vm234_vm3, %v11526_v43  ;;  %v2067_v7 = vmul.f32 %v11513_v56, %v16436_v57 }
 0x2b4   : > { %v2188_v59 = vadd.f32 %v16444_v24, %v2156_v23  ;;  %v2093_v26 = vsub.f32 %v2077_v6, %v1276_v29  ;;  %v9381_v42 = vpop.f32.mrb[38].mxu0  ;;  %9423 = vmatmul.mubr.msk.f32.vlgmr.msra.gmra.mrb[32].mxu1 %vm234_vm3, %v11518_v30  ;;  %v2068_v6 = vmul.f32 %v11521_v14, %v11341_v12  ;;  %v11555_v23 = vpop.permute.xlu1 %2007  ;;  %v11568_v22 = vadd.f32 %v2037_v18, %v1957_v49 }
 0x2b5   : > { %v2159_v27 = vmul.f32 %v11463_v58, %v2094_v20  ;;  %v1279_v39 = vmax.f32 %v9381_v42, 0.0  ;;  %v1143_v1 = vpop.f32.mrb[39].mxu0  ;;  %9921 = vmatpush3.bf16.msk.msra.mxu1 %vm10230_vm2, %v16445_v8  ;;  %v1928_v29 = vpop.permute.xlu0 %1927  ;;  %v11573_v12 = vsel %vm198_vm8, %v11485_v51, %v2189_v32  ;;  %v16450_v42 = vld [vmem:[#allocation24_spill] sm:$0xff]  ;;  %v2040_v32 = vmul.f32 %v11555_v23, %v11433_v34 }
 0x2b6   : > { %v11560_v57 = vsel %vm198_vm8, %v11485_v51, %v2188_v59  ;;  %v2158_v20 = vmul.f32 %v11463_v58, %v2093_v26  ;;  %v1278_v24 = vmax.f32 %v1143_v1, 0.0  ;;  %3424 = vrot.lane.b32.xlu0 %v11526_v43, %s10170_s28  ;;  %9930 = vmatprep.subr.msk.bf16.mxu1 %vm10230_vm2, %v16448_v46  ;;  %16449 = vst [vmem:[#allocation15_spill] sm:$0xff] %v11573_v12 }
 0x2b7   : > { %16447 = vst [vmem:[#allocation17_spill] sm:$0xff] %v11560_v57  ;;  %v2191_v59 = vadd.f32 %v16450_v42, %v2159_v27  ;;  %v2096_v8 = vsub.f32 %v2080_v41, %v1279_v39  ;;  %9425 = vmatprep.mubr.msk.f32.mxu1 %vm234_vm3, %v11560_v57  ;;  %v11578_v26 = vadd.f32 %v2038_v50, %v1958_v36 }
 0x2b8   : > { %v2039_v1 = vmul.f32 %v11497_v60, %v11419_v0  ;;  %v2190_v46 = vadd.f32 %v16451_v13, %v2158_v20  ;;  %v2095_v18 = vsub.f32 %v2079_v28, %v1278_v24  ;;  %v9384_v49 = vpop.f32.mrb[40].mxu0  ;;  %9426 = vmatmul.mubr.msk.f32.gmra.mrb[34].mxu1 %vm234_vm3, %v11573_v12  ;;  %v1960_v41 = vmul.f32 %v1928_v29, %v11447_v62  ;;  %v16454_v24 = vld [vmem:[#allocation30_spill] sm:$0xff] }
 0x2b9   : > { %v2161_v27 = vmul.f32 %v11463_v58, %v2096_v8  ;;  %v1281_v39 = vmax.f32 %v9384_v49, 0.0  ;;  %v1153_v50 = vpop.f32.mrb[41].mxu0  ;;  %v1959_v36 = vmul.f32 %v11508_v61, %v11429_v48  ;;  %v11602_v8 = vsel %vm198_vm8, %v11485_v51, %v2191_v59 }
 0x2ba   : > { %v11594_v28 = vsel %vm198_vm8, %v11485_v51, %v2190_v46  ;;  %v2160_v13 = vmul.f32 %v11463_v58, %v2095_v18  ;;  %v1280_v20 = vmax.f32 %v1153_v50, 0.0  ;;  %3433 = vrot.lane.b32.xlu0 %v11573_v12, %s10170_s28  ;;  %16453 = vst [vmem:[#allocation19_spill] sm:$0xff] %v11602_v8  ;;  %v2083_v46 = vsub.f32 %v2067_v7, %v16435_v3  ;;  %v16455_v50 = vld [vmem:[#allocation29_spill] sm:$0xff] }
 0x2bb   : > { %16452 = vst [vmem:[#allocation62_spill] sm:$0xff] %v11594_v28  ;;  %v2193_v42 = vadd.f32 %v16454_v24, %v2161_v27  ;;  %v2098_v49 = vsub.f32 %v2082_v35, %v1281_v39  ;;  %9428 = vmatprep.mubr.msk.f32.mxu1 %vm234_vm3, %v11594_v28  ;;  %v2069_v18 = vmul.f32 %v11568_v22, %v11401_v45 }
 0x2bc   : > { %v2192_v43 = vadd.f32 %v16455_v50, %v2160_v13  ;;  %v16456_v12 = vsub.f32 %v11480_v55, %v11284_v19  ;;  %v9387_v0 = vpop.f32.mrb[42].mxu0  ;;  %v2084_v59 = vsub.f32 %v2068_v6, %v11353_v52  ;;  %9429 = vmatmul.mubr.msk.f32.gmra.mrb[36].mxu1 %vm234_vm3, %v11602_v8  ;;  %v2070_v35 = vmul.f32 %v11578_v26, %v11461_v37 }
 0x2bd   : > { %v11619_v27 = vadd.f32 %v2040_v32, %v1960_v41  ;;  %v2163_v3 = vmul.f32 %v11463_v58, %v2098_v49  ;;  %v1283_v45 = vmax.f32 %v9387_v0, 0.0  ;;  %v1163_v7 = vpop.f32.mrb[43].mxu0  ;;  %v11622_v39 = vadd.f32 %v2039_v1, %v1959_v36  ;;  %v16459_v0 = vld [vmem:[#allocation33_spill] sm:$0xff]  ;;  %v16460_v1 = vld [vmem:[#allocation32_spill] sm:$0xff] }
 0x2be   : > { %v2097_v30 = vsub.f32 %v16456_v12, %v1280_v20  ;;  %v11627_v19 = vsel %vm198_vm8, %v11485_v51, %v2192_v43  ;;  %v1282_v55 = vmax.f32 %v1163_v7, 0.0  ;;  %3430 = vrot.lane.b32.xlu0 %v11560_v57, %s10170_s28  ;;  %v11635_v37 = vsel %vm198_vm8, %v11485_v51, %v2193_v42  ;;  %v16465_v7 = vld [vmem:[#allocation9_spill] sm:$0xff] }
 0x2bf   : > { %16457 = vst [vmem:[#allocation18_spill] sm:$0xff] %v11627_v19  ;;  %16458 = vst [vmem:[#allocation24_spill] sm:$0xff] %v11635_v37  ;;  %v2195_v6 = vadd.f32 %v16459_v0, %v2163_v3  ;;  %v2100_v12 = vsub.f32 %v2084_v59, %v1283_v45  ;;  %9431 = vmatprep.mubr.msk.f32.mxu1 %vm234_vm3, %v11627_v19  ;;  %v2072_v36 = vmul.f32 %v11619_v27, %v1928_v29 }
 0x2c0   : > { %v2162_v52 = vmul.f32 %v11463_v58, %v2097_v30  ;;  %v2099_v32 = vsub.f32 %v2083_v46, %v1282_v55  ;;  %v9390_v41 = vpop.f32.mrb[44].mxu0  ;;  %9432 = vmatmul.mubr.msk.f32.gmra.mrb[38].mxu1 %vm234_vm3, %v11635_v37  ;;  %v2085_v30 = vsub.f32 %v2069_v18, %v16442_v4  ;;  %v2086_v24 = vsub.f32 %v2070_v35, %v11409_v33  ;;  %v16463_v33 = vld [vmem:[#allocation40_spill] sm:$0xff] }
 0x2c1   : > { %v2165_v13 = vmul.f32 %v11463_v58, %v2100_v12  ;;  %v1285_v20 = vmax.f32 %v9390_v41, 0.0  ;;  %v1173_v42 = vpop.f32.mrb[45].mxu0  ;;  %v2071_v49 = vmul.f32 %v11622_v39, %v11508_v61  ;;  %v11660_v4 = vsel %vm198_vm8, %v11485_v51, %v2195_v6  ;;  %v16464_v61 = vld [vmem:[#allocation36_spill] sm:$0xff] }
 0x2c2   : > { %v2194_v43 = vadd.f32 %v16460_v1, %v2162_v52  ;;  %v2164_v50 = vmul.f32 %v11463_v58, %v2099_v32  ;;  %v1284_v59 = vmax.f32 %v1173_v42, 0.0  ;;  %3439 = vrot.lane.b32.xlu0 %v11602_v8, %s10170_s28  ;;  %16462 = vst [vmem:[#allocation30_spill] sm:$0xff] %v11660_v4  ;;  %v2105_v52 = vmul.f32 %v11371_v54, %v16465_v7  ;;  %v16466_v1 = vld [vmem:[#allocation10_spill] sm:$0xff] }
 0x2c3   : > { %v2197_v29 = vadd.f32 %v16463_v33, %v2165_v13  ;;  %v2102_v18 = vsub.f32 %v2086_v24, %v1285_v20  ;;  %v2088_v6 = vsub.f32 %v2072_v36, %v11447_v62  ;;  %v2087_v13 = vsub.f32 %v2071_v49, %v11429_v48  ;;  %v16469_v62 = vld [vmem:[#allocation48_spill] sm:$0xff]  ;;  %v16470_v20 = vld [vmem:[#allocation42_spill] sm:$0xff] }
 0x2c4   : > { %v11652_v46 = vsel %vm198_vm8, %v11485_v51, %v2194_v43  ;;  %v2196_v35 = vadd.f32 %v16464_v61, %v2164_v50  ;;  %v2101_v3 = vsub.f32 %v2085_v30, %v1284_v59  ;;  %v9393_v45 = vpop.f32.mrb[46].mxu0  ;;  %v2106_v43 = vmul.f32 %v11373_v44, %v16466_v1  ;;  %v16471_v48 = vld [vmem:[#allocation26_spill] sm:$0xff] }
 0x2c5   : > { %16461 = vst [vmem:[#allocation23_spill] sm:$0xff] %v11652_v46  ;;  %9434 = vmatprep.mubr.msk.f32.mxu1 %vm234_vm3, %v11652_v46  ;;  %v2167_v55 = vmul.f32 %v11463_v58, %v2102_v18  ;;  %v1287_v0 = vmax.f32 %v9393_v45, 0.0  ;;  %v1183_v12 = vpop.f32.mrb[47].mxu0  ;;  %v11686_v54 = vsel %vm198_vm8, %v11485_v51, %v2197_v29  ;;  %v2121_v49 = vsub.f32 %v2105_v52, %v16471_v48  ;;  %v16472_v29 = vld [vmem:[#allocation28_spill] sm:$0xff]  ;;  %v16475_v52 = vld [vmem:[#allocation11_spill] sm:$0xff] }
 0x2c6   : > { %9435 = vmatmul.mubr.msk.f32.gmra.mrb[40].mxu1 %vm234_vm3, %v11660_v4  ;;  %v11677_v32 = vsel %vm198_vm8, %v11485_v51, %v2196_v35  ;;  %v2166_v41 = vmul.f32 %v11463_v58, %v2101_v3  ;;  %v1286_v30 = vmax.f32 %v1183_v12, 0.0  ;;  %3436 = vrot.lane.b32.xlu0 %v11594_v28, %s10170_s28  ;;  %16468 = vst [vmem:[#allocation33_spill] sm:$0xff] %v11686_v54  ;;  %v16473_v35 = vld [vmem:[#allocation12_spill] sm:$0xff] }
 0x2c7   : > { %16467 = vst [vmem:[#allocation29_spill] sm:$0xff] %v11677_v32  ;;  %v2199_v44 = vadd.f32 %v16469_v62, %v2167_v55  ;;  %v2104_v36 = vsub.f32 %v2088_v6, %v1287_v0  ;;  %9437 = vmatprep.mubr.msk.f32.mxu1 %vm234_vm3, %v11677_v32  ;;  %v2122_v18 = vsub.f32 %v2106_v43, %v16472_v29  ;;  %v16478_v43 = vld [vmem:[#allocation50_spill] sm:$0xff]  ;;  %v16483_v29 = vld [vmem:[#allocation31_spill] sm:$0xff] }
 0x2c8   : > { %v2198_v24 = vadd.f32 %v16470_v20, %v2166_v41  ;;  %v2103_v42 = vsub.f32 %v2087_v13, %v1286_v30  ;;  %v9396_v50 = vpop.f32.mrb[48].mxu0  ;;  %v2108_v3 = vmul.f32 %v11381_v47, %v16473_v35  ;;  %v2107_v0 = vmul.f32 %v11375_v38, %v16475_v52  ;;  %v16477_v47 = vld [vmem:[#allocation51_spill] sm:$0xff]  ;;  %v16479_v62 = vld [vmem:[#allocation14_spill] sm:$0xff] }
 0x2c9   : > { %v2169_v59 = vmul.f32 %v11463_v58, %v2104_v36  ;;  %v1289_v33 = vmax.f32 %v9396_v50, 0.0  ;;  %v1193_v61 = vpop.f32.mrb[49].mxu0  ;;  %v11712_v6 = vsel %vm198_vm8, %v11485_v51, %v2199_v44  ;;  %v2110_v38 = vmul.f32 %v11385_v2, %v16479_v62  ;;  %v16480_v36 = vld [vmem:[#allocation13_spill] sm:$0xff]  ;;  %v16485_v2 = vld [vmem:[#allocation22_spill] sm:$0xff] }
 0x2ca   : > { %9438 = vmatmul.mubr.msk.f32.gmra.mrb[42].mxu1 %vm234_vm3, %v11686_v54  ;;  %v11702_v45 = vsel %vm198_vm8, %v11485_v51, %v2198_v24  ;;  %v2168_v7 = vmul.f32 %v11463_v58, %v2103_v42  ;;  %v1288_v55 = vmax.f32 %v1193_v61, 0.0  ;;  %3445 = vrot.lane.b32.xlu0 %v11635_v37, %s10170_s28  ;;  %16476 = vst [vmem:[#allocation40_spill] sm:$0xff] %v11712_v6  ;;  %v16481_v42 = vld [vmem:[#allocation34_spill] sm:$0xff] }
 0x2cb   : > { %16474 = vst [vmem:[#allocation32_spill] sm:$0xff] %v11702_v45  ;;  %v2201_v12 = vadd.f32 %v16477_v47, %v2169_v59  ;;  %v2138_v1 = vsub.f32 %v2122_v18, %v1289_v33  ;;  %9440 = vmatprep.mubr.msk.f32.mxu1 %vm234_vm3, %v11702_v45  ;;  %v2109_v44 = vmul.f32 %v11383_v25, %v16480_v36  ;;  %v16487_v47 = vld [vmem:[#allocation41_spill] sm:$0xff] }
 0x2cc   : > { %v2200_v41 = vadd.f32 %v16478_v43, %v2168_v7  ;;  %v2137_v30 = vsub.f32 %v2121_v49, %v1288_v55  ;;  %v9399_v13 = vpop.f32.mrb[50].mxu0  ;;  %v2124_v50 = vsub.f32 %v2108_v3, %v16481_v42  ;;  %v2123_v18 = vsub.f32 %v2107_v0, %v16483_v29  ;;  %v16486_v3 = vld [vmem:[#allocation20_spill] sm:$0xff] }
 0x2cd   : > { %v2171_v20 = vmul.f32 %v11463_v58, %v2138_v1  ;;  %v1291_v24 = vmax.f32 %v9399_v13, 0.0  ;;  %v1203_v48 = vpop.f32.mrb[51].mxu0  ;;  %v11738_v25 = vsel %vm198_vm8, %v11485_v51, %v2201_v12  ;;  %v2126_v0 = vsub.f32 %v2110_v38, %v16487_v47  ;;  %v16488_v1 = vld [vmem:[#allocation39_spill] sm:$0xff] }
 0x2ce   : > { %9441 = vmatmul.mubr.msk.f32.gmra.mrb[44].mxu1 %vm234_vm3, %v11712_v6  ;;  %v11729_v49 = vsel %vm198_vm8, %v11485_v51, %v2200_v41  ;;  %v2170_v59 = vmul.f32 %v11463_v58, %v2137_v30  ;;  %v1290_v33 = vmax.f32 %v1203_v48, 0.0  ;;  %3442 = vrot.lane.b32.xlu0 %v11627_v19, %s10170_s28  ;;  %16484 = vst [vmem:[#allocation9_spill] sm:$0xff] %v11738_v25 }
 0x2cf   : > { %16482 = vst [vmem:[#allocation36_spill] sm:$0xff] %v11729_v49  ;;  %v2203_v61 = vadd.f32 %v16485_v2, %v2171_v20  ;;  %v2140_v35 = vsub.f32 %v2124_v50, %v1291_v24  ;;  %9443 = vmatprep.mubr.msk.f32.mxu1 %vm234_vm3, %v11729_v49  ;;  %v2125_v43 = vsub.f32 %v2109_v44, %v16488_v1  ;;  %v16491_v24 = vld [vmem:[#allocation27_spill] sm:$0xff]  ;;  %v16498_v1 = vld [vmem:[#allocation52_spill] sm:$0xff] }
 0x2d0   : > { %v2202_v7 = vadd.f32 %v16486_v3, %v2170_v59  ;;  %v2139_v55 = vsub.f32 %v2123_v18, %v1290_v33  ;;  %v9402_v52 = vpop.f32.mrb[52].mxu0  ;;  %v2112_v62 = vmul.f32 %v11443_v16, %v11087_v63  ;;  %v2111_v20 = vmul.f32 %v11441_v10, %v11063_v15  ;;  %v16492_v16 = vld [vmem:[#allocation25_spill] sm:$0xff]  ;;  %v16493_v3 = vld [vmem:[#allocation43_spill] sm:$0xff] }
 0x2d1   : > { %v2173_v12 = vmul.f32 %v11463_v58, %v2140_v35  ;;  %v1293_v41 = vmax.f32 %v9402_v52, 0.0  ;;  %v1213_v30 = vpop.f32.mrb[53].mxu0  ;;  %v11752_v13 = vsel %vm198_vm8, %v11485_v51, %v2203_v61  ;;  %v2113_v33 = vmul.f32 %v11449_v11, %v11145_v9 }
 0x2d2   : > { %9444 = vmatmul.mubr.msk.f32.gmra.mrb[46].mxu1 %vm234_vm3, %v11738_v25  ;;  %16489 = vst [vmem:[#allocation10_spill] sm:$0xff] %v11752_v13  ;;  %v2172_v36 = vmul.f32 %v11463_v58, %v2139_v55  ;;  %v1292_v38 = vmax.f32 %v1213_v30, 0.0  ;;  %3451 = vrot.lane.b32.xlu0 %v11660_v4, %s10170_s28  ;;  %v11764_v44 = vsel %vm198_vm8, %v11485_v51, %v2202_v7  ;;  %v16499_v30 = vld [vmem:[#allocation53_spill] sm:$0xff] }
 0x2d3   : > { %3603 = vrot.lane.b32.xlu1 %v11752_v13, %s10170_s28  ;;  %16490 = vst [vmem:[#allocation48_spill] sm:$0xff] %v11764_v44  ;;  %v2205_v42 = vadd.f32 %v16491_v24, %v2173_v12  ;;  %v2142_v63 = vsub.f32 %v2126_v0, %v1293_v41  ;;  %9446 = vmatprep.mubr.msk.f32.mxu1 %vm234_vm3, %v11764_v44 }
 0x2d4   : > { %v2204_v50 = vadd.f32 %v16492_v16, %v2172_v36  ;;  %v2141_v48 = vsub.f32 %v2125_v43, %v1292_v38  ;;  %v9405_v59 = vpop.f32.mrb[54].mxu0  ;;  %v2128_v15 = vsub.f32 %v2112_v62, %v11260_v40  ;;  %v2114_v2 = vmul.f32 %v11482_v17, %v11200_v21  ;;  %v16495_v40 = vld [vmem:[#allocation37_spill] sm:$0xff]  ;;  %v16497_v17 = vld [vmem:[#allocation35_spill] sm:$0xff] }
 0x2d5   : > { %v2175_v29 = vmul.f32 %v11463_v58, %v2142_v63  ;;  %v1295_v18 = vmax.f32 %v9405_v59, 0.0  ;;  %v1223_v10 = vpop.f32.mrb[55].mxu0  ;;  %v2127_v7 = vsub.f32 %v2111_v20, %v16493_v3  ;;  %v11797_v21 = vsel %vm198_vm8, %v11485_v51, %v2205_v42  ;;  %v16500_v38 = vld [vmem:[#allocation59_spill] sm:$0xff]  ;;  %v16502_v16 = vld [vmem:[#allocation49_spill] sm:$0xff] }
 0x2d6   : > { %9447 = vmatmul.mubr.msk.f32.gmra.mrb[48].mxu1 %vm234_vm3, %v11752_v13  ;;  %v2174_v61 = vmul.f32 %v11463_v58, %v2141_v48  ;;  %v1294_v35 = vmax.f32 %v1223_v10, 0.0  ;;  %3448 = vrot.lane.b32.xlu0 %v11652_v46, %s10170_s28  ;;  %v11789_v9 = vsel %vm198_vm8, %v11485_v51, %v2204_v50  ;;  %16496 = vst [vmem:[#allocation26_spill] sm:$0xff] %v11797_v21  ;;  %v16503_v48 = vld [vmem:[#allocation44_spill] sm:$0xff] }
 0x2d7   : > { %3600 = vrot.lane.b32.xlu1 %v11764_v44, %s10170_s28  ;;  %16494 = vst [vmem:[#allocation42_spill] sm:$0xff] %v11789_v9  ;;  %v2207_v11 = vadd.f32 %v16495_v40, %v2175_v29  ;;  %v2144_v55 = vsub.f32 %v2128_v15, %v1295_v18  ;;  %9449 = vmatprep.mubr.msk.f32.mxu1 %vm234_vm3, %v11789_v9  ;;  %v16505_v29 = vld [vmem:[#allocation38_spill] sm:$0xff] }
 0x2d8   : > { %v2206_v52 = vadd.f32 %v16497_v17, %v2174_v61  ;;  %v2143_v47 = vsub.f32 %v2127_v7, %v1294_v35  ;;  %v9408_v0 = vpop.f32.mrb[56].mxu0  ;;  %v2129_v43 = vsub.f32 %v2113_v33, %v16498_v1  ;;  %v2130_v62 = vsub.f32 %v2114_v2, %v16499_v30  ;;  %v16506_v35 = vld [vmem:[#allocation60_spill] sm:$0xff]  ;;  %v16507_v17 = vld [vmem:[#allocation55_spill] sm:$0xff] }
 0x2d9   : > { %v2177_v12 = vmul.f32 %v11463_v58, %v2144_v55  ;;  %v1297_v41 = vmax.f32 %v9408_v0, 0.0  ;;  %v1233_v36 = vpop.f32.mrb[57].mxu0  ;;  %v2116_v20 = vmul.f32 %v11521_v14, %v16500_v38  ;;  %v2115_v50 = vmul.f32 %v11513_v56, %v16502_v16  ;;  %v16513_v38 = vld [vmem:[#allocation66_spill] sm:$0xff] }
 0x2da   : > { %9450 = vmatmul.mubr.msk.f32.gmra.mrb[50].mxu1 %vm234_vm3, %v11797_v21  ;;  %v2176_v24 = vmul.f32 %v11463_v58, %v2143_v47  ;;  %v1296_v42 = vmax.f32 %v1233_v36, 0.0  ;;  %3457 = vrot.lane.b32.xlu0 %v11686_v54, %s10170_s28  ;;  %v11815_v63 = vsel %vm198_vm8, %v11485_v51, %v2206_v52  ;;  %v11825_v33 = vsel %vm198_vm8, %v11485_v51, %v2207_v11 }
 0x2db   : > { %3609 = vrot.lane.b32.xlu1 %v11797_v21, %s10170_s28  ;;  %16501 = vst [vmem:[#allocation28_spill] sm:$0xff] %v11815_v63  ;;  %v2209_v59 = vadd.f32 %v16503_v48, %v2177_v12  ;;  %v2146_v14 = vsub.f32 %v2130_v62, %v1297_v41  ;;  %9452 = vmatprep.mubr.msk.f32.mxu1 %vm234_vm3, %v11815_v63  ;;  %16504 = vst [vmem:[#allocation12_spill] sm:$0xff] %v11825_v33  ;;  %v16512_v41 = vld [vmem:[#allocation61_spill] sm:$0xff] }
 0x2dc   : > { %v2208_v18 = vadd.f32 %v16505_v29, %v2176_v24  ;;  %v2145_v15 = vsub.f32 %v2129_v43, %v1296_v42  ;;  %v9411_v10 = vpop.f32.mrb[58].mxu0  ;;  %v2117_v56 = vmul.f32 %v11568_v22, %v11395_v5  ;;  %v2132_v3 = vsub.f32 %v2116_v20, %v16506_v35  ;;  %v16509_v22 = vld [vmem:[#allocation46_spill] sm:$0xff] }
 0x2dd   : > { %v2179_v2 = vmul.f32 %v11463_v58, %v2146_v14  ;;  %v1299_v61 = vmax.f32 %v9411_v10, 0.0  ;;  %v1243_v7 = vpop.f32.mrb[59].mxu0  ;;  %v2118_v40 = vmul.f32 %v11578_v26, %v11456_v53  ;;  %v2131_v52 = vsub.f32 %v2115_v50, %v16507_v17  ;;  %v16511_v26 = vld [vmem:[#allocation45_spill] sm:$0xff] }
 0x2de   : > { %9453 = vmatmul.mubr.msk.f32.gmra.mrb[52].mxu1 %vm234_vm3, %v11825_v33  ;;  %v2178_v11 = vmul.f32 %v11463_v58, %v2145_v15  ;;  %v1298_v55 = vmax.f32 %v1243_v7, 0.0  ;;  %3454 = vrot.lane.b32.xlu0 %v11677_v32, %s10170_s28  ;;  %v11845_v5 = vsel %vm198_vm8, %v11485_v51, %v2208_v18  ;;  %v11853_v53 = vsel %vm198_vm8, %v11485_v51, %v2209_v59  ;;  %v16515_v14 = vld [vmem:[#allocation57_spill] sm:$0xff]  ;;  %v16517_v18 = vld [vmem:[#allocation47_spill] sm:$0xff] }
 0x2df   : > { %3606 = vrot.lane.b32.xlu1 %v11789_v9, %s10170_s28  ;;  %16508 = vst [vmem:[#allocation11_spill] sm:$0xff] %v11845_v5  ;;  %v2211_v47 = vadd.f32 %v16509_v22, %v2179_v2  ;;  %v2148_v0 = vsub.f32 %v2132_v3, %v1299_v61  ;;  %9455 = vmatprep.mubr.msk.f32.mxu1 %vm234_vm3, %v11845_v5  ;;  %16510 = vst [vmem:[#allocation51_spill] sm:$0xff] %v11853_v53  ;;  %v16518_v7 = vld [vmem:[#allocation67_spill] sm:$0xff]  ;;  %v16522_v22 = vld [vmem:[#allocation58_spill] sm:$0xff] }
 0x2e0   : > { %v2210_v1 = vadd.f32 %v16511_v26, %v2178_v11  ;;  %v2147_v43 = vsub.f32 %v2131_v52, %v1298_v55  ;;  %v9414_v12 = vpop.f32.mrb[60].mxu0  ;;  %v2133_v30 = vsub.f32 %v2117_v56, %v16512_v41  ;;  %v2134_v20 = vsub.f32 %v2118_v40, %v16513_v38  ;;  %v16520_v55 = vld [vmem:[#allocation63_spill] sm:$0xff] }
 0x2e1   : > { %v2181_v62 = vmul.f32 %v11463_v58, %v2148_v0  ;;  %v1301_v36 = vmax.f32 %v9414_v12, 0.0  ;;  %v1253_v24 = vpop.f32.mrb[61].mxu0  ;;  %v2120_v42 = vmul.f32 %v11619_v27, %v11555_v23  ;;  %v2119_v59 = vmul.f32 %v11622_v39, %v11497_v60  ;;  %v16524_v12 = vld [vmem:[#allocation65_spill] sm:$0xff] }
 0x2e2   : > { %9456 = vmatmul.mubr.msk.f32.gmra.mrb[54].mxu1 %vm234_vm3, %v11853_v53  ;;  %v2180_v16 = vmul.f32 %v11463_v58, %v2147_v43  ;;  %v1300_v50 = vmax.f32 %v1253_v24, 0.0  ;;  %3463 = vrot.lane.b32.xlu0 %v11712_v6, %s10170_s28  ;;  %v11871_v48 = vsel %vm198_vm8, %v11485_v51, %v2210_v1  ;;  %v11881_v27 = vsel %vm198_vm8, %v11485_v51, %v2211_v47 }
 0x2e3   : > { %3615 = vrot.lane.b32.xlu1 %v11825_v33, %s10170_s28  ;;  %16514 = vst [vmem:[#allocation50_spill] sm:$0xff] %v11871_v48  ;;  %v2213_v29 = vadd.f32 %v16515_v14, %v2181_v62  ;;  %v2150_v23 = vsub.f32 %v2134_v20, %v1301_v36  ;;  %9458 = vmatprep.mubr.msk.f32.mxu1 %vm234_vm3, %v11871_v48  ;;  %16516 = vst [vmem:[#allocation14_spill] sm:$0xff] %v11881_v27  ;;  %v16529_v20 = vld [vmem:[#allocation56_spill] sm:$0xff]  ;;  %v16531_v14 = vld [vmem:[#allocation15_spill] sm:$0xff] }
 0x2e4   : > { %v2212_v15 = vadd.f32 %v16517_v18, %v2180_v16  ;;  %v2149_v10 = vsub.f32 %v2133_v30, %v1300_v50  ;;  %v9417_v56 = vpop.f32.mrb[62].mxu0  ;;  %v2136_v2 = vsub.f32 %v2120_v42, %v11433_v34  ;;  %v2135_v40 = vsub.f32 %v2119_v59, %v16518_v7  ;;  %v16526_v30 = vld [vmem:[#allocation64_spill] sm:$0xff]  ;;  %v16530_v16 = vld [vmem:[#allocation54_spill] sm:$0xff] }
 0x2e5   : > { %v2183_v60 = vmul.f32 %v11463_v58, %v2150_v23  ;;  %v1303_v39 = vmax.f32 %v9417_v56, 0.0  ;;  %v1263_v61 = vpop.f32.mrb[63].mxu0  ;;  %v11905_v52 = vsel %vm198_vm8, %v11485_v51, %v2213_v29 }
 0x2e6   : > { %9459 = vmatmul.mubr.msk.f32.gmra.mrb[56].mxu1 %vm234_vm3, %v11881_v27  ;;  %v2182_v35 = vmul.f32 %v11463_v58, %v2149_v10  ;;  %v1302_v3 = vmax.f32 %v1263_v61, 0.0  ;;  %3460 = vrot.lane.b32.xlu0 %v11702_v45, %s10170_s28  ;;  %v11897_v11 = vsel %vm198_vm8, %v11485_v51, %v2212_v15  ;;  %16521 = vst [vmem:[#allocation34_spill] sm:$0xff] %v11905_v52 }
 0x2e7   : > { %3612 = vrot.lane.b32.xlu1 %v11815_v63, %s10170_s28  ;;  %16519 = vst [vmem:[#allocation13_spill] sm:$0xff] %v11897_v11  ;;  %v2215_v17 = vadd.f32 %v16520_v55, %v2183_v60  ;;  %v2152_v34 = vsub.f32 %v2136_v2, %v1303_v39  ;;  %9461 = vmatprep.mubr.msk.f32.mxu1 %vm234_vm3, %v11897_v11 }
 0x2e8   : > { %v2214_v47 = vadd.f32 %v16522_v22, %v2182_v35  ;;  %v2151_v0 = vsub.f32 %v2135_v40, %v1302_v3 }
 0x2e9   : > { %v2185_v26 = vmul.f32 %v11463_v58, %v2152_v34 }
 0x2ea   : > { %9462 = vmatmul.mubr.msk.f32.gmra.mrb[58].mxu1 %vm234_vm3, %v11905_v52  ;;  %v2184_v1 = vmul.f32 %v11463_v58, %v2151_v0  ;;  %3469 = vrot.lane.b32.xlu0 %v11738_v25, %s10170_s28  ;;  %v11919_v43 = vsel %vm198_vm8, %v11485_v51, %v2214_v47  ;;  %v11927_v58 = vsel %vm198_vm8, %v11485_v51, %v2215_v17 }
 0x2eb   : > { %3621 = vrot.lane.b32.xlu1 %v11853_v53, %s10170_s28  ;;  %16523 = vst [vmem:[#allocation31_spill] sm:$0xff] %v11919_v43  ;;  %v2217_v41 = vadd.f32 %v16524_v12, %v2185_v26  ;;  %9464 = vmatprep.mubr.msk.f32.mxu1 %vm234_vm3, %v11919_v43  ;;  %16525 = vst [vmem:[#allocation22_spill] sm:$0xff] %v11927_v58 }
 0x2ec   : > { %v2216_v62 = vadd.f32 %v16526_v30, %v2184_v1 }
 0x2ed   : > { %v11946_v38 = vsel %vm198_vm8, %v11485_v51, %v2217_v41 }
 0x2ee   : > { %9465 = vmatmul.mubr.msk.f32.gmra.mrb[60].mxu1 %vm234_vm3, %v11927_v58  ;;  %3466 = vrot.lane.b32.xlu0 %v11729_v49, %s10170_s28  ;;  %v11939_v36 = vsel %vm198_vm8, %v11485_v51, %v2216_v62  ;;  %16528 = vst [vmem:[#allocation41_spill] sm:$0xff] %v11946_v38 }
 0x2ef   : > { %3618 = vrot.lane.b32.xlu1 %v11845_v5, %s10170_s28  ;;  %16527 = vst [vmem:[#allocation20_spill] sm:$0xff] %v11939_v36  ;;  %9467 = vmatprep.mubr.msk.f32.mxu1 %vm234_vm3, %v11939_v36 }
 0x2f2   : > { %9468 = vmatmul.mubr.msk.f32.gmra.mrb[62].mxu1 %vm234_vm3, %v11946_v38 }
 0x2f3   : > { %3627 = vrot.lane.b32.xlu1 %v11881_v27, %s10170_s28 }
 0x2f7   : > { %3624 = vrot.lane.b32.xlu1 %v11871_v48, %s10170_s28 }
 0x2fb   : > { %3633 = vrot.lane.b32.xlu1 %v11905_v52, %s10170_s28 }
 0x2ff   : > { %3630 = vrot.lane.b32.xlu1 %v11897_v11, %s10170_s28 }
 0x303   : > { %3639 = vrot.lane.b32.xlu1 %v11927_v58, %s10170_s28 }
 0x307   : > { %3636 = vrot.lane.b32.xlu1 %v11919_v43, %s10170_s28 }
 0x30b   : > { %3645 = vrot.lane.b32.xlu1 %v11946_v38, %s10170_s28 }
 0x30f   : > { %3642 = vrot.lane.b32.xlu1 %v11939_v36, %s10170_s28 }
 0x324   : > { %v3428_v51 = vpop.permute.xlu0 %3427 }
 0x325   : > { %v3429_v24 = vsel %vm1416_vm4, %v3428_v51, %v16529_v20 }
 0x326   : > { %3474 = vrot.lane.b32.xlu0 %v3429_v24, %s10170_s28 }
 0x328   : > { %v3425_v42 = vpop.permute.xlu0 %3424 }
 0x329   : > { %v3426_v50 = vsel %vm1416_vm4, %v3425_v42, %v16530_v16 }
 0x32a   : > { %3472 = vrot.lane.b32.xlu0 %v3426_v50, %s10170_s28 }
 0x32c   : > { %v3434_v59 = vpop.permute.xlu0 %3433 }
 0x32d   : > { %v3435_v29 = vsel %vm1416_vm4, %v3434_v59, %v16531_v14 }
 0x32e   : > { %3478 = vrot.lane.b32.xlu0 %v3435_v29, %s10170_s28 }
 0x330   : > { %v3431_v23 = vpop.permute.xlu0 %3430 }
 0x331   : > { %v3432_v18 = vsel %vm1416_vm4, %v3431_v23, %v11560_v57 }
 0x332   : > { %3476 = vrot.lane.b32.xlu0 %v3432_v18, %s10170_s28 }
 0x334   : > { %v3440_v15 = vpop.permute.xlu0 %3439 }
 0x335   : > { %v3441_v10 = vsel %vm1416_vm4, %v3440_v15, %v11602_v8 }
 0x336   : > { %3482 = vrot.lane.b32.xlu0 %v3441_v10, %s10170_s28 }
 0x338   : > { %v3437_v56 = vpop.permute.xlu0 %3436 }
 0x339   : > { %v3438_v60 = vsel %vm1416_vm4, %v3437_v56, %v11594_v28 }
 0x33a   : > { %3480 = vrot.lane.b32.xlu0 %v3438_v60, %s10170_s28 }
 0x33c   : > { %v3446_v39 = vpop.permute.xlu0 %3445 }
 0x33d   : > { %v3447_v2 = vsel %vm1416_vm4, %v3446_v39, %v11635_v37 }
 0x33e   : > { %3486 = vrot.lane.b32.xlu0 %v3447_v2, %s10170_s28 }
 0x340   : > { %v3443_v61 = vpop.permute.xlu0 %3442 }
 0x341   : > { %v3444_v35 = vsel %vm1416_vm4, %v3443_v61, %v11627_v19 }
 0x342   : > { %3484 = vrot.lane.b32.xlu0 %v3444_v35, %s10170_s28 }
 0x344   : > { %v3452_v3 = vpop.permute.xlu0 %3451 }
 0x345   : > { %v3604_v7 = vpop.permute.xlu1 %3603  ;;  %v3453_v40 = vsel %vm1416_vm4, %v3452_v3, %v11660_v4 }
 0x346   : > { %v3605_v55 = vsel %vm1416_vm4, %v3604_v7, %v11752_v13  ;;  %3490 = vrot.lane.b32.xlu0 %v3453_v40, %s10170_s28 }
 0x347   : > { %3650 = vrot.lane.b32.xlu1 %v3605_v55, %s10170_s28 }
 0x348   : > { %v3449_v17 = vpop.permute.xlu0 %3448 }
 0x349   : > { %v3601_v34 = vpop.permute.xlu1 %3600  ;;  %v3450_v22 = vsel %vm1416_vm4, %v3449_v17, %v11652_v46 }
 0x34a   : > { %v3602_v47 = vsel %vm1416_vm4, %v3601_v34, %v11764_v44  ;;  %3488 = vrot.lane.b32.xlu0 %v3450_v22, %s10170_s28 }
 0x34b   : > { %3648 = vrot.lane.b32.xlu1 %v3602_v47, %s10170_s28 }
 0x34c   : > { %v3458_v0 = vpop.permute.xlu0 %3457 }
 0x34d   : > { %v3610_v26 = vpop.permute.xlu1 %3609  ;;  %v3459_v1 = vsel %vm1416_vm4, %v3458_v0, %v11686_v54 }
 0x34e   : > { %v3611_v12 = vsel %vm1416_vm4, %v3610_v26, %v11797_v21  ;;  %3494 = vrot.lane.b32.xlu0 %v3459_v1, %s10170_s28 }
 0x34f   : > { %3654 = vrot.lane.b32.xlu1 %v3611_v12, %s10170_s28 }
 0x350   : > { %v3455_v41 = vpop.permute.xlu0 %3454 }
 0x351   : > { %v3607_v30 = vpop.permute.xlu1 %3606  ;;  %v3456_v62 = vsel %vm1416_vm4, %v3455_v41, %v11677_v32 }
 0x352   : > { %v3608_v51 = vsel %vm1416_vm4, %v3607_v30, %v11789_v9  ;;  %3492 = vrot.lane.b32.xlu0 %v3456_v62, %s10170_s28 }
 0x353   : > { %3652 = vrot.lane.b32.xlu1 %v3608_v51, %s10170_s28 }
 0x354   : > { %v3464_v24 = vpop.permute.xlu0 %3463 }
 0x355   : > { %v3616_v42 = vpop.permute.xlu1 %3615  ;;  %v3465_v50 = vsel %vm1416_vm4, %v3464_v24, %v11712_v6 }
 0x356   : > { %v3617_v59 = vsel %vm1416_vm4, %v3616_v42, %v11825_v33  ;;  %3498 = vrot.lane.b32.xlu0 %v3465_v50, %s10170_s28 }
 0x357   : > { %3658 = vrot.lane.b32.xlu1 %v3617_v59, %s10170_s28 }
 0x358   : > { %v3461_v29 = vpop.permute.xlu0 %3460 }
 0x359   : > { %v3613_v23 = vpop.permute.xlu1 %3612  ;;  %v3462_v18 = vsel %vm1416_vm4, %v3461_v29, %v11702_v45 }
 0x35a   : > { %v3614_v15 = vsel %vm1416_vm4, %v3613_v23, %v11815_v63  ;;  %3496 = vrot.lane.b32.xlu0 %v3462_v18, %s10170_s28 }
 0x35b   : > { %3656 = vrot.lane.b32.xlu1 %v3614_v15, %s10170_s28 }
 0x35c   : > { %v3470_v10 = vpop.permute.xlu0 %3469 }
 0x35d   : > { %v3622_v56 = vpop.permute.xlu1 %3621  ;;  %v3471_v60 = vsel %vm1416_vm4, %v3470_v10, %v11738_v25  ;;  %v16532_v10 = vld [vmem:[#allocation5_spill] sm:$0xff] }
 0x35e   : > { %v3623_v39 = vsel %vm1416_vm4, %v3622_v56, %v11853_v53  ;;  %3502 = vrot.lane.b32.xlu0 %v3471_v60, %s10170_s28 }
 0x35f   : > { %3662 = vrot.lane.b32.xlu1 %v3623_v39, %s10170_s28  ;;  %v16534_v39 = vld [vmem:[#allocation8_spill] sm:$0xff] }
 0x360   : > { %v3467_v2 = vpop.permute.xlu0 %3466 }
 0x361   : > { %v3619_v61 = vpop.permute.xlu1 %3618  ;;  %v3468_v35 = vsel %vm1416_vm4, %v3467_v2, %v11729_v49 }
 0x362   : > { %v3620_v3 = vsel %vm1416_vm4, %v3619_v61, %v11845_v5  ;;  %3500 = vrot.lane.b32.xlu0 %v3468_v35, %s10170_s28 }
 0x363   : > { %3660 = vrot.lane.b32.xlu1 %v3620_v3, %s10170_s28 }
 0x365   : > { %v3628_v7 = vpop.permute.xlu1 %3627 }
 0x366   : > { %v3629_v40 = vsel %vm1416_vm4, %v3628_v7, %v11881_v27 }
 0x367   : > { %3666 = vrot.lane.b32.xlu1 %v3629_v40, %s10170_s28 }
 0x369   : > { %v3625_v55 = vpop.permute.xlu1 %3624 }
 0x36a   : > { %v3626_v17 = vsel %vm1416_vm4, %v3625_v55, %v11871_v48 }
 0x36b   : > { %3664 = vrot.lane.b32.xlu1 %v3626_v17, %s10170_s28 }
 0x36d   : > { %v3634_v34 = vpop.permute.xlu1 %3633 }
 0x36e   : > { %v3635_v22 = vsel %vm1416_vm4, %v3634_v34, %v11905_v52 }
 0x36f   : > { %3670 = vrot.lane.b32.xlu1 %v3635_v22, %s10170_s28 }
 0x371   : > { %v3631_v47 = vpop.permute.xlu1 %3630 }
 0x372   : > { %v3632_v0 = vsel %vm1416_vm4, %v3631_v47, %v11897_v11 }
 0x373   : > { %3668 = vrot.lane.b32.xlu1 %v3632_v0, %s10170_s28 }
 0x375   : > { %v3640_v26 = vpop.permute.xlu1 %3639 }
 0x376   : > { %v3641_v1 = vsel %vm1416_vm4, %v3640_v26, %v11927_v58 }
 0x377   : > { %3674 = vrot.lane.b32.xlu1 %v3641_v1, %s10170_s28 }
 0x379   : > { %v3637_v12 = vpop.permute.xlu1 %3636 }
 0x37a   : > { %v3638_v41 = vsel %vm1416_vm4, %v3637_v12, %v11919_v43 }
 0x37b   : > { %3672 = vrot.lane.b32.xlu1 %v3638_v41, %s10170_s28 }
 0x37d   : > { %v3646_v30 = vpop.permute.xlu1 %3645 }
 0x37e   : > { %v3647_v62 = vsel %vm1416_vm4, %v3646_v30, %v11946_v38 }
 0x37f   : > { %3678 = vrot.lane.b32.xlu1 %v3647_v62, %s10170_s28 }
 0x381   : > { %v3643_v51 = vpop.permute.xlu1 %3642 }
 0x382   : > { %v3644_v24 = vsel %vm1416_vm4, %v3643_v51, %v11939_v36 }
 0x383   : > { %3676 = vrot.lane.b32.xlu1 %v3644_v24, %s10170_s28 }
 0x387   : > { %v9424_v42 = vpop.f32.mrb[32].mxu1 }
 0x388   : > { %v2415_v50 = vpop.f32.mrb[33].mxu1  ;;  %v2575_v29 = vmax.f32 %v9424_v42, 0.0 }
 0x389   : > { %v2574_v59 = vmax.f32 %v2415_v50, 0.0 }
 0x38b   : > { %v9427_v23 = vpop.f32.mrb[34].mxu1  ;;  %9474 = vmatprep.mubr.msk.f32.mxu0 %vm234_vm3, %v2574_v59 }
 0x38c   : > { %v2425_v18 = vpop.f32.mrb[35].mxu1  ;;  %9475 = vmatmul.mubr.msk.f32.vlgmr.msra.gmra.mrb[64].mxu0 %vm234_vm3, %v2575_v29  ;;  %v2577_v60 = vmax.f32 %v9427_v23, 0.0 }
 0x38d   : > { %v2576_v15 = vmax.f32 %v2425_v18, 0.0  ;;  %9927 = vmatpush3.bf16.msk.msra.mxu0 %vm10230_vm2, %v16532_v10 }
 0x38e   : > { %9936 = vmatprep.subr.msk.bf16.mxu0 %vm10230_vm2, %v16534_v39 }
 0x38f   : > { %v9430_v2 = vpop.f32.mrb[36].mxu1  ;;  %9477 = vmatprep.mubr.msk.f32.mxu0 %vm234_vm3, %v2576_v15 }
 0x390   : > { %v2435_v61 = vpop.f32.mrb[37].mxu1  ;;  %9478 = vmatmul.mubr.msk.f32.gmra.mrb[66].mxu0 %vm234_vm3, %v2577_v60  ;;  %v2579_v3 = vmax.f32 %v9430_v2, 0.0 }
 0x391   : > { %v2578_v35 = vmax.f32 %v2435_v61, 0.0 }
 0x393   : > { %v9433_v7 = vpop.f32.mrb[38].mxu1  ;;  %9480 = vmatprep.mubr.msk.f32.mxu0 %vm234_vm3, %v2578_v35 }
 0x394   : > { %v2445_v40 = vpop.f32.mrb[39].mxu1  ;;  %9481 = vmatmul.mubr.msk.f32.gmra.mrb[68].mxu0 %vm234_vm3, %v2579_v3  ;;  %v2581_v17 = vmax.f32 %v9433_v7, 0.0 }
 0x395   : > { %v2580_v55 = vmax.f32 %v2445_v40, 0.0 }
 0x397   : > { %9483 = vmatprep.mubr.msk.f32.mxu0 %vm234_vm3, %v2580_v55 }
 0x398   : > { %v3475_v22 = vpop.permute.xlu0 %3474  ;;  %9484 = vmatmul.mubr.msk.f32.gmra.mrb[70].mxu0 %vm234_vm3, %v2581_v17 }
 0x399   : > { %v9436_v34 = vpop.f32.mrb[40].mxu1  ;;  %v12078_v0 = vsel %vm1416_vm4, %v3475_v22, %v16529_v20 }
 0x39a   : > { %v2455_v47 = vpop.f32.mrb[41].mxu1  ;;  %v2583_v1 = vmax.f32 %v9436_v34, 0.0  ;;  %3538 = vrot.lane.b32.xlu0 %v12078_v0, %s10171_s6 }
 0x39b   : > { %v2582_v26 = vmax.f32 %v2455_v47, 0.0 }
 0x39c   : > { %v3473_v41 = vpop.permute.xlu0 %3472 }
 0x39d   : > { %v9439_v12 = vpop.f32.mrb[42].mxu1  ;;  %9486 = vmatprep.mubr.msk.f32.mxu0 %vm234_vm3, %v2582_v26  ;;  %v12086_v62 = vsel %vm1416_vm4, %v3473_v41, %v16530_v16 }
 0x39e   : > { %v2465_v30 = vpop.f32.mrb[43].mxu1  ;;  %9487 = vmatmul.mubr.msk.f32.gmra.mrb[72].mxu0 %vm234_vm3, %v2583_v1  ;;  %v2585_v24 = vmax.f32 %v9439_v12, 0.0  ;;  %3536 = vrot.lane.b32.xlu0 %v12086_v62, %s10171_s6 }
 0x39f   : > { %v2584_v51 = vmax.f32 %v2465_v30, 0.0 }
 0x3a0   : > { %v3479_v50 = vpop.permute.xlu0 %3478 }
 0x3a1   : > { %v9442_v42 = vpop.f32.mrb[44].mxu1  ;;  %9489 = vmatprep.mubr.msk.f32.mxu0 %vm234_vm3, %v2584_v51  ;;  %v12094_v29 = vsel %vm1416_vm4, %v3479_v50, %v16531_v14 }
 0x3a2   : > { %v2475_v59 = vpop.f32.mrb[45].mxu1  ;;  %9490 = vmatmul.mubr.msk.f32.gmra.mrb[74].mxu0 %vm234_vm3, %v2585_v24  ;;  %v2587_v18 = vmax.f32 %v9442_v42, 0.0  ;;  %3542 = vrot.lane.b32.xlu0 %v12094_v29, %s10171_s6 }
 0x3a3   : > { %v2586_v23 = vmax.f32 %v2475_v59, 0.0 }
 0x3a4   : > { %v3477_v60 = vpop.permute.xlu0 %3476 }
 0x3a5   : > { %v9445_v15 = vpop.f32.mrb[46].mxu1  ;;  %9492 = vmatprep.mubr.msk.f32.mxu0 %vm234_vm3, %v2586_v23  ;;  %v12102_v61 = vsel %vm1416_vm4, %v3477_v60, %v11560_v57 }
 0x3a6   : > { %v2485_v2 = vpop.f32.mrb[47].mxu1  ;;  %9493 = vmatmul.mubr.msk.f32.gmra.mrb[76].mxu0 %vm234_vm3, %v2587_v18  ;;  %v2589_v3 = vmax.f32 %v9445_v15, 0.0  ;;  %3540 = vrot.lane.b32.xlu0 %v12102_v61, %s10171_s6 }
 0x3a7   : > { %v2588_v35 = vmax.f32 %v2485_v2, 0.0 }
 0x3a8   : > { %v3483_v40 = vpop.permute.xlu0 %3482 }
 0x3a9   : > { %v9448_v7 = vpop.f32.mrb[48].mxu1  ;;  %9495 = vmatprep.mubr.msk.f32.mxu0 %vm234_vm3, %v2588_v35  ;;  %v12110_v17 = vsel %vm1416_vm4, %v3483_v40, %v11602_v8 }
 0x3aa   : > { %v2495_v55 = vpop.f32.mrb[49].mxu1  ;;  %9496 = vmatmul.mubr.msk.f32.gmra.mrb[78].mxu0 %vm234_vm3, %v2589_v3  ;;  %v2591_v22 = vmax.f32 %v9448_v7, 0.0  ;;  %3546 = vrot.lane.b32.xlu0 %v12110_v17, %s10171_s6 }
 0x3ab   : > { %v2590_v34 = vmax.f32 %v2495_v55, 0.0 }
 0x3ac   : > { %v3481_v26 = vpop.permute.xlu0 %3480 }
 0x3ad   : > { %v9451_v47 = vpop.f32.mrb[50].mxu1  ;;  %9498 = vmatprep.mubr.msk.f32.mxu0 %vm234_vm3, %v2590_v34  ;;  %v12118_v12 = vsel %vm1416_vm4, %v3481_v26, %v11594_v28 }
 0x3ae   : > { %v2505_v1 = vpop.f32.mrb[51].mxu1  ;;  %9499 = vmatmul.mubr.msk.f32.gmra.mrb[80].mxu0 %vm234_vm3, %v2591_v22  ;;  %v2593_v30 = vmax.f32 %v9451_v47, 0.0  ;;  %3544 = vrot.lane.b32.xlu0 %v12118_v12, %s10171_s6 }
 0x3af   : > { %v2592_v41 = vmax.f32 %v2505_v1, 0.0 }
 0x3b0   : > { %v3487_v24 = vpop.permute.xlu0 %3486 }
 0x3b1   : > { %v9454_v51 = vpop.f32.mrb[52].mxu1  ;;  %9501 = vmatprep.mubr.msk.f32.mxu0 %vm234_vm3, %v2592_v41  ;;  %v12126_v50 = vsel %vm1416_vm4, %v3487_v24, %v11635_v37 }
 0x3b2   : > { %v2515_v42 = vpop.f32.mrb[53].mxu1  ;;  %9502 = vmatmul.mubr.msk.f32.gmra.mrb[82].mxu0 %vm234_vm3, %v2593_v30  ;;  %v2595_v23 = vmax.f32 %v9454_v51, 0.0  ;;  %3550 = vrot.lane.b32.xlu0 %v12126_v50, %s10171_s6 }
 0x3b3   : > { %v2594_v59 = vmax.f32 %v2515_v42, 0.0 }
 0x3b4   : > { %v3485_v15 = vpop.permute.xlu0 %3484 }
 0x3b5   : > { %v9457_v18 = vpop.f32.mrb[54].mxu1  ;;  %9504 = vmatprep.mubr.msk.f32.mxu0 %vm234_vm3, %v2594_v59  ;;  %v12134_v2 = vsel %vm1416_vm4, %v3485_v15, %v11627_v19 }
 0x3b6   : > { %v2525_v60 = vpop.f32.mrb[55].mxu1  ;;  %9505 = vmatmul.mubr.msk.f32.gmra.mrb[84].mxu0 %vm234_vm3, %v2595_v23  ;;  %v2597_v3 = vmax.f32 %v9457_v18, 0.0  ;;  %3548 = vrot.lane.b32.xlu0 %v12134_v2, %s10171_s6 }
 0x3b7   : > { %v2596_v35 = vmax.f32 %v2525_v60, 0.0 }
 0x3b8   : > { %v3491_v40 = vpop.permute.xlu0 %3490 }
 0x3b9   : > { %v9460_v7 = vpop.f32.mrb[56].mxu1  ;;  %9507 = vmatprep.mubr.msk.f32.mxu0 %vm234_vm3, %v2596_v35  ;;  %v12142_v34 = vsel %vm1416_vm4, %v3491_v40, %v11660_v4  ;;  %v3651_v47 = vpop.permute.xlu1 %3650 }
 0x3ba   : > { %v2535_v55 = vpop.f32.mrb[57].mxu1  ;;  %9508 = vmatmul.mubr.msk.f32.gmra.mrb[86].mxu0 %vm234_vm3, %v2597_v3  ;;  %v2599_v26 = vmax.f32 %v9460_v7, 0.0  ;;  %v12146_v1 = vsel %vm1416_vm4, %v3651_v47, %v11752_v13  ;;  %3554 = vrot.lane.b32.xlu0 %v12142_v34, %s10171_s6 }
 0x3bb   : > { %v2598_v22 = vmax.f32 %v2535_v55, 0.0  ;;  %3714 = vrot.lane.b32.xlu1 %v12146_v1, %s10171_s6 }
 0x3bc   : > { %v3489_v30 = vpop.permute.xlu0 %3488 }
 0x3bd   : > { %v9463_v41 = vpop.f32.mrb[58].mxu1  ;;  %9510 = vmatprep.mubr.msk.f32.mxu0 %vm234_vm3, %v2598_v22  ;;  %v12156_v24 = vsel %vm1416_vm4, %v3489_v30, %v11652_v46  ;;  %v3649_v59 = vpop.permute.xlu1 %3648 }
 0x3be   : > { %v2545_v51 = vpop.f32.mrb[59].mxu1  ;;  %9511 = vmatmul.mubr.msk.f32.gmra.mrb[88].mxu0 %vm234_vm3, %v2599_v26  ;;  %v2601_v23 = vmax.f32 %v9463_v41, 0.0  ;;  %v12160_v18 = vsel %vm1416_vm4, %v3649_v59, %v11764_v44  ;;  %3552 = vrot.lane.b32.xlu0 %v12156_v24, %s10171_s6 }
 0x3bf   : > { %v2600_v42 = vmax.f32 %v2545_v51, 0.0  ;;  %3712 = vrot.lane.b32.xlu1 %v12160_v18, %s10171_s6 }
 0x3c0   : > { %v3495_v60 = vpop.permute.xlu0 %3494 }
 0x3c1   : > { %v9466_v15 = vpop.f32.mrb[60].mxu1  ;;  %9513 = vmatprep.mubr.msk.f32.mxu0 %vm234_vm3, %v2600_v42  ;;  %v12170_v3 = vsel %vm1416_vm4, %v3495_v60, %v11686_v54  ;;  %v3655_v40 = vpop.permute.xlu1 %3654 }
 0x3c2   : > { %v2555_v35 = vpop.f32.mrb[61].mxu1  ;;  %9514 = vmatmul.mubr.msk.f32.gmra.mrb[90].mxu0 %vm234_vm3, %v2601_v23  ;;  %v2603_v55 = vmax.f32 %v9466_v15, 0.0  ;;  %v12174_v22 = vsel %vm1416_vm4, %v3655_v40, %v11797_v21  ;;  %3558 = vrot.lane.b32.xlu0 %v12170_v3, %s10171_s6 }
 0x3c3   : > { %v2602_v7 = vmax.f32 %v2555_v35, 0.0  ;;  %3718 = vrot.lane.b32.xlu1 %v12174_v22, %s10171_s6 }
 0x3c4   : > { %v3493_v26 = vpop.permute.xlu0 %3492 }
 0x3c5   : > { %v9469_v47 = vpop.f32.mrb[62].mxu1  ;;  %9516 = vmatprep.mubr.msk.f32.mxu0 %vm234_vm3, %v2602_v7  ;;  %v12184_v30 = vsel %vm1416_vm4, %v3493_v26, %v11677_v32  ;;  %v3653_v51 = vpop.permute.xlu1 %3652 }
 0x3c6   : > { %9517 = vmatmul.mubr.msk.f32.gmra.mrb[92].mxu0 %vm234_vm3, %v2603_v55  ;;  %v2565_v41 = vpop.f32.mrb[63].mxu1  ;;  %v2605_v59 = vmax.f32 %v9469_v47, 0.0  ;;  %v12188_v23 = vsel %vm1416_vm4, %v3653_v51, %v11789_v9  ;;  %3556 = vrot.lane.b32.xlu0 %v12184_v30, %s10171_s6 }
 0x3c7   : > { %v2604_v42 = vmax.f32 %v2565_v41, 0.0  ;;  %3716 = vrot.lane.b32.xlu1 %v12188_v23, %s10171_s6 }
 0x3c8   : > { %v3499_v15 = vpop.permute.xlu0 %3498 }
 0x3c9   : > { %9519 = vmatprep.mubr.msk.f32.mxu0 %vm234_vm3, %v2604_v42  ;;  %v12198_v60 = vsel %vm1416_vm4, %v3499_v15, %v11712_v6  ;;  %v3659_v35 = vpop.permute.xlu1 %3658 }
 0x3ca   : > { %9520 = vmatmul.mubr.msk.f32.gmra.mrb[94].mxu0 %vm234_vm3, %v2605_v59  ;;  %v12202_v7 = vsel %vm1416_vm4, %v3659_v35, %v11825_v33  ;;  %3562 = vrot.lane.b32.xlu0 %v12198_v60, %s10171_s6 }
 0x3cb   : > { %3722 = vrot.lane.b32.xlu1 %v12202_v7, %s10171_s6 }
 0x3cc   : > { %v3497_v40 = vpop.permute.xlu0 %3496 }
 0x3cd   : > { %v12210_v55 = vsel %vm1416_vm4, %v3497_v40, %v11702_v45  ;;  %v3657_v47 = vpop.permute.xlu1 %3656 }
 0x3ce   : > { %v12214_v26 = vsel %vm1416_vm4, %v3657_v47, %v11815_v63  ;;  %3560 = vrot.lane.b32.xlu0 %v12210_v55, %s10171_s6 }
 0x3cf   : > { %3720 = vrot.lane.b32.xlu1 %v12214_v26, %s10171_s6 }
 0x3d0   : > { %v3503_v41 = vpop.permute.xlu0 %3502 }
 0x3d1   : > { %v3663_v51 = vpop.permute.xlu1 %3662  ;;  %v12240_v47 = vsel %vm1416_vm4, %v3503_v41, %v11738_v25 }
 0x3d2   : > { %v12222_v42 = vsel %vm1416_vm4, %v3663_v51, %v11853_v53 }
 0x3d3   : > { %3726 = vrot.lane.b32.xlu1 %v12222_v42, %s10171_s6 }
 0x3d4   : > { %v3501_v59 = vpop.permute.xlu0 %3500 }
 0x3d5   : > { %v12228_v15 = vsel %vm1416_vm4, %v3501_v59, %v11729_v49  ;;  %v3661_v35 = vpop.permute.xlu1 %3660 }
 0x3d6   : > { %v12232_v40 = vsel %vm1416_vm4, %v3661_v35, %v11845_v5  ;;  %3564 = vrot.lane.b32.xlu0 %v12228_v15, %s10171_s6 }
 0x3d7   : > { %3724 = vrot.lane.b32.xlu1 %v12232_v40, %s10171_s6 }
 0x3d9   : > { %v3667_v51 = vpop.permute.xlu1 %3666 }
 0x3da   : > { %v12244_v59 = vsel %vm1416_vm4, %v3667_v51, %v11881_v27  ;;  %3566 = vrot.lane.b32.xlu0 %v12240_v47, %s10171_s6 }
 0x3db   : > { %3730 = vrot.lane.b32.xlu1 %v12244_v59, %s10171_s6 }
 0x3dd   : > { %v3665_v35 = vpop.permute.xlu1 %3664 }
 0x3de   : > { %v12252_v39 = vsel %vm1416_vm4, %v3665_v35, %v11871_v48 }
 0x3df   : > { %3728 = vrot.lane.b32.xlu1 %v12252_v39, %s10171_s6 }
 0x3e1   : > { %v3671_v41 = vpop.permute.xlu1 %3670 }
 0x3e2   : > { %v12258_v31 = vsel %vm1416_vm4, %v3671_v41, %v11905_v52 }
 0x3e3   : > { %3734 = vrot.lane.b32.xlu1 %v12258_v31, %s10171_s6 }
 0x3e5   : > { %v3669_v51 = vpop.permute.xlu1 %3668 }
 0x3e6   : > { %v12264_v25 = vsel %vm1416_vm4, %v3669_v51, %v11897_v11 }
 0x3e7   : > { %3732 = vrot.lane.b32.xlu1 %v12264_v25, %s10171_s6 }
 0x3e9   : > { %v3675_v35 = vpop.permute.xlu1 %3674 }
 0x3ea   : > { %v12270_v49 = vsel %vm1416_vm4, %v3675_v35, %v11927_v58 }
 0x3eb   : > { %3738 = vrot.lane.b32.xlu1 %v12270_v49, %s10171_s6 }
 0x3ed   : > { %v3673_v41 = vpop.permute.xlu1 %3672 }
 0x3ee   : > { %v12276_v45 = vsel %vm1416_vm4, %v3673_v41, %v11919_v43 }
 0x3ef   : > { %3736 = vrot.lane.b32.xlu1 %v12276_v45, %s10171_s6 }
 0x3f1   : > { %v3679_v51 = vpop.permute.xlu1 %3678 }
 0x3f2   : > { %v12288_v35 = vsel %vm1416_vm4, %v3679_v51, %v11946_v38 }
 0x3f5   : > { %v3677_v6 = vpop.permute.xlu1 %3676 }
 0x3f6   : > { %v12282_v11 = vsel %vm1416_vm4, %v3677_v6, %v11939_v36 }
 0x3f7   : > { %3740 = vrot.lane.b32.xlu1 %v12282_v11, %s10171_s6 }
 0x3fb   : > { %3742 = vrot.lane.b32.xlu1 %v12288_v35, %s10171_s6 }
 0x40c   : > { %v3539_v41 = vpop.permute.xlu0 %3538 }
 0x40d   : > { %v3585_v27 = vsub.f32 %v12078_v0, %v3539_v41 }
 0x40f   : > { %v3777_v53 = vmul.f32 %v3585_v27, %v3585_v27 }
 0x410   : > { %v3537_v43 = vpop.permute.xlu0 %3536 }
 0x411   : > { %v3584_v63 = vsub.f32 %v12086_v62, %v3537_v43 }
 0x413   : > { %v3776_v44 = vmul.f32 %v3584_v63, %v3584_v63 }
 0x414   : > { %v3543_v58 = vpop.permute.xlu0 %3542 }
 0x415   : > { %v3587_v13 = vsub.f32 %v12094_v29, %v3543_v58 }
 0x418   : > { %v3541_v52 = vpop.permute.xlu0 %3540 }
 0x41c   : > { %v3547_v48 = vpop.permute.xlu0 %3546 }
 0x420   : > { %v3545_v5 = vpop.permute.xlu0 %3544 }
 0x424   : > { %v3551_v21 = vpop.permute.xlu0 %3550 }
 0x42d   : > { %v3715_v6 = vpop.permute.xlu1 %3714 }
 0x42e   : > { %v3761_v36 = vsub.f32 %v12146_v1, %v3715_v6  ;;  %v3779_v1 = vmul.f32 %v3587_v13, %v3587_v13  ;;  %v12299_v6 = vsub.f32 %v12102_v61, %v3541_v52 }
 0x430   : > { %v3793_v33 = vmul.f32 %v3761_v36, %v3761_v36  ;;  %v3778_v58 = vmul.f32 %v12299_v6, %v12299_v6 }
 0x431   : > { %v3713_v51 = vpop.permute.xlu1 %3712 }
 0x432   : > { %v3809_v38 = vadd.f32 %v3793_v33, %v3777_v53  ;;  %v3760_v9 = vsub.f32 %v12160_v18, %v3713_v51  ;;  %v3549_v33 = vpop.permute.xlu0 %3548 }
 0x434   : > { %v3825_v32 = vmax.f32 %v3809_v38, 1e-30  ;;  %v3792_v54 = vmul.f32 %v3760_v9, %v3760_v9 }
 0x435   : > { %v3719_v46 = vpop.permute.xlu1 %3718 }
 0x436   : > { %10013 = vrsqrt.f32 %v3825_v32  ;;  %v3808_v0 = vadd.f32 %v3792_v54, %v3776_v44  ;;  %v3763_v41 = vsub.f32 %v12174_v22, %v3719_v46  ;;  %v12305_v32 = vsub.f32 %v12110_v17, %v3547_v48  ;;  %v3555_v29 = vpop.permute.xlu0 %3554 }
 0x438   : > { %v3824_v43 = vmax.f32 %v3808_v0, 1e-30  ;;  %v3795_v62 = vmul.f32 %v3763_v41, %v3763_v41  ;;  %v3781_v22 = vmul.f32 %v12305_v32, %v12305_v32 }
 0x439   : > { %v3717_v53 = vpop.permute.xlu1 %3716 }
 0x43a   : > { %10015 = vrsqrt.f32 %v3824_v43  ;;  %v3811_v18 = vadd.f32 %v3795_v62, %v3779_v1  ;;  %v3762_v51 = vsub.f32 %v12188_v23, %v3717_v53  ;;  %v12311_v23 = vsub.f32 %v12118_v12, %v3545_v5 }
 0x43b   : > { %v12321_v5 = vsub.f32 %v12126_v50, %v3551_v21  ;;  %v12333_v50 = vsub.f32 %v12134_v2, %v3549_v33  ;;  %v12345_v33 = vsub.f32 %v12142_v34, %v3555_v29 }
 0x43c   : > { %v3827_v54 = vmax.f32 %v3811_v18, 1e-30  ;;  %v3794_v46 = vmul.f32 %v3762_v51, %v3762_v51  ;;  %v3780_v18 = vmul.f32 %v12311_v23, %v12311_v23 }
 0x43d   : > { %v3723_v44 = vpop.permute.xlu1 %3722  ;;  %v3783_v21 = vmul.f32 %v12321_v5, %v12321_v5  ;;  %v3782_v2 = vmul.f32 %v12333_v50, %v12333_v50  ;;  %v3785_v34 = vmul.f32 %v12345_v33, %v12345_v33 }
 0x43e   : > { %10017 = vrsqrt.f32 %v3827_v54  ;;  %v3810_v52 = vadd.f32 %v3794_v46, %v3778_v58  ;;  %v3765_v38 = vsub.f32 %v12202_v7, %v3723_v44 }
 0x440   : > { %v10014_v61 = vpop.eup %10013  ;;  %v3826_v0 = vmax.f32 %v3810_v52, 1e-30  ;;  %v3797_v1 = vmul.f32 %v3765_v38, %v3765_v38 }
 0x441   : > { %v3873_v43 = vmul.f32 %v10014_v61, %v3761_v36  ;;  %v3721_v48 = vpop.permute.xlu1 %3720  ;;  %v3857_v17 = vmul.f32 %v10014_v61, %v3585_v27  ;;  %v3553_v36 = vpop.permute.xlu0 %3552 }
 0x442   : > { %10019 = vrsqrt.f32 %v3826_v0  ;;  %v3813_v62 = vadd.f32 %v3797_v1, %v3781_v22  ;;  %v12314_v53 = vsub.f32 %v12214_v26, %v3721_v48  ;;  %v12358_v29 = vsub.f32 %v12156_v24, %v3553_v36 }
 0x443   : > { %3986 = vrot.lane.b32.xlu1 %v3873_v43, %s10172_s11  ;;  %3906 = vrot.lane.b32.xlu0 %v3857_v17, %s10172_s11 }
 0x444   : > { %v10016_v7 = vpop.eup %10015  ;;  %v3829_v12 = vmax.f32 %v3813_v62, 1e-30  ;;  %v3796_v27 = vmul.f32 %v12314_v53, %v12314_v53  ;;  %v3784_v36 = vmul.f32 %v12358_v29, %v12358_v29 }
 0x445   : > { %v3872_v58 = vmul.f32 %v10016_v7, %v3760_v9  ;;  %v3727_v54 = vpop.permute.xlu1 %3726  ;;  %v3856_v26 = vmul.f32 %v10016_v7, %v3584_v63  ;;  %v3559_v43 = vpop.permute.xlu0 %3558 }
 0x446   : > { %10021 = vrsqrt.f32 %v3829_v12  ;;  %v3812_v46 = vadd.f32 %v3796_v27, %v3780_v18  ;;  %v12326_v44 = vsub.f32 %v12222_v42, %v3727_v54 }
 0x447   : > { %3984 = vrot.lane.b32.xlu1 %v3872_v58, %s10172_s11  ;;  %3904 = vrot.lane.b32.xlu0 %v3856_v26, %s10172_s11 }
 0x448   : > { %v10018_v52 = vpop.eup %10017  ;;  %v3828_v61 = vmax.f32 %v3812_v46, 1e-30  ;;  %v3799_v9 = vmul.f32 %v12326_v44, %v12326_v44 }
 0x449   : > { %v3875_v63 = vmul.f32 %v10018_v52, %v3763_v41  ;;  %v3725_v22 = vpop.permute.xlu1 %3724  ;;  %v3859_v0 = vmul.f32 %v10018_v52, %v3587_v13  ;;  %v3557_v27 = vpop.permute.xlu0 %3556  ;;  %v12371_v52 = vsub.f32 %v12170_v3, %v3559_v43 }
 0x44a   : > { %10023 = vrsqrt.f32 %v3828_v61  ;;  %v3815_v42 = vadd.f32 %v3799_v9, %v3783_v21  ;;  %v12338_v1 = vsub.f32 %v12232_v40, %v3725_v22 }
 0x44b   : > { %3990 = vrot.lane.b32.xlu1 %v3875_v63, %s10172_s11  ;;  %3910 = vrot.lane.b32.xlu0 %v3859_v0, %s10172_s11  ;;  %v3787_v0 = vmul.f32 %v12371_v52, %v12371_v52 }
 0x44c   : > { %v10020_v48 = vpop.eup %10019  ;;  %v3831_v41 = vmax.f32 %v3815_v42, 1e-30  ;;  %v3798_v13 = vmul.f32 %v12338_v1, %v12338_v1  ;;  %v12385_v42 = vsub.f32 %v12184_v30, %v3557_v27 }
 0x44d   : > { %v3874_v17 = vmul.f32 %v10020_v48, %v3762_v51  ;;  %v3731_v62 = vpop.permute.xlu1 %3730  ;;  %v3858_v40 = vmul.f32 %v10020_v48, %v12299_v6  ;;  %v3563_v22 = vpop.permute.xlu0 %3562 }
 0x44e   : > { %10025 = vrsqrt.f32 %v3831_v41  ;;  %v3814_v7 = vadd.f32 %v3798_v13, %v3782_v2  ;;  %v12351_v18 = vsub.f32 %v12244_v59, %v3731_v62  ;;  %v3786_v13 = vmul.f32 %v12385_v42, %v12385_v42 }
 0x44f   : > { %3988 = vrot.lane.b32.xlu1 %v3874_v17, %s10172_s11  ;;  %3908 = vrot.lane.b32.xlu0 %v3858_v40, %s10172_s11  ;;  %v12399_v17 = vsub.f32 %v12198_v60, %v3563_v22 }
 0x450   : > { %v10022_v12 = vpop.eup %10021  ;;  %v3830_v51 = vmax.f32 %v3814_v7, 1e-30  ;;  %v3801_v6 = vmul.f32 %v12351_v18, %v12351_v18 }
 0x451   : > { %v3877_v58 = vmul.f32 %v10022_v12, %v3765_v38  ;;  %v3729_v54 = vpop.permute.xlu1 %3728  ;;  %v3861_v59 = vmul.f32 %v10022_v12, %v12305_v32  ;;  %v3561_v62 = vpop.permute.xlu0 %3560 }
 0x452   : > { %10027 = vrsqrt.f32 %v3830_v51  ;;  %v3817_v26 = vadd.f32 %v3801_v6, %v3785_v34  ;;  %v12364_v46 = vsub.f32 %v12252_v39, %v3729_v54  ;;  %v3789_v6 = vmul.f32 %v12399_v17, %v12399_v17 }
 0x453   : > { %3994 = vrot.lane.b32.xlu1 %v3877_v58, %s10172_s11  ;;  %3914 = vrot.lane.b32.xlu0 %v3861_v59, %s10172_s11  ;;  %v12413_v27 = vsub.f32 %v12210_v55, %v3561_v62 }
 0x454   : > { %v10024_v24 = vpop.eup %10023  ;;  %v3833_v38 = vmax.f32 %v3817_v26, 1e-30  ;;  %v3800_v32 = vmul.f32 %v12364_v46, %v12364_v46 }
 0x455   : > { %v3876_v21 = vmul.f32 %v10024_v24, %v12314_v53  ;;  %v3735_v61 = vpop.permute.xlu1 %3734  ;;  %v3860_v39 = vmul.f32 %v10024_v24, %v12311_v23 }
 0x456   : > { %10029 = vrsqrt.f32 %v3833_v38  ;;  %v3816_v9 = vadd.f32 %v3800_v32, %v3784_v36  ;;  %v12378_v63 = vsub.f32 %v12258_v31, %v3735_v61  ;;  %v3565_v38 = vpop.permute.xlu0 %3564 }
 0x457   : > { %3992 = vrot.lane.b32.xlu1 %v3876_v21, %s10172_s11  ;;  %3912 = vrot.lane.b32.xlu0 %v3860_v39, %s10172_s11 }
 0x458   : > { %v10026_v3 = vpop.eup %10025  ;;  %v3832_v53 = vmax.f32 %v3816_v9, 1e-30  ;;  %v3803_v23 = vmul.f32 %v12378_v63, %v12378_v63 }
 0x459   : > { %v3879_v43 = vmul.f32 %v10026_v3, %v12326_v44  ;;  %v3733_v31 = vpop.permute.xlu1 %3732  ;;  %v3863_v48 = vmul.f32 %v10026_v3, %v12321_v5 }
 0x45a   : > { %10031 = vrsqrt.f32 %v3832_v53  ;;  %v3819_v2 = vadd.f32 %v3803_v23, %v3787_v0  ;;  %v12392_v41 = vsub.f32 %v12264_v25, %v3733_v31  ;;  %v16535_v0 = vld [vmem:[#allocation7_spill] sm:$0xff] }
 0x45b   : > { %3998 = vrot.lane.b32.xlu1 %v3879_v43, %s10172_s11  ;;  %3918 = vrot.lane.b32.xlu0 %v3863_v48, %s10172_s11  ;;  %v3567_v48 = vpop.permute.xlu0 %3566 }
 0x45c   : > { %v10028_v30 = vpop.eup %10027  ;;  %v3835_v44 = vmax.f32 %v3819_v2, 1e-30  ;;  %v3802_v5 = vmul.f32 %v12392_v41, %v12392_v41 }
 0x45d   : > { %v3878_v40 = vmul.f32 %v10028_v30, %v12338_v1  ;;  %v3739_v25 = vpop.permute.xlu1 %3738  ;;  %v3862_v7 = vmul.f32 %v10028_v30, %v12333_v50 }
 0x45e   : > { %10033 = vrsqrt.f32 %v3835_v44  ;;  %v3818_v12 = vadd.f32 %v3802_v5, %v3786_v13  ;;  %v12406_v34 = vsub.f32 %v12270_v49, %v3739_v25 }
 0x45f   : > { %3996 = vrot.lane.b32.xlu1 %v3878_v40, %s10172_s11  ;;  %3916 = vrot.lane.b32.xlu0 %v3862_v7, %s10172_s11  ;;  %v9476_v60 = vpop.f32.mrb[64].mxu0 }
 0x460   : > { %v10030_v51 = vpop.eup %10029  ;;  %v3834_v1 = vmax.f32 %v3818_v12, 1e-30  ;;  %v3805_v50 = vmul.f32 %v12406_v34, %v12406_v34  ;;  %v2768_v58 = vpop.f32.mrb[65].mxu0  ;;  %v2928_v32 = vmax.f32 %v9476_v60, 0.0 }
 0x461   : > { %v3881_v49 = vmul.f32 %v10030_v51, %v12351_v18  ;;  %v2927_v54 = vmax.f32 %v2768_v58, 0.0  ;;  %v3737_v59 = vpop.permute.xlu1 %3736  ;;  %v3865_v26 = vmul.f32 %v10030_v51, %v12345_v33  ;;  %v3788_v18 = vmul.f32 %v12413_v27, %v12413_v27 }
 0x462   : > { %10035 = vrsqrt.f32 %v3834_v1  ;;  %v3821_v24 = vadd.f32 %v3805_v50, %v3789_v6  ;;  %v12420_v36 = vsub.f32 %v12276_v45, %v3737_v59 }
 0x463   : > { %4002 = vrot.lane.b32.xlu1 %v3881_v49, %s10172_s11  ;;  %3922 = vrot.lane.b32.xlu0 %v3865_v26, %s10172_s11  ;;  %v9479_v55 = vpop.f32.mrb[66].mxu0 }
 0x464   : > { %v10032_v21 = vpop.eup %10031  ;;  %v3837_v61 = vmax.f32 %v3821_v24, 1e-30  ;;  %v3804_v33 = vmul.f32 %v12420_v36, %v12420_v36  ;;  %9526 = vmatprep.mubr.msk.f32.mxu1 %vm234_vm3, %v2927_v54  ;;  %v2778_v39 = vpop.f32.mrb[67].mxu0  ;;  %v2930_v53 = vmax.f32 %v9479_v55, 0.0 }
 0x465   : > { %v3880_v45 = vmul.f32 %v10032_v21, %v12364_v46  ;;  %v2929_v9 = vmax.f32 %v2778_v39, 0.0  ;;  %9527 = vmatmul.mubr.msk.f32.vlgmr.msra.gmra.mrb[64].mxu1 %vm234_vm3, %v2928_v32  ;;  %v3864_v22 = vmul.f32 %v10032_v21, %v12358_v29  ;;  %v12438_v46 = vsub.f32 %v12228_v15, %v3565_v38 }
 0x466   : > { %10037 = vrsqrt.f32 %v3837_v61  ;;  %v3820_v3 = vadd.f32 %v3804_v33, %v3788_v18  ;;  %9933 = vmatpush3.bf16.msk.msra.mxu1 %vm10230_vm2, %v16535_v0 }
 0x467   : > { %4000 = vrot.lane.b32.xlu1 %v3880_v45, %s10172_s11  ;;  %3920 = vrot.lane.b32.xlu0 %v3864_v22, %s10172_s11  ;;  %v9482_v23 = vpop.f32.mrb[68].mxu0  ;;  %v3790_v25 = vmul.f32 %v12438_v46, %v12438_v46 }
 0x468   : > { %v10034_v43 = vpop.eup %10033  ;;  %v3836_v31 = vmax.f32 %v3820_v3, 1e-30  ;;  %9529 = vmatprep.mubr.msk.f32.mxu1 %vm234_vm3, %v2929_v9  ;;  %v2788_v29 = vpop.f32.mrb[69].mxu0  ;;  %9942 = vmatprep.subr.msk.bf16.mxu1 %vm10230_vm2, %v16532_v10  ;;  %v2932_v5 = vmax.f32 %v9482_v23, 0.0 }
 0x469   : > { %v3883_v2 = vmul.f32 %v10034_v43, %v12378_v63  ;;  %v2931_v30 = vmax.f32 %v2788_v29, 0.0  ;;  %v3741_v13 = vpop.permute.xlu1 %3740  ;;  %9530 = vmatmul.mubr.msk.f32.gmra.mrb[66].mxu1 %vm234_vm3, %v2930_v53  ;;  %v3867_v44 = vmul.f32 %v10034_v43, %v12371_v52  ;;  %v12453_v63 = vsub.f32 %v12240_v47, %v3567_v48 }
 0x46a   : > { %10039 = vrsqrt.f32 %v3836_v31  ;;  %v3774_v15 = vsub.f32 %v12282_v11, %v3741_v13 }
 0x46b   : > { %4006 = vrot.lane.b32.xlu1 %v3883_v2, %s10172_s11  ;;  %3926 = vrot.lane.b32.xlu0 %v3867_v44, %s10172_s11  ;;  %v9485_v62 = vpop.f32.mrb[70].mxu0  ;;  %v3791_v49 = vmul.f32 %v12453_v63, %v12453_v63 }
 0x46c   : > { %v10036_v40 = vpop.eup %10035  ;;  %v3806_v7 = vmul.f32 %v3774_v15, %v3774_v15  ;;  %9532 = vmatprep.mubr.msk.f32.mxu1 %vm234_vm3, %v2931_v30  ;;  %v2798_v52 = vpop.f32.mrb[71].mxu0  ;;  %v2934_v50 = vmax.f32 %v9485_v62, 0.0 }
 0x46d   : > { %v3882_v12 = vmul.f32 %v10036_v40, %v12392_v41  ;;  %v2933_v11 = vmax.f32 %v2798_v52, 0.0  ;;  %v3743_v60 = vpop.permute.xlu1 %3742  ;;  %9533 = vmatmul.mubr.msk.f32.gmra.mrb[68].mxu1 %vm234_vm3, %v2932_v5  ;;  %v3866_v51 = vmul.f32 %v10036_v40, %v12385_v42 }
 0x46e   : > { %v3822_v6 = vadd.f32 %v3806_v7, %v3790_v25  ;;  %v3775_v1 = vsub.f32 %v12288_v35, %v3743_v60 }
 0x46f   : > { %4004 = vrot.lane.b32.xlu1 %v3882_v12, %s10172_s11  ;;  %3924 = vrot.lane.b32.xlu0 %v3866_v51, %s10172_s11 }
 0x470   : > { %v10038_v58 = vpop.eup %10037  ;;  %v3838_v41 = vmax.f32 %v3822_v6, 1e-30  ;;  %v3807_v54 = vmul.f32 %v3775_v1, %v3775_v1  ;;  %9535 = vmatprep.mubr.msk.f32.mxu1 %vm234_vm3, %v2933_v11 }
 0x471   : > { %v9488_v47 = vpop.f32.mrb[72].mxu0  ;;  %v3885_v42 = vmul.f32 %v10038_v58, %v12406_v34  ;;  %9536 = vmatmul.mubr.msk.f32.gmra.mrb[70].mxu1 %vm234_vm3, %v2934_v50  ;;  %v3869_v35 = vmul.f32 %v10038_v58, %v12399_v17 }
 0x472   : > { %v2808_v59 = vpop.f32.mrb[73].mxu0  ;;  %10041 = vrsqrt.f32 %v3838_v41  ;;  %v3823_v24 = vadd.f32 %v3807_v54, %v3791_v49  ;;  %v2936_v38 = vmax.f32 %v9488_v47, 0.0 }
 0x473   : > { %v2935_v26 = vmax.f32 %v2808_v59, 0.0  ;;  %4010 = vrot.lane.b32.xlu1 %v3885_v42, %s10172_s11  ;;  %3930 = vrot.lane.b32.xlu0 %v3869_v35, %s10172_s11 }
 0x474   : > { %v10040_v55 = vpop.eup %10039  ;;  %v3839_v21 = vmax.f32 %v3823_v24, 1e-30 }
 0x475   : > { %v9491_v32 = vpop.f32.mrb[74].mxu0  ;;  %9538 = vmatprep.mubr.msk.f32.mxu1 %vm234_vm3, %v2935_v26  ;;  %v3884_v34 = vmul.f32 %v10040_v55, %v12420_v36  ;;  %v3868_v17 = vmul.f32 %v10040_v55, %v12413_v27 }
 0x476   : > { %v2818_v18 = vpop.f32.mrb[75].mxu0  ;;  %9539 = vmatmul.mubr.msk.f32.gmra.mrb[72].mxu1 %vm234_vm3, %v2936_v38  ;;  %10043 = vrsqrt.f32 %v3839_v21  ;;  %v2938_v33 = vmax.f32 %v9491_v32, 0.0 }
 0x477   : > { %v2937_v61 = vmax.f32 %v2818_v18, 0.0  ;;  %4008 = vrot.lane.b32.xlu1 %v3884_v34, %s10172_s11  ;;  %3928 = vrot.lane.b32.xlu0 %v3868_v17, %s10172_s11 }
 0x479   : > { %v9494_v39 = vpop.f32.mrb[76].mxu0  ;;  %9541 = vmatprep.mubr.msk.f32.mxu1 %vm234_vm3, %v2937_v61 }
 0x47a   : > { %v2828_v45 = vpop.f32.mrb[77].mxu0  ;;  %9542 = vmatmul.mubr.msk.f32.gmra.mrb[74].mxu1 %vm234_vm3, %v2938_v33  ;;  %v2940_v22 = vmax.f32 %v9494_v39, 0.0 }
 0x47b   : > { %v2939_v9 = vmax.f32 %v2828_v45, 0.0 }
 0x47c   : > { %v10042_v3 = vpop.eup %10041 }
 0x47d   : > { %v9497_v36 = vpop.f32.mrb[78].mxu0  ;;  %9544 = vmatprep.mubr.msk.f32.mxu1 %vm234_vm3, %v2939_v9  ;;  %v3886_v27 = vmul.f32 %v10042_v3, %v3774_v15  ;;  %v3870_v43 = vmul.f32 %v10042_v3, %v12438_v46 }
 0x47e   : > { %v2838_v53 = vpop.f32.mrb[79].mxu0  ;;  %9545 = vmatmul.mubr.msk.f32.gmra.mrb[76].mxu1 %vm234_vm3, %v2940_v22  ;;  %v2942_v31 = vmax.f32 %v9497_v36, 0.0 }
 0x47f   : > { %v2941_v23 = vmax.f32 %v2838_v53, 0.0  ;;  %4012 = vrot.lane.b32.xlu1 %v3886_v27, %s10172_s11  ;;  %3932 = vrot.lane.b32.xlu0 %v3870_v43, %s10172_s11  ;;  %v3329_v53 = vmul.f32 %v16529_v20, %v16529_v20  ;;  %v3328_v27 = vmul.f32 %v16530_v16, %v16530_v16  ;;  %v3331_v43 = vmul.f32 %v16531_v14, %v16531_v14 }
 0x480   : > { %v10044_v48 = vpop.eup %10043 }
 0x481   : > { %v9500_v29 = vpop.f32.mrb[80].mxu0  ;;  %9547 = vmatprep.mubr.msk.f32.mxu1 %vm234_vm3, %v2941_v23  ;;  %v3887_v30 = vmul.f32 %v10044_v48, %v3775_v1  ;;  %v3871_v44 = vmul.f32 %v10044_v48, %v12453_v63  ;;  %v3330_v48 = vmul.f32 %v11560_v57, %v11560_v57 }
 0x482   : > { %v2848_v2 = vpop.f32.mrb[81].mxu0  ;;  %9548 = vmatmul.mubr.msk.f32.gmra.mrb[78].mxu1 %vm234_vm3, %v2942_v31  ;;  %v2944_v15 = vmax.f32 %v9500_v29, 0.0  ;;  %v8603_v29 = vadd.f32 -1.0, %v3329_v53  ;;  %v3321_v53 = vmul.f32 4.0, %v11660_v4 }
 0x483   : > { %v2943_v13 = vmax.f32 %v2848_v2, 0.0  ;;  %4014 = vrot.lane.b32.xlu1 %v3887_v30, %s10172_s11  ;;  %3934 = vrot.lane.b32.xlu0 %v3871_v44, %s10172_s11  ;;  %v8602_v2 = vadd.f32 -1.0, %v3328_v27  ;;  %v3333_v30 = vmul.f32 %v11602_v8, %v11602_v8  ;;  %v3313_v44 = vmul.f32 4.0, %v16529_v20  ;;  %v16578_v20 = vld [vmem:[#allocation31_spill] sm:$0xff] }
 0x485   : > { %v9503_v46 = vpop.f32.mrb[82].mxu0  ;;  %9550 = vmatprep.mubr.msk.f32.mxu1 %vm234_vm3, %v2943_v13  ;;  %v3332_v13 = vmul.f32 %v11594_v28, %v11594_v28 }
 0x486   : > { %v2858_v5 = vpop.f32.mrb[83].mxu0  ;;  %9551 = vmatmul.mubr.msk.f32.gmra.mrb[80].mxu1 %vm234_vm3, %v2944_v15  ;;  %v2946_v40 = vmax.f32 %v9503_v46, 0.0  ;;  %v3335_v15 = vmul.f32 %v11635_v37, %v11635_v37  ;;  %v3334_v46 = vmul.f32 %v11627_v19, %v11627_v19 }
 0x487   : > { %v2945_v62 = vmax.f32 %v2858_v5, 0.0  ;;  %v3312_v5 = vmul.f32 4.0, %v16530_v16 }
 0x489   : > { %v9506_v25 = vpop.f32.mrb[84].mxu0  ;;  %9553 = vmatprep.mubr.msk.f32.mxu1 %vm234_vm3, %v2945_v62  ;;  %v8605_v62 = vadd.f32 -1.0, %v3331_v43 }
 0x48a   : > { %v2868_v7 = vpop.f32.mrb[85].mxu0  ;;  %9554 = vmatmul.mubr.msk.f32.gmra.mrb[82].mxu1 %vm234_vm3, %v2946_v40  ;;  %v2948_v63 = vmax.f32 %v9506_v25, 0.0  ;;  %v3337_v40 = vmul.f32 %v11660_v4, %v11660_v4  ;;  %v3361_v25 = vmul.f32 %v8603_v29, %v3313_v44 }
 0x48b   : > { %v2947_v52 = vmax.f32 %v2868_v7, 0.0  ;;  %v8604_v7 = vadd.f32 -1.0, %v3330_v48 }
 0x48d   : > { %v9509_v12 = vpop.f32.mrb[86].mxu0  ;;  %9556 = vmatprep.mubr.msk.f32.mxu1 %vm234_vm3, %v2947_v52 }
 0x48e   : > { %v2878_v11 = vpop.f32.mrb[87].mxu0  ;;  %9557 = vmatmul.mubr.msk.f32.gmra.mrb[84].mxu1 %vm234_vm3, %v2948_v63  ;;  %v2950_v51 = vmax.f32 %v9509_v12, 0.0  ;;  %v3360_v63 = vmul.f32 %v8602_v2, %v3312_v5  ;;  %v3315_v12 = vmul.f32 4.0, %v16531_v14  ;;  %v16543_v2 = vld [vmem:[#allocation33_spill] sm:$0xff] }
 0x48f   : > { %v2949_v60 = vmax.f32 %v2878_v11, 0.0  ;;  %v8607_v11 = vadd.f32 -1.0, %v3333_v30  ;;  %v3339_v30 = vmul.f32 %v16543_v2, %v16543_v2  ;;  %v16544_v5 = vld [vmem:[#allocation29_spill] sm:$0xff] }
 0x490   : > { %v12571_v27 = vsel %vm11089_vm7, %v3360_v63, 0.0 }
 0x491   : > { %v9512_v6 = vpop.f32.mrb[88].mxu0  ;;  %9559 = vmatprep.mubr.msk.f32.mxu1 %vm234_vm3, %v2949_v60  ;;  %v8606_v60 = vadd.f32 -1.0, %v3332_v13 }
 0x492   : > { %v2888_v1 = vpop.f32.mrb[89].mxu0  ;;  %9560 = vmatmul.mubr.msk.f32.gmra.mrb[86].mxu1 %vm234_vm3, %v2950_v51  ;;  %v2952_v47 = vmax.f32 %v9512_v6, 0.0  ;;  %v3314_v6 = vmul.f32 4.0, %v11560_v57 }
 0x493   : > { %v2951_v50 = vmax.f32 %v2888_v1, 0.0  ;;  %v3317_v1 = vmul.f32 4.0, %v11602_v8 }
 0x495   : > { %v9515_v58 = vpop.f32.mrb[90].mxu0  ;;  %9562 = vmatprep.mubr.msk.f32.mxu1 %vm234_vm3, %v2951_v50  ;;  %v8609_v50 = vadd.f32 -1.0, %v3335_v15 }
 0x496   : > { %v2898_v49 = vpop.f32.mrb[91].mxu0  ;;  %9563 = vmatmul.mubr.msk.f32.gmra.mrb[88].mxu1 %vm234_vm3, %v2952_v47  ;;  %v2954_v54 = vmax.f32 %v9515_v58, 0.0  ;;  %v8608_v47 = vadd.f32 -1.0, %v3334_v46  ;;  %v3363_v58 = vmul.f32 %v8605_v62, %v3315_v12  ;;  %v3338_v62 = vmul.f32 %v16544_v5, %v16544_v5  ;;  %v16547_v12 = vld [vmem:[#allocation26_spill] sm:$0xff] }
 0x497   : > { %v2953_v41 = vmax.f32 %v2898_v49, 0.0  ;;  %v3316_v49 = vmul.f32 4.0, %v11594_v28 }
 0x498   : > { %v12579_v13 = vsel %vm11089_vm7, %v3363_v58, 0.0 }
 0x499   : > { %v9518_v59 = vpop.f32.mrb[92].mxu0  ;;  %9565 = vmatprep.mubr.msk.f32.mxu1 %vm234_vm3, %v2953_v41  ;;  %v8611_v41 = vadd.f32 -1.0, %v3337_v40  ;;  %v16545_v40 = vld [vmem:[#allocation10_spill] sm:$0xff] }
 0x49a   : > { %v2908_v42 = vpop.f32.mrb[93].mxu0  ;;  %9566 = vmatmul.mubr.msk.f32.gmra.mrb[90].mxu1 %vm234_vm3, %v2954_v54  ;;  %v2956_v35 = vmax.f32 %v9518_v59, 0.0  ;;  %v16541_v54 = vld [vmem:[#allocation23_spill] sm:$0xff] }
 0x49b   : > { %v2955_v26 = vmax.f32 %v2908_v42, 0.0  ;;  %v3336_v59 = vmul.f32 %v16541_v54, %v16541_v54  ;;  %v3362_v42 = vmul.f32 %v8604_v7, %v3314_v6  ;;  %v3369_v44 = vmul.f32 %v8611_v41, %v3321_v53  ;;  %v16546_v7 = vld [vmem:[#allocation48_spill] sm:$0xff]  ;;  %v16548_v6 = vld [vmem:[#allocation42_spill] sm:$0xff] }
 0x49c   : > { %v3392_v63 = vmul.f32 2.0, %v16546_v7  ;;  %v3320_v58 = vmul.f32 4.0, %v16541_v54  ;;  %v8612_v53 = vadd.f32 -1.0, %v3338_v62  ;;  %v16558_v7 = vld [vmem:[#allocation14_spill] sm:$0xff] }
 0x49d   : > { %v9521_v24 = vpop.f32.mrb[94].mxu0  ;;  %9568 = vmatprep.mubr.msk.f32.mxu1 %vm234_vm3, %v2955_v26  ;;  %v3319_v26 = vmul.f32 4.0, %v11635_v37  ;;  %v8610_v46 = vadd.f32 -1.0, %v3336_v59  ;;  %v3323_v59 = vmul.f32 4.0, %v16543_v2 }
 0x49e   : > { %v2918_v38 = vpop.f32.mrb[95].mxu0  ;;  %9569 = vmatmul.mubr.msk.f32.gmra.mrb[92].mxu1 %vm234_vm3, %v2956_v35  ;;  %v2958_v55 = vmax.f32 %v9521_v24, 0.0  ;;  %v3318_v35 = vmul.f32 4.0, %v11627_v19 }
 0x49f   : > { %v2957_v32 = vmax.f32 %v2918_v38, 0.0  ;;  %v12566_v38 = vsel %vm11089_vm7, %v3361_v25, 0.0  ;;  %v3367_v43 = vmul.f32 %v8609_v50, %v3319_v26  ;;  %v3393_v25 = vmul.f32 2.0, %v16545_v40  ;;  %v16549_v26 = vld [vmem:[#allocation12_spill] sm:$0xff] }
 0x4a0   : > { %v3366_v29 = vmul.f32 %v8608_v47, %v3318_v35  ;;  %v3397_v35 = vmul.f32 2.0, %v16549_v26  ;;  %v3401_v40 = vmul.f32 2.0, %v16558_v7  ;;  %v16564_v7 = vld [vmem:[#allocation40_spill] sm:$0xff] }
 0x4a1   : > { %9571 = vmatprep.mubr.msk.f32.mxu1 %vm234_vm3, %v2957_v32  ;;  %v3365_v32 = vmul.f32 %v8607_v11, %v3317_v1  ;;  %v3395_v11 = vmul.f32 2.0, %v16547_v12  ;;  %v3394_v1 = vmul.f32 2.0, %v16548_v6  ;;  %v12618_v10 = vsel %vm11089_vm7, %v3393_v25, 0.0  ;;  %v16556_v25 = vld [vmem:[#allocation11_spill] sm:$0xff] }
 0x4a2   : > { %9572 = vmatmul.mubr.msk.f32.gmra.mrb[94].mxu1 %vm234_vm3, %v2958_v55  ;;  %v3364_v55 = vmul.f32 %v8606_v60, %v3316_v49  ;;  %v12590_v60 = vsel %vm11089_vm7, %v3362_v42, 0.0  ;;  %v12604_v49 = vsel %vm11089_vm7, %v3367_v43, 0.0  ;;  %v12608_v41 = vsel %vm11089_vm7, %v3366_v29, 0.0  ;;  %16550 = vst [vmem:[#allocation35_spill] sm:$0xff] %v12618_v10 }
 0x4a3   : > { %v12595_v50 = vsel %vm11089_vm7, %v3365_v32, 0.0  ;;  %v8613_v42 = vadd.f32 -1.0, %v3339_v30  ;;  %v12614_v32 = vsel %vm11089_vm7, %v3369_v44, 0.0  ;;  %v12622_v43 = vsel %vm11089_vm7, %v3392_v63, 0.0  ;;  %v16553_v30 = vld [vmem:[#allocation28_spill] sm:$0xff] }
 0x4a4   : > { %v12599_v47 = vsel %vm11089_vm7, %v3364_v55, 0.0  ;;  %v3368_v55 = vmul.f32 %v8610_v46, %v3320_v58  ;;  %16551 = vst [vmem:[#allocation52_spill] sm:$0xff] %v12622_v43  ;;  %v12626_v29 = vsel %vm11089_vm7, %v3395_v11, 0.0  ;;  %v3396_v26 = vmul.f32 2.0, %v16553_v30  ;;  %v16555_v46 = vld [vmem:[#allocation51_spill] sm:$0xff]  ;;  %v16559_v11 = vld [vmem:[#allocation50_spill] sm:$0xff] }
 0x4a5   : > { %16552 = vst [vmem:[#allocation53_spill] sm:$0xff] %v12626_v29  ;;  %v12633_v44 = vsel %vm11089_vm7, %v3394_v1, 0.0  ;;  %v3399_v62 = vmul.f32 2.0, %v16555_v46  ;;  %v3398_v58 = vmul.f32 2.0, %v16556_v25  ;;  %v3322_v63 = vmul.f32 4.0, %v16544_v5  ;;  %v16560_v30 = vld [vmem:[#allocation34_spill] sm:$0xff] }
 0x4a6   : > { %16554 = vst [vmem:[#allocation59_spill] sm:$0xff] %v12633_v44  ;;  %v3400_v2 = vmul.f32 2.0, %v16559_v11  ;;  %v3371_v54 = vmul.f32 %v8613_v42, %v3323_v59  ;;  %v3403_v4 = vmul.f32 2.0, %v16560_v30  ;;  %v12645_v19 = vsel %vm11089_vm7, %v3397_v35, 0.0  ;;  %v16562_v46 = vld [vmem:[#allocation13_spill] sm:$0xff]  ;;  %v16565_v42 = vld [vmem:[#allocation22_spill] sm:$0xff] }
 0x4a7   : > { %16561 = vst [vmem:[#allocation44_spill] sm:$0xff] %v12645_v19  ;;  %v12649_v1 = vsel %vm11089_vm7, %v3368_v55, 0.0  ;;  %v3370_v25 = vmul.f32 %v8612_v53, %v3322_v63  ;;  %v3402_v37 = vmul.f32 2.0, %v16562_v46  ;;  %v12654_v5 = vsel %vm11089_vm7, %v3396_v26, 0.0  ;;  %v16566_v11 = vld [vmem:[#allocation32_spill] sm:$0xff]  ;;  %v16570_v63 = vld [vmem:[#allocation9_spill] sm:$0xff] }
 0x4a8   : > { %16563 = vst [vmem:[#allocation38_spill] sm:$0xff] %v12654_v5  ;;  %v3341_v59 = vmul.f32 %v16564_v7, %v16564_v7  ;;  %v3405_v30 = vmul.f32 2.0, %v16565_v42  ;;  %v3340_v35 = vmul.f32 %v16566_v11, %v16566_v11  ;;  %v12663_v28 = vsel %vm11089_vm7, %v3399_v62, 0.0  ;;  %v16569_v53 = vld [vmem:[#allocation36_spill] sm:$0xff] }
 0x4a9   : > { %16567 = vst [vmem:[#allocation60_spill] sm:$0xff] %v12663_v28  ;;  %v12667_v55 = vsel %vm11089_vm7, %v3398_v58, 0.0  ;;  %v3342_v26 = vmul.f32 %v16569_v53, %v16569_v53  ;;  %v3343_v46 = vmul.f32 %v16570_v63, %v16570_v63  ;;  %v12675_v42 = vsel %vm11089_vm7, %v3401_v40, 0.0 }
 0x4aa   : > { %16568 = vst [vmem:[#allocation55_spill] sm:$0xff] %v12667_v55  ;;  %16571 = vst [vmem:[#allocation46_spill] sm:$0xff] %v12675_v42  ;;  %v12679_v8 = vsel %vm11089_vm7, %v3400_v2, 0.0  ;;  %v12683_v62 = vsel %vm11089_vm7, %v3371_v54, 0.0  ;;  %v12689_v0 = vsel %vm11089_vm7, %v3403_v4, 0.0  ;;  %v12695_v40 = vsel %vm11089_vm7, %v3370_v25, 0.0 }
 0x4ab   : > { %16572 = vst [vmem:[#allocation45_spill] sm:$0xff] %v12679_v8  ;;  %16573 = vst [vmem:[#allocation61_spill] sm:$0xff] %v12689_v0  ;;  %v12699_v2 = vsel %vm11089_vm7, %v3402_v37, 0.0  ;;  %v3325_v57 = vmul.f32 4.0, %v16564_v7  ;;  %v3324_v54 = vmul.f32 4.0, %v16566_v11  ;;  %v8615_v14 = vadd.f32 -1.0, %v3341_v59 }
 0x4ac   : > { %16575 = vst [vmem:[#allocation57_spill] sm:$0xff] %v12695_v40  ;;  %16576 = vst [vmem:[#allocation47_spill] sm:$0xff] %v12699_v2  ;;  %v12705_v16 = vsel %vm11089_vm7, %v3405_v30, 0.0  ;;  %v8614_v4 = vadd.f32 -1.0, %v3340_v35  ;;  %v8616_v37 = vadd.f32 -1.0, %v3342_v26  ;;  %v8617_v2 = vadd.f32 -1.0, %v3343_v46 }
 0x4ad   : > { %16577 = vst [vmem:[#allocation67_spill] sm:$0xff] %v12705_v16  ;;  %v3373_v11 = vmul.f32 %v8615_v14, %v3325_v57 }
 0x4b5   : > { %v12504_v21 = vpop.permute.xlu0 %3906  ;;  %v12506_v18 = vpop.permute.xlu1 %3986 }
 0x4b6   : > { %16536 = vst [vmem:[#allocation39_spill] sm:$0xff] %v12506_v18  ;;  %v3953_v25 = vmul.f32 %v12504_v21, %v12566_v38  ;;  %v4033_v40 = vmul.f32 %v12506_v18, %v12618_v10 }
 0x4b8   : > { %v12745_v57 = vadd.f32 %v4033_v40, %v3953_v25 }
 0x4b9   : > { %v12508_v34 = vpop.permute.xlu0 %3904  ;;  %v12510_v61 = vpop.permute.xlu1 %3984 }
 0x4ba   : > { %16537 = vst [vmem:[#allocation27_spill] sm:$0xff] %v12510_v61  ;;  %v3952_v7 = vmul.f32 %v12508_v34, %v12571_v27  ;;  %v4032_v59 = vmul.f32 %v12510_v61, %v12622_v43  ;;  %v3327_v61 = vmul.f32 4.0, %v16570_v63 }
 0x4bd   : > { %v12512_v17 = vpop.permute.xlu0 %3910  ;;  %v12514_v33 = vpop.permute.xlu1 %3990 }
 0x4be   : > { %16538 = vst [vmem:[#allocation25_spill] sm:$0xff] %v12514_v33  ;;  %v3955_v30 = vmul.f32 %v12512_v17, %v12579_v13  ;;  %v4035_v35 = vmul.f32 %v12514_v33, %v12626_v29  ;;  %v3326_v33 = vmul.f32 4.0, %v16569_v53  ;;  %v12748_v53 = vadd.f32 %v4032_v59, %v3952_v7 }
 0x4c0   : > { %v3374_v14 = vmul.f32 %v8616_v37, %v3326_v33  ;;  %v12750_v63 = vadd.f32 %v4035_v35, %v3955_v30  ;;  %v4065_v37 = vmul.f32 %v12745_v57, %v12504_v21 }
 0x4c1   : > { %v12516_v39 = vpop.permute.xlu0 %3908  ;;  %v12518_v45 = vpop.permute.xlu1 %3988 }
 0x4c2   : > { %16539 = vst [vmem:[#allocation43_spill] sm:$0xff] %v12518_v45  ;;  %v4034_v46 = vmul.f32 %v12518_v45, %v12633_v44  ;;  %v12796_v59 = vsel %vm11089_vm7, %v3374_v14, 0.0 }
 0x4c5   : > { %v12520_v9 = vpop.permute.xlu0 %3914  ;;  %v12522_v22 = vpop.permute.xlu1 %3994 }
 0x4c6   : > { %16540 = vst [vmem:[#allocation37_spill] sm:$0xff] %v12522_v22  ;;  %v3957_v26 = vmul.f32 %v12520_v9, %v12595_v50  ;;  %v4037_v43 = vmul.f32 %v12522_v22, %v12645_v19  ;;  %v3372_v19 = vmul.f32 %v8614_v4, %v3324_v54  ;;  %v16581_v22 = vld [vmem:[#allocation20_spill] sm:$0xff] }
 0x4c7   : > { %v3406_v16 = vmul.f32 2.0, %v16581_v22 }
 0x4c8   : > { %v12778_v25 = vsel %vm11089_vm7, %v3372_v19, 0.0  ;;  %v4064_v19 = vmul.f32 %v12748_v53, %v12508_v34 }
 0x4c9   : > { %v12524_v36 = vpop.permute.xlu0 %3912  ;;  %v12526_v3 = vpop.permute.xlu1 %3992 }
 0x4ca   : > { %v3956_v44 = vmul.f32 %v12524_v36, %v12599_v47  ;;  %v4036_v45 = vmul.f32 %v12526_v3, %v12654_v5  ;;  %v12754_v5 = vadd.f32 %v4037_v43, %v3957_v26 }
 0x4cc   : > { %v12764_v7 = vadd.f32 %v4036_v45, %v3956_v44  ;;  %v12782_v45 = vsel %vm11089_vm7, %v3406_v16, 0.0  ;;  %v4067_v16 = vmul.f32 %v12750_v63, %v12512_v17 }
 0x4cd   : > { %v12532_v23 = vpop.permute.xlu0 %3918  ;;  %v12536_v31 = vpop.permute.xlu1 %3998  ;;  %16583 = vst [vmem:[#allocation65_spill] sm:$0xff] %v12782_v45 }
 0x4ce   : > { %v3959_v54 = vmul.f32 %v12532_v23, %v12604_v49  ;;  %v4039_v40 = vmul.f32 %v12536_v31, %v12663_v28  ;;  %v4068_v14 = vmul.f32 %v12764_v7, %v12524_v36 }
 0x4d0   : > { %v12804_v30 = vadd.f32 %v4039_v40, %v3959_v54  ;;  %v4081_v40 = vsub.f32 %v4065_v37, %v12566_v38 }
 0x4d1   : > { %v12552_v52 = vpop.permute.xlu0 %3916  ;;  %v12555_v51 = vpop.permute.xlu1 %3996 }
 0x4d2   : > { %v4038_v33 = vmul.f32 %v12555_v51, %v12667_v55  ;;  %v12836_v38 = vmul.f32 %v12804_v30, %v12532_v23 }
 0x4d5   : > { %v12573_v48 = vpop.permute.xlu0 %3922  ;;  %v12581_v15 = vpop.permute.xlu1 %4002 }
 0x4d6   : > { %v4041_v43 = vmul.f32 %v12581_v15, %v12675_v42 }
 0x4d9   : > { %v12629_v6 = vpop.permute.xlu0 %3920  ;;  %v12637_v12 = vpop.permute.xlu1 %4000 }
 0x4da   : > { %16557 = vst [vmem:[#allocation49_spill] sm:$0xff] %v12637_v12  ;;  %v3960_v34 = vmul.f32 %v12629_v6, %v12649_v1  ;;  %v4040_v17 = vmul.f32 %v12637_v12, %v12679_v8  ;;  %v16589_v8 = vld [vmem:[#allocation56_spill] sm:$0xff] }
 0x4dd   : > { %v12685_v58 = vpop.permute.xlu0 %3926  ;;  %v12691_v56 = vpop.permute.xlu1 %4006 }
 0x4de   : > { %16574 = vst [vmem:[#allocation66_spill] sm:$0xff] %v12691_v56  ;;  %v3404_v56 = vmul.f32 2.0, %v16578_v20  ;;  %v3954_v20 = vmul.f32 %v12516_v39, %v12590_v60  ;;  %v3963_v23 = vmul.f32 %v12685_v58, %v12683_v62 }
 0x4e0   : > { %v12734_v29 = vsel %vm11089_vm7, %v3404_v56, 0.0  ;;  %v3375_v56 = vmul.f32 %v8617_v2, %v3327_v61  ;;  %v12752_v0 = vadd.f32 %v4034_v46, %v3954_v20  ;;  %v3958_v61 = vmul.f32 %v12552_v52, %v12608_v41 }
 0x4e1   : > { %v12730_v10 = vpop.permute.xlu0 %3924  ;;  %16580 = vst [vmem:[#allocation58_spill] sm:$0xff] %v12734_v29  ;;  %v12742_v18 = vpop.permute.xlu1 %4004  ;;  %v16582_v29 = vld [vmem:[#allocation41_spill] sm:$0xff]  ;;  %v3961_v20 = vmul.f32 %v12573_v48, %v12614_v32  ;;  %v12772_v2 = vsel %vm11089_vm7, %v3373_v11, 0.0  ;;  %v4069_v46 = vmul.f32 %v12754_v5, %v12520_v9 }
 0x4e2   : > { %16579 = vst [vmem:[#allocation63_spill] sm:$0xff] %v12730_v10  ;;  %v3407_v10 = vmul.f32 2.0, %v16582_v29  ;;  %v12806_v35 = vadd.f32 %v4038_v33, %v3958_v61  ;;  %v12810_v21 = vsel %vm11089_vm7, %v3375_v56, 0.0  ;;  %v12823_v56 = vstv %s2252_s18 }
 0x4e3   : > { %v12814_v26 = vadd.f32 %v4041_v43, %v3961_v20  ;;  %v12826_v61 = vstv %s12720_s17  ;;  %v4080_v20 = vsub.f32 %v4064_v19, %v12571_v27  ;;  %v4083_v43 = vsub.f32 %v4067_v16, %v12579_v13 }
 0x4e4   : > { %v12786_v44 = vsel %vm11089_vm7, %v3407_v10, 0.0  ;;  %v4066_v10 = vmul.f32 %v12752_v0, %v12516_v39  ;;  %v4085_v36 = vsub.f32 %v4069_v46, %v12595_v50  ;;  %v12840_v37 = vmul.f32 %v12806_v35, %v12552_v52  ;;  %v16584_v50 = vld [vmem:[#allocation61_spill] sm:$0xff] }
 0x4e5   : > { %v12774_v4 = vpop.permute.xlu0 %3930  ;;  %v12792_v11 = vpop.permute.xlu1 %4010  ;;  %v12849_v16 = vmul.f32 %v12814_v26, %v12573_v48 }
 0x4e6   : > { %v4082_v24 = vsub.f32 %v4066_v10, %v12590_v60  ;;  %v4084_v60 = vsub.f32 %v4068_v14, %v12599_v47  ;;  %v16585_v10 = vld [vmem:[#allocation66_spill] sm:$0xff] }
 0x4e7   : > { %v4043_v46 = vmul.f32 %v16585_v10, %v16584_v50  ;;  %v4087_v50 = vsub.f32 %v12836_v38, %v12604_v49  ;;  %v16590_v10 = vld [vmem:[#allocation54_spill] sm:$0xff] }
 0x4e9   : > { %v12831_v22 = vpop.permute.xlu0 %3928  ;;  %v12844_v27 = vpop.permute.xlu1 %4008 }
 0x538   : > { %v9528_v39 = vpop.f32.mrb[64].mxu1 }
 0x539   : > { %v3281_v54 = vmax.f32 %v9528_v39, 0.0  ;;  %v3121_v9 = vpop.f32.mrb[65].mxu1  ;;  %v12842_v39 = vadd.f32 %v4040_v17, %v3960_v34 }
 0x53a   : > { %v3280_v33 = vmax.f32 %v3121_v9, 0.0 }
 0x53b   : > { %v4097_v29 = vsub.f32 %v4081_v40, %v3281_v54  ;;  %v16586_v54 = vld [vmem:[#allocation57_spill] sm:$0xff]  ;;  %v16587_v40 = vld [vmem:[#allocation63_spill] sm:$0xff] }
 0x53c   : > { %v4096_v13 = vsub.f32 %v4080_v20, %v3280_v33  ;;  %v9531_v19 = vpop.f32.mrb[66].mxu1  ;;  %v3962_v9 = vmul.f32 %v16587_v40, %v16586_v54  ;;  %v16588_v33 = vld [vmem:[#allocation47_spill] sm:$0xff]  ;;  %v12861_v20 = vpop.permute.xlu0 %3932 }
 0x53d   : > { %v4162_v52 = vmul.f32 %v12823_v56, %v4097_v29  ;;  %v3283_v34 = vmax.f32 %v9531_v19, 0.0  ;;  %v3131_v17 = vpop.f32.mrb[67].mxu1  ;;  %v4042_v47 = vmul.f32 %v12742_v18, %v16588_v33  ;;  %v4086_v29 = vsub.f32 %v12840_v37, %v12608_v41  ;;  %v12868_v19 = vpop.permute.xlu1 %4012 }
 0x53e   : > { %v4161_v14 = vmul.f32 %v12823_v56, %v4096_v13  ;;  %v3282_v48 = vmax.f32 %v3131_v17, 0.0  ;;  %v4089_v13 = vsub.f32 %v12849_v16, %v12614_v32  ;;  %v12875_v17 = vmul.f32 %v12842_v39, %v12629_v6 }
 0x53f   : > { %v4194_v42 = vadd.f32 %v4162_v52, %v16589_v8  ;;  %v4099_v55 = vsub.f32 %v4083_v43, %v3283_v34  ;;  %v12877_v8 = vadd.f32 %v4043_v46, %v3963_v23  ;;  %v16594_v23 = vld [vmem:[#allocation67_spill] sm:$0xff] }
 0x540   : > { %v4193_v28 = vadd.f32 %v4161_v14, %v16590_v10  ;;  %v4098_v12 = vsub.f32 %v4082_v24, %v3282_v48  ;;  %v9534_v33 = vpop.f32.mrb[68].mxu1  ;;  %v12885_v24 = vadd.f32 %v4042_v47, %v3962_v9  ;;  %v16595_v10 = vld [vmem:[#allocation15_spill] sm:$0xff]  ;;  %v16597_v9 = vld [vmem:[#allocation17_spill] sm:$0xff] }
 0x541   : > { %v12882_v43 = vsel %vm198_vm8, %v12826_v61, %v4194_v42  ;;  %v4164_v41 = vmul.f32 %v12823_v56, %v4099_v55  ;;  %v3285_v38 = vmax.f32 %v9534_v33, 0.0  ;;  %v3141_v37 = vpop.f32.mrb[69].mxu1  ;;  %v3965_v42 = vmul.f32 %v12774_v4, %v12772_v2 }
 0x542   : > { %16592 = vst [vmem:[#allocation64_spill] sm:$0xff] %v12882_v43  ;;  %v12890_v32 = vsel %vm198_vm8, %v12826_v61, %v4193_v28  ;;  %v4163_v6 = vmul.f32 %v12823_v56, %v4098_v12  ;;  %v3284_v16 = vmax.f32 %v3141_v37, 0.0  ;;  %5434 = vrot.lane.b32.xlu0 %v12882_v43, %s10170_s28  ;;  %v4045_v55 = vmul.f32 %v12792_v11, %v16594_v23  ;;  %v16596_v12 = vld [vmem:[#allocation58_spill] sm:$0xff] }
 0x543   : > { %16593 = vst [vmem:[#allocation57_spill] sm:$0xff] %v12890_v32  ;;  %v4196_v46 = vadd.f32 %v4164_v41, %v16595_v10  ;;  %v4101_v52 = vsub.f32 %v4085_v36, %v3285_v38  ;;  %9578 = vmatprep.mubr.msk.f32.mxu0 %vm234_vm3, %v12890_v32  ;;  %v3964_v28 = vmul.f32 %v12831_v22, %v12778_v25  ;;  %v16598_v10 = vld [vmem:[#allocation8_spill] sm:$0xff]  ;;  %v16604_v23 = vld [vmem:[#allocation62_spill] sm:$0xff] }
 0x544   : > { %v4044_v34 = vmul.f32 %v12844_v27, %v16596_v12  ;;  %v4195_v33 = vadd.f32 %v4163_v6, %v16597_v9  ;;  %v4100_v47 = vsub.f32 %v4084_v60, %v3284_v16  ;;  %v9537_v14 = vpop.f32.mrb[70].mxu1  ;;  %9579 = vmatmul.mubr.msk.f32.vlgmr.msra.gmra.mrb[96].mxu0 %vm234_vm3, %v12882_v43  ;;  %v4088_v38 = vsub.f32 %v12875_v17, %v12649_v1  ;;  %v12917_v6 = vpop.permute.xlu0 %3934 }
 0x545   : > { %v4166_v48 = vmul.f32 %v12823_v56, %v4101_v52  ;;  %v3287_v41 = vmax.f32 %v9537_v14, 0.0  ;;  %v3151_v36 = vpop.f32.mrb[71].mxu1  ;;  %v4075_v37 = vmul.f32 %v12877_v8, %v12685_v58  ;;  %9939 = vmatpush3.bf16.msk.msra.mxu0 %vm10230_vm2, %v16598_v10  ;;  %v12919_v60 = vpop.permute.xlu1 %4014  ;;  %v4074_v1 = vmul.f32 %v12885_v24, %v16587_v40  ;;  %v16601_v58 = vld [vmem:[#allocation7_spill] sm:$0xff] }
 0x546   : > { %v12924_v16 = vsel %vm198_vm8, %v12826_v61, %v4195_v33  ;;  %v4165_v52 = vmul.f32 %v12823_v56, %v4100_v47  ;;  %v3286_v9 = vmax.f32 %v3151_v36, 0.0  ;;  %5431 = vrot.lane.b32.xlu0 %v12890_v32, %s10170_s28  ;;  %9948 = vmatprep.subr.msk.bf16.mxu0 %vm10230_vm2, %v16601_v58  ;;  %v12934_v17 = vadd.f32 %v4045_v55, %v3965_v42  ;;  %v16603_v14 = vld [vmem:[#allocation19_spill] sm:$0xff]  ;;  %v16608_v32 = vld [vmem:[#allocation18_spill] sm:$0xff] }
 0x547   : > { %16600 = vst [vmem:[#allocation63_spill] sm:$0xff] %v12924_v16  ;;  %v12939_v33 = vsel %vm198_vm8, %v12826_v61, %v4196_v46  ;;  %v4198_v47 = vadd.f32 %v4166_v48, %v16603_v14  ;;  %v4103_v36 = vsub.f32 %v4087_v50, %v3287_v41  ;;  %9581 = vmatprep.mubr.msk.f32.mxu0 %vm234_vm3, %v12924_v16  ;;  %v16607_v14 = vld [vmem:[#allocation24_spill] sm:$0xff] }
 0x548   : > { %16602 = vst [vmem:[#allocation56_spill] sm:$0xff] %v12939_v33  ;;  %v12944_v10 = vadd.f32 %v4044_v34, %v3964_v28  ;;  %v3966_v40 = vmul.f32 %v12861_v20, %v12796_v59  ;;  %v4197_v58 = vadd.f32 %v4165_v52, %v16604_v23  ;;  %v4102_v42 = vsub.f32 %v4086_v29, %v3286_v9 }
 0x549   : > { %v9540_v55 = vpop.f32.mrb[72].mxu1  ;;  %9582 = vmatmul.mubr.msk.f32.gmra.mrb[98].mxu0 %vm234_vm3, %v12939_v33  ;;  %v3967_v46 = vmul.f32 %v12917_v6, %v12810_v21  ;;  %v4047_v50 = vmul.f32 %v12919_v60, %v12786_v44  ;;  %v4168_v48 = vmul.f32 %v12823_v56, %v4103_v36  ;;  %v4046_v41 = vmul.f32 %v12868_v19, %v12782_v45 }
 0x54a   : > { %v3289_v28 = vmax.f32 %v9540_v55, 0.0  ;;  %v3161_v34 = vpop.f32.mrb[73].mxu1  ;;  %v12961_v29 = vsel %vm198_vm8, %v12826_v61, %v4197_v58  ;;  %v4167_v23 = vmul.f32 %v12823_v56, %v4102_v42  ;;  %5440 = vrot.lane.b32.xlu0 %v12939_v33, %s10170_s28  ;;  %v12969_v9 = vsel %vm198_vm8, %v12826_v61, %v4198_v47 }
 0x54b   : > { %16605 = vst [vmem:[#allocation54_spill] sm:$0xff] %v12961_v29  ;;  %v3288_v52 = vmax.f32 %v3161_v34, 0.0  ;;  %16606 = vst [vmem:[#allocation15_spill] sm:$0xff] %v12969_v9  ;;  %v4200_v36 = vadd.f32 %v4168_v48, %v16607_v14  ;;  %9584 = vmatprep.mubr.msk.f32.mxu0 %vm234_vm3, %v12961_v29  ;;  %v4091_v58 = vsub.f32 %v4075_v37, %v12683_v62 }
 0x54c   : > { %v4105_v55 = vsub.f32 %v4089_v13, %v3289_v28  ;;  %v4199_v43 = vadd.f32 %v4167_v23, %v16608_v32  ;;  %v4090_v33 = vsub.f32 %v4074_v1, %v16586_v54  ;;  %v4077_v47 = vmul.f32 %v12934_v17, %v12774_v4  ;;  %v16611_v1 = vld [vmem:[#allocation30_spill] sm:$0xff] }
 0x54d   : > { %v4104_v42 = vsub.f32 %v4088_v38, %v3288_v52  ;;  %v9543_v34 = vpop.f32.mrb[74].mxu1  ;;  %9585 = vmatmul.mubr.msk.f32.gmra.mrb[100].mxu0 %vm234_vm3, %v12969_v9  ;;  %v12981_v45 = vadd.f32 %v4047_v50, %v3967_v46  ;;  %v4076_v62 = vmul.f32 %v12944_v10, %v12831_v22  ;;  %v12986_v32 = vadd.f32 %v4046_v41, %v3966_v40  ;;  %v16612_v46 = vld [vmem:[#allocation23_spill] sm:$0xff] }
 0x54e   : > { %v4170_v13 = vmul.f32 %v12823_v56, %v4105_v55  ;;  %v3291_v48 = vmax.f32 %v9543_v34, 0.0  ;;  %v3171_v28 = vpop.f32.mrb[75].mxu1  ;;  %v12991_v38 = vsel %vm198_vm8, %v12826_v61, %v4199_v43  ;;  %5437 = vrot.lane.b32.xlu0 %v12924_v16, %s10170_s28  ;;  %v12999_v4 = vsel %vm198_vm8, %v12826_v61, %v4200_v36 }
 0x54f   : > { %16609 = vst [vmem:[#allocation58_spill] sm:$0xff] %v12991_v38  ;;  %v4169_v54 = vmul.f32 %v12823_v56, %v4104_v42  ;;  %v3290_v37 = vmax.f32 %v3171_v28, 0.0  ;;  %16610 = vst [vmem:[#allocation17_spill] sm:$0xff] %v12999_v4  ;;  %9587 = vmatprep.mubr.msk.f32.mxu0 %vm234_vm3, %v12991_v38  ;;  %v4093_v23 = vsub.f32 %v4077_v47, %v12772_v2 }
 0x550   : > { %v4202_v22 = vadd.f32 %v4170_v13, %v16611_v1  ;;  %v4107_v40 = vsub.f32 %v4091_v58, %v3291_v48  ;;  %v4092_v55 = vsub.f32 %v4076_v62, %v12778_v25  ;;  %v4079_v58 = vmul.f32 %v12981_v45, %v12917_v6  ;;  %v16615_v6 = vld [vmem:[#allocation33_spill] sm:$0xff]  ;;  %v16616_v48 = vld [vmem:[#allocation39_spill] sm:$0xff] }
 0x551   : > { %v4201_v43 = vadd.f32 %v4169_v54, %v16612_v46  ;;  %v4106_v50 = vsub.f32 %v4090_v33, %v3290_v37  ;;  %v9546_v41 = vpop.f32.mrb[76].mxu1  ;;  %9588 = vmatmul.mubr.msk.f32.gmra.mrb[102].mxu0 %vm234_vm3, %v12999_v4  ;;  %v4078_v34 = vmul.f32 %v12986_v32, %v12861_v20  ;;  %v4113_v28 = vmul.f32 %v12745_v57, %v16616_v48  ;;  %v16617_v62 = vld [vmem:[#allocation29_spill] sm:$0xff]  ;;  %v16618_v20 = vld [vmem:[#allocation27_spill] sm:$0xff] }
 0x552   : > { %v4172_v52 = vmul.f32 %v12823_v56, %v4107_v40  ;;  %v3293_v14 = vmax.f32 %v9546_v41, 0.0  ;;  %v3181_v36 = vpop.f32.mrb[77].mxu1  ;;  %5446 = vrot.lane.b32.xlu0 %v12969_v9, %s10170_s28  ;;  %v13025_v25 = vsel %vm198_vm8, %v12826_v61, %v4202_v22  ;;  %v4112_v22 = vmul.f32 %v12748_v53, %v16618_v20 }
 0x553   : > { %v13015_v42 = vsel %vm198_vm8, %v12826_v61, %v4201_v43  ;;  %v4171_v33 = vmul.f32 %v12823_v56, %v4106_v50  ;;  %v3292_v2 = vmax.f32 %v3181_v36, 0.0  ;;  %16614 = vst [vmem:[#allocation62_spill] sm:$0xff] %v13025_v25  ;;  %v4095_v43 = vsub.f32 %v4079_v58, %v12810_v21  ;;  %v16621_v21 = vld [vmem:[#allocation40_spill] sm:$0xff] }
 0x554   : > { %16613 = vst [vmem:[#allocation19_spill] sm:$0xff] %v13015_v42  ;;  %v4204_v47 = vadd.f32 %v4172_v52, %v16615_v6  ;;  %v4109_v13 = vsub.f32 %v4093_v23, %v3293_v14  ;;  %9590 = vmatprep.mubr.msk.f32.mxu0 %vm234_vm3, %v13015_v42  ;;  %v4094_v52 = vsub.f32 %v4078_v34, %v12796_v59  ;;  %v16623_v6 = vld [vmem:[#allocation35_spill] sm:$0xff]  ;;  %v16624_v34 = vld [vmem:[#allocation25_spill] sm:$0xff] }
 0x555   : > { %v4203_v54 = vadd.f32 %v4171_v33, %v16617_v62  ;;  %v4108_v37 = vsub.f32 %v4092_v55, %v3292_v2  ;;  %v9549_v1 = vpop.f32.mrb[78].mxu1  ;;  %9591 = vmatmul.mubr.msk.f32.gmra.mrb[104].mxu0 %vm234_vm3, %v13025_v25  ;;  %v16622_v55 = vld [vmem:[#allocation32_spill] sm:$0xff]  ;;  %v4129_v59 = vsub.f32 %v4113_v28, %v16623_v6 }
 0x556   : > { %v4174_v40 = vmul.f32 %v12823_v56, %v4109_v13  ;;  %v3295_v46 = vmax.f32 %v9549_v1, 0.0  ;;  %v3191_v50 = vpop.f32.mrb[79].mxu1  ;;  %5443 = vrot.lane.b32.xlu0 %v12961_v29, %s10170_s28  ;;  %v13051_v53 = vsel %vm198_vm8, %v12826_v61, %v4204_v47  ;;  %v4115_v13 = vmul.f32 %v12750_v63, %v16624_v34  ;;  %v16626_v1 = vld [vmem:[#allocation43_spill] sm:$0xff] }
 0x557   : > { %v13042_v57 = vsel %vm198_vm8, %v12826_v61, %v4203_v54  ;;  %v4173_v41 = vmul.f32 %v12823_v56, %v4108_v37  ;;  %v3294_v23 = vmax.f32 %v3191_v50, 0.0  ;;  %16620 = vst [vmem:[#allocation18_spill] sm:$0xff] %v13051_v53  ;;  %v16625_v54 = vld [vmem:[#allocation52_spill] sm:$0xff]  ;;  %v4114_v20 = vmul.f32 %v12752_v0, %v16626_v1  ;;  %v16630_v0 = vld [vmem:[#allocation37_spill] sm:$0xff] }
 0x558   : > { %16619 = vst [vmem:[#allocation24_spill] sm:$0xff] %v13042_v57  ;;  %v4206_v14 = vadd.f32 %v4174_v40, %v16621_v21  ;;  %v4111_v36 = vsub.f32 %v4095_v43, %v3295_v46  ;;  %9593 = vmatprep.mubr.msk.f32.mxu0 %vm234_vm3, %v13042_v57  ;;  %v4128_v37 = vsub.f32 %v4112_v22, %v16625_v54  ;;  %v16629_v22 = vld [vmem:[#allocation9_spill] sm:$0xff]  ;;  %v16637_v54 = vld [vmem:[#allocation48_spill] sm:$0xff] }
 0x559   : > { %v4205_v58 = vadd.f32 %v4173_v41, %v16622_v55  ;;  %v4110_v33 = vsub.f32 %v4094_v52, %v3294_v23  ;;  %v9552_v2 = vpop.f32.mrb[80].mxu1  ;;  %9594 = vmatmul.mubr.msk.f32.gmra.mrb[106].mxu0 %vm234_vm3, %v13051_v53  ;;  %v4117_v41 = vmul.f32 %v12754_v5, %v16630_v0  ;;  %v4116_v23 = vmul.f32 %v12764_v7, %v12526_v3  ;;  %v16631_v52 = vld [vmem:[#allocation36_spill] sm:$0xff] }
 0x55a   : > { %v4176_v47 = vmul.f32 %v12823_v56, %v4111_v36  ;;  %v3297_v48 = vmax.f32 %v9552_v2, 0.0  ;;  %v3201_v62 = vpop.f32.mrb[81].mxu1  ;;  %5452 = vrot.lane.b32.xlu0 %v12999_v4, %s10170_s28  ;;  %v13077_v63 = vsel %vm198_vm8, %v12826_v61, %v4206_v14 }
 0x55b   : > { %v13069_v40 = vsel %vm198_vm8, %v12826_v61, %v4205_v58  ;;  %v4175_v28 = vmul.f32 %v12823_v56, %v4110_v33  ;;  %v3296_v46 = vmax.f32 %v3201_v62, 0.0  ;;  %16628 = vst [vmem:[#allocation23_spill] sm:$0xff] %v13077_v63  ;;  %v16632_v33 = vld [vmem:[#allocation53_spill] sm:$0xff] }
 0x55c   : > { %16627 = vst [vmem:[#allocation30_spill] sm:$0xff] %v13069_v40  ;;  %v4208_v43 = vadd.f32 %v4176_v47, %v16629_v22  ;;  %v4145_v50 = vsub.f32 %v4129_v59, %v3297_v48  ;;  %9596 = vmatprep.mubr.msk.f32.mxu0 %vm234_vm3, %v13069_v40  ;;  %v4131_v2 = vsub.f32 %v4115_v13, %v16632_v33  ;;  %v16634_v59 = vld [vmem:[#allocation59_spill] sm:$0xff]  ;;  %v16636_v13 = vld [vmem:[#allocation10_spill] sm:$0xff] }
 0x55d   : > { %v4207_v21 = vadd.f32 %v4175_v28, %v16631_v52  ;;  %v4144_v36 = vsub.f32 %v4128_v37, %v3296_v46  ;;  %v9555_v55 = vpop.f32.mrb[82].mxu1  ;;  %9597 = vmatmul.mubr.msk.f32.gmra.mrb[108].mxu0 %vm234_vm3, %v13077_v63  ;;  %v4130_v34 = vsub.f32 %v4114_v20, %v16634_v59  ;;  %v16638_v46 = vld [vmem:[#allocation44_spill] sm:$0xff]  ;;  %v16639_v22 = vld [vmem:[#allocation38_spill] sm:$0xff] }
 0x55e   : > { %v4178_v14 = vmul.f32 %v12823_v56, %v4145_v50  ;;  %v3299_v58 = vmax.f32 %v9555_v55, 0.0  ;;  %v3211_v6 = vpop.f32.mrb[83].mxu1  ;;  %5449 = vrot.lane.b32.xlu0 %v12991_v38, %s10170_s28  ;;  %v13103_v47 = vsel %vm198_vm8, %v12826_v61, %v4208_v43  ;;  %v4133_v20 = vsub.f32 %v4117_v41, %v16638_v46 }
 0x55f   : > { %v13094_v5 = vsel %vm198_vm8, %v12826_v61, %v4207_v21  ;;  %v4177_v3 = vmul.f32 %v12823_v56, %v4144_v36  ;;  %v3298_v7 = vmax.f32 %v3211_v6, 0.0  ;;  %16635 = vst [vmem:[#allocation39_spill] sm:$0xff] %v13103_v47  ;;  %v4132_v50 = vsub.f32 %v4116_v23, %v16639_v22  ;;  %v16650_v22 = vld [vmem:[#allocation28_spill] sm:$0xff] }
 0x560   : > { %16633 = vst [vmem:[#allocation33_spill] sm:$0xff] %v13094_v5  ;;  %v4210_v48 = vadd.f32 %v4178_v14, %v16636_v13  ;;  %v4147_v62 = vsub.f32 %v4131_v2, %v3299_v58  ;;  %9599 = vmatprep.mubr.msk.f32.mxu0 %vm234_vm3, %v13094_v5  ;;  %v4119_v43 = vmul.f32 %v12804_v30, %v12536_v31  ;;  %v16642_v30 = vld [vmem:[#allocation26_spill] sm:$0xff]  ;;  %v16645_v13 = vld [vmem:[#allocation60_spill] sm:$0xff] }
 0x561   : > { %v4209_v37 = vadd.f32 %v4177_v3, %v16637_v54  ;;  %v4146_v1 = vsub.f32 %v4130_v34, %v3298_v7  ;;  %v9558_v28 = vpop.f32.mrb[84].mxu1  ;;  %9600 = vmatmul.mubr.msk.f32.gmra.mrb[110].mxu0 %vm234_vm3, %v13103_v47  ;;  %v4118_v41 = vmul.f32 %v12806_v35, %v12555_v51  ;;  %v4121_v51 = vmul.f32 %v12814_v26, %v12581_v15  ;;  %v16643_v35 = vld [vmem:[#allocation42_spill] sm:$0xff]  ;;  %v16644_v3 = vld [vmem:[#allocation49_spill] sm:$0xff]  ;;  %v16646_v15 = vld [vmem:[#allocation55_spill] sm:$0xff] }
 0x562   : > { %v4180_v0 = vmul.f32 %v12823_v56, %v4147_v62  ;;  %v3301_v52 = vmax.f32 %v9558_v28, 0.0  ;;  %v3221_v21 = vpop.f32.mrb[85].mxu1  ;;  %v13119_v36 = vsel %vm198_vm8, %v12826_v61, %v4210_v48  ;;  %5458 = vrot.lane.b32.xlu0 %v13025_v25, %s10170_s28  ;;  %v4120_v7 = vmul.f32 %v12842_v39, %v16644_v3 }
 0x563   : > { %16640 = vst [vmem:[#allocation29_spill] sm:$0xff] %v13119_v36  ;;  %v4179_v55 = vmul.f32 %v12823_v56, %v4146_v1  ;;  %v3300_v14 = vmax.f32 %v3221_v21, 0.0  ;;  %5610 = vrot.lane.b32.xlu1 %v13119_v36, %s10170_s28  ;;  %v13131_v31 = vsel %vm198_vm8, %v12826_v61, %v4209_v37  ;;  %v4135_v48 = vsub.f32 %v4119_v43, %v16645_v13  ;;  %v16648_v1 = vld [vmem:[#allocation12_spill] sm:$0xff] }
 0x564   : > { %16641 = vst [vmem:[#allocation27_spill] sm:$0xff] %v13131_v31  ;;  %v4212_v23 = vadd.f32 %v4180_v0, %v16642_v30  ;;  %v4149_v58 = vsub.f32 %v4133_v20, %v3301_v52  ;;  %9602 = vmatprep.mubr.msk.f32.mxu0 %vm234_vm3, %v13131_v31  ;;  %v4134_v26 = vsub.f32 %v4118_v41, %v16646_v15  ;;  %v16651_v52 = vld [vmem:[#allocation46_spill] sm:$0xff]  ;;  %v16658_v15 = vld [vmem:[#allocation61_spill] sm:$0xff] }
 0x565   : > { %v4211_v33 = vadd.f32 %v4179_v55, %v16643_v35  ;;  %v4148_v2 = vsub.f32 %v4132_v50, %v3300_v14  ;;  %v9561_v6 = vpop.f32.mrb[86].mxu1  ;;  %9603 = vmatmul.mubr.msk.f32.gmra.mrb[112].mxu0 %vm234_vm3, %v13119_v36  ;;  %v4137_v21 = vsub.f32 %v4121_v51, %v16651_v52  ;;  %v16652_v41 = vld [vmem:[#allocation66_spill] sm:$0xff]  ;;  %v16653_v35 = vld [vmem:[#allocation45_spill] sm:$0xff]  ;;  %v16655_v51 = vld [vmem:[#allocation51_spill] sm:$0xff] }
 0x566   : > { %v4182_v59 = vmul.f32 %v12823_v56, %v4149_v58  ;;  %v3303_v34 = vmax.f32 %v9561_v6, 0.0  ;;  %v3231_v62 = vpop.f32.mrb[87].mxu1  ;;  %5455 = vrot.lane.b32.xlu0 %v13015_v42, %s10170_s28  ;;  %v13162_v20 = vsel %vm198_vm8, %v12826_v61, %v4212_v23  ;;  %v4123_v55 = vmul.f32 %v12877_v8, %v16652_v41 }
 0x567   : > { %v4181_v54 = vmul.f32 %v12823_v56, %v4148_v2  ;;  %v3302_v37 = vmax.f32 %v3231_v62, 0.0  ;;  %5607 = vrot.lane.b32.xlu1 %v13131_v31, %s10170_s28  ;;  %v13154_v39 = vsel %vm198_vm8, %v12826_v61, %v4211_v33  ;;  %16649 = vst [vmem:[#allocation32_spill] sm:$0xff] %v13162_v20  ;;  %v4136_v33 = vsub.f32 %v4120_v7, %v16653_v35 }
 0x568   : > { %16647 = vst [vmem:[#allocation40_spill] sm:$0xff] %v13154_v39  ;;  %v4214_v28 = vadd.f32 %v4182_v59, %v16648_v1  ;;  %v4151_v46 = vsub.f32 %v4135_v48, %v3303_v34  ;;  %9605 = vmatprep.mubr.msk.f32.mxu0 %vm234_vm3, %v13154_v39  ;;  %v4122_v23 = vmul.f32 %v12885_v24, %v12742_v18  ;;  %v16657_v59 = vld [vmem:[#allocation11_spill] sm:$0xff] }
 0x569   : > { %v4213_v50 = vadd.f32 %v4181_v54, %v16650_v22  ;;  %v4150_v43 = vsub.f32 %v4134_v26, %v3302_v37  ;;  %v9564_v0 = vpop.f32.mrb[88].mxu1  ;;  %9606 = vmatmul.mubr.msk.f32.gmra.mrb[114].mxu0 %vm234_vm3, %v13162_v20  ;;  %v4125_v24 = vmul.f32 %v12934_v17, %v12792_v11  ;;  %v4124_v62 = vmul.f32 %v12944_v10, %v12844_v27  ;;  %v16659_v11 = vld [vmem:[#allocation47_spill] sm:$0xff]  ;;  %v16661_v10 = vld [vmem:[#allocation14_spill] sm:$0xff] }
 0x56a   : > { %v4184_v14 = vmul.f32 %v12823_v56, %v4151_v46  ;;  %v3305_v30 = vmax.f32 %v9564_v0, 0.0  ;;  %v3241_v58 = vpop.f32.mrb[89].mxu1  ;;  %5464 = vrot.lane.b32.xlu0 %v13051_v53, %s10170_s28  ;;  %v13190_v18 = vsel %vm198_vm8, %v12826_v61, %v4214_v28  ;;  %v4139_v26 = vsub.f32 %v4123_v55, %v16658_v15  ;;  %v16663_v0 = vld [vmem:[#allocation50_spill] sm:$0xff]  ;;  %v16664_v55 = vld [vmem:[#allocation67_spill] sm:$0xff]  ;;  %v16669_v15 = vld [vmem:[#allocation65_spill] sm:$0xff] }
 0x56b   : > { %v4183_v2 = vmul.f32 %v12823_v56, %v4150_v43  ;;  %v3304_v6 = vmax.f32 %v3241_v58, 0.0  ;;  %5616 = vrot.lane.b32.xlu1 %v13162_v20, %s10170_s28  ;;  %v13182_v8 = vsel %vm198_vm8, %v12826_v61, %v4213_v50  ;;  %16656 = vst [vmem:[#allocation25_spill] sm:$0xff] %v13190_v18  ;;  %v4138_v17 = vsub.f32 %v4122_v23, %v16659_v11 }
 0x56c   : > { %16654 = vst [vmem:[#allocation35_spill] sm:$0xff] %v13182_v8  ;;  %v4216_v3 = vadd.f32 %v4184_v14, %v16655_v51  ;;  %v4153_v7 = vsub.f32 %v4137_v21, %v3305_v30  ;;  %9608 = vmatprep.mubr.msk.f32.mxu0 %vm234_vm3, %v13182_v8  ;;  %v4141_v14 = vsub.f32 %v4125_v24, %v16664_v55  ;;  %v16677_v55 = vld [vmem:[#allocation20_spill] sm:$0xff] }
 0x56d   : > { %v4215_v34 = vadd.f32 %v4183_v2, %v16657_v59  ;;  %v4152_v13 = vsub.f32 %v4136_v33, %v3304_v6  ;;  %v9567_v48 = vpop.f32.mrb[90].mxu1  ;;  %9609 = vmatmul.mubr.msk.f32.gmra.mrb[116].mxu0 %vm234_vm3, %v13190_v18  ;;  %v4127_v30 = vmul.f32 %v12981_v45, %v12919_v60  ;;  %v4140_v23 = vsub.f32 %v4124_v62, %v16596_v12  ;;  %v16666_v60 = vld [vmem:[#allocation34_spill] sm:$0xff] }
 0x56e   : > { %v4186_v54 = vmul.f32 %v12823_v56, %v4153_v7  ;;  %v3307_v37 = vmax.f32 %v9567_v48, 0.0  ;;  %v3251_v1 = vpop.f32.mrb[91].mxu1  ;;  %5461 = vrot.lane.b32.xlu0 %v13042_v57, %s10170_s28  ;;  %v13218_v43 = vsel %vm198_vm8, %v12826_v61, %v4216_v3  ;;  %v4126_v2 = vmul.f32 %v12986_v32, %v12868_v19  ;;  %v16668_v32 = vld [vmem:[#allocation13_spill] sm:$0xff] }
 0x56f   : > { %v4185_v28 = vmul.f32 %v12823_v56, %v4152_v13  ;;  %v3306_v46 = vmax.f32 %v3251_v1, 0.0  ;;  %5613 = vrot.lane.b32.xlu1 %v13154_v39, %s10170_s28  ;;  %v13210_v27 = vsel %vm198_vm8, %v12826_v61, %v4215_v34  ;;  %16662 = vst [vmem:[#allocation43_spill] sm:$0xff] %v13218_v43  ;;  %v4143_v48 = vsub.f32 %v4127_v30, %v12786_v44 }
 0x570   : > { %16660 = vst [vmem:[#allocation52_spill] sm:$0xff] %v13210_v27  ;;  %v4218_v22 = vadd.f32 %v4186_v54, %v16661_v10  ;;  %v4155_v50 = vsub.f32 %v4139_v26, %v3307_v37  ;;  %9611 = vmatprep.mubr.msk.f32.mxu0 %vm234_vm3, %v13210_v27  ;;  %v4142_v26 = vsub.f32 %v4126_v2, %v16669_v15  ;;  %v16681_v2 = vld [vmem:[#allocation57_spill] sm:$0xff] }
 0x571   : > { %v4217_v52 = vadd.f32 %v4185_v28, %v16663_v0  ;;  %v4154_v21 = vsub.f32 %v4138_v17, %v3306_v46  ;;  %v9570_v41 = vpop.f32.mrb[92].mxu1  ;;  %9612 = vmatmul.mubr.msk.f32.gmra.mrb[118].mxu0 %vm234_vm3, %v13218_v43  ;;  %v16671_v28 = vld [vmem:[#allocation22_spill] sm:$0xff]  ;;  %v16673_v17 = vld [vmem:[#allocation31_spill] sm:$0xff] }
 0x572   : > { %v4188_v58 = vmul.f32 %v12823_v56, %v4155_v50  ;;  %v3309_v35 = vmax.f32 %v9570_v41, 0.0  ;;  %v3261_v33 = vpop.f32.mrb[93].mxu1  ;;  %5470 = vrot.lane.b32.xlu0 %v13077_v63, %s10170_s28  ;;  %v13246_v19 = vsel %vm198_vm8, %v12826_v61, %v4218_v22 }
 0x573   : > { %v4187_v6 = vmul.f32 %v12823_v56, %v4154_v21  ;;  %v3308_v51 = vmax.f32 %v3261_v33, 0.0  ;;  %5622 = vrot.lane.b32.xlu1 %v13190_v18, %s10170_s28  ;;  %v13238_v45 = vsel %vm198_vm8, %v12826_v61, %v4217_v52  ;;  %16667 = vst [vmem:[#allocation37_spill] sm:$0xff] %v13246_v19  ;;  %v16675_v21 = vld [vmem:[#allocation41_spill] sm:$0xff] }
 0x574   : > { %16665 = vst [vmem:[#allocation9_spill] sm:$0xff] %v13238_v45  ;;  %v4220_v3 = vadd.f32 %v4188_v58, %v16666_v60  ;;  %v4157_v12 = vsub.f32 %v4141_v14, %v3309_v35  ;;  %9614 = vmatprep.mubr.msk.f32.mxu0 %vm234_vm3, %v13238_v45  ;;  %v16680_v35 = vld [vmem:[#allocation64_spill] sm:$0xff] }
 0x575   : > { %v4219_v7 = vadd.f32 %v4187_v6, %v16668_v32  ;;  %v4156_v24 = vsub.f32 %v4140_v23, %v3308_v51  ;;  %v9573_v59 = vpop.f32.mrb[94].mxu1  ;;  %9615 = vmatmul.mubr.msk.f32.gmra.mrb[120].mxu0 %vm234_vm3, %v13246_v19  ;;  %v16682_v60 = vld [vmem:[#allocation56_spill] sm:$0xff] }
 0x576   : > { %v4190_v34 = vmul.f32 %v12823_v56, %v4157_v12  ;;  %v3311_v13 = vmax.f32 %v9573_v59, 0.0  ;;  %v3271_v62 = vpop.f32.mrb[95].mxu1  ;;  %5467 = vrot.lane.b32.xlu0 %v13069_v40, %s10170_s28  ;;  %v13270_v11 = vsel %vm198_vm8, %v12826_v61, %v4220_v3 }
 0x577   : > { %v4189_v54 = vmul.f32 %v12823_v56, %v4156_v24  ;;  %v3310_v37 = vmax.f32 %v3271_v62, 0.0  ;;  %5619 = vrot.lane.b32.xlu1 %v13182_v8, %s10170_s28  ;;  %v13262_v1 = vsel %vm198_vm8, %v12826_v61, %v4219_v7  ;;  %16672 = vst [vmem:[#allocation53_spill] sm:$0xff] %v13270_v11 }
 0x578   : > { %16670 = vst [vmem:[#allocation36_spill] sm:$0xff] %v13262_v1  ;;  %v4222_v46 = vadd.f32 %v4190_v34, %v16671_v28  ;;  %v4159_v44 = vsub.f32 %v4143_v48, %v3311_v13  ;;  %9617 = vmatprep.mubr.msk.f32.mxu0 %vm234_vm3, %v13262_v1 }
 0x579   : > { %v4221_v10 = vadd.f32 %v4189_v54, %v16673_v17  ;;  %v4158_v22 = vsub.f32 %v4142_v26, %v3310_v37  ;;  %9618 = vmatmul.mubr.msk.f32.gmra.mrb[122].mxu0 %vm234_vm3, %v13270_v11 }
 0x57a   : > { %v4192_v50 = vmul.f32 %v12823_v56, %v4159_v44  ;;  %5476 = vrot.lane.b32.xlu0 %v13103_v47, %s10170_s28 }
 0x57b   : > { %v4191_v0 = vmul.f32 %v12823_v56, %v4158_v22  ;;  %5628 = vrot.lane.b32.xlu1 %v13218_v43, %s10170_s28  ;;  %v13284_v52 = vsel %vm198_vm8, %v12826_v61, %v4221_v10  ;;  %v13292_v56 = vsel %vm198_vm8, %v12826_v61, %v4222_v46 }
 0x57c   : > { %16674 = vst [vmem:[#allocation59_spill] sm:$0xff] %v13284_v52  ;;  %v4224_v41 = vadd.f32 %v4192_v50, %v16675_v21  ;;  %9620 = vmatprep.mubr.msk.f32.mxu0 %vm234_vm3, %v13284_v52  ;;  %16676 = vst [vmem:[#allocation10_spill] sm:$0xff] %v13292_v56 }
 0x57d   : > { %v4223_v14 = vadd.f32 %v4191_v0, %v16677_v55  ;;  %9621 = vmatmul.mubr.msk.f32.gmra.mrb[124].mxu0 %vm234_vm3, %v13292_v56 }
 0x57e   : > { %5473 = vrot.lane.b32.xlu0 %v13094_v5, %s10170_s28  ;;  %v13311_v58 = vsel %vm198_vm8, %v12826_v61, %v4224_v41 }
 0x57f   : > { %5625 = vrot.lane.b32.xlu1 %v13210_v27, %s10170_s28  ;;  %v13304_v30 = vsel %vm198_vm8, %v12826_v61, %v4223_v14  ;;  %16679 = vst [vmem:[#allocation44_spill] sm:$0xff] %v13311_v58 }
 0x580   : > { %16678 = vst [vmem:[#allocation48_spill] sm:$0xff] %v13304_v30  ;;  %9623 = vmatprep.mubr.msk.f32.mxu0 %vm234_vm3, %v13304_v30 }
 0x581   : > { %9624 = vmatmul.mubr.msk.f32.gmra.mrb[126].mxu0 %vm234_vm3, %v13311_v58 }
 0x583   : > { %5634 = vrot.lane.b32.xlu1 %v13246_v19, %s10170_s28 }
 0x587   : > { %5631 = vrot.lane.b32.xlu1 %v13238_v45, %s10170_s28 }
 0x58b   : > { %5640 = vrot.lane.b32.xlu1 %v13270_v11, %s10170_s28 }
 0x58f   : > { %5637 = vrot.lane.b32.xlu1 %v13262_v1, %s10170_s28 }
 0x593   : > { %5646 = vrot.lane.b32.xlu1 %v13292_v56, %s10170_s28 }
 0x597   : > { %5643 = vrot.lane.b32.xlu1 %v13284_v52, %s10170_s28 }
 0x59b   : > { %5652 = vrot.lane.b32.xlu1 %v13311_v58, %s10170_s28 }
 0x59f   : > { %5649 = vrot.lane.b32.xlu1 %v13304_v30, %s10170_s28 }
 0x5b4   : > { %v5435_v61 = vpop.permute.xlu0 %5434 }
 0x5b5   : > { %v5436_v33 = vsel %vm1416_vm4, %v5435_v61, %v16680_v35 }
 0x5b6   : > { %5481 = vrot.lane.b32.xlu0 %v5436_v33, %s10170_s28 }
 0x5b8   : > { %v5432_v23 = vpop.permute.xlu0 %5431 }
 0x5b9   : > { %v5433_v6 = vsel %vm1416_vm4, %v5432_v23, %v16681_v2 }
 0x5ba   : > { %5479 = vrot.lane.b32.xlu0 %v5433_v6, %s10170_s28 }
 0x5bc   : > { %v5441_v51 = vpop.permute.xlu0 %5440 }
 0x5bd   : > { %v5442_v3 = vsel %vm1416_vm4, %v5441_v51, %v16682_v60 }
 0x5be   : > { %5485 = vrot.lane.b32.xlu0 %v5442_v3, %s10170_s28 }
 0x5c0   : > { %v5438_v12 = vpop.permute.xlu0 %5437 }
 0x5c1   : > { %v5439_v32 = vsel %vm1416_vm4, %v5438_v12, %v12924_v16 }
 0x5c2   : > { %5483 = vrot.lane.b32.xlu0 %v5439_v32, %s10170_s28 }
 0x5c4   : > { %v5447_v7 = vpop.permute.xlu0 %5446 }
 0x5c5   : > { %v5448_v24 = vsel %vm1416_vm4, %v5447_v7, %v12969_v9 }
 0x5c6   : > { %5489 = vrot.lane.b32.xlu0 %v5448_v24, %s10170_s28 }
 0x5c8   : > { %v5444_v59 = vpop.permute.xlu0 %5443 }
 0x5c9   : > { %v5445_v34 = vsel %vm1416_vm4, %v5444_v59, %v12961_v29 }
 0x5ca   : > { %5487 = vrot.lane.b32.xlu0 %v5445_v34, %s10170_s28 }
 0x5cc   : > { %v5453_v13 = vpop.permute.xlu0 %5452 }
 0x5cd   : > { %v5454_v48 = vsel %vm1416_vm4, %v5453_v13, %v12999_v4 }
 0x5ce   : > { %5493 = vrot.lane.b32.xlu0 %v5454_v48, %s10170_s28 }
 0x5d0   : > { %v5450_v62 = vpop.permute.xlu0 %5449 }
 0x5d1   : > { %v5451_v54 = vsel %vm1416_vm4, %v5450_v62, %v12991_v38 }
 0x5d2   : > { %5491 = vrot.lane.b32.xlu0 %v5451_v54, %s10170_s28 }
 0x5d4   : > { %v5459_v37 = vpop.permute.xlu0 %5458 }
 0x5d5   : > { %v5611_v15 = vpop.permute.xlu1 %5610  ;;  %v5460_v26 = vsel %vm1416_vm4, %v5459_v37, %v13025_v25 }
 0x5d6   : > { %v5612_v28 = vsel %vm1416_vm4, %v5611_v15, %v13119_v36  ;;  %5497 = vrot.lane.b32.xlu0 %v5460_v26, %s10170_s28 }
 0x5d7   : > { %5657 = vrot.lane.b32.xlu1 %v5612_v28, %s10170_s28 }
 0x5d8   : > { %v5456_v46 = vpop.permute.xlu0 %5455 }
 0x5d9   : > { %v5608_v44 = vpop.permute.xlu1 %5607  ;;  %v5457_v17 = vsel %vm1416_vm4, %v5456_v46, %v13015_v42 }
 0x5da   : > { %v5609_v10 = vsel %vm1416_vm4, %v5608_v44, %v13131_v31  ;;  %5495 = vrot.lane.b32.xlu0 %v5457_v17, %s10170_s28 }
 0x5db   : > { %5655 = vrot.lane.b32.xlu1 %v5609_v10, %s10170_s28 }
 0x5dc   : > { %v5465_v22 = vpop.permute.xlu0 %5464 }
 0x5dd   : > { %v5617_v50 = vpop.permute.xlu1 %5616  ;;  %v5466_v0 = vsel %vm1416_vm4, %v5465_v22, %v13051_v53 }
 0x5de   : > { %v5618_v21 = vsel %vm1416_vm4, %v5617_v50, %v13162_v20  ;;  %5501 = vrot.lane.b32.xlu0 %v5466_v0, %s10170_s28 }
 0x5df   : > { %5661 = vrot.lane.b32.xlu1 %v5618_v21, %s10170_s28 }
 0x5e0   : > { %v5462_v41 = vpop.permute.xlu0 %5461 }
 0x5e1   : > { %v5614_v55 = vpop.permute.xlu1 %5613  ;;  %v5463_v14 = vsel %vm1416_vm4, %v5462_v41, %v13042_v57 }
 0x5e2   : > { %v5615_v61 = vsel %vm1416_vm4, %v5614_v55, %v13154_v39  ;;  %5499 = vrot.lane.b32.xlu0 %v5463_v14, %s10170_s28 }
 0x5e3   : > { %5659 = vrot.lane.b32.xlu1 %v5615_v61, %s10170_s28 }
 0x5e4   : > { %v5471_v33 = vpop.permute.xlu0 %5470 }
 0x5e5   : > { %v5623_v23 = vpop.permute.xlu1 %5622  ;;  %v5472_v6 = vsel %vm1416_vm4, %v5471_v33, %v13077_v63 }
 0x5e6   : > { %v5624_v51 = vsel %vm1416_vm4, %v5623_v23, %v13190_v18  ;;  %5505 = vrot.lane.b32.xlu0 %v5472_v6, %s10170_s28 }
 0x5e7   : > { %5665 = vrot.lane.b32.xlu1 %v5624_v51, %s10170_s28 }
 0x5e8   : > { %v5468_v3 = vpop.permute.xlu0 %5467 }
 0x5e9   : > { %v5620_v12 = vpop.permute.xlu1 %5619  ;;  %v5469_v32 = vsel %vm1416_vm4, %v5468_v3, %v13069_v40 }
 0x5ea   : > { %v5621_v7 = vsel %vm1416_vm4, %v5620_v12, %v13182_v8  ;;  %5503 = vrot.lane.b32.xlu0 %v5469_v32, %s10170_s28 }
 0x5eb   : > { %5663 = vrot.lane.b32.xlu1 %v5621_v7, %s10170_s28 }
 0x5ec   : > { %v5477_v24 = vpop.permute.xlu0 %5476 }
 0x5ed   : > { %v5629_v59 = vpop.permute.xlu1 %5628  ;;  %v5478_v34 = vsel %vm1416_vm4, %v5477_v24, %v13103_v47  ;;  %v16683_v24 = vld [vmem:[#allocation5_spill] sm:$0xff] }
 0x5ee   : > { %v5630_v13 = vsel %vm1416_vm4, %v5629_v59, %v13218_v43  ;;  %5509 = vrot.lane.b32.xlu0 %v5478_v34, %s10170_s28 }
 0x5ef   : > { %5669 = vrot.lane.b32.xlu1 %v5630_v13, %s10170_s28  ;;  %v16685_v13 = vld [vmem:[#allocation8_spill] sm:$0xff] }
 0x5f0   : > { %v5474_v48 = vpop.permute.xlu0 %5473 }
 0x5f1   : > { %v5626_v62 = vpop.permute.xlu1 %5625  ;;  %v5475_v54 = vsel %vm1416_vm4, %v5474_v48, %v13094_v5 }
 0x5f2   : > { %v5627_v37 = vsel %vm1416_vm4, %v5626_v62, %v13210_v27  ;;  %5507 = vrot.lane.b32.xlu0 %v5475_v54, %s10170_s28 }
 0x5f3   : > { %5667 = vrot.lane.b32.xlu1 %v5627_v37, %s10170_s28 }
 0x5f5   : > { %v5635_v15 = vpop.permute.xlu1 %5634 }
 0x5f6   : > { %v5636_v26 = vsel %vm1416_vm4, %v5635_v15, %v13246_v19 }
 0x5f7   : > { %5673 = vrot.lane.b32.xlu1 %v5636_v26, %s10170_s28 }
 0x5f9   : > { %v5632_v28 = vpop.permute.xlu1 %5631 }
 0x5fa   : > { %v5633_v46 = vsel %vm1416_vm4, %v5632_v28, %v13238_v45 }
 0x5fb   : > { %5671 = vrot.lane.b32.xlu1 %v5633_v46, %s10170_s28 }
 0x5fd   : > { %v5641_v44 = vpop.permute.xlu1 %5640 }
 0x5fe   : > { %v5642_v17 = vsel %vm1416_vm4, %v5641_v44, %v13270_v11 }
 0x5ff   : > { %5677 = vrot.lane.b32.xlu1 %v5642_v17, %s10170_s28 }
 0x601   : > { %v5638_v10 = vpop.permute.xlu1 %5637 }
 0x602   : > { %v5639_v22 = vsel %vm1416_vm4, %v5638_v10, %v13262_v1 }
 0x603   : > { %5675 = vrot.lane.b32.xlu1 %v5639_v22, %s10170_s28 }
 0x605   : > { %v5647_v50 = vpop.permute.xlu1 %5646 }
 0x606   : > { %v5648_v0 = vsel %vm1416_vm4, %v5647_v50, %v13292_v56 }
 0x607   : > { %5681 = vrot.lane.b32.xlu1 %v5648_v0, %s10170_s28 }
 0x609   : > { %v5644_v21 = vpop.permute.xlu1 %5643 }
 0x60a   : > { %v5645_v41 = vsel %vm1416_vm4, %v5644_v21, %v13284_v52 }
 0x60b   : > { %5679 = vrot.lane.b32.xlu1 %v5645_v41, %s10170_s28 }
 0x60d   : > { %v5653_v55 = vpop.permute.xlu1 %5652 }
 0x60e   : > { %v5654_v14 = vsel %vm1416_vm4, %v5653_v55, %v13311_v58 }
 0x60f   : > { %5685 = vrot.lane.b32.xlu1 %v5654_v14, %s10170_s28 }
 0x611   : > { %v5650_v61 = vpop.permute.xlu1 %5649 }
 0x612   : > { %v5651_v33 = vsel %vm1416_vm4, %v5650_v61, %v13304_v30 }
 0x613   : > { %5683 = vrot.lane.b32.xlu1 %v5651_v33, %s10170_s28 }
 0x617   : > { %v9580_v23 = vpop.f32.mrb[96].mxu0 }
 0x618   : > { %v4422_v6 = vpop.f32.mrb[97].mxu0  ;;  %v4582_v3 = vmax.f32 %v9580_v23, 0.0 }
 0x619   : > { %v4581_v51 = vmax.f32 %v4422_v6, 0.0 }
 0x61b   : > { %9630 = vmatprep.mubr.msk.f32.mxu1 %vm234_vm3, %v4581_v51 }
 0x61c   : > { %v9583_v12 = vpop.f32.mrb[98].mxu0  ;;  %9631 = vmatmul.mubr.msk.f32.vlgmr.msra.gmra.mrb[96].mxu1 %vm234_vm3, %v4582_v3 }
 0x61d   : > { %v4432_v32 = vpop.f32.mrb[99].mxu0  ;;  %9945 = vmatpush3.bf16.msk.msra.mxu1 %vm10230_vm2, %v16683_v24  ;;  %v4584_v34 = vmax.f32 %v9583_v12, 0.0 }
 0x61e   : > { %v4583_v7 = vmax.f32 %v4432_v32, 0.0  ;;  %9954 = vmatprep.subr.msk.bf16.mxu1 %vm10230_vm2, %v16685_v13 }
 0x620   : > { %v9586_v48 = vpop.f32.mrb[100].mxu0  ;;  %9633 = vmatprep.mubr.msk.f32.mxu1 %vm234_vm3, %v4583_v7 }
 0x621   : > { %v4442_v62 = vpop.f32.mrb[101].mxu0  ;;  %9634 = vmatmul.mubr.msk.f32.gmra.mrb[98].mxu1 %vm234_vm3, %v4584_v34  ;;  %v4586_v37 = vmax.f32 %v9586_v48, 0.0 }
 0x622   : > { %v4585_v54 = vmax.f32 %v4442_v62, 0.0 }
 0x624   : > { %v9589_v15 = vpop.f32.mrb[102].mxu0  ;;  %9636 = vmatprep.mubr.msk.f32.mxu1 %vm234_vm3, %v4585_v54 }
 0x625   : > { %v4452_v26 = vpop.f32.mrb[103].mxu0  ;;  %9637 = vmatmul.mubr.msk.f32.gmra.mrb[100].mxu1 %vm234_vm3, %v4586_v37  ;;  %v4588_v46 = vmax.f32 %v9589_v15, 0.0 }
 0x626   : > { %v4587_v28 = vmax.f32 %v4452_v26, 0.0 }
 0x628   : > { %v9592_v44 = vpop.f32.mrb[104].mxu0  ;;  %9639 = vmatprep.mubr.msk.f32.mxu1 %vm234_vm3, %v4587_v28  ;;  %v5482_v17 = vpop.permute.xlu0 %5481 }
 0x629   : > { %v4462_v10 = vpop.f32.mrb[105].mxu0  ;;  %9640 = vmatmul.mubr.msk.f32.gmra.mrb[102].mxu1 %vm234_vm3, %v4588_v46  ;;  %v13443_v22 = vsel %vm1416_vm4, %v5482_v17, %v16680_v35  ;;  %v4590_v0 = vmax.f32 %v9592_v44, 0.0 }
 0x62a   : > { %v4589_v50 = vmax.f32 %v4462_v10, 0.0  ;;  %5545 = vrot.lane.b32.xlu0 %v13443_v22, %s10171_s6 }
 0x62c   : > { %v9595_v21 = vpop.f32.mrb[106].mxu0  ;;  %9642 = vmatprep.mubr.msk.f32.mxu1 %vm234_vm3, %v4589_v50  ;;  %v5480_v41 = vpop.permute.xlu0 %5479 }
 0x62d   : > { %v4472_v55 = vpop.f32.mrb[107].mxu0  ;;  %9643 = vmatmul.mubr.msk.f32.gmra.mrb[104].mxu1 %vm234_vm3, %v4590_v0  ;;  %v13451_v14 = vsel %vm1416_vm4, %v5480_v41, %v16681_v2  ;;  %v4592_v33 = vmax.f32 %v9595_v21, 0.0 }
 0x62e   : > { %v4591_v61 = vmax.f32 %v4472_v55, 0.0  ;;  %5543 = vrot.lane.b32.xlu0 %v13451_v14, %s10171_s6 }
 0x630   : > { %v9598_v23 = vpop.f32.mrb[108].mxu0  ;;  %9645 = vmatprep.mubr.msk.f32.mxu1 %vm234_vm3, %v4591_v61  ;;  %v5486_v6 = vpop.permute.xlu0 %5485 }
 0x631   : > { %v4482_v51 = vpop.f32.mrb[109].mxu0  ;;  %9646 = vmatmul.mubr.msk.f32.gmra.mrb[106].mxu1 %vm234_vm3, %v4592_v33  ;;  %v13459_v3 = vsel %vm1416_vm4, %v5486_v6, %v16682_v60  ;;  %v4594_v32 = vmax.f32 %v9598_v23, 0.0 }
 0x632   : > { %v4593_v12 = vmax.f32 %v4482_v51, 0.0  ;;  %5549 = vrot.lane.b32.xlu0 %v13459_v3, %s10171_s6 }
 0x634   : > { %v9601_v7 = vpop.f32.mrb[110].mxu0  ;;  %9648 = vmatprep.mubr.msk.f32.mxu1 %vm234_vm3, %v4593_v12  ;;  %v5484_v24 = vpop.permute.xlu0 %5483 }
 0x635   : > { %v4492_v34 = vpop.f32.mrb[111].mxu0  ;;  %9649 = vmatmul.mubr.msk.f32.gmra.mrb[108].mxu1 %vm234_vm3, %v4594_v32  ;;  %v13467_v48 = vsel %vm1416_vm4, %v5484_v24, %v12924_v16  ;;  %v4596_v54 = vmax.f32 %v9601_v7, 0.0 }
 0x636   : > { %v4595_v62 = vmax.f32 %v4492_v34, 0.0  ;;  %5547 = vrot.lane.b32.xlu0 %v13467_v48, %s10171_s6 }
 0x638   : > { %v9604_v37 = vpop.f32.mrb[112].mxu0  ;;  %9651 = vmatprep.mubr.msk.f32.mxu1 %vm234_vm3, %v4595_v62  ;;  %v5490_v15 = vpop.permute.xlu0 %5489 }
 0x639   : > { %v4502_v26 = vpop.f32.mrb[113].mxu0  ;;  %9652 = vmatmul.mubr.msk.f32.gmra.mrb[110].mxu1 %vm234_vm3, %v4596_v54  ;;  %v13475_v28 = vsel %vm1416_vm4, %v5490_v15, %v12969_v9  ;;  %v4598_v44 = vmax.f32 %v9604_v37, 0.0 }
 0x63a   : > { %v4597_v46 = vmax.f32 %v4502_v26, 0.0  ;;  %5553 = vrot.lane.b32.xlu0 %v13475_v28, %s10171_s6 }
 0x63c   : > { %v9607_v17 = vpop.f32.mrb[114].mxu0  ;;  %9654 = vmatprep.mubr.msk.f32.mxu1 %vm234_vm3, %v4597_v46  ;;  %v5488_v10 = vpop.permute.xlu0 %5487 }
 0x63d   : > { %v4512_v50 = vpop.f32.mrb[115].mxu0  ;;  %9655 = vmatmul.mubr.msk.f32.gmra.mrb[112].mxu1 %vm234_vm3, %v4598_v44  ;;  %v13483_v0 = vsel %vm1416_vm4, %v5488_v10, %v12961_v29  ;;  %v4600_v41 = vmax.f32 %v9607_v17, 0.0 }
 0x63e   : > { %v4599_v21 = vmax.f32 %v4512_v50, 0.0  ;;  %5551 = vrot.lane.b32.xlu0 %v13483_v0, %s10171_s6 }
 0x640   : > { %v9610_v55 = vpop.f32.mrb[116].mxu0  ;;  %9657 = vmatprep.mubr.msk.f32.mxu1 %vm234_vm3, %v4599_v21  ;;  %v5494_v61 = vpop.permute.xlu0 %5493 }
 0x641   : > { %v4522_v33 = vpop.f32.mrb[117].mxu0  ;;  %9658 = vmatmul.mubr.msk.f32.gmra.mrb[114].mxu1 %vm234_vm3, %v4600_v41  ;;  %v13491_v23 = vsel %vm1416_vm4, %v5494_v61, %v12999_v4  ;;  %v4602_v51 = vmax.f32 %v9610_v55, 0.0 }
 0x642   : > { %v4601_v6 = vmax.f32 %v4522_v33, 0.0  ;;  %5557 = vrot.lane.b32.xlu0 %v13491_v23, %s10171_s6 }
 0x644   : > { %v9613_v12 = vpop.f32.mrb[118].mxu0  ;;  %9660 = vmatprep.mubr.msk.f32.mxu1 %vm234_vm3, %v4601_v6  ;;  %v5492_v32 = vpop.permute.xlu0 %5491 }
 0x645   : > { %v4532_v7 = vpop.f32.mrb[119].mxu0  ;;  %9661 = vmatmul.mubr.msk.f32.gmra.mrb[116].mxu1 %vm234_vm3, %v4602_v51  ;;  %v13499_v24 = vsel %vm1416_vm4, %v5492_v32, %v12991_v38  ;;  %v4604_v62 = vmax.f32 %v9613_v12, 0.0 }
 0x646   : > { %v4603_v34 = vmax.f32 %v4532_v7, 0.0  ;;  %5555 = vrot.lane.b32.xlu0 %v13499_v24, %s10171_s6 }
 0x648   : > { %v9616_v54 = vpop.f32.mrb[120].mxu0  ;;  %9663 = vmatprep.mubr.msk.f32.mxu1 %vm234_vm3, %v4603_v34  ;;  %v5498_v37 = vpop.permute.xlu0 %5497 }
 0x649   : > { %v4542_v15 = vpop.f32.mrb[121].mxu0  ;;  %9664 = vmatmul.mubr.msk.f32.gmra.mrb[118].mxu1 %vm234_vm3, %v4604_v62  ;;  %v13507_v26 = vsel %vm1416_vm4, %v5498_v37, %v13025_v25  ;;  %v5658_v44 = vpop.permute.xlu1 %5657  ;;  %v4606_v17 = vmax.f32 %v9616_v54, 0.0 }
 0x64a   : > { %v4605_v46 = vmax.f32 %v4542_v15, 0.0  ;;  %v13511_v10 = vsel %vm1416_vm4, %v5658_v44, %v13119_v36  ;;  %5561 = vrot.lane.b32.xlu0 %v13507_v26, %s10171_s6 }
 0x64b   : > { %5721 = vrot.lane.b32.xlu1 %v13511_v10, %s10171_s6 }
 0x64c   : > { %v9619_v50 = vpop.f32.mrb[122].mxu0  ;;  %9666 = vmatprep.mubr.msk.f32.mxu1 %vm234_vm3, %v4605_v46  ;;  %v5496_v21 = vpop.permute.xlu0 %5495 }
 0x64d   : > { %v4552_v41 = vpop.f32.mrb[123].mxu0  ;;  %9667 = vmatmul.mubr.msk.f32.gmra.mrb[120].mxu1 %vm234_vm3, %v4606_v17  ;;  %v13521_v55 = vsel %vm1416_vm4, %v5496_v21, %v13015_v42  ;;  %v5656_v33 = vpop.permute.xlu1 %5655  ;;  %v4608_v6 = vmax.f32 %v9619_v50, 0.0 }
 0x64e   : > { %v4607_v61 = vmax.f32 %v4552_v41, 0.0  ;;  %v13525_v51 = vsel %vm1416_vm4, %v5656_v33, %v13131_v31  ;;  %5559 = vrot.lane.b32.xlu0 %v13521_v55, %s10171_s6 }
 0x64f   : > { %5719 = vrot.lane.b32.xlu1 %v13525_v51, %s10171_s6 }
 0x650   : > { %v9622_v12 = vpop.f32.mrb[124].mxu0  ;;  %9669 = vmatprep.mubr.msk.f32.mxu1 %vm234_vm3, %v4607_v61  ;;  %v5502_v32 = vpop.permute.xlu0 %5501 }
 0x651   : > { %v4562_v7 = vpop.f32.mrb[125].mxu0  ;;  %9670 = vmatmul.mubr.msk.f32.gmra.mrb[122].mxu1 %vm234_vm3, %v4608_v6  ;;  %v13535_v34 = vsel %vm1416_vm4, %v5502_v32, %v13051_v53  ;;  %v5662_v54 = vpop.permute.xlu1 %5661  ;;  %v4610_v37 = vmax.f32 %v9622_v12, 0.0 }
 0x652   : > { %v4609_v62 = vmax.f32 %v4562_v7, 0.0  ;;  %v13539_v15 = vsel %vm1416_vm4, %v5662_v54, %v13162_v20  ;;  %5565 = vrot.lane.b32.xlu0 %v13535_v34, %s10171_s6 }
 0x653   : > { %5725 = vrot.lane.b32.xlu1 %v13539_v15, %s10171_s6 }
 0x654   : > { %v9625_v46 = vpop.f32.mrb[126].mxu0  ;;  %9672 = vmatprep.mubr.msk.f32.mxu1 %vm234_vm3, %v4609_v62  ;;  %v5500_v44 = vpop.permute.xlu0 %5499 }
 0x655   : > { %9673 = vmatmul.mubr.msk.f32.gmra.mrb[124].mxu1 %vm234_vm3, %v4610_v37  ;;  %v4572_v17 = vpop.f32.mrb[127].mxu0  ;;  %v13549_v50 = vsel %vm1416_vm4, %v5500_v44, %v13042_v57  ;;  %v5660_v21 = vpop.permute.xlu1 %5659  ;;  %v4612_v61 = vmax.f32 %v9625_v46, 0.0 }
 0x656   : > { %v4611_v41 = vmax.f32 %v4572_v17, 0.0  ;;  %v13553_v33 = vsel %vm1416_vm4, %v5660_v21, %v13154_v39  ;;  %5563 = vrot.lane.b32.xlu0 %v13549_v50, %s10171_s6 }
 0x657   : > { %5723 = vrot.lane.b32.xlu1 %v13553_v33, %s10171_s6 }
 0x658   : > { %9675 = vmatprep.mubr.msk.f32.mxu1 %vm234_vm3, %v4611_v41  ;;  %v5506_v6 = vpop.permute.xlu0 %5505 }
 0x659   : > { %9676 = vmatmul.mubr.msk.f32.gmra.mrb[126].mxu1 %vm234_vm3, %v4612_v61  ;;  %v13563_v12 = vsel %vm1416_vm4, %v5506_v6, %v13077_v63  ;;  %v5666_v32 = vpop.permute.xlu1 %5665 }
 0x65a   : > { %v13567_v7 = vsel %vm1416_vm4, %v5666_v32, %v13190_v18  ;;  %5569 = vrot.lane.b32.xlu0 %v13563_v12, %s10171_s6 }
 0x65b   : > { %5729 = vrot.lane.b32.xlu1 %v13567_v7, %s10171_s6 }
 0x65c   : > { %v5504_v62 = vpop.permute.xlu0 %5503 }
 0x65d   : > { %v13575_v54 = vsel %vm1416_vm4, %v5504_v62, %v13069_v40  ;;  %v5664_v37 = vpop.permute.xlu1 %5663 }
 0x65e   : > { %v13579_v46 = vsel %vm1416_vm4, %v5664_v37, %v13182_v8  ;;  %5567 = vrot.lane.b32.xlu0 %v13575_v54, %s10171_s6 }
 0x65f   : > { %5727 = vrot.lane.b32.xlu1 %v13579_v46, %s10171_s6 }
 0x660   : > { %v5510_v44 = vpop.permute.xlu0 %5509 }
 0x661   : > { %v5670_v17 = vpop.permute.xlu1 %5669  ;;  %v13605_v62 = vsel %vm1416_vm4, %v5510_v44, %v13103_v47 }
 0x662   : > { %v13587_v21 = vsel %vm1416_vm4, %v5670_v17, %v13218_v43 }
 0x663   : > { %5733 = vrot.lane.b32.xlu1 %v13587_v21, %s10171_s6 }
 0x664   : > { %v5508_v41 = vpop.permute.xlu0 %5507 }
 0x665   : > { %v13593_v61 = vsel %vm1416_vm4, %v5508_v41, %v13094_v5  ;;  %v5668_v6 = vpop.permute.xlu1 %5667 }
 0x666   : > { %v13597_v32 = vsel %vm1416_vm4, %v5668_v6, %v13210_v27  ;;  %5571 = vrot.lane.b32.xlu0 %v13593_v61, %s10171_s6 }
 0x667   : > { %5731 = vrot.lane.b32.xlu1 %v13597_v32, %s10171_s6 }
 0x669   : > { %v5674_v37 = vpop.permute.xlu1 %5673 }
 0x66a   : > { %v13609_v17 = vsel %vm1416_vm4, %v5674_v37, %v13246_v19  ;;  %5573 = vrot.lane.b32.xlu0 %v13605_v62, %s10171_s6 }
 0x66b   : > { %5737 = vrot.lane.b32.xlu1 %v13609_v17, %s10171_s6 }
 0x66d   : > { %v5672_v41 = vpop.permute.xlu1 %5671 }
 0x66e   : > { %v13617_v6 = vsel %vm1416_vm4, %v5672_v41, %v13238_v45 }
 0x66f   : > { %5735 = vrot.lane.b32.xlu1 %v13617_v6, %s10171_s6 }
 0x671   : > { %v5678_v44 = vpop.permute.xlu1 %5677 }
 0x672   : > { %v13623_v13 = vsel %vm1416_vm4, %v5678_v44, %v13270_v11 }
 0x673   : > { %5741 = vrot.lane.b32.xlu1 %v13623_v13, %s10171_s6 }
 0x675   : > { %v5676_v37 = vpop.permute.xlu1 %5675 }
 0x676   : > { %v13629_v49 = vsel %vm1416_vm4, %v5676_v37, %v13262_v1 }
 0x677   : > { %5739 = vrot.lane.b32.xlu1 %v13629_v49, %s10171_s6 }
 0x679   : > { %v5682_v41 = vpop.permute.xlu1 %5681 }
 0x67a   : > { %v13635_v47 = vsel %vm1416_vm4, %v5682_v41, %v13292_v56 }
 0x67b   : > { %5745 = vrot.lane.b32.xlu1 %v13635_v47, %s10171_s6 }
 0x67d   : > { %v5680_v44 = vpop.permute.xlu1 %5679 }
 0x67e   : > { %v13641_v5 = vsel %vm1416_vm4, %v5680_v44, %v13284_v52 }
 0x67f   : > { %5743 = vrot.lane.b32.xlu1 %v13641_v5, %s10171_s6 }
 0x681   : > { %v5686_v37 = vpop.permute.xlu1 %5685 }
 0x682   : > { %v13653_v41 = vsel %vm1416_vm4, %v5686_v37, %v13311_v58 }
 0x685   : > { %v5684_v40 = vpop.permute.xlu1 %5683 }
 0x686   : > { %v13647_v63 = vsel %vm1416_vm4, %v5684_v40, %v13304_v30 }
 0x687   : > { %5747 = vrot.lane.b32.xlu1 %v13647_v63, %s10171_s6 }
 0x68b   : > { %5749 = vrot.lane.b32.xlu1 %v13653_v41, %s10171_s6 }
 0x69c   : > { %v5546_v44 = vpop.permute.xlu0 %5545 }
 0x69d   : > { %v5592_v45 = vsub.f32 %v13443_v22, %v5546_v44 }
 0x69f   : > { %v5784_v27 = vmul.f32 %v5592_v45, %v5592_v45 }
 0x6a0   : > { %v5544_v52 = vpop.permute.xlu0 %5543 }
 0x6a1   : > { %v5591_v43 = vsub.f32 %v13451_v14, %v5544_v52 }
 0x6a3   : > { %v5783_v57 = vmul.f32 %v5591_v43, %v5591_v43 }
 0x6a4   : > { %v5550_v56 = vpop.permute.xlu0 %5549 }
 0x6a5   : > { %v5594_v20 = vsub.f32 %v13459_v3, %v5550_v56 }
 0x6a8   : > { %v5548_v1 = vpop.permute.xlu0 %5547 }
 0x6ac   : > { %v5554_v11 = vpop.permute.xlu0 %5553 }
 0x6b0   : > { %v5552_v19 = vpop.permute.xlu0 %5551 }
 0x6b4   : > { %v5558_v39 = vpop.permute.xlu0 %5557 }
 0x6bd   : > { %v5722_v40 = vpop.permute.xlu1 %5721 }
 0x6be   : > { %v5768_v30 = vsub.f32 %v13511_v10, %v5722_v40  ;;  %v5786_v10 = vmul.f32 %v5594_v20, %v5594_v20  ;;  %v13664_v40 = vsub.f32 %v13467_v48, %v5548_v1 }
 0x6c0   : > { %v5800_v8 = vmul.f32 %v5768_v30, %v5768_v30  ;;  %v5785_v56 = vmul.f32 %v13664_v40, %v13664_v40 }
 0x6c1   : > { %v5720_v37 = vpop.permute.xlu1 %5719 }
 0x6c2   : > { %v5816_v58 = vadd.f32 %v5800_v8, %v5784_v27  ;;  %v5767_v18 = vsub.f32 %v13525_v51, %v5720_v37  ;;  %v5556_v8 = vpop.permute.xlu0 %5555 }
 0x6c4   : > { %v5832_v31 = vmax.f32 %v5816_v58, 1e-30  ;;  %v5799_v36 = vmul.f32 %v5767_v18, %v5767_v18 }
 0x6c5   : > { %v5726_v53 = vpop.permute.xlu1 %5725 }
 0x6c6   : > { %10045 = vrsqrt.f32 %v5832_v31  ;;  %v5815_v22 = vadd.f32 %v5799_v36, %v5783_v57  ;;  %v5770_v44 = vsub.f32 %v13539_v15, %v5726_v53  ;;  %v13670_v31 = vsub.f32 %v13475_v28, %v5554_v11  ;;  %v5562_v3 = vpop.permute.xlu0 %5561 }
 0x6c8   : > { %v5831_v52 = vmax.f32 %v5815_v22, 1e-30  ;;  %v5802_v14 = vmul.f32 %v5770_v44, %v5770_v44  ;;  %v5788_v15 = vmul.f32 %v13670_v31, %v13670_v31 }
 0x6c9   : > { %v5724_v27 = vpop.permute.xlu1 %5723 }
 0x6ca   : > { %10047 = vrsqrt.f32 %v5831_v52  ;;  %v5818_v51 = vadd.f32 %v5802_v14, %v5786_v10  ;;  %v5769_v37 = vsub.f32 %v13553_v33, %v5724_v27  ;;  %v13676_v33 = vsub.f32 %v13483_v0, %v5552_v19 }
 0x6cb   : > { %v13686_v19 = vsub.f32 %v13491_v23, %v5558_v39  ;;  %v13698_v23 = vsub.f32 %v13499_v24, %v5556_v8  ;;  %v13710_v8 = vsub.f32 %v13507_v26, %v5562_v3 }
 0x6cc   : > { %v5834_v57 = vmax.f32 %v5818_v51, 1e-30  ;;  %v5801_v53 = vmul.f32 %v5769_v37, %v5769_v37  ;;  %v5787_v51 = vmul.f32 %v13676_v33, %v13676_v33 }
 0x6cd   : > { %v5730_v36 = vpop.permute.xlu1 %5729  ;;  %v5790_v39 = vmul.f32 %v13686_v19, %v13686_v19  ;;  %v5789_v24 = vmul.f32 %v13698_v23, %v13698_v23  ;;  %v5792_v26 = vmul.f32 %v13710_v8, %v13710_v8 }
 0x6ce   : > { %10049 = vrsqrt.f32 %v5834_v57  ;;  %v5817_v1 = vadd.f32 %v5801_v53, %v5785_v56  ;;  %v5772_v58 = vsub.f32 %v13567_v7, %v5730_v36 }
 0x6d0   : > { %v10046_v48 = vpop.eup %10045  ;;  %v5833_v22 = vmax.f32 %v5817_v1, 1e-30  ;;  %v5804_v10 = vmul.f32 %v5772_v58, %v5772_v58 }
 0x6d1   : > { %v5880_v52 = vmul.f32 %v10046_v48, %v5768_v30  ;;  %v5728_v11 = vpop.permute.xlu1 %5727  ;;  %v5864_v28 = vmul.f32 %v10046_v48, %v5592_v45  ;;  %v5560_v30 = vpop.permute.xlu0 %5559 }
 0x6d2   : > { %10051 = vrsqrt.f32 %v5833_v22  ;;  %v5820_v14 = vadd.f32 %v5804_v10, %v5788_v15  ;;  %v13679_v27 = vsub.f32 %v13579_v46, %v5728_v11  ;;  %v13723_v3 = vsub.f32 %v13521_v55, %v5560_v30 }
 0x6d3   : > { %5993 = vrot.lane.b32.xlu1 %v5880_v52, %s10172_s11  ;;  %5913 = vrot.lane.b32.xlu0 %v5864_v28, %s10172_s11 }
 0x6d4   : > { %v10048_v7 = vpop.eup %10047  ;;  %v5836_v0 = vmax.f32 %v5820_v14, 1e-30  ;;  %v5803_v45 = vmul.f32 %v13679_v27, %v13679_v27  ;;  %v5791_v30 = vmul.f32 %v13723_v3, %v13723_v3 }
 0x6d5   : > { %v5879_v56 = vmul.f32 %v10048_v7, %v5767_v18  ;;  %v5734_v57 = vpop.permute.xlu1 %5733  ;;  %v5863_v46 = vmul.f32 %v10048_v7, %v5591_v43  ;;  %v5566_v52 = vpop.permute.xlu0 %5565 }
 0x6d6   : > { %10053 = vrsqrt.f32 %v5836_v0  ;;  %v5819_v53 = vadd.f32 %v5803_v45, %v5787_v51  ;;  %v13691_v36 = vsub.f32 %v13587_v21, %v5734_v57 }
 0x6d7   : > { %5991 = vrot.lane.b32.xlu1 %v5879_v56, %s10172_s11  ;;  %5911 = vrot.lane.b32.xlu0 %v5863_v46, %s10172_s11 }
 0x6d8   : > { %v10050_v1 = vpop.eup %10049  ;;  %v5835_v48 = vmax.f32 %v5819_v53, 1e-30  ;;  %v5806_v18 = vmul.f32 %v13691_v36, %v13691_v36 }
 0x6d9   : > { %v5882_v43 = vmul.f32 %v10050_v1, %v5770_v44  ;;  %v5732_v15 = vpop.permute.xlu1 %5731  ;;  %v5866_v22 = vmul.f32 %v10050_v1, %v5594_v20  ;;  %v5564_v45 = vpop.permute.xlu0 %5563  ;;  %v13736_v1 = vsub.f32 %v13535_v34, %v5566_v52 }
 0x6da   : > { %10055 = vrsqrt.f32 %v5835_v48  ;;  %v5822_v21 = vadd.f32 %v5806_v18, %v5790_v39  ;;  %v13703_v10 = vsub.f32 %v13597_v32, %v5732_v15 }
 0x6db   : > { %5997 = vrot.lane.b32.xlu1 %v5882_v43, %s10172_s11  ;;  %5917 = vrot.lane.b32.xlu0 %v5866_v22, %s10172_s11  ;;  %v5794_v22 = vmul.f32 %v13736_v1, %v13736_v1 }
 0x6dc   : > { %v10052_v11 = vpop.eup %10051  ;;  %v5838_v44 = vmax.f32 %v5822_v21, 1e-30  ;;  %v5805_v20 = vmul.f32 %v13703_v10, %v13703_v10  ;;  %v13750_v21 = vsub.f32 %v13549_v50, %v5564_v45 }
 0x6dd   : > { %v5881_v28 = vmul.f32 %v10052_v11, %v5769_v37  ;;  %v5738_v14 = vpop.permute.xlu1 %5737  ;;  %v5865_v32 = vmul.f32 %v10052_v11, %v13664_v40  ;;  %v5570_v15 = vpop.permute.xlu0 %5569 }
 0x6de   : > { %10057 = vrsqrt.f32 %v5838_v44  ;;  %v5821_v7 = vadd.f32 %v5805_v20, %v5789_v24  ;;  %v13716_v51 = vsub.f32 %v13609_v17, %v5738_v14  ;;  %v5793_v20 = vmul.f32 %v13750_v21, %v13750_v21 }
 0x6df   : > { %5995 = vrot.lane.b32.xlu1 %v5881_v28, %s10172_s11  ;;  %5915 = vrot.lane.b32.xlu0 %v5865_v32, %s10172_s11  ;;  %v13764_v28 = vsub.f32 %v13563_v12, %v5570_v15 }
 0x6e0   : > { %v10054_v0 = vpop.eup %10053  ;;  %v5837_v37 = vmax.f32 %v5821_v7, 1e-30  ;;  %v5808_v40 = vmul.f32 %v13716_v51, %v13716_v51 }
 0x6e1   : > { %v5884_v56 = vmul.f32 %v10054_v0, %v5772_v58  ;;  %v5736_v57 = vpop.permute.xlu1 %5735  ;;  %v5868_v17 = vmul.f32 %v10054_v0, %v13670_v31  ;;  %v5568_v14 = vpop.permute.xlu0 %5567 }
 0x6e2   : > { %10059 = vrsqrt.f32 %v5837_v37  ;;  %v5824_v46 = vadd.f32 %v5808_v40, %v5792_v26  ;;  %v13729_v53 = vsub.f32 %v13617_v6, %v5736_v57  ;;  %v5796_v40 = vmul.f32 %v13764_v28, %v13764_v28 }
 0x6e3   : > { %6001 = vrot.lane.b32.xlu1 %v5884_v56, %s10172_s11  ;;  %5921 = vrot.lane.b32.xlu0 %v5868_v17, %s10172_s11  ;;  %v13778_v45 = vsub.f32 %v13575_v54, %v5568_v14 }
 0x6e4   : > { %v10056_v55 = vpop.eup %10055  ;;  %v5840_v58 = vmax.f32 %v5824_v46, 1e-30  ;;  %v5807_v31 = vmul.f32 %v13729_v53, %v13729_v53 }
 0x6e5   : > { %v5883_v39 = vmul.f32 %v10056_v55, %v13679_v27  ;;  %v5742_v48 = vpop.permute.xlu1 %5741  ;;  %v5867_v6 = vmul.f32 %v10056_v55, %v13676_v33 }
 0x6e6   : > { %10061 = vrsqrt.f32 %v5840_v58  ;;  %v5823_v18 = vadd.f32 %v5807_v31, %v5791_v30  ;;  %v13743_v43 = vsub.f32 %v13623_v13, %v5742_v48  ;;  %v5572_v58 = vpop.permute.xlu0 %5571 }
 0x6e7   : > { %5999 = vrot.lane.b32.xlu1 %v5883_v39, %s10172_s11  ;;  %5919 = vrot.lane.b32.xlu0 %v5867_v6, %s10172_s11 }
 0x6e8   : > { %v10058_v34 = vpop.eup %10057  ;;  %v5839_v27 = vmax.f32 %v5823_v18, 1e-30  ;;  %v5810_v33 = vmul.f32 %v13743_v43, %v13743_v43 }
 0x6e9   : > { %v5886_v52 = vmul.f32 %v10058_v34, %v13691_v36  ;;  %v5740_v13 = vpop.permute.xlu1 %5739  ;;  %v5870_v11 = vmul.f32 %v10058_v34, %v13686_v19 }
 0x6ea   : > { %10063 = vrsqrt.f32 %v5839_v27  ;;  %v5826_v24 = vadd.f32 %v5810_v33, %v5794_v22  ;;  %v13757_v44 = vsub.f32 %v13629_v49, %v5740_v13  ;;  %v16686_v22 = vld [vmem:[#allocation7_spill] sm:$0xff] }
 0x6eb   : > { %6005 = vrot.lane.b32.xlu1 %v5886_v52, %s10172_s11  ;;  %5925 = vrot.lane.b32.xlu0 %v5870_v11, %s10172_s11  ;;  %v5574_v11 = vpop.permute.xlu0 %5573 }
 0x6ec   : > { %v10060_v50 = vpop.eup %10059  ;;  %v5842_v36 = vmax.f32 %v5826_v24, 1e-30  ;;  %v5809_v19 = vmul.f32 %v13757_v44, %v13757_v44 }
 0x6ed   : > { %v5885_v32 = vmul.f32 %v10060_v50, %v13703_v10  ;;  %v5746_v49 = vpop.permute.xlu1 %5745  ;;  %v5869_v7 = vmul.f32 %v10060_v50, %v13698_v23 }
 0x6ee   : > { %10065 = vrsqrt.f32 %v5842_v36  ;;  %v5825_v0 = vadd.f32 %v5809_v19, %v5793_v20  ;;  %v13771_v26 = vsub.f32 %v13635_v47, %v5746_v49 }
 0x6ef   : > { %6003 = vrot.lane.b32.xlu1 %v5885_v32, %s10172_s11  ;;  %5923 = vrot.lane.b32.xlu0 %v5869_v7, %s10172_s11  ;;  %v9632_v12 = vpop.f32.mrb[96].mxu1 }
 0x6f0   : > { %v10062_v37 = vpop.eup %10061  ;;  %v5841_v10 = vmax.f32 %v5825_v0, 1e-30  ;;  %v5812_v23 = vmul.f32 %v13771_v26, %v13771_v26  ;;  %v4775_v56 = vpop.f32.mrb[97].mxu1  ;;  %v4935_v31 = vmax.f32 %v9632_v12, 0.0 }
 0x6f1   : > { %v5888_v47 = vmul.f32 %v10062_v37, %v13716_v51  ;;  %v4934_v57 = vmax.f32 %v4775_v56, 0.0  ;;  %v5744_v17 = vpop.permute.xlu1 %5743  ;;  %v5872_v46 = vmul.f32 %v10062_v37, %v13710_v8  ;;  %v5795_v51 = vmul.f32 %v13778_v45, %v13778_v45 }
 0x6f2   : > { %10067 = vrsqrt.f32 %v5841_v10  ;;  %v5828_v55 = vadd.f32 %v5812_v23, %v5796_v40  ;;  %v13785_v30 = vsub.f32 %v13641_v5, %v5744_v17 }
 0x6f3   : > { %6009 = vrot.lane.b32.xlu1 %v5888_v47, %s10172_s11  ;;  %5929 = vrot.lane.b32.xlu0 %v5872_v46, %s10172_s11 }
 0x6f4   : > { %v9635_v54 = vpop.f32.mrb[98].mxu1  ;;  %v10064_v39 = vpop.eup %10063  ;;  %v5844_v48 = vmax.f32 %v5828_v55, 1e-30  ;;  %v5811_v8 = vmul.f32 %v13785_v30, %v13785_v30  ;;  %9682 = vmatprep.mubr.msk.f32.mxu0 %vm234_vm3, %v4934_v57 }
 0x6f5   : > { %v4785_v6 = vpop.f32.mrb[99].mxu1  ;;  %v5887_v5 = vmul.f32 %v10064_v39, %v13729_v53  ;;  %9683 = vmatmul.mubr.msk.f32.vlgmr.msra.gmra.mrb[128].mxu0 %vm234_vm3, %v4935_v31  ;;  %v5871_v15 = vmul.f32 %v10064_v39, %v13723_v3  ;;  %v4937_v27 = vmax.f32 %v9635_v54, 0.0  ;;  %v13803_v53 = vsub.f32 %v13593_v61, %v5572_v58 }
 0x6f6   : > { %v4936_v18 = vmax.f32 %v4785_v6, 0.0  ;;  %10069 = vrsqrt.f32 %v5844_v48  ;;  %v5827_v34 = vadd.f32 %v5811_v8, %v5795_v51  ;;  %9951 = vmatpush3.bf16.msk.msra.mxu0 %vm10230_vm2, %v16686_v22 }
 0x6f7   : > { %6007 = vrot.lane.b32.xlu1 %v5887_v5, %s10172_s11  ;;  %5927 = vrot.lane.b32.xlu0 %v5871_v15, %s10172_s11  ;;  %v5797_v49 = vmul.f32 %v13803_v53, %v13803_v53 }
 0x6f8   : > { %v9638_v33 = vpop.f32.mrb[100].mxu1  ;;  %v10066_v52 = vpop.eup %10065  ;;  %v5843_v13 = vmax.f32 %v5827_v34, 1e-30  ;;  %9685 = vmatprep.mubr.msk.f32.mxu0 %vm234_vm3, %v4936_v18 }
 0x6f9   : > { %v4795_v3 = vpop.f32.mrb[101].mxu1  ;;  %v5890_v24 = vmul.f32 %v10066_v52, %v13743_v43  ;;  %v5748_v20 = vpop.permute.xlu1 %5747  ;;  %9686 = vmatmul.mubr.msk.f32.gmra.mrb[130].mxu0 %vm234_vm3, %v4937_v27  ;;  %v5874_v36 = vmul.f32 %v10066_v52, %v13736_v1  ;;  %v4939_v14 = vmax.f32 %v9638_v33, 0.0  ;;  %v13815_v43 = vsub.f32 %v13605_v62, %v5574_v11 }
 0x6fa   : > { %v4938_v50 = vmax.f32 %v4795_v3, 0.0  ;;  %10071 = vrsqrt.f32 %v5843_v13  ;;  %v5781_v19 = vsub.f32 %v13647_v63, %v5748_v20 }
 0x6fb   : > { %6013 = vrot.lane.b32.xlu1 %v5890_v24, %s10172_s11  ;;  %5933 = vrot.lane.b32.xlu0 %v5874_v36, %s10172_s11  ;;  %v5798_v47 = vmul.f32 %v13815_v43, %v13815_v43 }
 0x6fc   : > { %v9641_v61 = vpop.f32.mrb[102].mxu1  ;;  %v10068_v32 = vpop.eup %10067  ;;  %v5813_v7 = vmul.f32 %v5781_v19, %v5781_v19  ;;  %9688 = vmatprep.mubr.msk.f32.mxu0 %vm234_vm3, %v4938_v50 }
 0x6fd   : > { %v4805_v1 = vpop.f32.mrb[103].mxu1  ;;  %v5889_v0 = vmul.f32 %v10068_v32, %v13757_v44  ;;  %v5750_v12 = vpop.permute.xlu1 %5749  ;;  %9689 = vmatmul.mubr.msk.f32.gmra.mrb[132].mxu0 %vm234_vm3, %v4939_v14  ;;  %v5873_v37 = vmul.f32 %v10068_v32, %v13750_v21  ;;  %v4941_v23 = vmax.f32 %v9641_v61, 0.0 }
 0x6fe   : > { %v4940_v63 = vmax.f32 %v4805_v1, 0.0  ;;  %v5829_v40 = vadd.f32 %v5813_v7, %v5797_v49  ;;  %v5782_v10 = vsub.f32 %v13653_v41, %v5750_v12 }
 0x6ff   : > { %6011 = vrot.lane.b32.xlu1 %v5889_v0, %s10172_s11  ;;  %5931 = vrot.lane.b32.xlu0 %v5873_v37, %s10172_s11 }
 0x700   : > { %v9644_v62 = vpop.f32.mrb[104].mxu1  ;;  %v10070_v56 = vpop.eup %10069  ;;  %v5845_v44 = vmax.f32 %v5829_v40, 1e-30  ;;  %v5814_v57 = vmul.f32 %v5782_v10, %v5782_v10  ;;  %9691 = vmatprep.mubr.msk.f32.mxu0 %vm234_vm3, %v4940_v63 }
 0x701   : > { %v4815_v17 = vpop.f32.mrb[105].mxu1  ;;  %v5892_v21 = vmul.f32 %v10070_v56, %v13771_v26  ;;  %9692 = vmatmul.mubr.msk.f32.gmra.mrb[134].mxu0 %vm234_vm3, %v4941_v23  ;;  %v5876_v41 = vmul.f32 %v10070_v56, %v13764_v28  ;;  %v4943_v58 = vmax.f32 %v9644_v62, 0.0 }
 0x702   : > { %v4942_v46 = vmax.f32 %v4815_v17, 0.0  ;;  %10073 = vrsqrt.f32 %v5845_v44  ;;  %v5830_v55 = vadd.f32 %v5814_v57, %v5798_v47 }
 0x703   : > { %6017 = vrot.lane.b32.xlu1 %v5892_v21, %s10172_s11  ;;  %5937 = vrot.lane.b32.xlu0 %v5876_v41, %s10172_s11 }
 0x704   : > { %v9647_v31 = vpop.f32.mrb[106].mxu1  ;;  %v10072_v54 = vpop.eup %10071  ;;  %v5846_v39 = vmax.f32 %v5830_v55, 1e-30  ;;  %9694 = vmatprep.mubr.msk.f32.mxu0 %vm234_vm3, %v4942_v46 }
 0x705   : > { %v4825_v51 = vpop.f32.mrb[107].mxu1  ;;  %v5891_v26 = vmul.f32 %v10072_v54, %v13785_v30  ;;  %9695 = vmatmul.mubr.msk.f32.gmra.mrb[136].mxu0 %vm234_vm3, %v4943_v58  ;;  %v5875_v28 = vmul.f32 %v10072_v54, %v13778_v45  ;;  %v4945_v8 = vmax.f32 %v9647_v31, 0.0 }
 0x706   : > { %v4944_v48 = vmax.f32 %v4825_v51, 0.0  ;;  %10075 = vrsqrt.f32 %v5846_v39 }
 0x707   : > { %6015 = vrot.lane.b32.xlu1 %v5891_v26, %s10172_s11  ;;  %5935 = vrot.lane.b32.xlu0 %v5875_v28, %s10172_s11 }
 0x708   : > { %v9650_v6 = vpop.f32.mrb[108].mxu1  ;;  %9697 = vmatprep.mubr.msk.f32.mxu0 %vm234_vm3, %v4944_v48 }
 0x709   : > { %v4835_v5 = vpop.f32.mrb[109].mxu1  ;;  %9698 = vmatmul.mubr.msk.f32.gmra.mrb[138].mxu0 %vm234_vm3, %v4945_v8  ;;  %v4947_v15 = vmax.f32 %v9650_v6, 0.0 }
 0x70a   : > { %v4946_v18 = vmax.f32 %v4835_v5, 0.0 }
 0x70c   : > { %v9653_v30 = vpop.f32.mrb[110].mxu1  ;;  %9700 = vmatprep.mubr.msk.f32.mxu0 %vm234_vm3, %v4946_v18  ;;  %v10074_v34 = vpop.eup %10073 }
 0x70d   : > { %v4845_v22 = vpop.f32.mrb[111].mxu1  ;;  %v5893_v45 = vmul.f32 %v10074_v34, %v5781_v19  ;;  %9701 = vmatmul.mubr.msk.f32.gmra.mrb[140].mxu0 %vm234_vm3, %v4947_v15  ;;  %v5877_v33 = vmul.f32 %v10074_v34, %v13803_v53  ;;  %v4949_v52 = vmax.f32 %v9653_v30, 0.0  ;;  %v5336_v34 = vmul.f32 %v16680_v35, %v16680_v35 }
 0x70e   : > { %v4948_v27 = vmax.f32 %v4845_v22, 0.0  ;;  %v5335_v22 = vmul.f32 %v16681_v2, %v16681_v2 }
 0x70f   : > { %6019 = vrot.lane.b32.xlu1 %v5893_v45, %s10172_s11  ;;  %5939 = vrot.lane.b32.xlu0 %v5877_v33, %s10172_s11  ;;  %v5337_v33 = vmul.f32 %v12924_v16, %v12924_v16 }
 0x710   : > { %v9656_v13 = vpop.f32.mrb[112].mxu1  ;;  %v10076_v3 = vpop.eup %10075  ;;  %9703 = vmatprep.mubr.msk.f32.mxu0 %vm234_vm3, %v4948_v27  ;;  %v5338_v27 = vmul.f32 %v16682_v60, %v16682_v60 }
 0x711   : > { %v4855_v11 = vpop.f32.mrb[113].mxu1  ;;  %v5894_v24 = vmul.f32 %v10076_v3, %v5782_v10  ;;  %9704 = vmatmul.mubr.msk.f32.gmra.mrb[142].mxu0 %vm234_vm3, %v4949_v52  ;;  %v5878_v20 = vmul.f32 %v10076_v3, %v13815_v43  ;;  %v4951_v36 = vmax.f32 %v9656_v13, 0.0  ;;  %v8719_v13 = vadd.f32 -1.0, %v5336_v34 }
 0x712   : > { %v4950_v50 = vmax.f32 %v4855_v11, 0.0  ;;  %v5340_v3 = vmul.f32 %v12969_v9, %v12969_v9  ;;  %v5339_v11 = vmul.f32 %v12961_v29, %v12961_v29 }
 0x713   : > { %6021 = vrot.lane.b32.xlu1 %v5894_v24, %s10172_s11  ;;  %5941 = vrot.lane.b32.xlu0 %v5878_v20, %s10172_s11  ;;  %v8718_v24 = vadd.f32 -1.0, %v5335_v22  ;;  %v5341_v20 = vmul.f32 %v12991_v38, %v12991_v38  ;;  %v16756_v22 = vld [vmem:[#allocation58_spill] sm:$0xff] }
 0x714   : > { %v9659_v53 = vpop.f32.mrb[114].mxu1  ;;  %9706 = vmatprep.mubr.msk.f32.mxu0 %vm234_vm3, %v4950_v50  ;;  %v5342_v50 = vmul.f32 %v12999_v4, %v12999_v4 }
 0x715   : > { %v4865_v19 = vpop.f32.mrb[115].mxu1  ;;  %9707 = vmatmul.mubr.msk.f32.gmra.mrb[144].mxu0 %vm234_vm3, %v4951_v36  ;;  %v4953_v61 = vmax.f32 %v9659_v53, 0.0  ;;  %v5320_v36 = vmul.f32 4.0, %v16680_v35  ;;  %v5344_v53 = vmul.f32 %v13025_v25, %v13025_v25 }
 0x716   : > { %v4952_v14 = vmax.f32 %v4865_v19, 0.0  ;;  %v5319_v19 = vmul.f32 4.0, %v16681_v2  ;;  %v16727_v2 = vld [vmem:[#allocation33_spill] sm:$0xff] }
 0x718   : > { %v9662_v32 = vpop.f32.mrb[116].mxu1  ;;  %9709 = vmatprep.mubr.msk.f32.mxu0 %vm234_vm3, %v4952_v14  ;;  %v8721_v14 = vadd.f32 -1.0, %v5338_v27 }
 0x719   : > { %v4875_v49 = vpop.f32.mrb[117].mxu1  ;;  %9710 = vmatmul.mubr.msk.f32.gmra.mrb[146].mxu0 %vm234_vm3, %v4953_v61  ;;  %v4955_v43 = vmax.f32 %v9662_v32, 0.0  ;;  %v8720_v61 = vadd.f32 -1.0, %v5337_v33  ;;  %v5368_v32 = vmul.f32 %v8719_v13, %v5320_v36 }
 0x71a   : > { %v4954_v7 = vmax.f32 %v4875_v49, 0.0  ;;  %v5322_v49 = vmul.f32 4.0, %v16682_v60  ;;  %v16726_v60 = vld [vmem:[#allocation59_spill] sm:$0xff] }
 0x71b   : > { %v13931_v27 = vsel %vm11089_vm7, %v5368_v32, 0.0 }
 0x71c   : > { %v9665_v1 = vpop.f32.mrb[118].mxu1  ;;  %9712 = vmatprep.mubr.msk.f32.mxu0 %vm234_vm3, %v4954_v7  ;;  %v8723_v7 = vadd.f32 -1.0, %v5340_v3 }
 0x71d   : > { %v4885_v0 = vpop.f32.mrb[119].mxu1  ;;  %9713 = vmatmul.mubr.msk.f32.gmra.mrb[148].mxu0 %vm234_vm3, %v4955_v43  ;;  %v4957_v12 = vmax.f32 %v9665_v1, 0.0  ;;  %v8722_v43 = vadd.f32 -1.0, %v5339_v11 }
 0x71e   : > { %v4956_v63 = vmax.f32 %v4885_v0, 0.0  ;;  %v5367_v0 = vmul.f32 %v8718_v24, %v5319_v19  ;;  %v16695_v24 = vld [vmem:[#allocation29_spill] sm:$0xff] }
 0x720   : > { %v9668_v37 = vpop.f32.mrb[120].mxu1  ;;  %9715 = vmatprep.mubr.msk.f32.mxu0 %vm234_vm3, %v4956_v63  ;;  %v5321_v63 = vmul.f32 4.0, %v12924_v16  ;;  %v13935_v33 = vsel %vm11089_vm7, %v5367_v0, 0.0 }
 0x721   : > { %v4895_v40 = vpop.f32.mrb[121].mxu1  ;;  %9716 = vmatmul.mubr.msk.f32.gmra.mrb[150].mxu0 %vm234_vm3, %v4957_v12  ;;  %v4959_v23 = vmax.f32 %v9668_v37, 0.0  ;;  %v8725_v12 = vadd.f32 -1.0, %v5342_v50  ;;  %v8724_v37 = vadd.f32 -1.0, %v5341_v20  ;;  %16694 = vst [vmem:[#allocation55_spill] sm:$0xff] %v13935_v33  ;;  %v5400_v50 = vmul.f32 2.0, %v16695_v24 }
 0x722   : > { %v4958_v10 = vmax.f32 %v4895_v40, 0.0  ;;  %v16696_v20 = vld [vmem:[#allocation27_spill] sm:$0xff]  ;;  %v16711_v24 = vld [vmem:[#allocation9_spill] sm:$0xff] }
 0x723   : > { %v5399_v36 = vmul.f32 2.0, %v16696_v20 }
 0x724   : > { %v9671_v62 = vpop.f32.mrb[122].mxu1  ;;  %9718 = vmatprep.mubr.msk.f32.mxu0 %vm234_vm3, %v4958_v10  ;;  %v5324_v10 = vmul.f32 4.0, %v12969_v9 }
 0x725   : > { %v4905_v56 = vpop.f32.mrb[123].mxu1  ;;  %9719 = vmatmul.mubr.msk.f32.gmra.mrb[152].mxu0 %vm234_vm3, %v4959_v23  ;;  %v4961_v44 = vmax.f32 %v9671_v62, 0.0  ;;  %v5323_v23 = vmul.f32 4.0, %v12961_v29  ;;  %v8727_v62 = vadd.f32 -1.0, %v5344_v53 }
 0x726   : > { %v4960_v47 = vmax.f32 %v4905_v56, 0.0  ;;  %v5343_v56 = vmul.f32 %v13015_v42, %v13015_v42 }
 0x728   : > { %v9674_v57 = vpop.f32.mrb[124].mxu1  ;;  %9721 = vmatprep.mubr.msk.f32.mxu0 %vm234_vm3, %v4960_v47  ;;  %v5370_v47 = vmul.f32 %v8721_v14, %v5322_v49  ;;  %v8726_v11 = vadd.f32 -1.0, %v5343_v56  ;;  %v5327_v49 = vmul.f32 4.0, %v13015_v42 }
 0x729   : > { %v4915_v17 = vpop.f32.mrb[125].mxu1  ;;  %9722 = vmatmul.mubr.msk.f32.gmra.mrb[154].mxu0 %vm234_vm3, %v4961_v44  ;;  %v4963_v46 = vmax.f32 %v9674_v57, 0.0  ;;  %v5369_v44 = vmul.f32 %v8720_v61, %v5321_v63  ;;  %v5326_v57 = vmul.f32 4.0, %v12999_v4 }
 0x72a   : > { %v4962_v21 = vmax.f32 %v4915_v17, 0.0  ;;  %v5325_v17 = vmul.f32 4.0, %v12991_v38  ;;  %v13943_v53 = vsel %vm11089_vm7, %v5370_v47, 0.0  ;;  %v5375_v47 = vmul.f32 %v8726_v11, %v5327_v49 }
 0x72b   : > { %16697 = vst [vmem:[#allocation12_spill] sm:$0xff] %v13943_v53  ;;  %v13947_v19 = vsel %vm11089_vm7, %v5369_v44, 0.0 }
 0x72c   : > { %v9677_v41 = vpop.f32.mrb[126].mxu1  ;;  %9724 = vmatprep.mubr.msk.f32.mxu0 %vm234_vm3, %v4962_v21  ;;  %v5372_v21 = vmul.f32 %v8723_v7, %v5324_v10  ;;  %v5373_v34 = vmul.f32 %v8724_v37, %v5325_v17  ;;  %16698 = vst [vmem:[#allocation28_spill] sm:$0xff] %v13947_v19  ;;  %v16701_v37 = vld [vmem:[#allocation24_spill] sm:$0xff]  ;;  %v13983_v17 = vsel %vm11089_vm7, %v5399_v36, 0.0  ;;  %v5407_v36 = vmul.f32 2.0, %v16711_v24 }
 0x72d   : > { %v4925_v55 = vpop.f32.mrb[127].mxu1  ;;  %9725 = vmatmul.mubr.msk.f32.gmra.mrb[156].mxu0 %vm234_vm3, %v4963_v46  ;;  %v4965_v31 = vmax.f32 %v9677_v41, 0.0  ;;  %v5371_v46 = vmul.f32 %v8722_v43, %v5323_v23  ;;  %v5328_v41 = vmul.f32 4.0, %v13025_v25  ;;  %v16700_v43 = vld [vmem:[#allocation32_spill] sm:$0xff]  ;;  %v5345_v10 = vmul.f32 %v16701_v37, %v16701_v37  ;;  %16704 = vst [vmem:[#allocation45_spill] sm:$0xff] %v13983_v17 }
 0x72e   : > { %v4964_v58 = vmax.f32 %v4925_v55, 0.0  ;;  %v16692_v55 = vld [vmem:[#allocation18_spill] sm:$0xff]  ;;  %v13953_v61 = vsel %vm11089_vm7, %v5372_v21, 0.0  ;;  %v5402_v0 = vmul.f32 2.0, %v16700_v43  ;;  %v16702_v23 = vld [vmem:[#allocation40_spill] sm:$0xff]  ;;  %v16705_v21 = vld [vmem:[#allocation25_spill] sm:$0xff] }
 0x72f   : > { %v5376_v13 = vmul.f32 %v8727_v62, %v5328_v41  ;;  %v13957_v32 = vsel %vm11089_vm7, %v5371_v46, 0.0  ;;  %v5401_v62 = vmul.f32 2.0, %v16702_v23  ;;  %v5330_v44 = vmul.f32 4.0, %v16692_v55  ;;  %v16706_v41 = vld [vmem:[#allocation35_spill] sm:$0xff]  ;;  %v16708_v23 = vld [vmem:[#allocation52_spill] sm:$0xff]  ;;  %v16709_v43 = vld [vmem:[#allocation37_spill] sm:$0xff] }
 0x730   : > { %9727 = vmatprep.mubr.msk.f32.mxu0 %vm234_vm3, %v4964_v58  ;;  %v5346_v58 = vmul.f32 %v16692_v55, %v16692_v55  ;;  %v5404_v46 = vmul.f32 2.0, %v16705_v21  ;;  %v5408_v11 = vmul.f32 2.0, %v16709_v43  ;;  %v16713_v21 = vld [vmem:[#allocation53_spill] sm:$0xff]  ;;  %v14006_v43 = vsel %vm11089_vm7, %v5375_v47, 0.0 }
 0x731   : > { %9728 = vmatmul.mubr.msk.f32.gmra.mrb[158].mxu0 %vm234_vm3, %v4965_v31  ;;  %v5374_v31 = vmul.f32 %v8725_v12, %v5326_v57  ;;  %v13967_v12 = vsel %vm11089_vm7, %v5373_v34, 0.0  ;;  %v13974_v56 = vsel %vm11089_vm7, %v5376_v13, 0.0  ;;  %v13979_v57 = vsel %vm11089_vm7, %v5400_v50, 0.0 }
 0x732   : > { %v8729_v7 = vadd.f32 -1.0, %v5346_v58  ;;  %16703 = vst [vmem:[#allocation66_spill] sm:$0xff] %v13979_v57  ;;  %v5403_v58 = vmul.f32 2.0, %v16706_v41  ;;  %v5405_v13 = vmul.f32 2.0, %v16708_v23  ;;  %v13994_v50 = vsel %vm11089_vm7, %v5402_v0, 0.0  ;;  %v16716_v23 = vld [vmem:[#allocation23_spill] sm:$0xff] }
 0x733   : > { %v13963_v63 = vsel %vm11089_vm7, %v5374_v31, 0.0  ;;  %v16707_v31 = vld [vmem:[#allocation43_spill] sm:$0xff]  ;;  %16710 = vst [vmem:[#allocation51_spill] sm:$0xff] %v13994_v50  ;;  %v5410_v42 = vmul.f32 2.0, %v16713_v21  ;;  %v8728_v41 = vadd.f32 -1.0, %v5345_v10  ;;  %v5348_v0 = vmul.f32 %v16716_v23, %v16716_v23  ;;  %v16717_v21 = vld [vmem:[#allocation30_spill] sm:$0xff] }
 0x734   : > { %v5406_v34 = vmul.f32 2.0, %v16707_v31  ;;  %v5378_v20 = vmul.f32 %v8729_v7, %v5330_v44  ;;  %v14002_v31 = vsel %vm11089_vm7, %v5401_v62, 0.0  ;;  %v16715_v7 = vld [vmem:[#allocation36_spill] sm:$0xff]  ;;  %v14013_v24 = vsel %vm11089_vm7, %v5404_v46, 0.0 }
 0x735   : > { %16714 = vst [vmem:[#allocation61_spill] sm:$0xff] %v14002_v31  ;;  %v5409_v44 = vmul.f32 2.0, %v16715_v7  ;;  %v14017_v10 = vsel %vm11089_vm7, %v5403_v58, 0.0  ;;  %v5329_v62 = vmul.f32 4.0, %v16701_v37  ;;  %v5347_v25 = vmul.f32 %v16717_v21, %v16717_v21 }
 0x736   : > { %v14024_v47 = vsel %vm11089_vm7, %v5406_v34, 0.0  ;;  %v14028_v7 = vsel %vm11089_vm7, %v5405_v13, 0.0  ;;  %v14032_v46 = vsel %vm11089_vm7, %v5408_v11, 0.0  ;;  %v14036_v58 = vsel %vm11089_vm7, %v5378_v20, 0.0  ;;  %v16724_v20 = vld [vmem:[#allocation10_spill] sm:$0xff] }
 0x737   : > { %16718 = vst [vmem:[#allocation47_spill] sm:$0xff] %v14024_v47  ;;  %16719 = vst [vmem:[#allocation14_spill] sm:$0xff] %v14028_v7  ;;  %v14040_v37 = vsel %vm11089_vm7, %v5407_v36, 0.0  ;;  %v14044_v34 = vsel %vm11089_vm7, %v5410_v42, 0.0  ;;  %v5377_v38 = vmul.f32 %v8728_v41, %v5329_v62  ;;  %v5332_v13 = vmul.f32 4.0, %v16716_v23  ;;  %v16728_v62 = vld [vmem:[#allocation39_spill] sm:$0xff] }
 0x738   : > { %16720 = vst [vmem:[#allocation50_spill] sm:$0xff] %v14032_v46  ;;  %16721 = vst [vmem:[#allocation67_spill] sm:$0xff] %v14040_v37  ;;  %v14051_v11 = vsel %vm11089_vm7, %v5409_v44, 0.0  ;;  %v8731_v29 = vadd.f32 -1.0, %v5348_v0  ;;  %v5412_v9 = vmul.f32 2.0, %v16724_v20  ;;  %v5331_v59 = vmul.f32 4.0, %v16717_v21 }
 0x739   : > { %16722 = vst [vmem:[#allocation34_spill] sm:$0xff] %v14044_v34  ;;  %16723 = vst [vmem:[#allocation13_spill] sm:$0xff] %v14051_v11  ;;  %v8730_v16 = vadd.f32 -1.0, %v5347_v25  ;;  %v5411_v42 = vmul.f32 2.0, %v16726_v60  ;;  %v5349_v41 = vmul.f32 %v16727_v2, %v16727_v2  ;;  %v5350_v23 = vmul.f32 %v16728_v62, %v16728_v62 }
 0x745   : > { %v13866_v54 = vpop.permute.xlu0 %5913  ;;  %v13868_v39 = vpop.permute.xlu1 %5993 }
 0x746   : > { %16687 = vst [vmem:[#allocation38_spill] sm:$0xff] %v13868_v39  ;;  %v5960_v44 = vmul.f32 %v13866_v54, %v13931_v27  ;;  %v6040_v0 = vmul.f32 %v13868_v39, %v13979_v57  ;;  %v14082_v57 = vsel %vm11089_vm7, %v5377_v38, 0.0  ;;  %v5380_v39 = vmul.f32 %v8731_v29, %v5332_v13  ;;  %v16731_v13 = vld [vmem:[#allocation44_spill] sm:$0xff] }
 0x747   : > { %v8733_v29 = vadd.f32 -1.0, %v5350_v23 }
 0x749   : > { %v13870_v51 = vpop.permute.xlu0 %5911  ;;  %v13872_v26 = vpop.permute.xlu1 %5991 }
 0x74a   : > { %16688 = vst [vmem:[#allocation26_spill] sm:$0xff] %v13872_v26  ;;  %v5959_v20 = vmul.f32 %v13870_v51, %v13935_v33  ;;  %v6039_v25 = vmul.f32 %v13872_v26, %v13983_v17  ;;  %v14086_v17 = vsel %vm11089_vm7, %v5412_v9, 0.0  ;;  %v5333_v26 = vmul.f32 4.0, %v16727_v2 }
 0x74b   : > { %16729 = vst [vmem:[#allocation22_spill] sm:$0xff] %v14086_v17  ;;  %v5414_v9 = vmul.f32 2.0, %v16731_v13  ;;  %v5334_v13 = vmul.f32 4.0, %v16728_v62 }
 0x74c   : > { %v14096_v33 = vadd.f32 %v6039_v25, %v5959_v20 }
 0x74d   : > { %v13874_v48 = vpop.permute.xlu0 %5917  ;;  %v13876_v28 = vpop.permute.xlu1 %5997 }
 0x74e   : > { %16689 = vst [vmem:[#allocation42_spill] sm:$0xff] %v13876_v28  ;;  %v5962_v60 = vmul.f32 %v13874_v48, %v13943_v53  ;;  %v6042_v21 = vmul.f32 %v13876_v28, %v13994_v50  ;;  %v5379_v50 = vmul.f32 %v8730_v16, %v5331_v59  ;;  %v14091_v28 = vsel %vm11089_vm7, %v5411_v42, 0.0 }
 0x74f   : > { %v14094_v53 = vadd.f32 %v6040_v0, %v5960_v44  ;;  %v14129_v0 = vsel %vm11089_vm7, %v5380_v39, 0.0 }
 0x750   : > { %v14101_v17 = vadd.f32 %v6042_v21, %v5962_v60  ;;  %v14133_v25 = vsel %vm11089_vm7, %v5379_v50, 0.0 }
 0x751   : > { %v13878_v8 = vpop.permute.xlu0 %5915  ;;  %v13880_v6 = vpop.permute.xlu1 %5995  ;;  %v6072_v39 = vmul.f32 %v14094_v53, %v13866_v54 }
 0x752   : > { %16690 = vst [vmem:[#allocation49_spill] sm:$0xff] %v13880_v6  ;;  %v5961_v35 = vmul.f32 %v13878_v8, %v13947_v19  ;;  %v6041_v11 = vmul.f32 %v13880_v6, %v14002_v31  ;;  %v8732_v19 = vadd.f32 -1.0, %v5349_v41  ;;  %v16730_v31 = vld [vmem:[#allocation48_spill] sm:$0xff]  ;;  %v6074_v54 = vmul.f32 %v14101_v17, %v13874_v48 }
 0x753   : > { %v5413_v6 = vmul.f32 2.0, %v16730_v31  ;;  %v14184_v48 = vstv %s14078_s19 }
 0x754   : > { %v14103_v2 = vadd.f32 %v6041_v11, %v5961_v35  ;;  %v14135_v31 = vmul.f32 %v8732_v19, %v5333_v26 }
 0x755   : > { %v13882_v5 = vpop.permute.xlu0 %5921  ;;  %v13884_v18 = vpop.permute.xlu1 %6001 }
 0x756   : > { %v5964_v16 = vmul.f32 %v13882_v5, %v13953_v61  ;;  %v6044_v59 = vmul.f32 %v13884_v18, %v14013_v24 }
 0x759   : > { %v13886_v15 = vpop.permute.xlu0 %5919  ;;  %v13888_v30 = vpop.permute.xlu1 %5999 }
 0x75a   : > { %v5963_v20 = vmul.f32 %v13886_v15, %v13957_v32  ;;  %v6043_v23 = vmul.f32 %v13888_v30, %v14017_v10 }
 0x75c   : > { %v14152_v50 = vadd.f32 %v6043_v23, %v5963_v20  ;;  %v6073_v20 = vmul.f32 %v14103_v2, %v13878_v8 }
 0x75d   : > { %v13894_v45 = vpop.permute.xlu0 %5925  ;;  %v13900_v52 = vpop.permute.xlu1 %6005 }
 0x75e   : > { %v5966_v35 = vmul.f32 %v13894_v45, %v13963_v63  ;;  %v6046_v60 = vmul.f32 %v13900_v52, %v14024_v47  ;;  %v14138_v47 = vadd.f32 %v6044_v59, %v5964_v16  ;;  %v14158_v16 = vmul.f32 %v8733_v29, %v5334_v13 }
 0x760   : > { %v14154_v26 = vadd.f32 %v6046_v60, %v5966_v35  ;;  %v6088_v60 = vsub.f32 %v6072_v39, %v13931_v27  ;;  %v6076_v8 = vmul.f32 %v14138_v47, %v13882_v5  ;;  %v16735_v27 = vld [vmem:[#allocation12_spill] sm:$0xff] }
 0x761   : > { %v13915_v1 = vpop.permute.xlu0 %5923  ;;  %v13918_v40 = vpop.permute.xlu1 %6003  ;;  %v6090_v39 = vsub.f32 %v6074_v54, %v16735_v27 }
 0x762   : > { %16691 = vst [vmem:[#allocation60_spill] sm:$0xff] %v13918_v40  ;;  %v5965_v21 = vmul.f32 %v13915_v1, %v13967_v12  ;;  %v6045_v11 = vmul.f32 %v13918_v40, %v14028_v7  ;;  %v14142_v7 = vsel %vm11089_vm7, %v5413_v6, 0.0  ;;  %16732 = vst [vmem:[#allocation31_spill] sm:$0xff] %v14154_v26  ;;  %v6071_v6 = vmul.f32 %v14096_v33, %v13870_v51 }
 0x764   : > { %v14162_v59 = vadd.f32 %v6045_v11, %v5965_v21  ;;  %v14181_v21 = vstv %s4259_s20 }
 0x765   : > { %v13937_v3 = vpop.permute.xlu0 %5929  ;;  %v13949_v14 = vpop.permute.xlu1 %6009 }
 0x766   : > { %16699 = vst [vmem:[#allocation46_spill] sm:$0xff] %v13949_v14  ;;  %v5968_v41 = vmul.f32 %v13937_v3, %v13974_v56  ;;  %v6048_v44 = vmul.f32 %v13949_v14, %v14032_v46  ;;  %v14146_v46 = vsel %vm11089_vm7, %v5414_v9, 0.0  ;;  %16733 = vst [vmem:[#allocation41_spill] sm:$0xff] %v14162_v59  ;;  %v14198_v40 = vmul.f32 %v14162_v59, %v13915_v1 }
 0x768   : > { %v14164_v9 = vadd.f32 %v6048_v44, %v5968_v41  ;;  %v16734_v44 = vld [vmem:[#allocation55_spill] sm:$0xff] }
 0x769   : > { %v13990_v49 = vpop.permute.xlu0 %5927  ;;  %v13997_v55 = vpop.permute.xlu1 %6007 }
 0x76a   : > { %16712 = vst [vmem:[#allocation11_spill] sm:$0xff] %v13997_v55  ;;  %v5967_v23 = vmul.f32 %v13990_v49, %v14006_v43  ;;  %v6047_v29 = vmul.f32 %v13997_v55, %v14040_v37  ;;  %v6087_v37 = vsub.f32 %v6071_v6, %v16734_v44  ;;  %v6075_v55 = vmul.f32 %v14152_v50, %v13886_v15 }
 0x76b   : > { %v14202_v5 = vmul.f32 %v14164_v9, %v13937_v3 }
 0x76d   : > { %v14047_v4 = vpop.permute.xlu0 %5933  ;;  %v14055_v36 = vpop.permute.xlu1 %6013 }
 0x76e   : > { %16725 = vst [vmem:[#allocation65_spill] sm:$0xff] %v14055_v36  ;;  %v5970_v51 = vmul.f32 %v14047_v4, %v14036_v58  ;;  %v6050_v13 = vmul.f32 %v14055_v36, %v14044_v34  ;;  %v14193_v34 = vmul.f32 %v14154_v26, %v13894_v45  ;;  %v16736_v45 = vld [vmem:[#allocation28_spill] sm:$0xff] }
 0x76f   : > { %v6089_v26 = vsub.f32 %v6073_v20, %v16736_v45 }
 0x770   : > { %v14206_v6 = vadd.f32 %v6050_v13, %v5970_v51  ;;  %v6094_v20 = vsub.f32 %v14193_v34, %v13963_v63  ;;  %v16739_v34 = vld [vmem:[#allocation57_spill] sm:$0xff] }
 0x771   : > { %v14098_v38 = vpop.permute.xlu0 %5931  ;;  %v14109_v42 = vpop.permute.xlu1 %6011 }
 0x772   : > { %v5969_v54 = vmul.f32 %v14098_v38, %v14082_v57 }
 0x775   : > { %v14156_v19 = vpop.permute.xlu0 %5937  ;;  %v14166_v14 = vpop.permute.xlu1 %6017 }
 0x779   : > { %v14208_v15 = vpop.permute.xlu0 %5935  ;;  %v14215_v27 = vpop.permute.xlu1 %6015 }
 0x7c8   : > { %v9684_v35 = vpop.f32.mrb[128].mxu0 }
 0x7c9   : > { %v5288_v11 = vmax.f32 %v9684_v35, 0.0  ;;  %v5128_v41 = vpop.f32.mrb[129].mxu0  ;;  %v14204_v35 = vadd.f32 %v6047_v29, %v5967_v23  ;;  %v6092_v23 = vsub.f32 %v6076_v8, %v13953_v61  ;;  %v16738_v61 = vld [vmem:[#allocation64_spill] sm:$0xff] }
 0x7ca   : > { %v5287_v36 = vmax.f32 %v5128_v41, 0.0  ;;  %v16737_v41 = vld [vmem:[#allocation13_spill] sm:$0xff] }
 0x7cb   : > { %v6104_v44 = vsub.f32 %v6088_v60, %v5288_v11  ;;  %v6049_v1 = vmul.f32 %v14109_v42, %v16737_v41  ;;  %v6091_v60 = vsub.f32 %v6075_v55, %v13957_v32  ;;  %v6093_v41 = vsub.f32 %v14198_v40, %v13967_v12  ;;  %v14242_v12 = vpop.permute.xlu1 %6019 }
 0x7cc   : > { %v6103_v59 = vsub.f32 %v6087_v37, %v5287_v36  ;;  %v9687_v3 = vpop.f32.mrb[130].mxu0  ;;  %v14227_v36 = vpop.permute.xlu0 %5939  ;;  %v14232_v55 = vmul.f32 %v14204_v35, %v13990_v49  ;;  %v14236_v32 = vmul.f32 %v14206_v6, %v14047_v4  ;;  %v5972_v40 = vmul.f32 %v14156_v19, %v14129_v0 }
 0x7cd   : > { %v6169_v29 = vmul.f32 %v14181_v21, %v6104_v44  ;;  %v5290_v51 = vmax.f32 %v9687_v3, 0.0  ;;  %v5138_v13 = vpop.f32.mrb[131].mxu0  ;;  %v14238_v63 = vadd.f32 %v6049_v1, %v5969_v54 }
 0x7ce   : > { %v6168_v11 = vmul.f32 %v14181_v21, %v6103_v59  ;;  %v5289_v45 = vmax.f32 %v5138_v13, 0.0 }
 0x7cf   : > { %v6201_v8 = vadd.f32 %v6169_v29, %v16738_v61  ;;  %v6106_v44 = vsub.f32 %v6090_v39, %v5290_v51  ;;  %v16740_v39 = vld [vmem:[#allocation22_spill] sm:$0xff]  ;;  %v5971_v61 = vmul.f32 %v14208_v15, %v14133_v25 }
 0x7d0   : > { %v6200_v59 = vadd.f32 %v6168_v11, %v16739_v34  ;;  %v6105_v3 = vsub.f32 %v6089_v26, %v5289_v45  ;;  %v9690_v29 = vpop.f32.mrb[132].mxu0  ;;  %v6052_v51 = vmul.f32 %v14166_v14, %v16740_v39  ;;  %v16744_v34 = vld [vmem:[#allocation56_spill] sm:$0xff] }
 0x7d1   : > { %v14250_v13 = vsel %vm198_vm8, %v14184_v48, %v6201_v8  ;;  %v6171_v4 = vmul.f32 %v14181_v21, %v6106_v44  ;;  %v5292_v54 = vmax.f32 %v9690_v29, 0.0  ;;  %v5148_v1 = vpop.f32.mrb[133].mxu0  ;;  %v6051_v8 = vmul.f32 %v14215_v27, %v14091_v28 }
 0x7d2   : > { %16742 = vst [vmem:[#allocation20_spill] sm:$0xff] %v14250_v13  ;;  %v14258_v26 = vsel %vm198_vm8, %v14184_v48, %v6200_v59  ;;  %v6170_v11 = vmul.f32 %v14181_v21, %v6105_v3  ;;  %v5291_v45 = vmax.f32 %v5148_v1, 0.0  ;;  %7441 = vrot.lane.b32.xlu1 %v14250_v13, %s10170_s28  ;;  %v14268_v44 = vsel %vm11089_vm7, %v14135_v31, 0.0  ;;  %v16745_v59 = vld [vmem:[#allocation63_spill] sm:$0xff] }
 0x7d3   : > { %16743 = vst [vmem:[#allocation5_spill] sm:$0xff] %v14258_v26  ;;  %v6203_v29 = vadd.f32 %v6171_v4, %v16744_v34  ;;  %v6108_v37 = vsub.f32 %v6092_v23, %v5292_v54  ;;  %7438 = vrot.lane.b32.xlu0 %v14258_v26, %s10170_s28  ;;  %9734 = vmatprep.mubr.msk.f32.mxu1 %vm234_vm3, %v14258_v26  ;;  %v14282_v23 = vpop.permute.xlu0 %5941 }
 0x7d4   : > { %v6202_v3 = vadd.f32 %v6170_v11, %v16745_v59  ;;  %v6107_v1 = vsub.f32 %v6091_v60, %v5291_v45  ;;  %v9693_v39 = vpop.f32.mrb[134].mxu0  ;;  %9735 = vmatmul.mubr.msk.f32.vlgmr.msra.gmra.mrb[128].mxu1 %vm234_vm3, %v14250_v13  ;;  %v6095_v31 = vsub.f32 %v14232_v55, %v14006_v43  ;;  %v6098_v4 = vsub.f32 %v14236_v32, %v14036_v58  ;;  %v16747_v59 = vld [vmem:[#allocation8_spill] sm:$0xff]  ;;  %v14297_v58 = vpop.permute.xlu1 %6021 }
 0x7d5   : > { %v14287_v54 = vsel %vm198_vm8, %v14184_v48, %v6203_v29  ;;  %v6173_v11 = vmul.f32 %v14181_v21, %v6108_v37  ;;  %v5294_v60 = vmax.f32 %v9693_v39, 0.0  ;;  %v5158_v45 = vpop.f32.mrb[135].mxu0  ;;  %v6081_v34 = vmul.f32 %v14238_v63, %v14098_v38  ;;  %9957 = vmatpush3.bf16.msk.msra.mxu1 %vm10230_vm2, %v16747_v59  ;;  %v16750_v39 = vld [vmem:[#allocation15_spill] sm:$0xff] }
 0x7d6   : > { %16746 = vst [vmem:[#allocation7_spill] sm:$0xff] %v14287_v54  ;;  %v14295_v43 = vadd.f32 %v6052_v51, %v5972_v40  ;;  %v14302_v55 = vsel %vm198_vm8, %v14184_v48, %v6202_v3  ;;  %v6172_v37 = vmul.f32 %v14181_v21, %v6107_v1  ;;  %v5293_v32 = vmax.f32 %v5158_v45, 0.0  ;;  %7447 = vrot.lane.b32.xlu1 %v14287_v54, %s10170_s28 }
 0x7d7   : > { %16749 = vst [vmem:[#allocation39_spill] sm:$0xff] %v14302_v55  ;;  %v14307_v38 = vadd.f32 %v6051_v8, %v5971_v61  ;;  %v14312_v40 = vsel %vm11089_vm7, %v14158_v16, 0.0  ;;  %v6205_v51 = vadd.f32 %v6173_v11, %v16750_v39  ;;  %v6110_v26 = vsub.f32 %v6094_v20, %v5294_v60  ;;  %7444 = vrot.lane.b32.xlu0 %v14302_v55, %s10170_s28  ;;  %v16751_v8 = vld [vmem:[#allocation54_spill] sm:$0xff] }
 0x7d8   : > { %9737 = vmatprep.mubr.msk.f32.mxu1 %vm234_vm3, %v14302_v55  ;;  %v5973_v29 = vmul.f32 %v14227_v36, %v14268_v44  ;;  %v5974_v61 = vmul.f32 %v14282_v23, %v14312_v40  ;;  %v6204_v3 = vadd.f32 %v6172_v37, %v16751_v8  ;;  %v6109_v1 = vsub.f32 %v6093_v41, %v5293_v32  ;;  %v9696_v16 = vpop.f32.mrb[136].mxu0 }
 0x7d9   : > { %9738 = vmatmul.mubr.msk.f32.gmra.mrb[130].mxu1 %vm234_vm3, %v14287_v54  ;;  %v6054_v20 = vmul.f32 %v14297_v58, %v14146_v46  ;;  %v14331_v11 = vsel %vm198_vm8, %v14184_v48, %v6205_v51  ;;  %v6175_v60 = vmul.f32 %v14181_v21, %v6110_v26  ;;  %v5296_v45 = vmax.f32 %v9696_v16, 0.0  ;;  %v5168_v59 = vpop.f32.mrb[137].mxu0  ;;  %v16754_v51 = vld [vmem:[#allocation17_spill] sm:$0xff] }
 0x7da   : > { %16752 = vst [vmem:[#allocation55_spill] sm:$0xff] %v14331_v11  ;;  %v6053_v37 = vmul.f32 %v14242_v12, %v14142_v7  ;;  %v14339_v41 = vsel %vm198_vm8, %v14184_v48, %v6204_v3  ;;  %v6174_v32 = vmul.f32 %v14181_v21, %v6109_v1  ;;  %v5295_v39 = vmax.f32 %v5168_v59, 0.0  ;;  %7453 = vrot.lane.b32.xlu1 %v14331_v11, %s10170_s28 }
 0x7db   : > { %16753 = vst [vmem:[#allocation12_spill] sm:$0xff] %v14339_v41  ;;  %v6207_v8 = vadd.f32 %v6175_v60, %v16754_v51  ;;  %v16755_v26 = vsub.f32 %v14202_v5, %v13974_v56  ;;  %7450 = vrot.lane.b32.xlu0 %v14339_v41, %s10170_s28  ;;  %9740 = vmatprep.mubr.msk.f32.mxu1 %vm234_vm3, %v14339_v41 }
 0x7dc   : > { %v6097_v3 = vsub.f32 %v6081_v34, %v14082_v57  ;;  %v6206_v1 = vadd.f32 %v6174_v32, %v16756_v22  ;;  %v6111_v59 = vsub.f32 %v6095_v31, %v5295_v39  ;;  %v9699_v55 = vpop.f32.mrb[138].mxu0  ;;  %v6084_v60 = vmul.f32 %v14295_v43, %v14156_v19 }
 0x7dd   : > { %v6112_v16 = vsub.f32 %v16755_v26, %v5296_v45  ;;  %9741 = vmatmul.mubr.msk.f32.gmra.mrb[132].mxu1 %vm234_vm3, %v14331_v11  ;;  %v6083_v56 = vmul.f32 %v14307_v38, %v14208_v15  ;;  %v14360_v5 = vadd.f32 %v6054_v20, %v5974_v61  ;;  %v14365_v45 = vsel %vm198_vm8, %v14184_v48, %v6207_v8  ;;  %v5178_v31 = vpop.f32.mrb[139].mxu0  ;;  %v16759_v20 = vld [vmem:[#allocation62_spill] sm:$0xff] }
 0x7de   : > { %16757 = vst [vmem:[#allocation28_spill] sm:$0xff] %v14365_v45  ;;  %v5298_v57 = vmax.f32 %v9699_v55, 0.0  ;;  %v14368_v34 = vadd.f32 %v6053_v37, %v5973_v29  ;;  %v14373_v19 = vsel %vm198_vm8, %v14184_v48, %v6206_v1  ;;  %v6176_v15 = vmul.f32 %v14181_v21, %v6111_v59  ;;  %7459 = vrot.lane.b32.xlu1 %v14365_v45, %s10170_s28  ;;  %v16760_v55 = vld [vmem:[#allocation19_spill] sm:$0xff] }
 0x7df   : > { %v6177_v22 = vmul.f32 %v14181_v21, %v6112_v16  ;;  %16758 = vst [vmem:[#allocation64_spill] sm:$0xff] %v14373_v19  ;;  %v5297_v61 = vmax.f32 %v5178_v31, 0.0  ;;  %7456 = vrot.lane.b32.xlu0 %v14373_v19, %s10170_s28  ;;  %9743 = vmatprep.mubr.msk.f32.mxu1 %vm234_vm3, %v14373_v19  ;;  %v6100_v8 = vsub.f32 %v6084_v60, %v14129_v0 }
 0x7e0   : > { %v6114_v39 = vsub.f32 %v6098_v4, %v5298_v57  ;;  %v6208_v29 = vadd.f32 %v6176_v15, %v16760_v55  ;;  %v9702_v51 = vpop.f32.mrb[140].mxu0  ;;  %v6099_v26 = vsub.f32 %v6083_v56, %v14133_v25  ;;  %v6085_v56 = vmul.f32 %v14368_v34, %v14227_v36 }
 0x7e1   : > { %v6209_v32 = vadd.f32 %v6177_v22, %v16759_v20  ;;  %v6113_v37 = vsub.f32 %v6097_v3, %v5297_v61  ;;  %9744 = vmatmul.mubr.msk.f32.gmra.mrb[134].mxu1 %vm234_vm3, %v14365_v45  ;;  %v5300_v1 = vmax.f32 %v9702_v51, 0.0  ;;  %v5188_v59 = vpop.f32.mrb[141].mxu0  ;;  %v6086_v3 = vmul.f32 %v14360_v5, %v14282_v23  ;;  %v16763_v22 = vld [vmem:[#allocation18_spill] sm:$0xff] }
 0x7e2   : > { %v6179_v16 = vmul.f32 %v14181_v21, %v6114_v39  ;;  %v14399_v0 = vsel %vm198_vm8, %v14184_v48, %v6208_v29  ;;  %v5299_v25 = vmax.f32 %v5188_v59, 0.0  ;;  %v16764_v23 = vld [vmem:[#allocation38_spill] sm:$0xff]  ;;  %v16769_v59 = vld [vmem:[#allocation23_spill] sm:$0xff] }
 0x7e3   : > { %v14391_v4 = vsel %vm198_vm8, %v14184_v48, %v6209_v32  ;;  %16762 = vst [vmem:[#allocation56_spill] sm:$0xff] %v14399_v0  ;;  %v6178_v60 = vmul.f32 %v14181_v21, %v6113_v37  ;;  %v6116_v31 = vsub.f32 %v6100_v8, %v5300_v1  ;;  %7462 = vrot.lane.b32.xlu0 %v14399_v0, %s10170_s28  ;;  %v16765_v61 = vld [vmem:[#allocation26_spill] sm:$0xff]  ;;  %v16766_v32 = vld [vmem:[#allocation24_spill] sm:$0xff] }
 0x7e4   : > { %16761 = vst [vmem:[#allocation57_spill] sm:$0xff] %v14391_v4  ;;  %7465 = vrot.lane.b32.xlu1 %v14391_v4, %s10170_s28  ;;  %v6211_v57 = vadd.f32 %v6179_v16, %v16763_v22  ;;  %9746 = vmatprep.mubr.msk.f32.mxu1 %vm234_vm3, %v14399_v0  ;;  %v6120_v15 = vmul.f32 %v14094_v53, %v16764_v23  ;;  %v9705_v29 = vpop.f32.mrb[142].mxu0 }
 0x7e5   : > { %v6119_v20 = vmul.f32 %v14096_v33, %v16765_v61  ;;  %v6210_v39 = vadd.f32 %v6178_v60, %v16766_v32  ;;  %v6115_v55 = vsub.f32 %v6099_v26, %v5299_v25  ;;  %9747 = vmatmul.mubr.msk.f32.gmra.mrb[136].mxu1 %vm234_vm3, %v14391_v4  ;;  %v6181_v37 = vmul.f32 %v14181_v21, %v6116_v31  ;;  %v5198_v8 = vpop.f32.mrb[143].mxu0  ;;  %v16771_v31 = vld [vmem:[#allocation66_spill] sm:$0xff] }
 0x7e6   : > { %v14421_v36 = vsel %vm198_vm8, %v14184_v48, %v6211_v57  ;;  %v5302_v51 = vmax.f32 %v9705_v29, 0.0  ;;  %v6102_v53 = vsub.f32 %v6086_v3, %v14312_v40  ;;  %v5301_v16 = vmax.f32 %v5198_v8, 0.0  ;;  %v16770_v40 = vld [vmem:[#allocation30_spill] sm:$0xff] }
 0x7e7   : > { %16767 = vst [vmem:[#allocation63_spill] sm:$0xff] %v14421_v36  ;;  %v14428_v33 = vsel %vm198_vm8, %v14184_v48, %v6210_v39  ;;  %v6180_v26 = vmul.f32 %v14181_v21, %v6115_v55  ;;  %v6101_v1 = vsub.f32 %v6085_v56, %v14268_v44  ;;  %v6213_v60 = vadd.f32 %v6181_v37, %v16769_v59  ;;  %v16772_v44 = vld [vmem:[#allocation45_spill] sm:$0xff]  ;;  %v16773_v61 = vld [vmem:[#allocation42_spill] sm:$0xff] }
 0x7e8   : > { %16768 = vst [vmem:[#allocation8_spill] sm:$0xff] %v14428_v33  ;;  %7471 = vrot.lane.b32.xlu1 %v14421_v36, %s10170_s28  ;;  %v6118_v25 = vsub.f32 %v6102_v53, %v5302_v51  ;;  %7468 = vrot.lane.b32.xlu0 %v14428_v33, %s10170_s28  ;;  %v9708_v57 = vpop.f32.mrb[144].mxu0  ;;  %v6136_v23 = vsub.f32 %v6120_v15, %v16771_v31  ;;  %v16775_v51 = vld [vmem:[#allocation49_spill] sm:$0xff] }
 0x7e9   : > { %9749 = vmatprep.mubr.msk.f32.mxu1 %vm234_vm3, %v14428_v33  ;;  %v6212_v3 = vadd.f32 %v6180_v26, %v16770_v40  ;;  %v6117_v22 = vsub.f32 %v6101_v1, %v5301_v16  ;;  %v6135_v56 = vsub.f32 %v6119_v20, %v16772_v44  ;;  %v6122_v32 = vmul.f32 %v14101_v17, %v16773_v61  ;;  %v5208_v37 = vpop.f32.mrb[145].mxu0  ;;  %v16777_v1 = vld [vmem:[#allocation33_spill] sm:$0xff] }
 0x7ea   : > { %9750 = vmatmul.mubr.msk.f32.gmra.mrb[138].mxu1 %vm234_vm3, %v14421_v36  ;;  %v14449_v39 = vsel %vm198_vm8, %v14184_v48, %v6213_v60  ;;  %v6183_v55 = vmul.f32 %v14181_v21, %v6118_v25  ;;  %v5304_v29 = vmax.f32 %v9708_v57, 0.0  ;;  %v6121_v15 = vmul.f32 %v14103_v2, %v16775_v51  ;;  %v16781_v31 = vld [vmem:[#allocation61_spill] sm:$0xff] }
 0x7eb   : > { %16774 = vst [vmem:[#allocation6_spill] sm:$0xff] %v14449_v39  ;;  %v14457_v53 = vsel %vm198_vm8, %v14184_v48, %v6212_v3  ;;  %v6182_v20 = vmul.f32 %v14181_v21, %v6117_v22  ;;  %v5303_v17 = vmax.f32 %v5208_v37, 0.0  ;;  %v6124_v2 = vmul.f32 %v14138_v47, %v13884_v18  ;;  %v16779_v22 = vld [vmem:[#allocation51_spill] sm:$0xff]  ;;  %v16782_v44 = vld [vmem:[#allocation29_spill] sm:$0xff] }
 0x7ec   : > { %16776 = vst [vmem:[#allocation15_spill] sm:$0xff] %v14457_v53  ;;  %7477 = vrot.lane.b32.xlu1 %v14449_v39, %s10170_s28  ;;  %v6215_v8 = vadd.f32 %v6183_v55, %v16728_v62  ;;  %v6152_v26 = vsub.f32 %v6136_v23, %v5304_v29  ;;  %7474 = vrot.lane.b32.xlu0 %v14457_v53, %s10170_s28  ;;  %v9711_v25 = vpop.f32.mrb[146].mxu0 }
 0x7ed   : > { %9752 = vmatprep.mubr.msk.f32.mxu1 %vm234_vm3, %v14457_v53  ;;  %v6123_v16 = vmul.f32 %v14152_v50, %v13888_v30  ;;  %v6214_v59 = vadd.f32 %v6182_v20, %v16777_v1  ;;  %v6151_v60 = vsub.f32 %v6135_v56, %v5303_v17  ;;  %v5306_v3 = vmax.f32 %v9711_v25, 0.0  ;;  %v5218_v47 = vpop.f32.mrb[147].mxu0  ;;  %v16784_v20 = vld [vmem:[#allocation31_spill] sm:$0xff]  ;;  %v16787_v25 = vld [vmem:[#allocation41_spill] sm:$0xff] }
 0x7ee   : > { %9753 = vmatmul.mubr.msk.f32.gmra.mrb[140].mxu1 %vm234_vm3, %v14449_v39  ;;  %v14477_v62 = vsel %vm198_vm8, %v14184_v48, %v6215_v8  ;;  %v6185_v40 = vmul.f32 %v14181_v21, %v6152_v26  ;;  %v6138_v18 = vsub.f32 %v6122_v32, %v16779_v22  ;;  %v5305_v57 = vmax.f32 %v5218_v47, 0.0  ;;  %v16783_v32 = vld [vmem:[#allocation27_spill] sm:$0xff]  ;;  %v16790_v22 = vld [vmem:[#allocation46_spill] sm:$0xff] }
 0x7ef   : > { %16778 = vst [vmem:[#allocation54_spill] sm:$0xff] %v14477_v62  ;;  %v14484_v30 = vsel %vm198_vm8, %v14184_v48, %v6214_v59  ;;  %v6184_v50 = vmul.f32 %v14181_v21, %v6151_v60  ;;  %v6137_v23 = vsub.f32 %v6121_v15, %v16781_v31  ;;  %v6140_v51 = vsub.f32 %v6124_v2, %v14013_v24  ;;  %v16786_v60 = vld [vmem:[#allocation60_spill] sm:$0xff]  ;;  %v16791_v47 = vld [vmem:[#allocation11_spill] sm:$0xff] }
 0x7f0   : > { %16780 = vst [vmem:[#allocation17_spill] sm:$0xff] %v14484_v30  ;;  %7483 = vrot.lane.b32.xlu1 %v14477_v62, %s10170_s28  ;;  %v6217_v56 = vadd.f32 %v6185_v40, %v16782_v44  ;;  %v6154_v61 = vsub.f32 %v6138_v18, %v5306_v3  ;;  %7480 = vrot.lane.b32.xlu0 %v14484_v30, %s10170_s28  ;;  %v9714_v37 = vpop.f32.mrb[148].mxu0 }
 0x7f1   : > { %9755 = vmatprep.mubr.msk.f32.mxu1 %vm234_vm3, %v14484_v30  ;;  %v6216_v55 = vadd.f32 %v6184_v50, %v16783_v32  ;;  %v6153_v29 = vsub.f32 %v6137_v23, %v5305_v57  ;;  %v6139_v15 = vsub.f32 %v6123_v16, %v14017_v10  ;;  %v6126_v17 = vmul.f32 %v16784_v20, %v13900_v52  ;;  %v5228_v1 = vpop.f32.mrb[149].mxu0  ;;  %v16789_v10 = vld [vmem:[#allocation32_spill] sm:$0xff]  ;;  %v16793_v32 = vld [vmem:[#allocation47_spill] sm:$0xff] }
 0x7f2   : > { %9756 = vmatmul.mubr.msk.f32.gmra.mrb[142].mxu1 %vm234_vm3, %v14477_v62  ;;  %v6187_v8 = vmul.f32 %v14181_v21, %v6154_v61  ;;  %v5308_v26 = vmax.f32 %v9714_v37, 0.0  ;;  %v14506_v59 = vsel %vm198_vm8, %v14184_v48, %v6217_v56  ;;  %v6125_v24 = vmul.f32 %v16787_v25, %v16786_v60  ;;  %v16792_v57 = vld [vmem:[#allocation40_spill] sm:$0xff] }
 0x7f3   : > { %16785 = vst [vmem:[#allocation58_spill] sm:$0xff] %v14506_v59  ;;  %v6186_v2 = vmul.f32 %v14181_v21, %v6153_v29  ;;  %v5307_v40 = vmax.f32 %v5228_v1, 0.0  ;;  %v14516_v52 = vsel %vm198_vm8, %v14184_v48, %v6216_v55  ;;  %v6128_v18 = vmul.f32 %v14164_v9, %v16790_v22  ;;  %v16798_v1 = vld [vmem:[#allocation35_spill] sm:$0xff] }
 0x7f4   : > { %7617 = vrot.lane.b32.xlu1 %v14506_v59, %s10170_s28  ;;  %16788 = vst [vmem:[#allocation62_spill] sm:$0xff] %v14516_v52  ;;  %v6219_v16 = vadd.f32 %v6187_v8, %v16789_v10  ;;  %v6156_v3 = vsub.f32 %v6140_v51, %v5308_v26  ;;  %7614 = vrot.lane.b32.xlu0 %v14516_v52, %s10170_s28  ;;  %v9717_v44 = vpop.f32.mrb[150].mxu0  ;;  %v16795_v51 = vld [vmem:[#allocation14_spill] sm:$0xff]  ;;  %v16800_v10 = vld [vmem:[#allocation67_spill] sm:$0xff] }
 0x7f5   : > { %9758 = vmatprep.mubr.msk.f32.mxu1 %vm234_vm3, %v14516_v52  ;;  %v6127_v50 = vmul.f32 %v14204_v35, %v16791_v47  ;;  %v6218_v31 = vadd.f32 %v6186_v2, %v16792_v57  ;;  %v6155_v23 = vsub.f32 %v6139_v15, %v5307_v40  ;;  %v5310_v61 = vmax.f32 %v9717_v44, 0.0  ;;  %v5238_v29 = vpop.f32.mrb[151].mxu0  ;;  %v16799_v2 = vld [vmem:[#allocation50_spill] sm:$0xff] }
 0x7f6   : > { %9759 = vmatmul.mubr.msk.f32.gmra.mrb[144].mxu1 %vm234_vm3, %v14506_v59  ;;  %v6189_v56 = vmul.f32 %v14181_v21, %v6156_v3  ;;  %v6142_v55 = vsub.f32 %v6126_v17, %v16793_v32  ;;  %v14535_v9 = vsel %vm198_vm8, %v14184_v48, %v6219_v16  ;;  %v5309_v37 = vmax.f32 %v5238_v29, 0.0  ;;  %v16797_v17 = vld [vmem:[#allocation25_spill] sm:$0xff] }
 0x7f7   : > { %16794 = vst [vmem:[#allocation19_spill] sm:$0xff] %v14535_v9  ;;  %v6188_v35 = vmul.f32 %v14181_v21, %v6155_v23  ;;  %v6141_v15 = vsub.f32 %v6125_v24, %v16795_v51  ;;  %v14544_v20 = vsel %vm198_vm8, %v14184_v48, %v6218_v31  ;;  %v6144_v40 = vsub.f32 %v6128_v18, %v16799_v2  ;;  %v16801_v3 = vld [vmem:[#allocation65_spill] sm:$0xff] }
 0x7f8   : > { %7623 = vrot.lane.b32.xlu1 %v14535_v9, %s10170_s28  ;;  %16796 = vst [vmem:[#allocation18_spill] sm:$0xff] %v14544_v20  ;;  %v6221_v8 = vadd.f32 %v6189_v56, %v16797_v17  ;;  %v6158_v26 = vsub.f32 %v6142_v55, %v5310_v61  ;;  %7620 = vrot.lane.b32.xlu0 %v14544_v20, %s10170_s28  ;;  %v9720_v24 = vpop.f32.mrb[152].mxu0  ;;  %v16805_v55 = vld [vmem:[#allocation52_spill] sm:$0xff]  ;;  %v16806_v17 = vld [vmem:[#allocation34_spill] sm:$0xff] }
 0x7f9   : > { %9761 = vmatprep.mubr.msk.f32.mxu1 %vm234_vm3, %v14544_v20  ;;  %v6220_v60 = vadd.f32 %v6188_v35, %v16798_v1  ;;  %v6157_v25 = vsub.f32 %v6141_v15, %v5309_v37  ;;  %v6143_v16 = vsub.f32 %v6127_v50, %v16800_v10  ;;  %v6130_v22 = vmul.f32 %v14206_v6, %v16801_v3  ;;  %v5248_v31 = vpop.f32.mrb[153].mxu0  ;;  %v16804_v50 = vld [vmem:[#allocation43_spill] sm:$0xff] }
 0x7fa   : > { %9762 = vmatmul.mubr.msk.f32.gmra.mrb[146].mxu1 %vm234_vm3, %v14535_v9  ;;  %v6191_v47 = vmul.f32 %v14181_v21, %v6158_v26  ;;  %v5312_v57 = vmax.f32 %v9720_v24, 0.0  ;;  %v14562_v23 = vsel %vm198_vm8, %v14184_v48, %v6221_v8  ;;  %v6129_v18 = vmul.f32 %v14238_v63, %v14109_v42 }
 0x7fb   : > { %16802 = vst [vmem:[#allocation38_spill] sm:$0xff] %v14562_v23  ;;  %v6190_v44 = vmul.f32 %v14181_v21, %v6157_v25  ;;  %v5311_v56 = vmax.f32 %v5248_v31, 0.0  ;;  %v14572_v6 = vsel %vm198_vm8, %v14184_v48, %v6220_v60  ;;  %v6132_v42 = vmul.f32 %v14295_v43, %v14166_v14  ;;  %v16810_v25 = vld [vmem:[#allocation37_spill] sm:$0xff] }
 0x7fc   : > { %7629 = vrot.lane.b32.xlu1 %v14562_v23, %s10170_s28  ;;  %16803 = vst [vmem:[#allocation26_spill] sm:$0xff] %v14572_v6  ;;  %v6223_v61 = vadd.f32 %v6191_v47, %v16804_v50  ;;  %v6160_v32 = vsub.f32 %v6144_v40, %v5312_v57  ;;  %7626 = vrot.lane.b32.xlu0 %v14572_v6, %s10170_s28  ;;  %v9723_v37 = vpop.f32.mrb[154].mxu0  ;;  %v16811_v40 = vld [vmem:[#allocation9_spill] sm:$0xff] }
 0x7fd   : > { %9764 = vmatprep.mubr.msk.f32.mxu1 %vm234_vm3, %v14572_v6  ;;  %v6131_v63 = vmul.f32 %v14307_v38, %v14215_v27  ;;  %v6222_v29 = vadd.f32 %v6190_v44, %v16805_v55  ;;  %v6159_v35 = vsub.f32 %v6143_v16, %v5311_v56  ;;  %v5314_v15 = vmax.f32 %v9723_v37, 0.0  ;;  %v5258_v26 = vpop.f32.mrb[155].mxu0  ;;  %v16808_v38 = vld [vmem:[#allocation13_spill] sm:$0xff] }
 0x7fe   : > { %9765 = vmatmul.mubr.msk.f32.gmra.mrb[148].mxu1 %vm234_vm3, %v14562_v23  ;;  %v6193_v51 = vmul.f32 %v14181_v21, %v6160_v32  ;;  %v6146_v8 = vsub.f32 %v6130_v22, %v16806_v17  ;;  %v14591_v14 = vsel %vm198_vm8, %v14184_v48, %v6223_v61  ;;  %v5313_v43 = vmax.f32 %v5258_v26, 0.0  ;;  %v16812_v22 = vld [vmem:[#allocation22_spill] sm:$0xff] }
 0x7ff   : > { %16807 = vst [vmem:[#allocation24_spill] sm:$0xff] %v14591_v14  ;;  %v6192_v27 = vmul.f32 %v14181_v21, %v6159_v35  ;;  %v6145_v1 = vsub.f32 %v6129_v18, %v16808_v38  ;;  %v14600_v60 = vsel %vm198_vm8, %v14184_v48, %v6222_v29  ;;  %v6148_v47 = vsub.f32 %v6132_v42, %v16812_v22 }
 0x800   : > { %7635 = vrot.lane.b32.xlu1 %v14591_v14, %s10170_s28  ;;  %16809 = vst [vmem:[#allocation23_spill] sm:$0xff] %v14600_v60  ;;  %v6225_v24 = vadd.f32 %v6193_v51, %v16810_v25  ;;  %v6162_v2 = vsub.f32 %v6146_v8, %v5314_v15  ;;  %7632 = vrot.lane.b32.xlu0 %v14600_v60, %s10170_s28  ;;  %v9726_v3 = vpop.f32.mrb[156].mxu0  ;;  %v16820_v25 = vld [vmem:[#allocation59_spill] sm:$0xff] }
 0x801   : > { %9767 = vmatprep.mubr.msk.f32.mxu1 %vm234_vm3, %v14600_v60  ;;  %v6224_v10 = vadd.f32 %v6192_v27, %v16811_v40  ;;  %v6161_v16 = vsub.f32 %v6145_v1, %v5313_v43  ;;  %v6147_v57 = vsub.f32 %v6131_v63, %v14091_v28  ;;  %v6134_v31 = vmul.f32 %v14360_v5, %v14297_v58  ;;  %v5268_v56 = vpop.f32.mrb[157].mxu0  ;;  %v16815_v58 = vld [vmem:[#allocation53_spill] sm:$0xff] }
 0x802   : > { %9768 = vmatmul.mubr.msk.f32.gmra.mrb[150].mxu1 %vm234_vm3, %v14591_v14  ;;  %v6195_v18 = vmul.f32 %v14181_v21, %v6162_v2  ;;  %v5316_v44 = vmax.f32 %v9726_v3, 0.0  ;;  %v14618_v50 = vsel %vm198_vm8, %v14184_v48, %v6225_v24  ;;  %v6133_v61 = vmul.f32 %v14368_v34, %v14242_v12  ;;  %v16816_v12 = vld [vmem:[#allocation36_spill] sm:$0xff] }
 0x803   : > { %16813 = vst [vmem:[#allocation30_spill] sm:$0xff] %v14618_v50  ;;  %v6194_v32 = vmul.f32 %v14181_v21, %v6161_v16  ;;  %v5315_v42 = vmax.f32 %v5268_v56, 0.0  ;;  %v14628_v28 = vsel %vm198_vm8, %v14184_v48, %v6224_v10  ;;  %v6150_v51 = vsub.f32 %v6134_v31, %v14146_v46  ;;  %v16819_v46 = vld [vmem:[#allocation10_spill] sm:$0xff]  ;;  %v16823_v3 = vld [vmem:[#allocation44_spill] sm:$0xff] }
 0x804   : > { %7641 = vrot.lane.b32.xlu1 %v14618_v50, %s10170_s28  ;;  %16814 = vst [vmem:[#allocation66_spill] sm:$0xff] %v14628_v28  ;;  %v6227_v5 = vadd.f32 %v6195_v18, %v16815_v58  ;;  %v6164_v63 = vsub.f32 %v6148_v47, %v5316_v44  ;;  %7638 = vrot.lane.b32.xlu0 %v14628_v28, %s10170_s28  ;;  %v9729_v29 = vpop.f32.mrb[158].mxu0  ;;  %v16824_v47 = vld [vmem:[#allocation48_spill] sm:$0xff] }
 0x805   : > { %9770 = vmatprep.mubr.msk.f32.mxu1 %vm234_vm3, %v14628_v28  ;;  %v6226_v34 = vadd.f32 %v6194_v32, %v16816_v12  ;;  %v6163_v55 = vsub.f32 %v6147_v57, %v5315_v42  ;;  %v5318_v37 = vmax.f32 %v9729_v29, 0.0  ;;  %v5278_v15 = vpop.f32.mrb[159].mxu0  ;;  %v6149_v27 = vsub.f32 %v6133_v61, %v14142_v7  ;;  %v16827_v61 = vld [vmem:[#allocation5_spill] sm:$0xff] }
 0x806   : > { %9771 = vmatmul.mubr.msk.f32.gmra.mrb[152].mxu1 %vm234_vm3, %v14618_v50  ;;  %v6197_v35 = vmul.f32 %v14181_v21, %v6164_v63  ;;  %v14643_v17 = vsel %vm198_vm8, %v14184_v48, %v6227_v5  ;;  %v5317_v26 = vmax.f32 %v5278_v15, 0.0  ;;  %v16828_v5 = vld [vmem:[#allocation39_spill] sm:$0xff] }
 0x807   : > { %16817 = vst [vmem:[#allocation45_spill] sm:$0xff] %v14643_v17  ;;  %v6196_v8 = vmul.f32 %v14181_v21, %v6163_v55  ;;  %v14652_v43 = vsel %vm198_vm8, %v14184_v48, %v6226_v34  ;;  %v6166_v1 = vsub.f32 %v6150_v51, %v5318_v37 }
 0x808   : > { %7647 = vrot.lane.b32.xlu1 %v14643_v17, %s10170_s28  ;;  %16818 = vst [vmem:[#allocation42_spill] sm:$0xff] %v14652_v43  ;;  %v6229_v38 = vadd.f32 %v6197_v35, %v16819_v46  ;;  %7644 = vrot.lane.b32.xlu0 %v14652_v43, %s10170_s28  ;;  %v6165_v7 = vsub.f32 %v6149_v27, %v5317_v26 }
 0x809   : > { %9773 = vmatprep.mubr.msk.f32.mxu1 %vm234_vm3, %v14652_v43  ;;  %v6228_v24 = vadd.f32 %v6196_v8, %v16820_v25  ;;  %v6199_v2 = vmul.f32 %v14181_v21, %v6166_v1 }
 0x80a   : > { %9774 = vmatmul.mubr.msk.f32.gmra.mrb[154].mxu1 %vm234_vm3, %v14643_v17  ;;  %v14666_v40 = vsel %vm198_vm8, %v14184_v48, %v6229_v38  ;;  %v6198_v10 = vmul.f32 %v14181_v21, %v6165_v7 }
 0x80b   : > { %16821 = vst [vmem:[#allocation49_spill] sm:$0xff] %v14666_v40  ;;  %v14674_v16 = vsel %vm198_vm8, %v14184_v48, %v6228_v24  ;;  %v6231_v22 = vadd.f32 %v6199_v2, %v16823_v3 }
 0x80c   : > { %7653 = vrot.lane.b32.xlu1 %v14666_v40, %s10170_s28  ;;  %16822 = vst [vmem:[#allocation33_spill] sm:$0xff] %v14674_v16  ;;  %7650 = vrot.lane.b32.xlu0 %v14674_v16, %s10170_s28  ;;  %v6230_v57 = vadd.f32 %v6198_v10, %v16824_v47 }
 0x80d   : > { %9776 = vmatprep.mubr.msk.f32.mxu1 %vm234_vm3, %v14674_v16  ;;  %v14687_v21 = vsel %vm198_vm8, %v14184_v48, %v6231_v22 }
 0x80e   : > { %9777 = vmatmul.mubr.msk.f32.gmra.mrb[156].mxu1 %vm234_vm3, %v14666_v40  ;;  %16825 = vst [vmem:[#allocation51_spill] sm:$0xff] %v14687_v21  ;;  %v14694_v31 = vsel %vm198_vm8, %v14184_v48, %v6230_v57 }
 0x80f   : > { %16826 = vst [vmem:[#allocation61_spill] sm:$0xff] %v14694_v31  ;;  %9779 = vmatprep.mubr.msk.f32.mxu1 %vm234_vm3, %v14694_v31 }
 0x810   : > { %7659 = vrot.lane.b32.xlu1 %v14687_v21, %s10170_s28  ;;  %7656 = vrot.lane.b32.xlu0 %v14694_v31, %s10170_s28 }
 0x812   : > { %9780 = vmatmul.mubr.msk.f32.gmra.mrb[158].mxu1 %vm234_vm3, %v14687_v21 }
 0x844   : > { %v7442_v18 = vpop.permute.xlu1 %7441 }
 0x845   : > { %v7443_v44 = vsel %vm1416_vm4, %v7442_v18, %v14250_v13  ;;  %v7439_v56 = vpop.permute.xlu0 %7438 }
 0x846   : > { %v7440_v32 = vsel %vm1416_vm4, %v7439_v56, %v16827_v61  ;;  %7488 = vrot.lane.b32.xlu1 %v7443_v44, %s10170_s28 }
 0x847   : > { %7486 = vrot.lane.b32.xlu0 %v7440_v32, %s10170_s28 }
 0x848   : > { %v7448_v48 = vpop.permute.xlu1 %7447 }
 0x849   : > { %v7449_v42 = vsel %vm1416_vm4, %v7448_v48, %v14287_v54  ;;  %v7445_v58 = vpop.permute.xlu0 %7444 }
 0x84a   : > { %v7446_v63 = vsel %vm1416_vm4, %v7445_v58, %v16828_v5  ;;  %7492 = vrot.lane.b32.xlu1 %v7449_v42, %s10170_s28 }
 0x84b   : > { %7490 = vrot.lane.b32.xlu0 %v7446_v63, %s10170_s28 }
 0x84c   : > { %v7454_v12 = vpop.permute.xlu1 %7453 }
 0x84d   : > { %v7455_v34 = vsel %vm1416_vm4, %v7454_v12, %v14331_v11  ;;  %v7451_v55 = vpop.permute.xlu0 %7450 }
 0x84e   : > { %v7452_v29 = vsel %vm1416_vm4, %v7451_v55, %v14339_v41  ;;  %7496 = vrot.lane.b32.xlu1 %v7455_v34, %s10170_s28 }
 0x84f   : > { %7494 = vrot.lane.b32.xlu0 %v7452_v29, %s10170_s28 }
 0x850   : > { %v7460_v35 = vpop.permute.xlu1 %7459 }
 0x851   : > { %v7461_v37 = vsel %vm1416_vm4, %v7460_v35, %v14365_v45  ;;  %v7457_v51 = vpop.permute.xlu0 %7456 }
 0x852   : > { %v7458_v15 = vsel %vm1416_vm4, %v7457_v51, %v14373_v19  ;;  %7500 = vrot.lane.b32.xlu1 %v7461_v37, %s10170_s28 }
 0x853   : > { %7498 = vrot.lane.b32.xlu0 %v7458_v15, %s10170_s28 }
 0x855   : > { %v7463_v27 = vpop.permute.xlu0 %7462 }
 0x856   : > { %v7466_v8 = vpop.permute.xlu1 %7465  ;;  %v7464_v46 = vsel %vm1416_vm4, %v7463_v27, %v14399_v0 }
 0x857   : > { %v7467_v26 = vsel %vm1416_vm4, %v7466_v8, %v14391_v4  ;;  %7502 = vrot.lane.b32.xlu0 %v7464_v46, %s10170_s28 }
 0x858   : > { %7504 = vrot.lane.b32.xlu1 %v7467_v26, %s10170_s28 }
 0x85a   : > { %v7472_v38 = vpop.permute.xlu1 %7471  ;;  %v7469_v25 = vpop.permute.xlu0 %7468 }
 0x85b   : > { %v7473_v1 = vsel %vm1416_vm4, %v7472_v38, %v14421_v36  ;;  %v7470_v24 = vsel %vm1416_vm4, %v7469_v25, %v14428_v33 }
 0x85c   : > { %7508 = vrot.lane.b32.xlu1 %v7473_v1, %s10170_s28  ;;  %7506 = vrot.lane.b32.xlu0 %v7470_v24, %s10170_s28 }
 0x85e   : > { %v7478_v7 = vpop.permute.xlu1 %7477  ;;  %v7475_v10 = vpop.permute.xlu0 %7474 }
 0x85f   : > { %v7479_v2 = vsel %vm1416_vm4, %v7478_v7, %v14449_v39  ;;  %v7476_v3 = vsel %vm1416_vm4, %v7475_v10, %v14457_v53 }
 0x860   : > { %7512 = vrot.lane.b32.xlu1 %v7479_v2, %s10170_s28  ;;  %7510 = vrot.lane.b32.xlu0 %v7476_v3, %s10170_s28 }
 0x862   : > { %v7484_v22 = vpop.permute.xlu1 %7483  ;;  %v7481_v57 = vpop.permute.xlu0 %7480 }
 0x863   : > { %v7485_v47 = vsel %vm1416_vm4, %v7484_v22, %v14477_v62  ;;  %v7482_v18 = vsel %vm1416_vm4, %v7481_v57, %v14484_v30 }
 0x864   : > { %7516 = vrot.lane.b32.xlu1 %v7485_v47, %s10170_s28  ;;  %7514 = vrot.lane.b32.xlu0 %v7482_v18, %s10170_s28 }
 0x866   : > { %v7618_v44 = vpop.permute.xlu1 %7617  ;;  %v7615_v32 = vpop.permute.xlu0 %7614 }
 0x867   : > { %v7619_v56 = vsel %vm1416_vm4, %v7618_v44, %v14506_v59  ;;  %v7616_v48 = vsel %vm1416_vm4, %v7615_v32, %v14516_v52 }
 0x868   : > { %7664 = vrot.lane.b32.xlu1 %v7619_v56, %s10170_s28  ;;  %7662 = vrot.lane.b32.xlu0 %v7616_v48, %s10170_s28 }
 0x86a   : > { %v7624_v42 = vpop.permute.xlu1 %7623  ;;  %v7621_v63 = vpop.permute.xlu0 %7620 }
 0x86b   : > { %v7625_v58 = vsel %vm1416_vm4, %v7624_v42, %v14535_v9  ;;  %v7622_v12 = vsel %vm1416_vm4, %v7621_v63, %v14544_v20 }
 0x86c   : > { %7668 = vrot.lane.b32.xlu1 %v7625_v58, %s10170_s28  ;;  %7666 = vrot.lane.b32.xlu0 %v7622_v12, %s10170_s28 }
 0x86e   : > { %v7630_v34 = vpop.permute.xlu1 %7629  ;;  %v7627_v29 = vpop.permute.xlu0 %7626 }
 0x86f   : > { %v7631_v55 = vsel %vm1416_vm4, %v7630_v34, %v14562_v23  ;;  %v7628_v35 = vsel %vm1416_vm4, %v7627_v29, %v14572_v6 }
 0x870   : > { %7672 = vrot.lane.b32.xlu1 %v7631_v55, %s10170_s28  ;;  %7670 = vrot.lane.b32.xlu0 %v7628_v35, %s10170_s28 }
 0x872   : > { %v7636_v37 = vpop.permute.xlu1 %7635  ;;  %v7633_v15 = vpop.permute.xlu0 %7632 }
 0x873   : > { %v7637_v51 = vsel %vm1416_vm4, %v7636_v37, %v14591_v14  ;;  %v7634_v8 = vsel %vm1416_vm4, %v7633_v15, %v14600_v60 }
 0x874   : > { %7676 = vrot.lane.b32.xlu1 %v7637_v51, %s10170_s28  ;;  %7674 = vrot.lane.b32.xlu0 %v7634_v8, %s10170_s28 }
 0x876   : > { %v7642_v26 = vpop.permute.xlu1 %7641  ;;  %v7639_v46 = vpop.permute.xlu0 %7638 }
 0x877   : > { %v7643_v27 = vsel %vm1416_vm4, %v7642_v26, %v14618_v50  ;;  %v7640_v38 = vsel %vm1416_vm4, %v7639_v46, %v14628_v28 }
 0x878   : > { %7680 = vrot.lane.b32.xlu1 %v7643_v27, %s10170_s28  ;;  %7678 = vrot.lane.b32.xlu0 %v7640_v38, %s10170_s28 }
 0x87a   : > { %v7648_v1 = vpop.permute.xlu1 %7647  ;;  %v7645_v24 = vpop.permute.xlu0 %7644 }
 0x87b   : > { %v7649_v25 = vsel %vm1416_vm4, %v7648_v1, %v14643_v17  ;;  %v7646_v7 = vsel %vm1416_vm4, %v7645_v24, %v14652_v43 }
 0x87c   : > { %7684 = vrot.lane.b32.xlu1 %v7649_v25, %s10170_s28  ;;  %7682 = vrot.lane.b32.xlu0 %v7646_v7, %s10170_s28 }
 0x87e   : > { %v7654_v2 = vpop.permute.xlu1 %7653  ;;  %v7651_v3 = vpop.permute.xlu0 %7650 }
 0x87f   : > { %v7655_v10 = vsel %vm1416_vm4, %v7654_v2, %v14666_v40  ;;  %v7652_v22 = vsel %vm1416_vm4, %v7651_v3, %v14674_v16 }
 0x880   : > { %7688 = vrot.lane.b32.xlu1 %v7655_v10, %s10170_s28  ;;  %7686 = vrot.lane.b32.xlu0 %v7652_v22, %s10170_s28 }
 0x882   : > { %v7660_v47 = vpop.permute.xlu1 %7659  ;;  %v7657_v18 = vpop.permute.xlu0 %7656 }
 0x883   : > { %v7661_v57 = vsel %vm1416_vm4, %v7660_v47, %v14687_v21  ;;  %v7658_v44 = vsel %vm1416_vm4, %v7657_v18, %v14694_v31 }
 0x884   : > { %7692 = vrot.lane.b32.xlu1 %v7661_v57, %s10170_s28  ;;  %7690 = vrot.lane.b32.xlu0 %v7658_v44, %s10170_s28 }
 0x8a7   : > { %v9736_v56 = vpop.f32.mrb[128].mxu1 }
 0x8a8   : > { %v6429_v32 = vpop.f32.mrb[129].mxu1  ;;  %v6589_v42 = vmax.f32 %v9736_v56, 0.0 }
 0x8a9   : > { %v6588_v48 = vmax.f32 %v6429_v32, 0.0 }
 0x8ab   : > { %9786 = vmatprep.mubr.msk.f32.mxu0 %vm234_vm3, %v6588_v48 }
 0x8ac   : > { %v9739_v58 = vpop.f32.mrb[130].mxu1  ;;  %9787 = vmatmul.mubr.msk.f32.vlgmr.msra.gmra.mrb[160].mxu0 %vm234_vm3, %v6589_v42 }
 0x8ad   : > { %v6439_v63 = vpop.f32.mrb[131].mxu1  ;;  %v6591_v34 = vmax.f32 %v9739_v58, 0.0 }
 0x8ae   : > { %v6590_v12 = vmax.f32 %v6439_v63, 0.0 }
 0x8b0   : > { %v9742_v55 = vpop.f32.mrb[132].mxu1  ;;  %9789 = vmatprep.mubr.msk.f32.mxu0 %vm234_vm3, %v6590_v12 }
 0x8b1   : > { %v6449_v29 = vpop.f32.mrb[133].mxu1  ;;  %9790 = vmatmul.mubr.msk.f32.gmra.mrb[162].mxu0 %vm234_vm3, %v6591_v34  ;;  %v6593_v37 = vmax.f32 %v9742_v55, 0.0 }
 0x8b2   : > { %v6592_v35 = vmax.f32 %v6449_v29, 0.0 }
 0x8b4   : > { %v9745_v51 = vpop.f32.mrb[134].mxu1  ;;  %9792 = vmatprep.mubr.msk.f32.mxu0 %vm234_vm3, %v6592_v35 }
 0x8b5   : > { %v6459_v15 = vpop.f32.mrb[135].mxu1  ;;  %9793 = vmatmul.mubr.msk.f32.gmra.mrb[164].mxu0 %vm234_vm3, %v6593_v37  ;;  %v6595_v26 = vmax.f32 %v9745_v51, 0.0 }
 0x8b6   : > { %v6594_v8 = vmax.f32 %v6459_v15, 0.0 }
 0x8b8   : > { %v9748_v27 = vpop.f32.mrb[136].mxu1  ;;  %9795 = vmatprep.mubr.msk.f32.mxu0 %vm234_vm3, %v6594_v8  ;;  %v7489_v38 = vpop.permute.xlu1 %7488 }
 0x8b9   : > { %v6469_v46 = vpop.f32.mrb[137].mxu1  ;;  %9796 = vmatmul.mubr.msk.f32.gmra.mrb[166].mxu0 %vm234_vm3, %v6595_v26  ;;  %v14808_v25 = vsel %vm1416_vm4, %v7489_v38, %v14250_v13  ;;  %v7487_v24 = vpop.permute.xlu0 %7486  ;;  %v6597_v7 = vmax.f32 %v9748_v27, 0.0 }
 0x8ba   : > { %v6596_v1 = vmax.f32 %v6469_v46, 0.0  ;;  %v14812_v2 = vsel %vm1416_vm4, %v7487_v24, %v16827_v61  ;;  %7552 = vrot.lane.b32.xlu1 %v14808_v25, %s10171_s6 }
 0x8bb   : > { %7550 = vrot.lane.b32.xlu0 %v14812_v2, %s10171_s6 }
 0x8bc   : > { %9798 = vmatprep.mubr.msk.f32.mxu0 %vm234_vm3, %v6596_v1  ;;  %v7493_v22 = vpop.permute.xlu1 %7492 }
 0x8bd   : > { %v9751_v10 = vpop.f32.mrb[138].mxu1  ;;  %9799 = vmatmul.mubr.msk.f32.gmra.mrb[168].mxu0 %vm234_vm3, %v6597_v7  ;;  %v14822_v57 = vsel %vm1416_vm4, %v7493_v22, %v14287_v54  ;;  %v7491_v18 = vpop.permute.xlu0 %7490 }
 0x8be   : > { %v6479_v3 = vpop.f32.mrb[139].mxu1  ;;  %v6599_v44 = vmax.f32 %v9751_v10, 0.0  ;;  %v14826_v56 = vsel %vm1416_vm4, %v7491_v18, %v16828_v5  ;;  %7556 = vrot.lane.b32.xlu1 %v14822_v57, %s10171_s6 }
 0x8bf   : > { %v6598_v47 = vmax.f32 %v6479_v3, 0.0  ;;  %7554 = vrot.lane.b32.xlu0 %v14826_v56, %s10171_s6 }
 0x8c0   : > { %v7497_v42 = vpop.permute.xlu1 %7496 }
 0x8c1   : > { %v9754_v32 = vpop.f32.mrb[140].mxu1  ;;  %9801 = vmatprep.mubr.msk.f32.mxu0 %vm234_vm3, %v6598_v47  ;;  %v14836_v63 = vsel %vm1416_vm4, %v7497_v42, %v14331_v11  ;;  %v7495_v12 = vpop.permute.xlu0 %7494 }
 0x8c2   : > { %v6489_v48 = vpop.f32.mrb[141].mxu1  ;;  %9802 = vmatmul.mubr.msk.f32.gmra.mrb[170].mxu0 %vm234_vm3, %v6599_v44  ;;  %v6601_v34 = vmax.f32 %v9754_v32, 0.0  ;;  %v14840_v55 = vsel %vm1416_vm4, %v7495_v12, %v14339_v41  ;;  %7560 = vrot.lane.b32.xlu1 %v14836_v63, %s10171_s6 }
 0x8c3   : > { %v6600_v58 = vmax.f32 %v6489_v48, 0.0  ;;  %7558 = vrot.lane.b32.xlu0 %v14840_v55, %s10171_s6 }
 0x8c4   : > { %v7501_v37 = vpop.permute.xlu1 %7500 }
 0x8c5   : > { %v9757_v29 = vpop.f32.mrb[142].mxu1  ;;  %9804 = vmatprep.mubr.msk.f32.mxu0 %vm234_vm3, %v6600_v58  ;;  %v14850_v15 = vsel %vm1416_vm4, %v7501_v37, %v14365_v45  ;;  %v7499_v8 = vpop.permute.xlu0 %7498 }
 0x8c6   : > { %v6499_v35 = vpop.f32.mrb[143].mxu1  ;;  %9805 = vmatmul.mubr.msk.f32.gmra.mrb[172].mxu0 %vm234_vm3, %v6601_v34  ;;  %v6603_v26 = vmax.f32 %v9757_v29, 0.0  ;;  %v14854_v27 = vsel %vm1416_vm4, %v7499_v8, %v14373_v19  ;;  %7564 = vrot.lane.b32.xlu1 %v14850_v15, %s10171_s6 }
 0x8c7   : > { %v6602_v51 = vmax.f32 %v6499_v35, 0.0  ;;  %7562 = vrot.lane.b32.xlu0 %v14854_v27, %s10171_s6 }
 0x8c9   : > { %v9760_v46 = vpop.f32.mrb[144].mxu1  ;;  %9807 = vmatprep.mubr.msk.f32.mxu0 %vm234_vm3, %v6602_v51  ;;  %v7503_v10 = vpop.permute.xlu0 %7502 }
 0x8ca   : > { %v6509_v38 = vpop.f32.mrb[145].mxu1  ;;  %9808 = vmatmul.mubr.msk.f32.gmra.mrb[174].mxu0 %vm234_vm3, %v6603_v26  ;;  %v7505_v1 = vpop.permute.xlu1 %7504  ;;  %v6605_v3 = vmax.f32 %v9760_v46, 0.0  ;;  %v14868_v22 = vsel %vm1416_vm4, %v7503_v10, %v14399_v0 }
 0x8cb   : > { %v6604_v24 = vmax.f32 %v6509_v38, 0.0  ;;  %v14864_v7 = vsel %vm1416_vm4, %v7505_v1, %v14391_v4  ;;  %7566 = vrot.lane.b32.xlu0 %v14868_v22, %s10171_s6 }
 0x8cc   : > { %7568 = vrot.lane.b32.xlu1 %v14864_v7, %s10171_s6 }
 0x8cd   : > { %v9763_v47 = vpop.f32.mrb[146].mxu1  ;;  %9810 = vmatprep.mubr.msk.f32.mxu0 %vm234_vm3, %v6604_v24 }
 0x8ce   : > { %v6519_v18 = vpop.f32.mrb[147].mxu1  ;;  %9811 = vmatmul.mubr.msk.f32.gmra.mrb[176].mxu0 %vm234_vm3, %v6605_v3  ;;  %v7509_v44 = vpop.permute.xlu1 %7508  ;;  %v6607_v58 = vmax.f32 %v9763_v47, 0.0 }
 0x8cf   : > { %v6606_v32 = vmax.f32 %v6519_v18, 0.0  ;;  %v14878_v48 = vsel %vm1416_vm4, %v7509_v44, %v14421_v36  ;;  %v7507_v42 = vpop.permute.xlu0 %7506 }
 0x8d0   : > { %v14882_v12 = vsel %vm1416_vm4, %v7507_v42, %v14428_v33  ;;  %7572 = vrot.lane.b32.xlu1 %v14878_v48, %s10171_s6 }
 0x8d1   : > { %v9766_v34 = vpop.f32.mrb[148].mxu1  ;;  %9813 = vmatprep.mubr.msk.f32.mxu0 %vm234_vm3, %v6606_v32  ;;  %7570 = vrot.lane.b32.xlu0 %v14882_v12, %s10171_s6 }
 0x8d2   : > { %v6529_v29 = vpop.f32.mrb[149].mxu1  ;;  %9814 = vmatmul.mubr.msk.f32.gmra.mrb[178].mxu0 %vm234_vm3, %v6607_v58  ;;  %v7513_v35 = vpop.permute.xlu1 %7512  ;;  %v6609_v26 = vmax.f32 %v9766_v34, 0.0 }
 0x8d3   : > { %v6608_v37 = vmax.f32 %v6529_v29, 0.0  ;;  %v14892_v51 = vsel %vm1416_vm4, %v7513_v35, %v14449_v39  ;;  %v7511_v8 = vpop.permute.xlu0 %7510 }
 0x8d4   : > { %v14896_v46 = vsel %vm1416_vm4, %v7511_v8, %v14457_v53  ;;  %7576 = vrot.lane.b32.xlu1 %v14892_v51, %s10171_s6 }
 0x8d5   : > { %v9769_v38 = vpop.f32.mrb[150].mxu1  ;;  %9816 = vmatprep.mubr.msk.f32.mxu0 %vm234_vm3, %v6608_v37  ;;  %7574 = vrot.lane.b32.xlu0 %v14896_v46, %s10171_s6 }
 0x8d6   : > { %v6539_v1 = vpop.f32.mrb[151].mxu1  ;;  %9817 = vmatmul.mubr.msk.f32.gmra.mrb[180].mxu0 %vm234_vm3, %v6609_v26  ;;  %v7517_v24 = vpop.permute.xlu1 %7516  ;;  %v6611_v18 = vmax.f32 %v9769_v38, 0.0 }
 0x8d7   : > { %v6610_v10 = vmax.f32 %v6539_v1, 0.0  ;;  %v14906_v3 = vsel %vm1416_vm4, %v7517_v24, %v14477_v62  ;;  %v7515_v47 = vpop.permute.xlu0 %7514 }
 0x8d8   : > { %v14910_v44 = vsel %vm1416_vm4, %v7515_v47, %v14484_v30  ;;  %7580 = vrot.lane.b32.xlu1 %v14906_v3, %s10171_s6 }
 0x8d9   : > { %v9772_v32 = vpop.f32.mrb[152].mxu1  ;;  %9819 = vmatprep.mubr.msk.f32.mxu0 %vm234_vm3, %v6610_v10  ;;  %7578 = vrot.lane.b32.xlu0 %v14910_v44, %s10171_s6 }
 0x8da   : > { %v6549_v42 = vpop.f32.mrb[153].mxu1  ;;  %9820 = vmatmul.mubr.msk.f32.gmra.mrb[182].mxu0 %vm234_vm3, %v6611_v18  ;;  %v7665_v58 = vpop.permute.xlu1 %7664  ;;  %v6613_v37 = vmax.f32 %v9772_v32, 0.0 }
 0x8db   : > { %v6612_v34 = vmax.f32 %v6549_v42, 0.0  ;;  %v14920_v29 = vsel %vm1416_vm4, %v7665_v58, %v14506_v59  ;;  %v7663_v35 = vpop.permute.xlu0 %7662 }
 0x8dc   : > { %v14924_v8 = vsel %vm1416_vm4, %v7663_v35, %v14516_v52  ;;  %7728 = vrot.lane.b32.xlu1 %v14920_v29, %s10171_s6 }
 0x8dd   : > { %v9775_v26 = vpop.f32.mrb[154].mxu1  ;;  %9822 = vmatprep.mubr.msk.f32.mxu0 %vm234_vm3, %v6612_v34  ;;  %7726 = vrot.lane.b32.xlu0 %v14924_v8, %s10171_s6 }
 0x8de   : > { %v6559_v38 = vpop.f32.mrb[155].mxu1  ;;  %9823 = vmatmul.mubr.msk.f32.gmra.mrb[184].mxu0 %vm234_vm3, %v6613_v37  ;;  %v7669_v1 = vpop.permute.xlu1 %7668  ;;  %v6615_v18 = vmax.f32 %v9775_v26, 0.0 }
 0x8df   : > { %v6614_v24 = vmax.f32 %v6559_v38, 0.0  ;;  %v14934_v10 = vsel %vm1416_vm4, %v7669_v1, %v14535_v9  ;;  %v7667_v47 = vpop.permute.xlu0 %7666 }
 0x8e0   : > { %v14938_v32 = vsel %vm1416_vm4, %v7667_v47, %v14544_v20  ;;  %7732 = vrot.lane.b32.xlu1 %v14934_v10, %s10171_s6 }
 0x8e1   : > { %v9778_v42 = vpop.f32.mrb[156].mxu1  ;;  %9825 = vmatprep.mubr.msk.f32.mxu0 %vm234_vm3, %v6614_v24  ;;  %7730 = vrot.lane.b32.xlu0 %v14938_v32, %s10171_s6 }
 0x8e2   : > { %v6569_v58 = vpop.f32.mrb[157].mxu1  ;;  %9826 = vmatmul.mubr.msk.f32.gmra.mrb[186].mxu0 %vm234_vm3, %v6615_v18  ;;  %v7673_v34 = vpop.permute.xlu1 %7672  ;;  %v6617_v38 = vmax.f32 %v9778_v42, 0.0 }
 0x8e3   : > { %v6616_v35 = vmax.f32 %v6569_v58, 0.0  ;;  %v14948_v37 = vsel %vm1416_vm4, %v7673_v34, %v14562_v23  ;;  %v7671_v26 = vpop.permute.xlu0 %7670 }
 0x8e4   : > { %v14952_v1 = vsel %vm1416_vm4, %v7671_v26, %v14572_v6  ;;  %7736 = vrot.lane.b32.xlu1 %v14948_v37, %s10171_s6 }
 0x8e5   : > { %9828 = vmatprep.mubr.msk.f32.mxu0 %vm234_vm3, %v6616_v35  ;;  %7734 = vrot.lane.b32.xlu0 %v14952_v1, %s10171_s6  ;;  %v9781_v24 = vpop.f32.mrb[158].mxu1 }
 0x8e6   : > { %9829 = vmatmul.mubr.msk.f32.gmra.mrb[188].mxu0 %vm234_vm3, %v6617_v38  ;;  %v7677_v47 = vpop.permute.xlu1 %7676  ;;  %v6579_v18 = vpop.f32.mrb[159].mxu1  ;;  %v6619_v26 = vmax.f32 %v9781_v24, 0.0 }
 0x8e7   : > { %v14962_v42 = vsel %vm1416_vm4, %v7677_v47, %v14591_v14  ;;  %v6618_v58 = vmax.f32 %v6579_v18, 0.0  ;;  %v7675_v34 = vpop.permute.xlu0 %7674 }
 0x8e8   : > { %v14966_v49 = vsel %vm1416_vm4, %v7675_v34, %v14600_v60  ;;  %7740 = vrot.lane.b32.xlu1 %v14962_v42, %s10171_s6 }
 0x8e9   : > { %7738 = vrot.lane.b32.xlu0 %v14966_v49, %s10171_s6  ;;  %9831 = vmatprep.mubr.msk.f32.mxu0 %vm234_vm3, %v6618_v58 }
 0x8ea   : > { %v7681_v35 = vpop.permute.xlu1 %7680  ;;  %9832 = vmatmul.mubr.msk.f32.gmra.mrb[190].mxu0 %vm234_vm3, %v6619_v26 }
 0x8eb   : > { %v14976_v38 = vsel %vm1416_vm4, %v7681_v35, %v14618_v50  ;;  %v7679_v24 = vpop.permute.xlu0 %7678 }
 0x8ec   : > { %v14980_v47 = vsel %vm1416_vm4, %v7679_v24, %v14628_v28  ;;  %7744 = vrot.lane.b32.xlu1 %v14976_v38, %s10171_s6 }
 0x8ed   : > { %7742 = vrot.lane.b32.xlu0 %v14980_v47, %s10171_s6 }
 0x8ee   : > { %v7685_v18 = vpop.permute.xlu1 %7684 }
 0x8ef   : > { %v14988_v58 = vsel %vm1416_vm4, %v7685_v18, %v14643_v17  ;;  %v7683_v34 = vpop.permute.xlu0 %7682 }
 0x8f0   : > { %v14992_v26 = vsel %vm1416_vm4, %v7683_v34, %v14652_v43  ;;  %7748 = vrot.lane.b32.xlu1 %v14988_v58, %s10171_s6 }
 0x8f1   : > { %7746 = vrot.lane.b32.xlu0 %v14992_v26, %s10171_s6 }
 0x8f2   : > { %v7689_v35 = vpop.permute.xlu1 %7688 }
 0x8f3   : > { %v15000_v24 = vsel %vm1416_vm4, %v7689_v35, %v14666_v40  ;;  %v7687_v30 = vpop.permute.xlu0 %7686 }
 0x8f4   : > { %v15004_v18 = vsel %vm1416_vm4, %v7687_v30, %v14674_v16  ;;  %7752 = vrot.lane.b32.xlu1 %v15000_v24, %s10171_s6 }
 0x8f5   : > { %7750 = vrot.lane.b32.xlu0 %v15004_v18, %s10171_s6 }
 0x8f6   : > { %v7693_v34 = vpop.permute.xlu1 %7692 }
 0x8f7   : > { %v15012_v62 = vsel %vm1416_vm4, %v7693_v34, %v14687_v21  ;;  %v7691_v43 = vpop.permute.xlu0 %7690 }
 0x8f8   : > { %v15016_v35 = vsel %vm1416_vm4, %v7691_v43, %v14694_v31  ;;  %7756 = vrot.lane.b32.xlu1 %v15012_v62, %s10171_s6 }
 0x8f9   : > { %7754 = vrot.lane.b32.xlu0 %v15016_v35, %s10171_s6 }
 0x92c   : > { %v7553_v30 = vpop.permute.xlu1 %7552 }
 0x92d   : > { %v7551_v16 = vpop.permute.xlu0 %7550  ;;  %v7599_v20 = vsub.f32 %v14808_v25, %v7553_v30 }
 0x92e   : > { %v7598_v33 = vsub.f32 %v14812_v2, %v7551_v16 }
 0x92f   : > { %v7791_v0 = vmul.f32 %v7599_v20, %v7599_v20 }
 0x930   : > { %v7557_v40 = vpop.permute.xlu1 %7556  ;;  %v7790_v45 = vmul.f32 %v7598_v33, %v7598_v33 }
 0x931   : > { %v7555_v17 = vpop.permute.xlu0 %7554  ;;  %v15047_v4 = vsub.f32 %v14822_v57, %v7557_v40 }
 0x932   : > { %v15052_v25 = vsub.f32 %v14826_v56, %v7555_v17 }
 0x933   : > { %v7793_v57 = vmul.f32 %v15047_v4, %v15047_v4 }
 0x934   : > { %v7561_v28 = vpop.permute.xlu1 %7560  ;;  %v7792_v56 = vmul.f32 %v15052_v25, %v15052_v25 }
 0x935   : > { %v7559_v53 = vpop.permute.xlu0 %7558 }
 0x938   : > { %v7565_v50 = vpop.permute.xlu1 %7564 }
 0x939   : > { %v7563_v34 = vpop.permute.xlu0 %7562 }
 0x93d   : > { %v15024_v39 = vpop.permute.xlu0 %7566 }
 0x93e   : > { %v15022_v21 = vpop.permute.xlu1 %7568 }
 0x942   : > { %v15026_v43 = vpop.permute.xlu1 %7572 }
 0x943   : > { %v15028_v31 = vpop.permute.xlu0 %7570 }
 0x946   : > { %v15030_v60 = vpop.permute.xlu1 %7576 }
 0x947   : > { %v15032_v14 = vpop.permute.xlu0 %7574 }
 0x94a   : > { %v15034_v6 = vpop.permute.xlu1 %7580 }
 0x94b   : > { %v15036_v23 = vpop.permute.xlu0 %7578 }
 0x94e   : > { %v7729_v9 = vpop.permute.xlu1 %7728 }
 0x94f   : > { %v15041_v52 = vsub.f32 %v14920_v29, %v7729_v9  ;;  %v7727_v59 = vpop.permute.xlu0 %7726 }
 0x950   : > { %v15044_v36 = vsub.f32 %v14924_v8, %v7727_v59 }
 0x951   : > { %v7807_v19 = vmul.f32 %v15041_v52, %v15041_v52 }
 0x952   : > { %v7806_v16 = vmul.f32 %v15044_v36, %v15044_v36  ;;  %v7733_v9 = vpop.permute.xlu1 %7732 }
 0x953   : > { %v7823_v2 = vadd.f32 %v7807_v19, %v7791_v0  ;;  %v15057_v29 = vsub.f32 %v14934_v10, %v7733_v9  ;;  %v7731_v59 = vpop.permute.xlu0 %7730 }
 0x954   : > { %v7822_v8 = vadd.f32 %v7806_v16, %v7790_v45  ;;  %v15060_v40 = vsub.f32 %v14938_v32, %v7731_v59  ;;  %v15071_v45 = vsub.f32 %v14836_v63, %v7561_v28  ;;  %v15080_v59 = vsub.f32 %v14840_v55, %v7559_v53 }
 0x955   : > { %v7839_v30 = vmax.f32 %v7823_v2, 1e-30  ;;  %v7809_v17 = vmul.f32 %v15057_v29, %v15057_v29  ;;  %v15094_v55 = vsub.f32 %v14850_v15, %v7565_v50 }
 0x956   : > { %v7838_v41 = vmax.f32 %v7822_v8, 1e-30  ;;  %v7808_v19 = vmul.f32 %v15060_v40, %v15060_v40  ;;  %v7737_v0 = vpop.permute.xlu1 %7736  ;;  %v7795_v63 = vmul.f32 %v15071_v45, %v15071_v45 }
 0x957   : > { %10077 = vrsqrt.f32 %v7839_v30  ;;  %v7825_v10 = vadd.f32 %v7809_v17, %v7793_v57  ;;  %v15074_v32 = vsub.f32 %v14948_v37, %v7737_v0  ;;  %v7735_v16 = vpop.permute.xlu0 %7734  ;;  %v15100_v0 = vsub.f32 %v14854_v27, %v7563_v34 }
 0x958   : > { %10079 = vrsqrt.f32 %v7838_v41  ;;  %v7824_v9 = vadd.f32 %v7808_v19, %v7792_v56  ;;  %v15077_v2 = vsub.f32 %v14952_v1, %v7735_v16  ;;  %v7794_v1 = vmul.f32 %v15080_v59, %v15080_v59 }
 0x959   : > { %v7841_v8 = vmax.f32 %v7825_v10, 1e-30  ;;  %v7811_v11 = vmul.f32 %v15074_v32, %v15074_v32  ;;  %v7797_v50 = vmul.f32 %v15094_v55, %v15094_v55  ;;  %v7796_v27 = vmul.f32 %v15100_v0, %v15100_v0 }
 0x95a   : > { %v7741_v28 = vpop.permute.xlu1 %7740  ;;  %v7840_v57 = vmax.f32 %v7824_v9, 1e-30  ;;  %v7810_v37 = vmul.f32 %v15077_v2, %v15077_v2 }
 0x95b   : > { %v7739_v41 = vpop.permute.xlu0 %7738  ;;  %10081 = vrsqrt.f32 %v7841_v8  ;;  %v7827_v30 = vadd.f32 %v7811_v11, %v7795_v63  ;;  %v15091_v53 = vsub.f32 %v14962_v42, %v7741_v28 }
 0x95c   : > { %10083 = vrsqrt.f32 %v7840_v57  ;;  %v7826_v17 = vadd.f32 %v7810_v37, %v7794_v1  ;;  %v15097_v56 = vsub.f32 %v14966_v49, %v7739_v41  ;;  %v15118_v37 = vsub.f32 %v14864_v7, %v15022_v21 }
 0x95d   : > { %v7843_v10 = vmax.f32 %v7827_v30, 1e-30  ;;  %v7813_v16 = vmul.f32 %v15091_v53, %v15091_v53 }
 0x95e   : > { %v7745_v9 = vpop.permute.xlu1 %7744  ;;  %v7842_v15 = vmax.f32 %v7826_v17, 1e-30  ;;  %v7812_v8 = vmul.f32 %v15097_v56, %v15097_v56 }
 0x95f   : > { %v7743_v49 = vpop.permute.xlu0 %7742  ;;  %10085 = vrsqrt.f32 %v7843_v10  ;;  %v7829_v34 = vadd.f32 %v7813_v16, %v7797_v50  ;;  %v15112_v63 = vsub.f32 %v14976_v38, %v7745_v9 }
 0x960   : > { %10087 = vrsqrt.f32 %v7842_v15  ;;  %v7828_v41 = vadd.f32 %v7812_v8, %v7796_v27 }
 0x961   : > { %v10078_v19 = vpop.eup %10077  ;;  %v7845_v30 = vmax.f32 %v7829_v34, 1e-30  ;;  %v7815_v17 = vmul.f32 %v15112_v63, %v15112_v63 }
 0x962   : > { %v10080_v11 = vpop.eup %10079  ;;  %v7871_v42 = vmul.f32 %v10078_v19, %v7599_v20  ;;  %v7887_v20 = vmul.f32 %v10078_v19, %v15041_v52  ;;  %v15127_v52 = vsub.f32 %v14868_v22, %v15024_v39  ;;  %v7749_v21 = vpop.permute.xlu1 %7748 }
 0x963   : > { %v7870_v28 = vmul.f32 %v10080_v11, %v7598_v33  ;;  %v15121_v33 = vsub.f32 %v14980_v47, %v7743_v49  ;;  %v7886_v1 = vmul.f32 %v10080_v11, %v15044_v36  ;;  %v7799_v47 = vmul.f32 %v15118_v37, %v15118_v37  ;;  %v7747_v10 = vpop.permute.xlu0 %7746 }
 0x964   : > { %7920 = vrot.lane.b32.xlu1 %v7871_v42, %s10172_s11  ;;  %v7844_v36 = vmax.f32 %v7828_v41, 1e-30  ;;  %v7798_v22 = vmul.f32 %v15127_v52, %v15127_v52  ;;  %10089 = vrsqrt.f32 %v7845_v30  ;;  %v15142_v11 = vsub.f32 %v14988_v58, %v7749_v21 }
 0x965   : > { %7918 = vrot.lane.b32.xlu0 %v7870_v28, %s10172_s11  ;;  %v10082_v57 = vpop.eup %10081  ;;  %v7814_v19 = vmul.f32 %v15121_v33, %v15121_v33  ;;  %v7831_v16 = vadd.f32 %v7815_v17, %v7799_v47  ;;  %v15148_v42 = vsub.f32 %v14878_v48, %v15026_v43  ;;  %v15178_v41 = vsub.f32 %v14892_v51, %v15030_v60 }
 0x966   : > { %v10084_v38 = vpop.eup %10083  ;;  %v7873_v7 = vmul.f32 %v10082_v57, %v15047_v4  ;;  %v7889_v4 = vmul.f32 %v10082_v57, %v15057_v29  ;;  %10091 = vrsqrt.f32 %v7844_v36  ;;  %v15157_v29 = vsub.f32 %v14882_v12, %v15028_v31  ;;  %v7753_v48 = vpop.permute.xlu1 %7752 }
 0x967   : > { %v7872_v39 = vmul.f32 %v10084_v38, %v15052_v25  ;;  %v7830_v50 = vadd.f32 %v7814_v19, %v7798_v22  ;;  %v15151_v25 = vsub.f32 %v14992_v26, %v7747_v10  ;;  %v7888_v15 = vmul.f32 %v10084_v38, %v15060_v40  ;;  %v7751_v27 = vpop.permute.xlu0 %7750 }
 0x968   : > { %8000 = vrot.lane.b32.xlu1 %v7887_v20, %s10172_s11  ;;  %v7847_v8 = vmax.f32 %v7831_v16, 1e-30  ;;  %v7817_v49 = vmul.f32 %v15142_v11, %v15142_v11  ;;  %v7801_v26 = vmul.f32 %v15148_v42, %v15148_v42  ;;  %v7800_v12 = vmul.f32 %v15157_v29, %v15157_v29 }
 0x969   : > { %7998 = vrot.lane.b32.xlu0 %v7886_v1, %s10172_s11  ;;  %v10086_v9 = vpop.eup %10085  ;;  %v7846_v40 = vmax.f32 %v7830_v50, 1e-30  ;;  %v7816_v28 = vmul.f32 %v15151_v25, %v15151_v25  ;;  %v15172_v20 = vsub.f32 %v15000_v24, %v7753_v48  ;;  %v15208_v10 = vsub.f32 %v14906_v3, %v15034_v6 }
 0x96a   : > { %v10088_v58 = vpop.eup %10087  ;;  %v7875_v43 = vmul.f32 %v10086_v9, %v15071_v45  ;;  %10093 = vrsqrt.f32 %v7847_v8  ;;  %v7833_v34 = vadd.f32 %v7817_v49, %v7801_v26  ;;  %v7891_v45 = vmul.f32 %v10086_v9, %v15074_v32  ;;  %v7757_v60 = vpop.permute.xlu1 %7756 }
 0x96b   : > { %v7874_v31 = vmul.f32 %v10088_v58, %v15080_v59  ;;  %10095 = vrsqrt.f32 %v7846_v40  ;;  %v7832_v1 = vadd.f32 %v7816_v28, %v7800_v12  ;;  %v15181_v59 = vsub.f32 %v15004_v18, %v7751_v27 }
 0x96c   : > { %7924 = vrot.lane.b32.xlu1 %v7873_v7, %s10172_s11  ;;  %v7890_v38 = vmul.f32 %v10088_v58, %v15077_v2  ;;  %v15187_v32 = vsub.f32 %v14896_v46, %v15032_v14  ;;  %v7849_v30 = vmax.f32 %v7833_v34, 1e-30  ;;  %v7819_v17 = vmul.f32 %v15172_v20, %v15172_v20  ;;  %v7755_v7 = vpop.permute.xlu0 %7754 }
 0x96d   : > { %7922 = vrot.lane.b32.xlu0 %v7872_v39, %s10172_s11  ;;  %v7803_v18 = vmul.f32 %v15178_v41, %v15178_v41  ;;  %v7848_v2 = vmax.f32 %v7832_v1, 1e-30  ;;  %v7818_v21 = vmul.f32 %v15181_v59, %v15181_v59  ;;  %v15202_v36 = vsub.f32 %v15012_v62, %v7757_v60 }
 0x96e   : > { %v10090_v57 = vpop.eup %10089  ;;  %v7802_v46 = vmul.f32 %v15187_v32, %v15187_v32  ;;  %10097 = vrsqrt.f32 %v7849_v30 }
 0x96f   : > { %v7877_v51 = vmul.f32 %v10090_v57, %v15094_v55  ;;  %v7835_v47 = vadd.f32 %v7819_v17, %v7803_v18  ;;  %v7893_v55 = vmul.f32 %v10090_v57, %v15091_v53  ;;  %10099 = vrsqrt.f32 %v7848_v2 }
 0x970   : > { %8004 = vrot.lane.b32.xlu1 %v7889_v4, %s10172_s11  ;;  %v10092_v24 = vpop.eup %10091  ;;  %v7834_v39 = vadd.f32 %v7818_v21, %v7802_v46  ;;  %v15217_v53 = vsub.f32 %v14910_v44, %v15036_v23  ;;  %v7821_v4 = vmul.f32 %v15202_v36, %v15202_v36 }
 0x971   : > { %8002 = vrot.lane.b32.xlu0 %v7888_v15, %s10172_s11  ;;  %v7876_v14 = vmul.f32 %v10092_v24, %v15100_v0  ;;  %v15211_v0 = vsub.f32 %v15016_v35, %v7755_v7  ;;  %v7892_v22 = vmul.f32 %v10092_v24, %v15097_v56  ;;  %v7851_v16 = vmax.f32 %v7835_v47, 1e-30 }
 0x972   : > { %v7805_v56 = vmul.f32 %v15208_v10, %v15208_v10  ;;  %v7850_v9 = vmax.f32 %v7834_v39, 1e-30  ;;  %v7804_v58 = vmul.f32 %v15217_v53, %v15217_v53 }
 0x973   : > { %v7820_v50 = vmul.f32 %v15211_v0, %v15211_v0  ;;  %10101 = vrsqrt.f32 %v7851_v16 }
 0x974   : > { %7928 = vrot.lane.b32.xlu1 %v7875_v43, %s10172_s11  ;;  %v10094_v19 = vpop.eup %10093  ;;  %v7837_v8 = vadd.f32 %v7821_v4, %v7805_v56  ;;  %10103 = vrsqrt.f32 %v7850_v9 }
 0x975   : > { %7926 = vrot.lane.b32.xlu0 %v7874_v31, %s10172_s11  ;;  %v10096_v62 = vpop.eup %10095  ;;  %v7879_v35 = vmul.f32 %v10094_v19, %v15118_v37  ;;  %v7895_v37 = vmul.f32 %v10094_v19, %v15112_v63  ;;  %v7836_v26 = vadd.f32 %v7820_v50, %v7804_v58 }
 0x976   : > { %v7878_v44 = vmul.f32 %v10096_v62, %v15127_v52  ;;  %v7894_v52 = vmul.f32 %v10096_v62, %v15121_v33  ;;  %v7853_v31 = vmax.f32 %v7837_v8, 1e-30 }
 0x978   : > { %8008 = vrot.lane.b32.xlu1 %v7891_v45, %s10172_s11  ;;  %v10098_v43 = vpop.eup %10097  ;;  %v7852_v45 = vmax.f32 %v7836_v26, 1e-30  ;;  %10105 = vrsqrt.f32 %v7853_v31 }
 0x979   : > { %8006 = vrot.lane.b32.xlu0 %v7890_v38, %s10172_s11  ;;  %v10100_v27 = vpop.eup %10099  ;;  %v7881_v34 = vmul.f32 %v10098_v43, %v15148_v42  ;;  %v7897_v24 = vmul.f32 %v10098_v43, %v15142_v11 }
 0x97a   : > { %v7880_v33 = vmul.f32 %v10100_v27, %v15157_v29  ;;  %10107 = vrsqrt.f32 %v7852_v45  ;;  %v7896_v60 = vmul.f32 %v10100_v27, %v15151_v25 }
 0x97c   : > { %7932 = vrot.lane.b32.xlu1 %v7877_v51, %s10172_s11 }
 0x97d   : > { %7930 = vrot.lane.b32.xlu0 %v7876_v14, %s10172_s11  ;;  %v10102_v17 = vpop.eup %10101 }
 0x97e   : > { %v10104_v29 = vpop.eup %10103  ;;  %v7883_v2 = vmul.f32 %v10102_v17, %v15178_v41  ;;  %v7899_v46 = vmul.f32 %v10102_v17, %v15172_v20 }
 0x97f   : > { %v9788_v6 = vpop.f32.mrb[160].mxu0  ;;  %v7882_v25 = vmul.f32 %v10104_v29, %v15187_v32  ;;  %v7898_v41 = vmul.f32 %v10104_v29, %v15181_v59 }
 0x980   : > { %8012 = vrot.lane.b32.xlu1 %v7893_v55, %s10172_s11  ;;  %v6782_v3 = vpop.f32.mrb[161].mxu0  ;;  %v6942_v23 = vmax.f32 %v9788_v6, 0.0 }
 0x981   : > { %8010 = vrot.lane.b32.xlu0 %v7892_v22, %s10172_s11  ;;  %v6941_v15 = vmax.f32 %v6782_v3, 0.0 }
 0x982   : > { %v10106_v55 = vpop.eup %10105 }
 0x983   : > { %9838 = vmatprep.mubr.msk.f32.mxu1 %vm234_vm3, %v6941_v15  ;;  %v7885_v20 = vmul.f32 %v10106_v55, %v15208_v10  ;;  %v7901_v3 = vmul.f32 %v10106_v55, %v15202_v36 }
 0x984   : > { %7936 = vrot.lane.b32.xlu1 %v7879_v35, %s10172_s11  ;;  %v9791_v49 = vpop.f32.mrb[162].mxu0  ;;  %9839 = vmatmul.mubr.msk.f32.vlgmr.msra.gmra.mrb[160].mxu1 %vm234_vm3, %v6942_v23  ;;  %v10108_v22 = vpop.eup %10107 }
 0x985   : > { %7934 = vrot.lane.b32.xlu0 %v7878_v44, %s10172_s11  ;;  %v6792_v48 = vpop.f32.mrb[163].mxu0  ;;  %v6944_v28 = vmax.f32 %v9791_v49, 0.0  ;;  %v7884_v59 = vmul.f32 %v10108_v22, %v15217_v53  ;;  %v7900_v9 = vmul.f32 %v10108_v22, %v15211_v0 }
 0x986   : > { %v6943_v40 = vmax.f32 %v6792_v48, 0.0 }
 0x988   : > { %8016 = vrot.lane.b32.xlu1 %v7895_v37, %s10172_s11  ;;  %v9794_v12 = vpop.f32.mrb[164].mxu0  ;;  %9841 = vmatprep.mubr.msk.f32.mxu1 %vm234_vm3, %v6943_v40 }
 0x989   : > { %8014 = vrot.lane.b32.xlu0 %v7894_v52, %s10172_s11  ;;  %v6802_v63 = vpop.f32.mrb[165].mxu0  ;;  %9842 = vmatmul.mubr.msk.f32.gmra.mrb[162].mxu1 %vm234_vm3, %v6944_v28  ;;  %v6946_v1 = vmax.f32 %v9794_v12, 0.0 }
 0x98a   : > { %v6945_v57 = vmax.f32 %v6802_v63, 0.0 }
 0x98c   : > { %7940 = vrot.lane.b32.xlu1 %v7881_v34, %s10172_s11  ;;  %v9797_v38 = vpop.f32.mrb[166].mxu0  ;;  %9844 = vmatprep.mubr.msk.f32.mxu1 %vm234_vm3, %v6945_v57 }
 0x98d   : > { %7938 = vrot.lane.b32.xlu0 %v7880_v33, %s10172_s11  ;;  %v6812_v30 = vpop.f32.mrb[167].mxu0  ;;  %9845 = vmatmul.mubr.msk.f32.gmra.mrb[164].mxu1 %vm234_vm3, %v6946_v1  ;;  %v6948_v51 = vmax.f32 %v9797_v38, 0.0 }
 0x98e   : > { %v6947_v42 = vmax.f32 %v6812_v30, 0.0 }
 0x990   : > { %8020 = vrot.lane.b32.xlu1 %v7897_v24, %s10172_s11  ;;  %v9800_v18 = vpop.f32.mrb[168].mxu0  ;;  %9847 = vmatprep.mubr.msk.f32.mxu1 %vm234_vm3, %v6947_v42 }
 0x991   : > { %8018 = vrot.lane.b32.xlu0 %v7896_v60, %s10172_s11  ;;  %v6822_v11 = vpop.f32.mrb[169].mxu0  ;;  %9848 = vmatmul.mubr.msk.f32.gmra.mrb[166].mxu1 %vm234_vm3, %v6948_v51  ;;  %v6950_v7 = vmax.f32 %v9800_v18, 0.0 }
 0x992   : > { %v6949_v21 = vmax.f32 %v6822_v11, 0.0 }
 0x994   : > { %7944 = vrot.lane.b32.xlu1 %v7883_v2, %s10172_s11  ;;  %9850 = vmatprep.mubr.msk.f32.mxu1 %vm234_vm3, %v6949_v21 }
 0x995   : > { %v9803_v14 = vpop.f32.mrb[170].mxu0  ;;  %7942 = vrot.lane.b32.xlu0 %v7882_v25, %s10172_s11  ;;  %9851 = vmatmul.mubr.msk.f32.gmra.mrb[168].mxu1 %vm234_vm3, %v6950_v7 }
 0x996   : > { %v6832_v47 = vpop.f32.mrb[171].mxu0  ;;  %v6952_v39 = vmax.f32 %v9803_v14, 0.0 }
 0x997   : > { %v6951_v19 = vmax.f32 %v6832_v47, 0.0 }
 0x998   : > { %8024 = vrot.lane.b32.xlu1 %v7899_v46, %s10172_s11 }
 0x999   : > { %v9806_v62 = vpop.f32.mrb[172].mxu0  ;;  %9853 = vmatprep.mubr.msk.f32.mxu1 %vm234_vm3, %v6951_v19  ;;  %8022 = vrot.lane.b32.xlu0 %v7898_v41, %s10172_s11  ;;  %v7343_v19 = vmul.f32 %v14250_v13, %v14250_v13 }
 0x99a   : > { %v6842_v32 = vpop.f32.mrb[173].mxu0  ;;  %9854 = vmatmul.mubr.msk.f32.gmra.mrb[170].mxu1 %vm234_vm3, %v6952_v39  ;;  %v6954_v4 = vmax.f32 %v9806_v62, 0.0  ;;  %v7342_v39 = vmul.f32 %v16827_v61, %v16827_v61 }
 0x99b   : > { %v6953_v16 = vmax.f32 %v6842_v32, 0.0  ;;  %v8835_v62 = vadd.f32 -1.0, %v7343_v19  ;;  %v7345_v32 = vmul.f32 %v14287_v54, %v14287_v54 }
 0x99c   : > { %7948 = vrot.lane.b32.xlu1 %v7885_v20, %s10172_s11  ;;  %v7344_v20 = vmul.f32 %v16828_v5, %v16828_v5 }
 0x99d   : > { %v9809_v6 = vpop.f32.mrb[174].mxu0  ;;  %9856 = vmatprep.mubr.msk.f32.mxu1 %vm234_vm3, %v6953_v16  ;;  %7946 = vrot.lane.b32.xlu0 %v7884_v59, %s10172_s11  ;;  %v7327_v16 = vmul.f32 4.0, %v14250_v13 }
 0x99e   : > { %v6852_v35 = vpop.f32.mrb[175].mxu0  ;;  %9857 = vmatmul.mubr.msk.f32.gmra.mrb[172].mxu1 %vm234_vm3, %v6954_v4  ;;  %v6956_v10 = vmax.f32 %v9809_v6, 0.0  ;;  %v16833_v4 = vld [vmem:[#allocation55_spill] sm:$0xff]  ;;  %v16834_v6 = vld [vmem:[#allocation12_spill] sm:$0xff] }
 0x99f   : > { %v6955_v56 = vmax.f32 %v6852_v35, 0.0  ;;  %v7347_v59 = vmul.f32 %v16833_v4, %v16833_v4  ;;  %v8834_v35 = vadd.f32 -1.0, %v7342_v39 }
 0x9a0   : > { %8028 = vrot.lane.b32.xlu1 %v7901_v3, %s10172_s11  ;;  %v7346_v3 = vmul.f32 %v16834_v6, %v16834_v6 }
 0x9a1   : > { %v9812_v50 = vpop.f32.mrb[176].mxu0  ;;  %9859 = vmatprep.mubr.msk.f32.mxu1 %vm234_vm3, %v6955_v56  ;;  %8026 = vrot.lane.b32.xlu0 %v7900_v9, %s10172_s11  ;;  %v16835_v56 = vld [vmem:[#allocation28_spill] sm:$0xff] }
 0x9a2   : > { %v6862_v53 = vpop.f32.mrb[177].mxu0  ;;  %9860 = vmatmul.mubr.msk.f32.gmra.mrb[174].mxu1 %vm234_vm3, %v6956_v10  ;;  %v6958_v15 = vmax.f32 %v9812_v50, 0.0  ;;  %v7349_v9 = vmul.f32 %v16835_v56, %v16835_v56  ;;  %v16836_v10 = vld [vmem:[#allocation64_spill] sm:$0xff] }
 0x9a3   : > { %v6957_v36 = vmax.f32 %v6862_v53, 0.0  ;;  %v7348_v50 = vmul.f32 %v16836_v10, %v16836_v10  ;;  %v7375_v53 = vmul.f32 %v8835_v62, %v7327_v16 }
 0x9a5   : > { %v9815_v23 = vpop.f32.mrb[178].mxu0  ;;  %9862 = vmatprep.mubr.msk.f32.mxu1 %vm234_vm3, %v6957_v36 }
 0x9a6   : > { %v6872_v44 = vpop.f32.mrb[179].mxu0  ;;  %9863 = vmatmul.mubr.msk.f32.gmra.mrb[176].mxu1 %vm234_vm3, %v6958_v15  ;;  %v6960_v58 = vmax.f32 %v9815_v23, 0.0  ;;  %v16838_v15 = vld [vmem:[#allocation57_spill] sm:$0xff] }
 0x9a7   : > { %v6959_v0 = vmax.f32 %v6872_v44, 0.0  ;;  %v7351_v23 = vmul.f32 %v16838_v15, %v16838_v15  ;;  %v7326_v44 = vmul.f32 4.0, %v16827_v61 }
 0x9a9   : > { %v9818_v8 = vpop.f32.mrb[180].mxu0  ;;  %9865 = vmatprep.mubr.msk.f32.mxu1 %vm234_vm3, %v6959_v0  ;;  %v8837_v0 = vadd.f32 -1.0, %v7345_v32 }
 0x9aa   : > { %v6882_v49 = vpop.f32.mrb[181].mxu0  ;;  %9866 = vmatmul.mubr.msk.f32.gmra.mrb[178].mxu1 %vm234_vm3, %v6960_v58  ;;  %v6962_v48 = vmax.f32 %v9818_v8, 0.0  ;;  %v8836_v58 = vadd.f32 -1.0, %v7344_v20  ;;  %v16842_v20 = vld [vmem:[#allocation63_spill] sm:$0xff] }
 0x9ab   : > { %v6961_v37 = vmax.f32 %v6882_v49, 0.0  ;;  %v7329_v49 = vmul.f32 4.0, %v14287_v54  ;;  %v7353_v16 = vmul.f32 %v16842_v20, %v16842_v20 }
 0x9ad   : > { %v9821_v43 = vpop.f32.mrb[182].mxu0  ;;  %9868 = vmatprep.mubr.msk.f32.mxu1 %vm234_vm3, %v6961_v37  ;;  %v8839_v37 = vadd.f32 -1.0, %v7347_v59  ;;  %v16843_v59 = vld [vmem:[#allocation58_spill] sm:$0xff] }
 0x9ae   : > { %v6892_v26 = vpop.f32.mrb[183].mxu0  ;;  %9869 = vmatmul.mubr.msk.f32.gmra.mrb[180].mxu1 %vm234_vm3, %v6962_v48  ;;  %v6964_v52 = vmax.f32 %v9821_v43, 0.0  ;;  %v8838_v48 = vadd.f32 -1.0, %v7346_v3  ;;  %v16840_v43 = vld [vmem:[#allocation56_spill] sm:$0xff]  ;;  %v7407_v3 = vmul.f32 2.0, %v16843_v59 }
 0x9af   : > { %v6963_v40 = vmax.f32 %v6892_v26, 0.0  ;;  %v7350_v26 = vmul.f32 %v16840_v43, %v16840_v43 }
 0x9b1   : > { %v9824_v28 = vpop.f32.mrb[184].mxu0  ;;  %9871 = vmatprep.mubr.msk.f32.mxu1 %vm234_vm3, %v6963_v40  ;;  %v7374_v40 = vmul.f32 %v8834_v35, %v7326_v44  ;;  %v16844_v35 = vld [vmem:[#allocation62_spill] sm:$0xff] }
 0x9b2   : > { %v6902_v27 = vpop.f32.mrb[185].mxu0  ;;  %9872 = vmatmul.mubr.msk.f32.gmra.mrb[182].mxu1 %vm234_vm3, %v6964_v52  ;;  %v6966_v12 = vmax.f32 %v9824_v28, 0.0  ;;  %v7328_v52 = vmul.f32 4.0, %v16828_v5  ;;  %v8841_v28 = vadd.f32 -1.0, %v7349_v9  ;;  %v7406_v9 = vmul.f32 2.0, %v16844_v35  ;;  %v16859_v35 = vld [vmem:[#allocation30_spill] sm:$0xff] }
 0x9b3   : > { %v6965_v31 = vmax.f32 %v6902_v27, 0.0  ;;  %v8840_v27 = vadd.f32 -1.0, %v7348_v50  ;;  %v15361_v19 = vsel %vm11089_vm7, %v7374_v40, 0.0 }
 0x9b5   : > { %v9827_v63 = vpop.f32.mrb[186].mxu0  ;;  %9874 = vmatprep.mubr.msk.f32.mxu1 %vm234_vm3, %v6965_v31 }
 0x9b6   : > { %v6912_v34 = vpop.f32.mrb[187].mxu0  ;;  %9875 = vmatmul.mubr.msk.f32.gmra.mrb[184].mxu1 %vm234_vm3, %v6966_v12  ;;  %v6968_v57 = vmax.f32 %v9827_v63, 0.0  ;;  %v15350_v12 = vsel %vm11089_vm7, %v7375_v53, 0.0  ;;  %v7331_v63 = vmul.f32 4.0, %v16833_v4  ;;  %v7334_v53 = vmul.f32 4.0, %v16840_v43 }
 0x9b7   : > { %v6967_v45 = vmax.f32 %v6912_v34, 0.0  ;;  %v7330_v34 = vmul.f32 4.0, %v16834_v6 }
 0x9b9   : > { %v9830_v1 = vpop.f32.mrb[188].mxu0  ;;  %9877 = vmatprep.mubr.msk.f32.mxu1 %vm234_vm3, %v6967_v45  ;;  %v8843_v45 = vadd.f32 -1.0, %v7351_v23 }
 0x9ba   : > { %v6922_v33 = vpop.f32.mrb[189].mxu0  ;;  %9878 = vmatmul.mubr.msk.f32.gmra.mrb[186].mxu1 %vm234_vm3, %v6968_v57  ;;  %v6970_v24 = vmax.f32 %v9830_v1, 0.0  ;;  %v7377_v57 = vmul.f32 %v8837_v0, %v7329_v49  ;;  %v7376_v1 = vmul.f32 %v8836_v58, %v7328_v52  ;;  %v16845_v0 = vld [vmem:[#allocation19_spill] sm:$0xff]  ;;  %v16846_v49 = vld [vmem:[#allocation8_spill] sm:$0xff] }
 0x9bb   : > { %v6969_v38 = vmax.f32 %v6922_v33, 0.0  ;;  %v7333_v33 = vmul.f32 4.0, %v16835_v56  ;;  %v7409_v58 = vmul.f32 2.0, %v16845_v0  ;;  %v16858_v0 = vld [vmem:[#allocation6_spill] sm:$0xff] }
 0x9bc   : > { %v15372_v23 = vsel %vm11089_vm7, %v7377_v57, 0.0  ;;  %v15376_v44 = vsel %vm11089_vm7, %v7376_v1, 0.0  ;;  %v15401_v57 = vsel %vm11089_vm7, %v7407_v3, 0.0  ;;  %v15405_v1 = vsel %vm11089_vm7, %v7406_v9, 0.0 }
 0x9bd   : > { %v9833_v30 = vpop.f32.mrb[190].mxu0  ;;  %9880 = vmatprep.mubr.msk.f32.mxu1 %vm234_vm3, %v6969_v38  ;;  %v7332_v38 = vmul.f32 4.0, %v16836_v10  ;;  %v7381_v39 = vmul.f32 %v8841_v28, %v7333_v33  ;;  %16848 = vst [vmem:[#allocation46_spill] sm:$0xff] %v15401_v57  ;;  %16849 = vst [vmem:[#allocation11_spill] sm:$0xff] %v15405_v1  ;;  %v16850_v33 = vld [vmem:[#allocation38_spill] sm:$0xff] }
 0x9be   : > { %v6932_v17 = vpop.f32.mrb[191].mxu0  ;;  %9881 = vmatmul.mubr.msk.f32.gmra.mrb[188].mxu1 %vm234_vm3, %v6970_v24  ;;  %v6972_v60 = vmax.f32 %v9833_v30, 0.0  ;;  %v7379_v24 = vmul.f32 %v8839_v37, %v7331_v63  ;;  %v7378_v30 = vmul.f32 %v8838_v48, %v7330_v34  ;;  %v7352_v37 = vmul.f32 %v16846_v49, %v16846_v49  ;;  %v16847_v48 = vld [vmem:[#allocation18_spill] sm:$0xff] }
 0x9bf   : > { %v6971_v42 = vmax.f32 %v6932_v17, 0.0  ;;  %v7335_v17 = vmul.f32 4.0, %v16838_v15  ;;  %v7380_v62 = vmul.f32 %v8840_v27, %v7332_v38  ;;  %v15392_v27 = vsel %vm11089_vm7, %v7381_v39, 0.0  ;;  %v16863_v15 = vld [vmem:[#allocation45_spill] sm:$0xff]  ;;  %v16864_v10 = vld [vmem:[#allocation42_spill] sm:$0xff] }
 0x9c0   : > { %v15384_v40 = vsel %vm11089_vm7, %v7379_v24, 0.0  ;;  %v15388_v52 = vsel %vm11089_vm7, %v7378_v30, 0.0  ;;  %v7337_v34 = vmul.f32 4.0, %v16842_v20  ;;  %v7411_v38 = vmul.f32 2.0, %v16850_v33  ;;  %v16857_v33 = vld [vmem:[#allocation23_spill] sm:$0xff] }
 0x9c1   : > { %9883 = vmatprep.mubr.msk.f32.mxu1 %vm234_vm3, %v6971_v42  ;;  %v7383_v50 = vmul.f32 %v8843_v45, %v7335_v17  ;;  %v15396_v63 = vsel %vm11089_vm7, %v7380_v62, 0.0  ;;  %v8845_v45 = vadd.f32 -1.0, %v7353_v16  ;;  %v15416_v17 = vsel %vm11089_vm7, %v7409_v58, 0.0  ;;  %v16854_v62 = vld [vmem:[#allocation24_spill] sm:$0xff]  ;;  %v16860_v20 = vld [vmem:[#allocation15_spill] sm:$0xff] }
 0x9c2   : > { %9884 = vmatmul.mubr.msk.f32.gmra.mrb[190].mxu1 %vm234_vm3, %v6972_v60  ;;  %v8842_v60 = vadd.f32 -1.0, %v7350_v26  ;;  %v7408_v26 = vmul.f32 2.0, %v16847_v48  ;;  %16852 = vst [vmem:[#allocation47_spill] sm:$0xff] %v15416_v17  ;;  %v7413_v16 = vmul.f32 2.0, %v16854_v62  ;;  %v8844_v9 = vadd.f32 -1.0, %v7352_v37 }
 0x9c3   : > { %v15410_v24 = vsel %vm11089_vm7, %v7383_v50, 0.0  ;;  %v7412_v50 = vmul.f32 2.0, %v16857_v33  ;;  %v7355_v58 = vmul.f32 %v16858_v0, %v16858_v0  ;;  %v7385_v59 = vmul.f32 %v8845_v45, %v7337_v34  ;;  %v16862_v33 = vld [vmem:[#allocation66_spill] sm:$0xff] }
 0x9c4   : > { %v7382_v28 = vmul.f32 %v8842_v60, %v7334_v53  ;;  %v16853_v60 = vld [vmem:[#allocation26_spill] sm:$0xff]  ;;  %v15424_v53 = vsel %vm11089_vm7, %v7408_v26, 0.0  ;;  %v7336_v62 = vmul.f32 4.0, %v16846_v49  ;;  %v7354_v37 = vmul.f32 %v16860_v20, %v16860_v20 }
 0x9c5   : > { %v7410_v39 = vmul.f32 2.0, %v16853_v60  ;;  %16856 = vst [vmem:[#allocation25_spill] sm:$0xff] %v15424_v53  ;;  %v7415_v60 = vmul.f32 2.0, %v16859_v35  ;;  %v15439_v26 = vsel %vm11089_vm7, %v7411_v38, 0.0  ;;  %v7414_v43 = vmul.f32 2.0, %v16862_v33  ;;  %v16866_v35 = vld [vmem:[#allocation54_spill] sm:$0xff] }
 0x9c6   : > { %v15429_v48 = vsel %vm11089_vm7, %v7382_v28, 0.0  ;;  %16861 = vst [vmem:[#allocation35_spill] sm:$0xff] %v15439_v26  ;;  %v7417_v28 = vmul.f32 2.0, %v16863_v15  ;;  %v7416_v56 = vmul.f32 2.0, %v16864_v10  ;;  %v15450_v34 = vsel %vm11089_vm7, %v7413_v16, 0.0  ;;  %v16867_v33 = vld [vmem:[#allocation49_spill] sm:$0xff] }
 0x9c7   : > { %v15446_v6 = vsel %vm11089_vm7, %v7410_v39, 0.0  ;;  %16865 = vst [vmem:[#allocation50_spill] sm:$0xff] %v15450_v34  ;;  %v7384_v45 = vmul.f32 %v8844_v9, %v7336_v62  ;;  %v7357_v49 = vmul.f32 %v16866_v35, %v16866_v35  ;;  %v8847_v4 = vadd.f32 -1.0, %v7355_v58  ;;  %v16868_v15 = vld [vmem:[#allocation33_spill] sm:$0xff] }
 0x9c8   : > { %v7419_v5 = vmul.f32 2.0, %v16867_v33  ;;  %v7418_v54 = vmul.f32 2.0, %v16868_v15  ;;  %v16869_v10 = vld [vmem:[#allocation17_spill] sm:$0xff]  ;;  %v15462_v39 = vsel %vm11089_vm7, %v7412_v50, 0.0  ;;  %v15466_v62 = vsel %vm11089_vm7, %v7415_v60, 0.0 }
 0x9c9   : > { %v7356_v61 = vmul.f32 %v16869_v10, %v16869_v10  ;;  %16870 = vst [vmem:[#allocation67_spill] sm:$0xff] %v15462_v39  ;;  %16871 = vst [vmem:[#allocation65_spill] sm:$0xff] %v15466_v62  ;;  %v15470_v16 = vsel %vm11089_vm7, %v7385_v59, 0.0  ;;  %v8846_v58 = vadd.f32 -1.0, %v7354_v37  ;;  %v15476_v15 = vsel %vm11089_vm7, %v7414_v43, 0.0 }
 0x9ca   : > { %16873 = vst [vmem:[#allocation52_spill] sm:$0xff] %v15476_v15  ;;  %v15480_v33 = vsel %vm11089_vm7, %v7417_v28, 0.0  ;;  %v15484_v50 = vsel %vm11089_vm7, %v7416_v56, 0.0  ;;  %v7339_v60 = vmul.f32 4.0, %v16858_v0  ;;  %v15489_v59 = vsel %vm11089_vm7, %v7384_v45, 0.0 }
 0x9cb   : > { %v7338_v37 = vmul.f32 4.0, %v16860_v20  ;;  %v7341_v13 = vmul.f32 4.0, %v16866_v35  ;;  %v8849_v43 = vadd.f32 -1.0, %v7357_v49  ;;  %v15497_v28 = vsel %vm11089_vm7, %v7419_v5, 0.0 }
 0x9cc   : > { %16874 = vst [vmem:[#allocation34_spill] sm:$0xff] %v15497_v28  ;;  %v15501_v56 = vsel %vm11089_vm7, %v7418_v54, 0.0  ;;  %v8848_v0 = vadd.f32 -1.0, %v7356_v61  ;;  %v7340_v49 = vmul.f32 4.0, %v16869_v10  ;;  %v16876_v54 = vld [vmem:[#allocation51_spill] sm:$0xff]  ;;  %v16877_v61 = vld [vmem:[#allocation61_spill] sm:$0xff] }
 0x9cd   : > { %16875 = vst [vmem:[#allocation13_spill] sm:$0xff] %v15501_v56  ;;  %v7386_v35 = vmul.f32 %v8846_v58, %v7338_v37  ;;  %v7421_v56 = vmul.f32 2.0, %v16876_v54  ;;  %v7420_v28 = vmul.f32 2.0, %v16877_v61 }
 0x9d6   : > { %v15292_v51 = vpop.permute.xlu1 %7920 }
 0x9d7   : > { %v15294_v29 = vpop.permute.xlu0 %7918 }
 0x9d8   : > { %v7966_v58 = vmul.f32 %v15294_v29, %v15361_v19 }
 0x9da   : > { %v15296_v18 = vpop.permute.xlu1 %8000 }
 0x9db   : > { %v15298_v11 = vpop.permute.xlu0 %7998  ;;  %v8047_v45 = vmul.f32 %v15296_v18, %v15401_v57  ;;  %v7967_v57 = vmul.f32 %v15292_v51, %v15350_v12 }
 0x9dc   : > { %16829 = vst [vmem:[#allocation29_spill] sm:$0xff] %v15298_v11  ;;  %v8046_v20 = vmul.f32 %v15298_v11, %v15405_v1 }
 0x9de   : > { %v15300_v2 = vpop.permute.xlu1 %7924  ;;  %v15532_v1 = vadd.f32 %v8046_v20, %v7966_v58 }
 0x9df   : > { %v15302_v21 = vpop.permute.xlu0 %7922 }
 0x9e0   : > { %v7968_v61 = vmul.f32 %v15302_v21, %v15376_v44 }
 0x9e2   : > { %v15304_v7 = vpop.permute.xlu1 %8004 }
 0x9e3   : > { %16830 = vst [vmem:[#allocation27_spill] sm:$0xff] %v15304_v7  ;;  %v15306_v25 = vpop.permute.xlu0 %8002 }
 0x9e4   : > { %16831 = vst [vmem:[#allocation31_spill] sm:$0xff] %v15306_v25  ;;  %v8048_v5 = vmul.f32 %v15306_v25, %v15424_v53  ;;  %v7969_v53 = vmul.f32 %v15300_v2, %v15372_v23  ;;  %v7388_v25 = vmul.f32 %v8848_v0, %v7340_v49  ;;  %v15548_v0 = vsel %vm11089_vm7, %v7386_v35, 0.0 }
 0x9e6   : > { %v15308_v14 = vpop.permute.xlu1 %7928 }
 0x9e7   : > { %v15310_v46 = vpop.permute.xlu0 %7926 }
 0x9e8   : > { %v7970_v11 = vmul.f32 %v15310_v46, %v15388_v52 }
 0x9ea   : > { %v15312_v47 = vpop.permute.xlu1 %8008 }
 0x9eb   : > { %16832 = vst [vmem:[#allocation60_spill] sm:$0xff] %v15312_v47  ;;  %v15314_v55 = vpop.permute.xlu0 %8006  ;;  %v8051_v37 = vmul.f32 %v15312_v47, %v15439_v26  ;;  %v7971_v26 = vmul.f32 %v15308_v14, %v15384_v40  ;;  %v15542_v47 = vadd.f32 %v8048_v5, %v7968_v61 }
 0x9ec   : > { %v8050_v54 = vmul.f32 %v15314_v55, %v15446_v6 }
 0x9ed   : > { %v15550_v20 = vadd.f32 %v8051_v37, %v7971_v26  ;;  %v15604_v37 = vstv %s6266_s22 }
 0x9ee   : > { %v15318_v41 = vpop.permute.xlu1 %7932 }
 0x9ef   : > { %v15322_v22 = vpop.permute.xlu0 %7930 }
 0x9f2   : > { %v15337_v36 = vpop.permute.xlu1 %8012 }
 0x9f3   : > { %16837 = vst [vmem:[#allocation41_spill] sm:$0xff] %v15337_v36  ;;  %v15342_v8 = vpop.permute.xlu0 %8010 }
 0x9f4   : > { %16839 = vst [vmem:[#allocation32_spill] sm:$0xff] %v15342_v8  ;;  %v8052_v35 = vmul.f32 %v15342_v8, %v15462_v39  ;;  %v15615_v39 = vstv %s15493_s21 }
 0x9f6   : > { %v15357_v42 = vpop.permute.xlu1 %7936 }
 0x9f7   : > { %v15363_v32 = vpop.permute.xlu0 %7934  ;;  %v7975_v58 = vmul.f32 %v15357_v42, %v15410_v24 }
 0x9fa   : > { %v15412_v30 = vpop.permute.xlu1 %8016 }
 0x9fb   : > { %16851 = vst [vmem:[#allocation40_spill] sm:$0xff] %v15412_v30  ;;  %v15420_v3 = vpop.permute.xlu0 %8014  ;;  %v8055_v5 = vmul.f32 %v15412_v30, %v15466_v62 }
 0x9fc   : > { %16855 = vst [vmem:[#allocation14_spill] sm:$0xff] %v15420_v3 }
 0x9fe   : > { %v15454_v38 = vpop.permute.xlu1 %7940 }
 0x9ff   : > { %v15472_v9 = vpop.permute.xlu0 %7938 }
 0xa00   : > { %16872 = vst [vmem:[#allocation43_spill] sm:$0xff] %v15472_v9  ;;  %v7387_v9 = vmul.f32 %v8847_v4, %v7339_v60  ;;  %v8049_v4 = vmul.f32 %v15304_v7, %v15416_v17  ;;  %v7389_v17 = vmul.f32 %v8849_v43, %v7341_v13  ;;  %v15530_v7 = vadd.f32 %v8047_v45, %v7967_v57 }
 0xa01   : > { %v8053_v57 = vmul.f32 %v15337_v36, %v15450_v34  ;;  %v15564_v45 = vadd.f32 %v8050_v54, %v7970_v11  ;;  %v8078_v11 = vmul.f32 %v15532_v1, %v15294_v29  ;;  %v8054_v29 = vmul.f32 %v15420_v3, %v15476_v15 }
 0xa02   : > { %v15512_v60 = vpop.permute.xlu1 %8020  ;;  %v15538_v13 = vsel %vm11089_vm7, %v7387_v9, 0.0  ;;  %v15540_v43 = vadd.f32 %v8049_v4, %v7969_v53  ;;  %v15556_v9 = vsel %vm11089_vm7, %v7421_v56, 0.0  ;;  %v15560_v53 = vsel %vm11089_vm7, %v7420_v28, 0.0 }
 0xa03   : > { %v15522_v10 = vpop.permute.xlu0 %8018  ;;  %v15572_v26 = vsel %vm11089_vm7, %v7389_v17, 0.0  ;;  %v15576_v56 = vsel %vm11089_vm7, %v7388_v25, 0.0  ;;  %v8079_v28 = vmul.f32 %v15530_v7, %v15292_v51  ;;  %v7973_v4 = vmul.f32 %v15318_v41, %v15392_v27 }
 0xa04   : > { %v8081_v31 = vmul.f32 %v15540_v43, %v15300_v2  ;;  %v8080_v25 = vmul.f32 %v15542_v47, %v15302_v21  ;;  %v7972_v51 = vmul.f32 %v15322_v22, %v15396_v63  ;;  %v15598_v17 = vmul.f32 %v15550_v20, %v15308_v14 }
 0xa05   : > { %v15600_v61 = vadd.f32 %v8053_v57, %v7973_v4  ;;  %v15608_v2 = vmul.f32 %v15564_v45, %v15310_v46  ;;  %v7974_v15 = vmul.f32 %v15363_v32, %v15429_v48  ;;  %v15617_v14 = vadd.f32 %v8055_v5, %v7975_v58 }
 0xa06   : > { %v15568_v49 = vpop.permute.xlu1 %7944  ;;  %v15610_v21 = vadd.f32 %v8052_v35, %v7972_v51  ;;  %v8095_v4 = vsub.f32 %v8079_v28, %v15350_v12  ;;  %v8094_v3 = vsub.f32 %v8078_v11, %v15361_v19  ;;  %v8097_v51 = vsub.f32 %v8081_v31, %v15372_v23 }
 0xa07   : > { %v15586_v54 = vpop.permute.xlu0 %7942  ;;  %v15621_v30 = vadd.f32 %v8054_v29, %v7974_v15  ;;  %v8096_v8 = vsub.f32 %v8080_v25, %v15376_v44  ;;  %v15629_v36 = vmul.f32 %v15600_v61, %v15318_v41  ;;  %v8099_v15 = vsub.f32 %v15598_v17, %v15384_v40 }
 0xa08   : > { %v15639_v19 = vmul.f32 %v15610_v21, %v15322_v22  ;;  %v8056_v23 = vmul.f32 %v15522_v10, %v15484_v50  ;;  %v15647_v11 = vmul.f32 %v15617_v14, %v15357_v42  ;;  %v7977_v40 = vmul.f32 %v15454_v38, %v15470_v16  ;;  %v16879_v42 = vld [vmem:[#allocation20_spill] sm:$0xff] }
 0xa09   : > { %v15654_v25 = vmul.f32 %v15621_v30, %v15363_v32  ;;  %v8101_v32 = vsub.f32 %v15629_v36, %v15392_v27 }
 0xa0a   : > { %v15623_v46 = vpop.permute.xlu1 %8024 }
 0xa0b   : > { %v15633_v12 = vpop.permute.xlu0 %8022 }
 0xa57   : > { %v9840_v62 = vpop.f32.mrb[160].mxu1 }
 0xa58   : > { %v7295_v57 = vmax.f32 %v9840_v62, 0.0  ;;  %v7135_v34 = vpop.f32.mrb[161].mxu1  ;;  %v8057_v62 = vmul.f32 %v15512_v60, %v15480_v33 }
 0xa59   : > { %v7294_v35 = vmax.f32 %v7135_v34, 0.0  ;;  %v8098_v34 = vsub.f32 %v15608_v2, %v15388_v52 }
 0xa5a   : > { %v8111_v28 = vsub.f32 %v8095_v4, %v7295_v57  ;;  %v15659_v58 = vadd.f32 %v8057_v62, %v7977_v40  ;;  %v8100_v40 = vsub.f32 %v15639_v19, %v15396_v63 }
 0xa5b   : > { %v8110_v44 = vsub.f32 %v8094_v3, %v7294_v35  ;;  %v16878_v3 = vld [vmem:[#allocation43_spill] sm:$0xff]  ;;  %v15673_v35 = vpop.permute.xlu1 %7948 }
 0xa5c   : > { %v9843_v41 = vpop.f32.mrb[162].mxu1  ;;  %v8176_v5 = vmul.f32 %v15604_v37, %v8111_v28  ;;  %v7976_v29 = vmul.f32 %v16878_v3, %v15489_v59  ;;  %v16880_v28 = vld [vmem:[#allocation5_spill] sm:$0xff] }
 0xa5d   : > { %v7297_v31 = vmax.f32 %v9843_v41, 0.0  ;;  %v7145_v22 = vpop.f32.mrb[163].mxu1  ;;  %v8175_v52 = vmul.f32 %v15604_v37, %v8110_v44 }
 0xa5e   : > { %v7296_v17 = vmax.f32 %v7145_v22, 0.0  ;;  %v8208_v2 = vadd.f32 %v8176_v5, %v16879_v42  ;;  %v15671_v4 = vadd.f32 %v8056_v23, %v7976_v29  ;;  %v15678_v22 = vpop.permute.xlu0 %7946  ;;  %v8102_v29 = vsub.f32 %v15654_v25, %v15429_v48  ;;  %v16885_v48 = vld [vmem:[#allocation39_spill] sm:$0xff] }
 0xa5f   : > { %v8113_v57 = vsub.f32 %v8097_v51, %v7297_v31  ;;  %v8207_v62 = vadd.f32 %v8175_v52, %v16880_v28  ;;  %v8103_v31 = vsub.f32 %v15647_v11, %v15410_v24  ;;  %v15696_v52 = vmul.f32 %v15659_v58, %v15454_v38  ;;  %v16883_v24 = vld [vmem:[#allocation7_spill] sm:$0xff]  ;;  %v16884_v28 = vld [vmem:[#allocation13_spill] sm:$0xff] }
 0xa60   : > { %v8112_v44 = vsub.f32 %v8096_v8, %v7296_v17  ;;  %v9846_v41 = vpop.f32.mrb[164].mxu1  ;;  %v8241_v51 = vsel %vm198_vm8, %v15615_v39, %v8208_v2  ;;  %v16882_v17 = vld [vmem:[#allocation34_spill] sm:$0xff] }
 0xa61   : > { %v8178_v36 = vmul.f32 %v15604_v37, %v8113_v57  ;;  %v7299_v27 = vmax.f32 %v9846_v41, 0.0  ;;  %v7155_v23 = vpop.f32.mrb[165].mxu1  ;;  %8273 = vst.msk [vmem:[%s15666_s26 + $0x8] sm:$0xff] %vm234_vm3, %v8241_v51  ;;  %v8240_v8 = vsel %vm198_vm8, %v15615_v39, %v8207_v62  ;;  %v8059_v42 = vmul.f32 %v15623_v46, %v16882_v17 }
 0xa62   : > { %v8177_v63 = vmul.f32 %v15604_v37, %v8112_v44  ;;  %v7298_v19 = vmax.f32 %v7155_v23, 0.0  ;;  %8272 = vst.msk [vmem:[%s15666_s26] sm:$0xff] %vm234_vm3, %v8240_v8  ;;  %v8088_v57 = vmul.f32 %v15671_v4, %v16878_v3  ;;  %v8058_v62 = vmul.f32 %v15633_v12, %v16884_v28  ;;  %v15716_v23 = vpop.permute.xlu1 %8028  ;;  %v16887_v28 = vld [vmem:[#allocation12_spill] sm:$0xff] }
 0xa63   : > { %v8210_v11 = vadd.f32 %v8178_v36, %v16883_v24  ;;  %v8115_v2 = vsub.f32 %v8099_v15, %v7299_v27  ;;  %v7979_v41 = vmul.f32 %v15568_v49, %v15538_v13  ;;  %v7978_v3 = vmul.f32 %v15586_v54, %v15548_v0  ;;  %v15726_v24 = vpop.permute.xlu0 %8026 }
 0xa64   : > { %v8209_v25 = vadd.f32 %v8177_v63, %v16885_v48  ;;  %v8114_v38 = vsub.f32 %v8098_v34, %v7298_v19  ;;  %v9849_v44 = vpop.f32.mrb[166].mxu1 }
 0xa65   : > { %v8243_v51 = vsel %vm198_vm8, %v15615_v39, %v8210_v11  ;;  %v8180_v15 = vmul.f32 %v15604_v37, %v8115_v2  ;;  %v7301_v36 = vmax.f32 %v9849_v44, 0.0  ;;  %v7165_v27 = vpop.f32.mrb[167].mxu1  ;;  %v15724_v19 = vadd.f32 %v8059_v42, %v7979_v41  ;;  %v16886_v11 = vld [vmem:[#allocation55_spill] sm:$0xff] }
 0xa66   : > { %8275 = vst.msk [vmem:[%s15666_s26 + $0x18] sm:$0xff] %vm234_vm3, %v8243_v51  ;;  %v8242_v34 = vsel %vm198_vm8, %v15615_v39, %v8209_v25  ;;  %v8179_v8 = vmul.f32 %v15604_v37, %v8114_v38  ;;  %v7300_v63 = vmax.f32 %v7165_v27, 0.0  ;;  %v8105_v44 = vsub.f32 %v15696_v52, %v15470_v16 }
 0xa67   : > { %8274 = vst.msk [vmem:[%s15666_s26 + $0x10] sm:$0xff] %vm234_vm3, %v8242_v34  ;;  %v8212_v2 = vadd.f32 %v8180_v15, %v16886_v11  ;;  %v8117_v48 = vsub.f32 %v8101_v32, %v7301_v36  ;;  %v15733_v51 = vadd.f32 %v8058_v62, %v7978_v3  ;;  %v8104_v42 = vsub.f32 %v8088_v57, %v15489_v59  ;;  %v16888_v3 = vld [vmem:[#allocation28_spill] sm:$0xff] }
 0xa68   : > { %v8211_v25 = vadd.f32 %v8179_v8, %v16887_v28  ;;  %v8116_v38 = vsub.f32 %v8100_v40, %v7300_v63  ;;  %v9852_v27 = vpop.f32.mrb[168].mxu1  ;;  %v8061_v41 = vmul.f32 %v15716_v23, %v15556_v9  ;;  %v8060_v52 = vmul.f32 %v15726_v24, %v15560_v53 }
 0xa69   : > { %v8245_v15 = vsel %vm198_vm8, %v15615_v39, %v8212_v2  ;;  %v8182_v32 = vmul.f32 %v15604_v37, %v8117_v48  ;;  %v7303_v36 = vmax.f32 %v9852_v27, 0.0  ;;  %v7175_v16 = vpop.f32.mrb[169].mxu1  ;;  %v8091_v28 = vmul.f32 %v15724_v19, %v15568_v49  ;;  %v16889_v2 = vld [vmem:[#allocation64_spill] sm:$0xff] }
 0xa6a   : > { %8277 = vst.msk [vmem:[%s15666_s26 + $0x28] sm:$0xff] %vm234_vm3, %v8245_v15  ;;  %v8244_v59 = vsel %vm198_vm8, %v15615_v39, %v8211_v25  ;;  %v8181_v40 = vmul.f32 %v15604_v37, %v8116_v38  ;;  %v7302_v57 = vmax.f32 %v7175_v16, 0.0  ;;  %v7981_v62 = vmul.f32 %v15673_v35, %v15572_v26  ;;  %v16890_v16 = vld [vmem:[#allocation57_spill] sm:$0xff] }
 0xa6b   : > { %8276 = vst.msk [vmem:[%s15666_s26 + $0x20] sm:$0xff] %vm234_vm3, %v8244_v59  ;;  %v8214_v34 = vadd.f32 %v8182_v32, %v16888_v3  ;;  %v8119_v8 = vsub.f32 %v8103_v31, %v7303_v36  ;;  %v8090_v63 = vmul.f32 %v15733_v51, %v15586_v54  ;;  %v7980_v11 = vmul.f32 %v15678_v22, %v15576_v56 }
 0xa6c   : > { %v8213_v48 = vadd.f32 %v8181_v40, %v16889_v2  ;;  %v8118_v25 = vsub.f32 %v8102_v29, %v7302_v57  ;;  %v15763_v38 = vadd.f32 %v8061_v41, %v7981_v62  ;;  %v16891_v57 = vld [vmem:[#allocation56_spill] sm:$0xff] }
 0xa6d   : > { %v9855_v49 = vpop.f32.mrb[170].mxu1  ;;  %v8247_v27 = vsel %vm198_vm8, %v15615_v39, %v8214_v34  ;;  %v8184_v15 = vmul.f32 %v15604_v37, %v8119_v8  ;;  %v15769_v36 = vadd.f32 %v8060_v52, %v7980_v11  ;;  %v8107_v34 = vsub.f32 %v8091_v28, %v15538_v13 }
 0xa6e   : > { %v7305_v31 = vmax.f32 %v9855_v49, 0.0  ;;  %v7185_v32 = vpop.f32.mrb[171].mxu1  ;;  %8279 = vst.msk [vmem:[%s15666_s26 + $0x38] sm:$0xff] %vm234_vm3, %v8247_v27  ;;  %v8246_v54 = vsel %vm198_vm8, %v15615_v39, %v8213_v48  ;;  %v8183_v29 = vmul.f32 %v15604_v37, %v8118_v25  ;;  %v8106_v8 = vsub.f32 %v8090_v63, %v15548_v0 }
 0xa6f   : > { %v7304_v41 = vmax.f32 %v7185_v32, 0.0  ;;  %8278 = vst.msk [vmem:[%s15666_s26 + $0x30] sm:$0xff] %vm234_vm3, %v8246_v54  ;;  %v8216_v59 = vadd.f32 %v8184_v15, %v16890_v16  ;;  %v8093_v11 = vmul.f32 %v15763_v38, %v15673_v35  ;;  %v8092_v49 = vmul.f32 %v15769_v36, %v15678_v22  ;;  %v16893_v22 = vld [vmem:[#allocation29_spill] sm:$0xff] }
 0xa70   : > { %v8121_v40 = vsub.f32 %v8105_v44, %v7305_v31  ;;  %v8215_v62 = vadd.f32 %v8183_v29, %v16891_v57  ;;  %v8127_v27 = vmul.f32 %v15530_v7, %v15296_v18  ;;  %v8126_v15 = vmul.f32 %v15532_v1, %v16893_v22  ;;  %v16894_v31 = vld [vmem:[#allocation8_spill] sm:$0xff] }
 0xa71   : > { %v8120_v52 = vsub.f32 %v8104_v42, %v7304_v41  ;;  %v9858_v3 = vpop.f32.mrb[172].mxu1  ;;  %v8249_v2 = vsel %vm198_vm8, %v15615_v39, %v8216_v59  ;;  %v16892_v42 = vld [vmem:[#allocation63_spill] sm:$0xff] }
 0xa72   : > { %v8186_v48 = vmul.f32 %v15604_v37, %v8121_v40  ;;  %v7307_v25 = vmax.f32 %v9858_v3, 0.0  ;;  %v7195_v44 = vpop.f32.mrb[173].mxu1  ;;  %8281 = vst.msk [vmem:[%s15666_s26 + $0x48] sm:$0xff] %vm234_vm3, %v8249_v2  ;;  %v8248_v13 = vsel %vm198_vm8, %v15615_v39, %v8215_v62  ;;  %v8109_v40 = vsub.f32 %v8093_v11, %v15572_v26  ;;  %v16897_v11 = vld [vmem:[#allocation11_spill] sm:$0xff] }
 0xa73   : > { %v8185_v0 = vmul.f32 %v15604_v37, %v8120_v52  ;;  %v7306_v35 = vmax.f32 %v7195_v44, 0.0  ;;  %8280 = vst.msk [vmem:[%s15666_s26 + $0x40] sm:$0xff] %vm234_vm3, %v8248_v13  ;;  %v8108_v62 = vsub.f32 %v8092_v49, %v15576_v56  ;;  %v16895_v52 = vld [vmem:[#allocation6_spill] sm:$0xff]  ;;  %v8142_v2 = vsub.f32 %v8126_v15, %v16897_v11 }
 0xa74   : > { %v8218_v28 = vadd.f32 %v8186_v48, %v16892_v42  ;;  %v8123_v63 = vsub.f32 %v8107_v34, %v7307_v25  ;;  %v16898_v48 = vld [vmem:[#allocation15_spill] sm:$0xff] }
 0xa75   : > { %v8217_v32 = vadd.f32 %v8185_v0, %v16894_v31  ;;  %v8122_v54 = vsub.f32 %v8106_v8, %v7306_v35  ;;  %v9861_v29 = vpop.f32.mrb[174].mxu1  ;;  %v16896_v8 = vld [vmem:[#allocation46_spill] sm:$0xff]  ;;  %v16899_v0 = vld [vmem:[#allocation27_spill] sm:$0xff] }
 0xa76   : > { %v8251_v41 = vsel %vm198_vm8, %v15615_v39, %v8218_v28  ;;  %v8188_v16 = vmul.f32 %v15604_v37, %v8123_v63  ;;  %v7309_v59 = vmax.f32 %v9861_v29, 0.0  ;;  %v7205_v57 = vpop.f32.mrb[175].mxu1  ;;  %v8143_v26 = vsub.f32 %v8127_v27, %v16896_v8  ;;  %v16900_v63 = vld [vmem:[#allocation31_spill] sm:$0xff]  ;;  %v16901_v31 = vld [vmem:[#allocation54_spill] sm:$0xff]  ;;  %v16902_v29 = vld [vmem:[#allocation60_spill] sm:$0xff] }
 0xa77   : > { %8283 = vst.msk [vmem:[%s15666_s26 + $0x58] sm:$0xff] %vm234_vm3, %v8251_v41  ;;  %v8250_v18 = vsel %vm198_vm8, %v15615_v39, %v8217_v32  ;;  %v8187_v7 = vmul.f32 %v15604_v37, %v8122_v54  ;;  %v7308_v1 = vmax.f32 %v7205_v57, 0.0  ;;  %v8129_v35 = vmul.f32 %v15540_v43, %v16899_v0 }
 0xa78   : > { %8282 = vst.msk [vmem:[%s15666_s26 + $0x50] sm:$0xff] %vm234_vm3, %v8250_v18  ;;  %v8220_v3 = vadd.f32 %v8188_v16, %v16895_v52  ;;  %v8125_v34 = vsub.f32 %v8109_v40, %v7309_v59  ;;  %v8128_v27 = vmul.f32 %v15542_v47, %v16900_v63  ;;  %v8131_v41 = vmul.f32 %v15550_v20, %v16902_v29  ;;  %v16903_v16 = vld [vmem:[#allocation17_spill] sm:$0xff]  ;;  %v16904_v18 = vld [vmem:[#allocation47_spill] sm:$0xff] }
 0xa79   : > { %v8219_v25 = vadd.f32 %v8187_v7, %v16898_v48  ;;  %v8124_v44 = vsub.f32 %v8108_v62, %v7308_v1  ;;  %v9864_v13 = vpop.f32.mrb[176].mxu1  ;;  %v8130_v47 = vmul.f32 %v15564_v45, %v15314_v55  ;;  %v8145_v7 = vsub.f32 %v8129_v35, %v16904_v18  ;;  %v16907_v48 = vld [vmem:[#allocation35_spill] sm:$0xff] }
 0xa7a   : > { %v8253_v56 = vsel %vm198_vm8, %v15615_v39, %v8220_v3  ;;  %v8190_v49 = vmul.f32 %v15604_v37, %v8125_v34  ;;  %v7311_v42 = vmax.f32 %v9864_v13, 0.0  ;;  %v7215_v28 = vpop.f32.mrb[177].mxu1  ;;  %v16905_v34 = vld [vmem:[#allocation25_spill] sm:$0xff]  ;;  %v16908_v13 = vld [vmem:[#allocation62_spill] sm:$0xff] }
 0xa7b   : > { %8285 = vst.msk [vmem:[%s15666_s26 + $0x68] sm:$0xff] %vm234_vm3, %v8253_v56  ;;  %v8252_v22 = vsel %vm198_vm8, %v15615_v39, %v8219_v25  ;;  %v8189_v15 = vmul.f32 %v15604_v37, %v8124_v44  ;;  %v7310_v43 = vmax.f32 %v7215_v28, 0.0  ;;  %v8144_v8 = vsub.f32 %v8128_v27, %v16905_v34 }
 0xa7c   : > { %8284 = vst.msk [vmem:[%s15666_s26 + $0x60] sm:$0xff] %vm234_vm3, %v8252_v22  ;;  %v8222_v32 = vadd.f32 %v8190_v49, %v16901_v31  ;;  %v8159_v54 = vsub.f32 %v8143_v26, %v7311_v42  ;;  %v16906_v26 = vld [vmem:[#allocation58_spill] sm:$0xff]  ;;  %v8147_v25 = vsub.f32 %v8131_v41, %v16907_v48  ;;  %v8146_v44 = vsub.f32 %v8130_v47, %v15446_v6  ;;  %v16909_v49 = vld [vmem:[#allocation41_spill] sm:$0xff]  ;;  %v16912_v41 = vld [vmem:[#allocation40_spill] sm:$0xff] }
 0xa7d   : > { %v8221_v59 = vadd.f32 %v8189_v15, %v16903_v16  ;;  %v8158_v40 = vsub.f32 %v8142_v2, %v7310_v43  ;;  %v9867_v57 = vpop.f32.mrb[178].mxu1  ;;  %v8133_v42 = vmul.f32 %v15600_v61, %v16909_v49  ;;  %v16910_v15 = vld [vmem:[#allocation32_spill] sm:$0xff]  ;;  %v8135_v47 = vmul.f32 %v15617_v14, %v16912_v41 }
 0xa7e   : > { %v8255_v1 = vsel %vm198_vm8, %v15615_v39, %v8222_v32  ;;  %v8192_v62 = vmul.f32 %v15604_v37, %v8159_v54  ;;  %v7313_v52 = vmax.f32 %v9867_v57, 0.0  ;;  %v7225_v3 = vpop.f32.mrb[179].mxu1  ;;  %v8132_v43 = vmul.f32 %v15610_v21, %v16910_v15  ;;  %v16911_v32 = vld [vmem:[#allocation19_spill] sm:$0xff]  ;;  %v16913_v21 = vld [vmem:[#allocation14_spill] sm:$0xff] }
 0xa7f   : > { %8287 = vst.msk [vmem:[%s15666_s26 + $0x78] sm:$0xff] %vm234_vm3, %v8255_v1  ;;  %v8254_v55 = vsel %vm198_vm8, %v15615_v39, %v8221_v59  ;;  %v8191_v20 = vmul.f32 %v15604_v37, %v8158_v40  ;;  %v7312_v45 = vmax.f32 %v7225_v3, 0.0  ;;  %v8134_v16 = vmul.f32 %v15621_v30, %v16913_v21  ;;  %v16914_v59 = vld [vmem:[#allocation18_spill] sm:$0xff] }
 0xa80   : > { %8286 = vst.msk [vmem:[%s15666_s26 + $0x70] sm:$0xff] %vm234_vm3, %v8254_v55  ;;  %v8224_v11 = vadd.f32 %v8192_v62, %v16906_v26  ;;  %v8161_v2 = vsub.f32 %v8145_v7, %v7313_v52  ;;  %v16915_v7 = vld [vmem:[#allocation50_spill] sm:$0xff]  ;;  %v8137_v49 = vmul.f32 %v15659_v58, %v15512_v60  ;;  %v16921_v58 = vld [vmem:[#allocation24_spill] sm:$0xff] }
 0xa81   : > { %v8223_v0 = vadd.f32 %v8191_v20, %v16908_v13  ;;  %v8160_v35 = vsub.f32 %v8144_v8, %v7312_v45  ;;  %v9870_v56 = vpop.f32.mrb[180].mxu1  ;;  %v8149_v1 = vsub.f32 %v8133_v42, %v16915_v7  ;;  %v16916_v8 = vld [vmem:[#allocation67_spill] sm:$0xff]  ;;  %v16917_v45 = vld [vmem:[#allocation38_spill] sm:$0xff]  ;;  %v16924_v7 = vld [vmem:[#allocation13_spill] sm:$0xff] }
 0xa82   : > { %v8257_v28 = vsel %vm198_vm8, %v15615_v39, %v8224_v11  ;;  %v8194_v63 = vmul.f32 %v15604_v37, %v8161_v2  ;;  %v7315_v27 = vmax.f32 %v9870_v56, 0.0  ;;  %v7235_v22 = vpop.f32.mrb[181].mxu1  ;;  %v8148_v55 = vsub.f32 %v8132_v43, %v16916_v8  ;;  %v16918_v2 = vld [vmem:[#allocation65_spill] sm:$0xff]  ;;  %v16920_v13 = vld [vmem:[#allocation26_spill] sm:$0xff] }
 0xa83   : > { %8289 = vst.msk [vmem:[%s15666_s26 + $0x88] sm:$0xff] %vm234_vm3, %v8257_v28  ;;  %v8256_v6 = vsel %vm198_vm8, %v15615_v39, %v8223_v0  ;;  %v8193_v31 = vmul.f32 %v15604_v37, %v8160_v35  ;;  %v7314_v61 = vmax.f32 %v7235_v22, 0.0  ;;  %v8151_v48 = vsub.f32 %v8135_v47, %v16918_v2  ;;  %v16927_v2 = vld [vmem:[#allocation42_spill] sm:$0xff] }
 0xa84   : > { %8288 = vst.msk [vmem:[%s15666_s26 + $0x80] sm:$0xff] %vm234_vm3, %v8256_v6  ;;  %v8226_v54 = vadd.f32 %v8194_v63, %v16911_v32  ;;  %v8163_v29 = vsub.f32 %v8147_v25, %v7315_v27  ;;  %v16919_v25 = vld [vmem:[#allocation52_spill] sm:$0xff]  ;;  %v8136_v22 = vmul.f32 %v15671_v4, %v15522_v10  ;;  %v8138_v10 = vmul.f32 %v15733_v51, %v15633_v12  ;;  %v16922_v4 = vld [vmem:[#allocation23_spill] sm:$0xff] }
 0xa85   : > { %v8225_v40 = vadd.f32 %v8193_v31, %v16914_v59  ;;  %v8162_v57 = vsub.f32 %v8146_v44, %v7314_v61  ;;  %v9873_v18 = vpop.f32.mrb[182].mxu1  ;;  %v8150_v44 = vsub.f32 %v8134_v16, %v16919_v25  ;;  %v8139_v61 = vmul.f32 %v15724_v19, %v15623_v46  ;;  %v16923_v19 = vld [vmem:[#allocation30_spill] sm:$0xff] }
 0xa86   : > { %v8259_v62 = vsel %vm198_vm8, %v15615_v39, %v8226_v54  ;;  %v8196_v52 = vmul.f32 %v15604_v37, %v8163_v29  ;;  %v7317_v3 = vmax.f32 %v9873_v18, 0.0  ;;  %v7245_v34 = vpop.f32.mrb[183].mxu1  ;;  %v8153_v41 = vsub.f32 %v8137_v49, %v15480_v33 }
 0xa87   : > { %8291 = vst.msk [vmem:[%s15666_s26 + $0x98] sm:$0xff] %vm234_vm3, %v8259_v62  ;;  %v8258_v30 = vsel %vm198_vm8, %v15615_v39, %v8225_v40  ;;  %v8195_v14 = vmul.f32 %v15604_v37, %v8162_v57  ;;  %v7316_v20 = vmax.f32 %v7245_v34, 0.0  ;;  %v8152_v40 = vsub.f32 %v8136_v22, %v15484_v50  ;;  %v16929_v22 = vld [vmem:[#allocation33_spill] sm:$0xff] }
 0xa88   : > { %8290 = vst.msk [vmem:[%s15666_s26 + $0x90] sm:$0xff] %vm234_vm3, %v8258_v30  ;;  %v8228_v26 = vadd.f32 %v8196_v52, %v16917_v45  ;;  %v8165_v11 = vsub.f32 %v8149_v1, %v7317_v3  ;;  %v8155_v18 = vsub.f32 %v8139_v61, %v16882_v17  ;;  %v8154_v50 = vsub.f32 %v8138_v10, %v16924_v7  ;;  %v16925_v1 = vld [vmem:[#allocation66_spill] sm:$0xff]  ;;  %v16926_v45 = vld [vmem:[#allocation45_spill] sm:$0xff] }
 0xa89   : > { %v8227_v0 = vadd.f32 %v8195_v14, %v16920_v13  ;;  %v8164_v35 = vsub.f32 %v8148_v55, %v7316_v20  ;;  %v9876_v56 = vpop.f32.mrb[184].mxu1  ;;  %v8141_v34 = vmul.f32 %v15763_v38, %v15716_v23  ;;  %v8140_v17 = vmul.f32 %v15769_v36, %v15726_v24  ;;  %v16931_v10 = vld [vmem:[#allocation61_spill] sm:$0xff] }
 0xa8a   : > { %v8261_v42 = vsel %vm198_vm8, %v15615_v39, %v8228_v26  ;;  %v8198_v28 = vmul.f32 %v15604_v37, %v8165_v11  ;;  %v7319_v63 = vmax.f32 %v9876_v56, 0.0  ;;  %v7255_v27 = vpop.f32.mrb[185].mxu1 }
 0xa8b   : > { %8293 = vst.msk [vmem:[%s15666_s26 + $0xa8] sm:$0xff] %vm234_vm3, %v8261_v42  ;;  %v8260_v15 = vsel %vm198_vm8, %v15615_v39, %v8227_v0  ;;  %v8197_v43 = vmul.f32 %v15604_v37, %v8164_v35  ;;  %v7318_v60 = vmax.f32 %v7255_v27, 0.0  ;;  %v8157_v36 = vsub.f32 %v8141_v34, %v15556_v9 }
 0xa8c   : > { %8292 = vst.msk [vmem:[%s15666_s26 + $0xa0] sm:$0xff] %vm234_vm3, %v8260_v15  ;;  %v8230_v6 = vadd.f32 %v8198_v28, %v16921_v58  ;;  %v8167_v31 = vsub.f32 %v8151_v48, %v7319_v63  ;;  %v8156_v56 = vsub.f32 %v8140_v17, %v15560_v53  ;;  %v16928_v28 = vld [vmem:[#allocation49_spill] sm:$0xff] }
 0xa8d   : > { %v8229_v32 = vadd.f32 %v8197_v43, %v16922_v4  ;;  %v8166_v54 = vsub.f32 %v8150_v44, %v7318_v60  ;;  %v9879_v29 = vpop.f32.mrb[186].mxu1 }
 0xa8e   : > { %v8263_v47 = vsel %vm198_vm8, %v15615_v39, %v8230_v6  ;;  %v8200_v21 = vmul.f32 %v15604_v37, %v8167_v31  ;;  %v7321_v16 = vmax.f32 %v9879_v29, 0.0  ;;  %v7265_v59 = vpop.f32.mrb[187].mxu1  ;;  %v16930_v31 = vld [vmem:[#allocation51_spill] sm:$0xff] }
 0xa8f   : > { %8295 = vst.msk [vmem:[%s15666_s26 + $0xb8] sm:$0xff] %vm234_vm3, %v8263_v47  ;;  %v8262_v46 = vsel %vm198_vm8, %v15615_v39, %v8229_v32  ;;  %v8199_v12 = vmul.f32 %v15604_v37, %v8166_v54  ;;  %v7320_v33 = vmax.f32 %v7265_v59, 0.0 }
 0xa90   : > { %8294 = vst.msk [vmem:[%s15666_s26 + $0xb0] sm:$0xff] %vm234_vm3, %v8262_v46  ;;  %v8232_v51 = vadd.f32 %v8200_v21, %v16923_v19  ;;  %v8169_v57 = vsub.f32 %v8153_v41, %v7321_v16 }
 0xa91   : > { %v8231_v62 = vadd.f32 %v8199_v12, %v16925_v1  ;;  %v8168_v52 = vsub.f32 %v8152_v40, %v7320_v33  ;;  %v9882_v3 = vpop.f32.mrb[188].mxu1 }
 0xa92   : > { %v8265_v8 = vsel %vm198_vm8, %v15615_v39, %v8232_v51  ;;  %v8202_v55 = vmul.f32 %v15604_v37, %v8169_v57  ;;  %v7323_v30 = vmax.f32 %v9882_v3, 0.0  ;;  %v7275_v14 = vpop.f32.mrb[189].mxu1 }
 0xa93   : > { %8297 = vst.msk [vmem:[%s15666_s26 + $0xc8] sm:$0xff] %vm234_vm3, %v8265_v8  ;;  %v8264_v20 = vsel %vm198_vm8, %v15615_v39, %v8231_v62  ;;  %v8201_v23 = vmul.f32 %v15604_v37, %v8168_v52  ;;  %v7322_v38 = vmax.f32 %v7275_v14, 0.0 }
 0xa94   : > { %8296 = vst.msk [vmem:[%s15666_s26 + $0xc0] sm:$0xff] %vm234_vm3, %v8264_v20  ;;  %v8234_v26 = vadd.f32 %v8202_v55, %v16926_v45  ;;  %v8171_v11 = vsub.f32 %v8155_v18, %v7323_v30 }
 0xa95   : > { %v8233_v48 = vadd.f32 %v8201_v23, %v16927_v2  ;;  %v8170_v25 = vsub.f32 %v8154_v50, %v7322_v38  ;;  %v9885_v24 = vpop.f32.mrb[190].mxu1 }
 0xa96   : > { %v8267_v44 = vsel %vm198_vm8, %v15615_v39, %v8234_v26  ;;  %v8204_v13 = vmul.f32 %v15604_v37, %v8171_v11  ;;  %v7325_v0 = vmax.f32 %v9885_v24, 0.0  ;;  %v7285_v35 = vpop.f32.mrb[191].mxu1 }
 0xa97   : > { %8299 = vst.msk [vmem:[%s15666_s26 + $0xd8] sm:$0xff] %vm234_vm3, %v8267_v44  ;;  %v8266_v49 = vsel %vm198_vm8, %v15615_v39, %v8233_v48  ;;  %v8203_v9 = vmul.f32 %v15604_v37, %v8170_v25  ;;  %v7324_v42 = vmax.f32 %v7285_v35, 0.0 }
 0xa98   : > { %8298 = vst.msk [vmem:[%s15666_s26 + $0xd0] sm:$0xff] %vm234_vm3, %v8266_v49  ;;  %v8236_v63 = vadd.f32 %v8204_v13, %v16928_v28  ;;  %v8173_v27 = vsub.f32 %v8157_v36, %v7325_v0 }
 0xa99   : > { %v8235_v15 = vadd.f32 %v8203_v9, %v16929_v22  ;;  %v8172_v43 = vsub.f32 %v8156_v56, %v7324_v42 }
 0xa9a   : > { %v8269_v53 = vsel %vm198_vm8, %v15615_v39, %v8236_v63  ;;  %v8206_v60 = vmul.f32 %v15604_v37, %v8173_v27 }
 0xa9b   : > { %8301 = vst.msk [vmem:[%s15666_s26 + $0xe8] sm:$0xff] %vm234_vm3, %v8269_v53  ;;  %v8268_v58 = vsel %vm198_vm8, %v15615_v39, %v8235_v15  ;;  %v8205_v6 = vmul.f32 %v15604_v37, %v8172_v43 }
 0xa9c   : > { %8300 = vst.msk [vmem:[%s15666_s26 + $0xe0] sm:$0xff] %vm234_vm3, %v8268_v58  ;;  %v8238_v61 = vadd.f32 %v8206_v60, %v16930_v31 }
 0xa9d   : > { %v8237_v4 = vadd.f32 %v8205_v6, %v16931_v10 }
 0xa9e   : > { %v8271_v32 = vsel %vm198_vm8, %v15615_v39, %v8238_v61 }
 0xa9f   : > { %8303 = vst.msk [vmem:[%s15666_s26 + $0xf8] sm:$0xff] %vm234_vm3, %v8271_v32  ;;  %v8270_v54 = vsel %vm198_vm8, %v15615_v39, %v8237_v4 }
 0xaa0   : > { %8302 = vst.msk [vmem:[%s15666_s26 + $0xf0] sm:$0xff] %vm234_vm3, %v8270_v54 }
 0xaa1 PF: > { %s14_s12 = sadd.s32 1, %s10166_s12  }
 0xaa2   : > { %p11_p1 = scmp.ge.s32.totalorder %s14_s12, 4  }
 0xaa4   :  { %13 = sbr.rel (!%p11_p1) target bundleno = 1 (0x1), region = 69 }
 0xaab   :  { %8325 = vsyncpa [#allocation3], 1 }
 0xaac   :  { %8327 = vsyncpa [#allocation3 + $0x1], 1 }

</bundles_post_ra>
